<compile_context>
chip_gen: v6e
topology: v6e:2x2x1
jax: 0.10.0
libtpu: 0.0.40
codegen_flags: <defaults>
</compile_context>

<pallas_src>
import functools

import numpy as np
import jax
import jax.numpy as jnp
from jax.experimental import pallas as pl
from jax.experimental.pallas import tpu as pltpu


def _round_up(x, m):
    return ((x + m - 1) // m) * m


# ---------------------------------------------------------------------------
# Fused kernel: expand 1x1 -> depthwise 7x7 (stride 1|2) -> project 1x1 (+res)
# ---------------------------------------------------------------------------
def _inverted_residual_kernel(*refs, H, W, Wo, Wo_acc, band_h, stride, hidden,
                              do_expand, use_res, fold_out, matmul_dtype):
    it = iter(refs)
    x_ref = next(it)
    if do_expand:
        w1_ref, b1_ref = next(it), next(it)
    wdw_ref, b2_ref, w3_ref, b3_ref = next(it), next(it), next(it), next(it)
    res_ref = next(it) if use_res else None
    o_ref = next(it)
    h_ref = next(it)                          # VMEM scratch (rows_in, Wp, hidden)

    band = pl.program_id(1)
    Wp = x_ref.shape[2]
    rows_in = band_h * stride + 6
    out_r0 = band * band_h
    in_r0 = out_r0 * stride

    # ---- expand: 1x1 conv (BN scale folded) + ReLU, into VMEM scratch -------
    x_slab = x_ref[0, pl.ds(in_r0, rows_in), :, :]          # (rows_in, Wp, inp)
    if do_expand:
        inp = x_slab.shape[-1]
        xm = x_slab.reshape(rows_in * Wp, inp).astype(matmul_dtype)
        hm = jnp.dot(xm, w1_ref[...], preferred_element_type=jnp.float32)
        h_ref[...] = jnp.maximum(hm + b1_ref[...], 0.0).reshape(rows_in, Wp, hidden)
        # The depthwise conv zero-pads its input; ReLU(bias) over that padding
        # is nonzero, so zero the halo (cheap border writes, not a full-slab
        # select/copy).
        h_ref[:, :3, :] = jnp.zeros((rows_in, 3, hidden), jnp.float32)
        h_ref[:, 3 + W:, :] = jnp.zeros((rows_in, Wp - 3 - W, hidden), jnp.float32)
        for r in range(3):                                   # top padded rows
            @pl.when(in_r0 + r < 3)
            def _(r=r):
                h_ref[r, :, :] = jnp.zeros((Wp, hidden), jnp.float32)
        for r in range(3):                                   # bottom padded rows
            rr = rows_in - 1 - r
            @pl.when(in_r0 + rr >= 3 + H)
            def _(rr=rr):
                h_ref[rr, :, :] = jnp.zeros((Wp, hidden), jnp.float32)
    else:
        h_ref[...] = x_slab.astype(jnp.float32)              # halo already zero

    # ---- depthwise 7x7 (BN scale folded) + ReLU, stride-aware in H and W ----
    # kw is the OUTER loop: one shifted (stride 1) / strided-decimated
    # (stride 2) slab read per kw; kh inner uses layout-free major-dim slices.
    w_dw = wdw_ref[...]                                      # (7, 7, hidden)
    acc = jnp.zeros((band_h, Wo_acc, hidden), jnp.float32)
    for kw in range(7):
        if stride == 1:
            h_w = h_ref[:, pl.ds(kw, Wo_acc), :]             # (rows_in, Wo_acc, hid)
        else:
            # in-kernel column decimation: only surviving output columns
            h_w = h_ref[:, pl.ds(kw, Wo_acc, stride=2), :]
            h_w = h_w.reshape(rows_in // 2, 2, Wo_acc, hidden)
        for kh in range(7):
            if stride == 1:
                slab = h_w[kh:kh + band_h]
            else:
                slab = h_w[kh // 2:kh // 2 + band_h, kh % 2]
            acc = acc + slab * w_dw[kh, kw]
    # TODO(synk): explicit per-8-row vreg tiling of the 49-tap accumulation
    # would cut accumulator VMEM read-modify-write traffic further.
    dw = jnp.maximum(acc + b2_ref[...], 0.0)                 # (band_h, Wo_acc, hid)

    # ---- project: 1x1 conv (BN scale folded) [+ residual] --------------------
    oup = w3_ref.shape[1]
    ym = dw.reshape(band_h * Wo_acc, hidden).astype(matmul_dtype)
    om = jnp.dot(ym, w3_ref[...], preferred_element_type=jnp.float32) + b3_ref[...]
    out = om.reshape(band_h, Wo_acc, oup)[:, :Wo, :]
    if use_res:
        out = out + res_ref[0]
    out = out.astype(o_ref.dtype)

    if fold_out:
        # Lane-dense output: the HBM array's trailing dim is Wo*oup, so output
        # tiles / DMA are dense even for oup << 128.
        # TODO(synk): replace the per-column store loop with a single
        # minor-dim-merging reshape once that relayout is relied upon.
        for w in range(Wo):
            o_ref[0, :, w * oup:(w + 1) * oup] = out[:, w, :]
    else:
        o_ref[0] = out


# ---------------------------------------------------------------------------
# Host-side helpers
# ---------------------------------------------------------------------------
def _vmem_budget_and_limit():
    """Generation-aware VMEM budget (v7x has 64 MiB/TC, v5e/v6e have 128 MiB)."""
    cap = 64 * 1024 * 1024                    # conservative fallback (v7x per-TC)
    try:
        info = pltpu.get_tpu_info()
        cap = int(getattr(info, "vmem_capacity_bytes", cap))
    except Exception:
        pass
    limit = min(int(cap * 0.85), 112 * 1024 * 1024)
    budget = min(limit // 2, 48 * 1024 * 1024)
    return budget, limit


def _pick_band_h(*, N, Ho, Hp, Wp, Wo, Wo_acc, W, stride, inp, hidden, oup,
                 do_expand, use_res, fold_out, in_itemsize, mm_itemsize,
                 budget_bytes):
    """Largest divisor of Ho whose per-band working set fits the VMEM budget."""

    def estimate(bh):
        rows_in = bh * stride + 6
        est = 2 * Hp * Wp * inp * in_itemsize              # input block (x2 buf)
        if use_res:
            est += 2 * bh * W * oup * 4                    # residual block
        est += 2 * bh * Wo * oup * 4                       # output block
        w_bytes = (49 * hidden + hidden + oup) * 4 + hidden * oup * mm_itemsize
        if do_expand:
            w_bytes += inp * hidden * mm_itemsize + hidden * 4
        est += 2 * w_bytes                                 # weights (x2 buf)
        est += rows_in * Wp * hidden * 4                   # h scratch
        if do_expand:
            est += rows_in * Wp * hidden * 4               # expand matmul result
            est += rows_in * Wp * inp * mm_itemsize        # xm cast copy
        est += 2 * rows_in * Wo_acc * hidden * 4           # shifted depthwise slab
        est += bh * Wo_acc * hidden * 4                    # depthwise accumulator
        est += bh * Wo_acc * hidden * mm_itemsize          # ym cast copy
        est += 2 * bh * Wo_acc * oup * 4                   # project result + copy
        return est

    cands = []
    for bh in range(1, Ho + 1):
        if Ho % bh:
            continue
        if fold_out and not (bh % 8 == 0 or bh == Ho):
            continue
        cands.append(bh)
    fitting = [bh for bh in cands if estimate(bh) <= budget_bytes] or [min(cands)]
    best = max(fitting)
    # v7x: prefer an even number of grid steps so both TensorCores stay busy.
    if (N * (Ho // best)) % 2 == 1:
        even = [bh for bh in fitting
                if (N * (Ho // bh)) % 2 == 0 and 2 * bh >= best]
        if even:
            best = max(even)
    return best


def prepare_params(params, *, do_expand, matmul_dtype):
    """Fold BN scales into conv weights; keep only the shifts as biases."""
    p = {}
    if do_expand:
        p["w1"] = (params["w1"] * params["scale1"]).astype(matmul_dtype)
        p["b1"] = params["shift1"].astype(jnp.float32)              # (1, hidden)
    p["w_dw"] = (params["w_dw"] * params["scale2"]).astype(jnp.float32)
    p["b2"] = params["shift2"].reshape(1, -1).astype(jnp.float32)   # (1, hidden)
    p["w3"] = (params["w3"] * params["scale3"]).astype(matmul_dtype)
    p["b3"] = params["shift3"].astype(jnp.float32)                  # (1, oup)
    return p


def inverted_residual_forward(x_nchw, params, *, stride, expand_ratio, inp, oup,
                              band_h=None, matmul_dtype=jnp.bfloat16):
    """Pallas implementation of InvertedResidual.forward (NCHW in / NCHW out)."""
    assert stride in (1, 2)
    N, C, H, W = x_nchw.shape
    assert C == inp
    hidden = int(round(inp * expand_ratio))
    do_expand = expand_ratio != 1
    use_res = (stride == 1) and (inp == oup)
    if stride == 2:
        # TODO(synk): odd spatial sizes with stride 2 (ceil semantics) not handled.
        assert H % 2 == 0 and W % 2 == 0
    Ho, Wo = H // stride, W // stride
    fold_out = oup < 128                      # lane-dense output for small oup

    in_dtype = np.dtype(matmul_dtype) if do_expand else np.dtype(np.float32)
    in_itemsize = in_dtype.itemsize
    mm_itemsize = np.dtype(matmul_dtype).itemsize

    # Lane/sublane-friendly widths: keep in-kernel reshapes layout-free and the
    # shifted / strided depthwise reads in bounds.
    Wo_acc = _round_up(Wo, 8)
    w_need = (Wo_acc + 6) if stride == 1 else (2 * Wo_acc + 6)
    sub = 8 * (4 // in_itemsize)              # 8 for f32 input, 16 for bf16
    Wp = _round_up(max(w_need, W + 6), sub)
    Hp = H + 6

    budget, vmem_limit = _vmem_budget_and_limit()
    if band_h is None:
        band_h = _pick_band_h(
            N=N, Ho=Ho, Hp=Hp, Wp=Wp, Wo=Wo, Wo_acc=Wo_acc, W=W, stride=stride,
            inp=inp, hidden=hidden, oup=oup, do_expand=do_expand,
            use_res=use_res, fold_out=fold_out, in_itemsize=in_itemsize,
            mm_itemsize=mm_itemsize, budget_bytes=budget)
    assert Ho % band_h == 0
    if fold_out:
        assert band_h % 8 == 0 or band_h == Ho, (band_h, Ho)
    n_bands = Ho // band_h
    rows_in = band_h * stride + 6

    p = prepare_params(params, do_expand=do_expand, matmul_dtype=matmul_dtype)

    # NCHW -> NHWC.  The padded image (3-pixel halo + lane alignment) is stored
    # in the matmul input dtype (bf16 when the expand matmul exists); the
    # residual is fed separately as unpadded f32.
    x_nhwc = jnp.transpose(x_nchw, (0, 2, 3, 1))
    x_pad = jnp.pad(x_nhwc.astype(in_dtype),
                    ((0, 0), (3, 3), (3, Wp - W - 3), (0, 0)))

    kern = functools.partial(
        _inverted_residual_kernel, H=H, W=W, Wo=Wo, Wo_acc=Wo_acc, band_h=band_h,
        stride=stride, hidden=hidden, do_expand=do_expand, use_res=use_res,
        fold_out=fold_out, matmul_dtype=matmul_dtype)

    in_specs = [pl.BlockSpec((1, Hp, Wp, inp), lambda n, b: (n, 0, 0, 0))]
    args = [x_pad]
    if do_expand:
        in_specs += [pl.BlockSpec((inp, hidden), lambda n, b: (0, 0)),
                     pl.BlockSpec((1, hidden), lambda n, b: (0, 0))]
        args += [p["w1"], p["b1"]]
    in_specs += [pl.BlockSpec((7, 7, hidden), lambda n, b: (0, 0, 0)),
                 pl.BlockSpec((1, hidden), lambda n, b: (0, 0)),
                 pl.BlockSpec((hidden, oup), lambda n, b: (0, 0)),
                 pl.BlockSpec((1, oup), lambda n, b: (0, 0))]
    args += [p["w_dw"], p["b2"], p["w3"], p["b3"]]
    if use_res:
        in_specs += [pl.BlockSpec((1, band_h, W, oup), lambda n, b: (n, b, 0, 0))]
        args += [x_nhwc.astype(jnp.float32)]

    if fold_out:
        out_shape = jax.ShapeDtypeStruct((N, Ho, Wo * oup), jnp.float32)
        out_spec = pl.BlockSpec((1, band_h, Wo * oup), lambda n, b: (n, b, 0))
    else:
        out_shape = jax.ShapeDtypeStruct((N, Ho, Wo, oup), jnp.float32)
        out_spec = pl.BlockSpec((1, band_h, Wo, oup), lambda n, b: (n, b, 0, 0))

    out = pl.pallas_call(
        kern,
        out_shape=out_shape,
        grid=(N, n_bands),
        in_specs=in_specs,
        out_specs=out_spec,
        scratch_shapes=[pltpu.VMEM((rows_in, Wp, hidden), jnp.float32)],
        compiler_params=pltpu.CompilerParams(
            dimension_semantics=("parallel", "parallel"),
            vmem_limit_bytes=vmem_limit),
    )(*args)

    if fold_out:
        out = out.reshape(N, Ho, Wo, oup)
    return jnp.transpose(out, (0, 3, 1, 2))   # -> NCHW


# ---------------------------------------------------------------------------
# Deterministic parameter init (inference-mode BN as per-channel scale/shift)
# ---------------------------------------------------------------------------
def init_params(key, inp, oup, expand_ratio, eps=1e-5):
    hidden = int(round(inp * expand_ratio))
    keys = jax.random.split(key, 8)

    def folded_bn(k, c):
        kg, kb, km, kv = jax.random.split(k, 4)
        gamma = 1.0 + 0.1 * jax.random.normal(kg, (c,), jnp.float32)
        beta = 0.1 * jax.random.normal(kb, (c,), jnp.float32)
        mean = 0.1 * jax.random.normal(km, (c,), jnp.float32)
        var = jax.random.uniform(kv, (c,), jnp.float32, minval=0.5, maxval=1.5)
        scale = gamma / jnp.sqrt(var + eps)
        shift = beta - mean * scale
        return scale, shift

    params = {}
    if expand_ratio != 1:
        params["w1"] = (jax.random.normal(keys[0], (inp, hidden), jnp.float32)
                        / jnp.sqrt(float(inp)))
        s, b = folded_bn(keys[1], hidden)
        params["scale1"] = s.reshape(1, hidden)
        params["shift1"] = b.reshape(1, hidden)

    params["w_dw"] = jax.random.normal(keys[2], (7, 7, hidden), jnp.float32) / 7.0
    s, b = folded_bn(keys[3], hidden)
    params["scale2"] = s.reshape(1, 1, hidden)
    params["shift2"] = b.reshape(1, 1, hidden)

    params["w3"] = (jax.random.normal(keys[4], (hidden, oup), jnp.float32)
                    / jnp.sqrt(float(hidden)))
    s, b = folded_bn(keys[5], oup)
    params["scale3"] = s.reshape(1, oup)
    params["shift3"] = b.reshape(1, oup)
    return params


# ---------------------------------------------------------------------------
# Pure-JAX reference (full-precision convs) for verification
# ---------------------------------------------------------------------------
def reference_forward(x_nchw, params, *, stride, expand_ratio, inp, oup):
    hidden = int(round(inp * expand_ratio))
    prec = jax.lax.Precision.HIGHEST
    x = jnp.transpose(x_nchw, (0, 2, 3, 1))
    dn = ("NHWC", "HWIO", "NHWC")
    h = x
    if expand_ratio != 1:
        h = jax.lax.conv_general_dilated(h, params["w1"].reshape(1, 1, inp, hidden),
                                         (1, 1), "VALID", dimension_numbers=dn,
                                         precision=prec)
        h = jnp.maximum(h * params["scale1"].reshape(1, 1, 1, hidden)
                        + params["shift1"].reshape(1, 1, 1, hidden), 0.0)
    h = jax.lax.conv_general_dilated(h, params["w_dw"].reshape(7, 7, 1, hidden),
                                     (stride, stride), ((3, 3), (3, 3)),
                                     dimension_numbers=dn,
                                     feature_group_count=hidden, precision=prec)
    h = jnp.maximum(h * params["scale2"].reshape(1, 1, 1, hidden)
                    + params["shift2"].reshape(1, 1, 1, hidden), 0.0)
    h = jax.lax.conv_general_dilated(h, params["w3"].reshape(1, 1, hidden, oup),
                                     (1, 1), "VALID", dimension_numbers=dn,
                                     precision=prec)
    h = (h * params["scale3"].reshape(1, 1, 1, oup)
         + params["shift3"].reshape(1, 1, 1, oup))
    if stride == 1 and inp == oup:
        h = x + h
    return jnp.transpose(h, (0, 3, 1, 2))


if __name__ == "__main__":
    key = jax.random.PRNGKey(0)

    # Tolerances dominated by the (intentional) bf16 weight/activation
    # quantization of the MXU matmuls; the relative-Frobenius check guards
    # against real indexing/semantics bugs.
    TOL_MAX, TOL_REL = 1e-1, 2e-2

    configs = [
        # (N, inp, oup, H, W, stride, expand_ratio, band_h, matmul_dtype)
        (2, 4, 4, 16, 16, 1, 4, 8, jnp.bfloat16),    # residual + expand, 2 bands
        (2, 4, 8, 32, 32, 2, 4, 8, jnp.bfloat16),    # stride-2, in-kernel decimation
        (1, 8, 8, 16, 16, 1, 1, 8, jnp.bfloat16),    # expand_ratio == 1 path
        (1, 4, 8, 16, 16, 1, 4, 16, jnp.bfloat16),   # no residual, single band
        (2, 4, 4, 16, 16, 1, 4, None, jnp.float32),  # f32 matmuls, auto band size
    ]

    for i, (N, inp, oup, H, W, stride, er, bh, mdt) in enumerate(configs):
        kx, kp, key = jax.random.split(key, 3)
        x = jax.random.normal(kx, (N, inp, H, W), jnp.float32)  # NCHW, like PyTorch
        params = init_params(kp, inp, oup, er)

        out = inverted_residual_forward(x, params, stride=stride, expand_ratio=er,
                                        inp=inp, oup=oup, band_h=bh,
                                        matmul_dtype=mdt)
        out = jax.block_until_ready(out)
        ref = reference_forward(x, params, stride=stride, expand_ratio=er,
                                inp=inp, oup=oup)
        assert out.shape == (N, oup, H // stride, W // stride), (i, out.shape)

        max_err = float(jnp.max(jnp.abs(out - ref)))
        rel_err = float(jnp.linalg.norm(out - ref) /
                        (jnp.linalg.norm(ref) + 1e-12))
        if max_err > TOL_MAX or rel_err > TOL_REL:
            raise AssertionError(
                f"config {i}: mismatch vs reference "
                f"(max_abs={max_err:.4e}, rel_fro={rel_err:.4e})")

    print("KERNEL_OK")
</pallas_src>

<mosaic_0001>
module attributes {stable_mosaic.version = 11 : i64} {
  func.func @_inverted_residual_kernel(%arg0: i32, %arg1: i32, %arg2: memref<1x22x32x4xbf16, #tpu.memory_space<vmem>>, %arg3: memref<4x16xbf16, #tpu.memory_space<vmem>>, %arg4: memref<1x16xf32, #tpu.memory_space<vmem>>, %arg5: memref<7x7x16xf32, #tpu.memory_space<vmem>>, %arg6: memref<1x16xf32, #tpu.memory_space<vmem>>, %arg7: memref<16x4xbf16, #tpu.memory_space<vmem>>, %arg8: memref<1x4xf32, #tpu.memory_space<vmem>>, %arg9: memref<1x8x16x4xf32, #tpu.memory_space<vmem>>, %arg10: memref<1x8x64xf32, #tpu.memory_space<vmem>>, %arg11: memref<14x32x16xf32, #tpu.memory_space<vmem>>) attributes {dimension_semantics = [#tpu.dimension_semantics<parallel>, #tpu.dimension_semantics<parallel>], iteration_bounds = array<i64: 2, 2>, scalar_prefetch = 0 : i64, scratch_operands = 1 : i64, tpu.core_type = #tpu.core_type<tc>, window_params = [{transform_indices = @transform_0, window_bounds = array<i64: 1, 22, 32, 4>}, {pipeline_mode = #tpu.pipeline_mode<synchronous>, transform_indices = @transform_1, window_bounds = array<i64: 4, 16>}, {pipeline_mode = #tpu.pipeline_mode<synchronous>, transform_indices = @transform_2, window_bounds = array<i64: 1, 16>}, {pipeline_mode = #tpu.pipeline_mode<synchronous>, transform_indices = @transform_3, window_bounds = array<i64: 7, 7, 16>}, {pipeline_mode = #tpu.pipeline_mode<synchronous>, transform_indices = @transform_4, window_bounds = array<i64: 1, 16>}, {pipeline_mode = #tpu.pipeline_mode<synchronous>, transform_indices = @transform_5, window_bounds = array<i64: 16, 4>}, {pipeline_mode = #tpu.pipeline_mode<synchronous>, transform_indices = @transform_6, window_bounds = array<i64: 1, 4>}, {transform_indices = @transform_7, window_bounds = array<i64: 1, 8, 16, 4>}, {transform_indices = @transform_8, window_bounds = array<i64: 1, 8, 64>}]} {
    %c8_i32 = arith.constant 8 : i32
    %0 = arith.muli %arg1, %c8_i32 : i32
    %c1_i32 = arith.constant 1 : i32
    %1 = arith.muli %0, %c1_i32 : i32
    %c0 = arith.constant 0 : index
    %2 = arith.index_cast %1 : i32 to index
    %c0_0 = arith.constant 0 : index
    %c0_1 = arith.constant 0 : index
    %3 = vector.load %arg2[%c0, %2, %c0_0, %c0_1] : memref<1x22x32x4xbf16, #tpu.memory_space<vmem>>, vector<1x14x32x4xbf16>
    %4 = vector.shape_cast %3 : vector<1x14x32x4xbf16> to vector<14x32x4xbf16>
    %5 = vector.shape_cast %4 : vector<14x32x4xbf16> to vector<448x4xbf16>
    %c0_2 = arith.constant 0 : index
    %c0_3 = arith.constant 0 : index
    %6 = vector.load %arg3[%c0_2, %c0_3] : memref<4x16xbf16, #tpu.memory_space<vmem>>, vector<4x16xbf16>
    %cst = arith.constant dense<0.000000e+00> : vector<448x16xf32>
    %7 = tpu.matmul %5, %6, %cst {dimension_numbers = #tpu.dot_dimension_numbers<[1], [0], [0], [1], [0, 0, 1, 1], [], []>} : vector<448x4xbf16>, vector<4x16xbf16>, vector<448x16xf32> -> vector<448x16xf32>
    %c0_4 = arith.constant 0 : index
    %c0_5 = arith.constant 0 : index
    %8 = vector.load %arg4[%c0_4, %c0_5] : memref<1x16xf32, #tpu.memory_space<vmem>>, vector<1x16xf32>
    %9 = vector.broadcast %8 : vector<1x16xf32> to vector<448x16xf32>
    %10 = arith.addf %7, %9 : vector<448x16xf32>
    %cst_6 = arith.constant 0.000000e+00 : f32
    %11 = vector.broadcast %cst_6 : f32 to vector<448x16xf32>
    %12 = arith.maximumf %10, %11 : vector<448x16xf32>
    %13 = vector.shape_cast %12 : vector<448x16xf32> to vector<14x32x16xf32>
    %c0_7 = arith.constant 0 : index
    %c0_8 = arith.constant 0 : index
    %c0_9 = arith.constant 0 : index
    %14 = vector.load %arg11[%c0_7, %c0_8, %c0_9] : memref<14x32x16xf32, #tpu.memory_space<vmem>>, vector<14x32x16xf32>
    tpu.vector_store %arg11[%c0_7, %c0_8, %c0_9], %13 {strides = array<i32>} : memref<14x32x16xf32, #tpu.memory_space<vmem>>, vector<14x32x16xf32>,
    %cst_10 = arith.constant 0.000000e+00 : f32
    %15 = vector.broadcast %cst_10 : f32 to vector<14x3x16xf32>
    %c0_11 = arith.constant 0 : index
    %c0_12 = arith.constant 0 : index
    %c0_13 = arith.constant 0 : index
    %16 = vector.load %arg11[%c0_11, %c0_12, %c0_13] : memref<14x32x16xf32, #tpu.memory_space<vmem>>, vector<14x3x16xf32>
    tpu.vector_store %arg11[%c0_11, %c0_12, %c0_13], %15 {strides = array<i32>} : memref<14x32x16xf32, #tpu.memory_space<vmem>>, vector<14x3x16xf32>,
    %cst_14 = arith.constant 0.000000e+00 : f32
    %17 = vector.broadcast %cst_14 : f32 to vector<14x13x16xf32>
    %c0_15 = arith.constant 0 : index
    %c19 = arith.constant 19 : index
    %c0_16 = arith.constant 0 : index
    %18 = vector.load %arg11[%c0_15, %c19, %c0_16] : memref<14x32x16xf32, #tpu.memory_space<vmem>>, vector<14x13x16xf32>
    tpu.vector_store %arg11[%c0_15, %c19, %c0_16], %17 {strides = array<i32>} : memref<14x32x16xf32, #tpu.memory_space<vmem>>, vector<14x13x16xf32>,
    %c0_i32 = arith.constant 0 : i32
    %19 = arith.addi %1, %c0_i32 : i32
    %c3_i32 = arith.constant 3 : i32
    %20 = arith.cmpi slt, %19, %c3_i32 : i32
    %21 = arith.extui %20 : i1 to i32
    %c0_i32_17 = arith.constant 0 : i32
    %22 = arith.cmpi ne, %21, %c0_i32_17 : i32
    scf.if %22 {
      %cst_93 = arith.constant 0.000000e+00 : f32
      %492 = vector.broadcast %cst_93 : f32 to vector<32x16xf32>
      %c0_94 = arith.constant 0 : index
      %c0_95 = arith.constant 0 : index
      %c0_96 = arith.constant 0 : index
      %493 = vector.load %arg11[%c0_94, %c0_95, %c0_96] : memref<14x32x16xf32, #tpu.memory_space<vmem>>, vector<1x32x16xf32>
      %494 = vector.shape_cast %493 : vector<1x32x16xf32> to vector<32x16xf32>
      %495 = vector.shape_cast %492 : vector<32x16xf32> to vector<1x32x16xf32>
      tpu.vector_store %arg11[%c0_94, %c0_95, %c0_96], %495 {strides = array<i32>} : memref<14x32x16xf32, #tpu.memory_space<vmem>>, vector<1x32x16xf32>,
    } else {
    }
    %c1_i32_18 = arith.constant 1 : i32
    %23 = arith.addi %1, %c1_i32_18 : i32
    %c3_i32_19 = arith.constant 3 : i32
    %24 = arith.cmpi slt, %23, %c3_i32_19 : i32
    %25 = arith.extui %24 : i1 to i32
    %c0_i32_20 = arith.constant 0 : i32
    %26 = arith.cmpi ne, %25, %c0_i32_20 : i32
    scf.if %26 {
      %cst_93 = arith.constant 0.000000e+00 : f32
      %492 = vector.broadcast %cst_93 : f32 to vector<32x16xf32>
      %c1_94 = arith.constant 1 : index
      %c0_95 = arith.constant 0 : index
      %c0_96 = arith.constant 0 : index
      %493 = vector.load %arg11[%c1_94, %c0_95, %c0_96] : memref<14x32x16xf32, #tpu.memory_space<vmem>>, vector<1x32x16xf32>
      %494 = vector.shape_cast %493 : vector<1x32x16xf32> to vector<32x16xf32>
      %495 = vector.shape_cast %492 : vector<32x16xf32> to vector<1x32x16xf32>
      tpu.vector_store %arg11[%c1_94, %c0_95, %c0_96], %495 {strides = array<i32>} : memref<14x32x16xf32, #tpu.memory_space<vmem>>, vector<1x32x16xf32>,
    } else {
    }
    %c2_i32 = arith.constant 2 : i32
    %27 = arith.addi %1, %c2_i32 : i32
    %c3_i32_21 = arith.constant 3 : i32
    %28 = arith.cmpi slt, %27, %c3_i32_21 : i32
    %29 = arith.extui %28 : i1 to i32
    %c0_i32_22 = arith.constant 0 : i32
    %30 = arith.cmpi ne, %29, %c0_i32_22 : i32
    scf.if %30 {
      %cst_93 = arith.constant 0.000000e+00 : f32
      %492 = vector.broadcast %cst_93 : f32 to vector<32x16xf32>
      %c2_94 = arith.constant 2 : index
      %c0_95 = arith.constant 0 : index
      %c0_96 = arith.constant 0 : index
      %493 = vector.load %arg11[%c2_94, %c0_95, %c0_96] : memref<14x32x16xf32, #tpu.memory_space<vmem>>, vector<1x32x16xf32>
      %494 = vector.shape_cast %493 : vector<1x32x16xf32> to vector<32x16xf32>
      %495 = vector.shape_cast %492 : vector<32x16xf32> to vector<1x32x16xf32>
      tpu.vector_store %arg11[%c2_94, %c0_95, %c0_96], %495 {strides = array<i32>} : memref<14x32x16xf32, #tpu.memory_space<vmem>>, vector<1x32x16xf32>,
    } else {
    }
    %c13_i32 = arith.constant 13 : i32
    %31 = arith.addi %1, %c13_i32 : i32
    %c19_i32 = arith.constant 19 : i32
    %32 = arith.cmpi sge, %31, %c19_i32 : i32
    %33 = arith.extui %32 : i1 to i32
    %c0_i32_23 = arith.constant 0 : i32
    %34 = arith.cmpi ne, %33, %c0_i32_23 : i32
    scf.if %34 {
      %cst_93 = arith.constant 0.000000e+00 : f32
      %492 = vector.broadcast %cst_93 : f32 to vector<32x16xf32>
      %c13 = arith.constant 13 : index
      %c0_94 = arith.constant 0 : index
      %c0_95 = arith.constant 0 : index
      %493 = vector.load %arg11[%c13, %c0_94, %c0_95] : memref<14x32x16xf32, #tpu.memory_space<vmem>>, vector<1x32x16xf32>
      %494 = vector.shape_cast %493 : vector<1x32x16xf32> to vector<32x16xf32>
      %495 = vector.shape_cast %492 : vector<32x16xf32> to vector<1x32x16xf32>
      tpu.vector_store %arg11[%c13, %c0_94, %c0_95], %495 {strides = array<i32>} : memref<14x32x16xf32, #tpu.memory_space<vmem>>, vector<1x32x16xf32>,
    } else {
    }
    %c12_i32 = arith.constant 12 : i32
    %35 = arith.addi %1, %c12_i32 : i32
    %c19_i32_24 = arith.constant 19 : i32
    %36 = arith.cmpi sge, %35, %c19_i32_24 : i32
    %37 = arith.extui %36 : i1 to i32
    %c0_i32_25 = arith.constant 0 : i32
    %38 = arith.cmpi ne, %37, %c0_i32_25 : i32
    scf.if %38 {
      %cst_93 = arith.constant 0.000000e+00 : f32
      %492 = vector.broadcast %cst_93 : f32 to vector<32x16xf32>
      %c12_94 = arith.constant 12 : index
      %c0_95 = arith.constant 0 : index
      %c0_96 = arith.constant 0 : index
      %493 = vector.load %arg11[%c12_94, %c0_95, %c0_96] : memref<14x32x16xf32, #tpu.memory_space<vmem>>, vector<1x32x16xf32>
      %494 = vector.shape_cast %493 : vector<1x32x16xf32> to vector<32x16xf32>
      %495 = vector.shape_cast %492 : vector<32x16xf32> to vector<1x32x16xf32>
      tpu.vector_store %arg11[%c12_94, %c0_95, %c0_96], %495 {strides = array<i32>} : memref<14x32x16xf32, #tpu.memory_space<vmem>>, vector<1x32x16xf32>,
    } else {
    }
    %c11_i32 = arith.constant 11 : i32
    %39 = arith.addi %1, %c11_i32 : i32
    %c19_i32_26 = arith.constant 19 : i32
    %40 = arith.cmpi sge, %39, %c19_i32_26 : i32
    %41 = arith.extui %40 : i1 to i32
    %c0_i32_27 = arith.constant 0 : i32
    %42 = arith.cmpi ne, %41, %c0_i32_27 : i32
    scf.if %42 {
      %cst_93 = arith.constant 0.000000e+00 : f32
      %492 = vector.broadcast %cst_93 : f32 to vector<32x16xf32>
      %c11 = arith.constant 11 : index
      %c0_94 = arith.constant 0 : index
      %c0_95 = arith.constant 0 : index
      %493 = vector.load %arg11[%c11, %c0_94, %c0_95] : memref<14x32x16xf32, #tpu.memory_space<vmem>>, vector<1x32x16xf32>
      %494 = vector.shape_cast %493 : vector<1x32x16xf32> to vector<32x16xf32>
      %495 = vector.shape_cast %492 : vector<32x16xf32> to vector<1x32x16xf32>
      tpu.vector_store %arg11[%c11, %c0_94, %c0_95], %495 {strides = array<i32>} : memref<14x32x16xf32, #tpu.memory_space<vmem>>, vector<1x32x16xf32>,
    } else {
    }
    %c0_28 = arith.constant 0 : index
    %c0_29 = arith.constant 0 : index
    %c0_30 = arith.constant 0 : index
    %43 = vector.load %arg5[%c0_28, %c0_29, %c0_30] : memref<7x7x16xf32, #tpu.memory_space<vmem>>, vector<7x7x16xf32>
    %cst_31 = arith.constant 0.000000e+00 : f32
    %44 = vector.broadcast %cst_31 : f32 to vector<8x16x16xf32>
    %c0_32 = arith.constant 0 : index
    %c0_33 = arith.constant 0 : index
    %c0_34 = arith.constant 0 : index
    %45 = vector.load %arg11[%c0_32, %c0_33, %c0_34] : memref<14x32x16xf32, #tpu.memory_space<vmem>>, vector<14x16x16xf32>
    %46 = vector.extract_strided_slice %45 {offsets = [0, 0, 0], sizes = [8, 16, 16], strides = [1, 1, 1]} : vector<14x16x16xf32> to vector<8x16x16xf32>
    %47 = vector.extract_strided_slice %43 {offsets = [0, 0, 0], sizes = [1, 1, 16], strides = [1, 1, 1]} : vector<7x7x16xf32> to vector<1x1x16xf32>
    %48 = vector.shape_cast %47 : vector<1x1x16xf32> to vector<16xf32>
    %49 = vector.shape_cast %48 : vector<16xf32> to vector<1x1x16xf32>
    %50 = vector.broadcast %49 : vector<1x1x16xf32> to vector<8x16x16xf32>
    %51 = arith.mulf %46, %50 : vector<8x16x16xf32>
    %52 = arith.addf %44, %51 : vector<8x16x16xf32>
    %53 = vector.extract_strided_slice %45 {offsets = [1, 0, 0], sizes = [8, 16, 16], strides = [1, 1, 1]} : vector<14x16x16xf32> to vector<8x16x16xf32>
    %54 = vector.extract_strided_slice %43 {offsets = [1, 0, 0], sizes = [1, 1, 16], strides = [1, 1, 1]} : vector<7x7x16xf32> to vector<1x1x16xf32>
    %55 = vector.shape_cast %54 : vector<1x1x16xf32> to vector<16xf32>
    %56 = vector.shape_cast %55 : vector<16xf32> to vector<1x1x16xf32>
    %57 = vector.broadcast %56 : vector<1x1x16xf32> to vector<8x16x16xf32>
    %58 = arith.mulf %53, %57 : vector<8x16x16xf32>
    %59 = arith.addf %52, %58 : vector<8x16x16xf32>
    %60 = vector.extract_strided_slice %45 {offsets = [2, 0, 0], sizes = [8, 16, 16], strides = [1, 1, 1]} : vector<14x16x16xf32> to vector<8x16x16xf32>
    %61 = vector.extract_strided_slice %43 {offsets = [2, 0, 0], sizes = [1, 1, 16], strides = [1, 1, 1]} : vector<7x7x16xf32> to vector<1x1x16xf32>
    %62 = vector.shape_cast %61 : vector<1x1x16xf32> to vector<16xf32>
    %63 = vector.shape_cast %62 : vector<16xf32> to vector<1x1x16xf32>
    %64 = vector.broadcast %63 : vector<1x1x16xf32> to vector<8x16x16xf32>
    %65 = arith.mulf %60, %64 : vector<8x16x16xf32>
    %66 = arith.addf %59, %65 : vector<8x16x16xf32>
    %67 = vector.extract_strided_slice %45 {offsets = [3, 0, 0], sizes = [8, 16, 16], strides = [1, 1, 1]} : vector<14x16x16xf32> to vector<8x16x16xf32>
    %68 = vector.extract_strided_slice %43 {offsets = [3, 0, 0], sizes = [1, 1, 16], strides = [1, 1, 1]} : vector<7x7x16xf32> to vector<1x1x16xf32>
    %69 = vector.shape_cast %68 : vector<1x1x16xf32> to vector<16xf32>
    %70 = vector.shape_cast %69 : vector<16xf32> to vector<1x1x16xf32>
    %71 = vector.broadcast %70 : vector<1x1x16xf32> to vector<8x16x16xf32>
    %72 = arith.mulf %67, %71 : vector<8x16x16xf32>
    %73 = arith.addf %66, %72 : vector<8x16x16xf32>
    %74 = vector.extract_strided_slice %45 {offsets = [4, 0, 0], sizes = [8, 16, 16], strides = [1, 1, 1]} : vector<14x16x16xf32> to vector<8x16x16xf32>
    %75 = vector.extract_strided_slice %43 {offsets = [4, 0, 0], sizes = [1, 1, 16], strides = [1, 1, 1]} : vector<7x7x16xf32> to vector<1x1x16xf32>
    %76 = vector.shape_cast %75 : vector<1x1x16xf32> to vector<16xf32>
    %77 = vector.shape_cast %76 : vector<16xf32> to vector<1x1x16xf32>
    %78 = vector.broadcast %77 : vector<1x1x16xf32> to vector<8x16x16xf32>
    %79 = arith.mulf %74, %78 : vector<8x16x16xf32>
    %80 = arith.addf %73, %79 : vector<8x16x16xf32>
    %81 = vector.extract_strided_slice %45 {offsets = [5, 0, 0], sizes = [8, 16, 16], strides = [1, 1, 1]} : vector<14x16x16xf32> to vector<8x16x16xf32>
    %82 = vector.extract_strided_slice %43 {offsets = [5, 0, 0], sizes = [1, 1, 16], strides = [1, 1, 1]} : vector<7x7x16xf32> to vector<1x1x16xf32>
    %83 = vector.shape_cast %82 : vector<1x1x16xf32> to vector<16xf32>
    %84 = vector.shape_cast %83 : vector<16xf32> to vector<1x1x16xf32>
    %85 = vector.broadcast %84 : vector<1x1x16xf32> to vector<8x16x16xf32>
    %86 = arith.mulf %81, %85 : vector<8x16x16xf32>
    %87 = arith.addf %80, %86 : vector<8x16x16xf32>
    %88 = vector.extract_strided_slice %45 {offsets = [6, 0, 0], sizes = [8, 16, 16], strides = [1, 1, 1]} : vector<14x16x16xf32> to vector<8x16x16xf32>
    %89 = vector.extract_strided_slice %43 {offsets = [6, 0, 0], sizes = [1, 1, 16], strides = [1, 1, 1]} : vector<7x7x16xf32> to vector<1x1x16xf32>
    %90 = vector.shape_cast %89 : vector<1x1x16xf32> to vector<16xf32>
    %91 = vector.shape_cast %90 : vector<16xf32> to vector<1x1x16xf32>
    %92 = vector.broadcast %91 : vector<1x1x16xf32> to vector<8x16x16xf32>
    %93 = arith.mulf %88, %92 : vector<8x16x16xf32>
    %94 = arith.addf %87, %93 : vector<8x16x16xf32>
    %c0_35 = arith.constant 0 : index
    %c1 = arith.constant 1 : index
    %c0_36 = arith.constant 0 : index
    %95 = vector.load %arg11[%c0_35, %c1, %c0_36] : memref<14x32x16xf32, #tpu.memory_space<vmem>>, vector<14x16x16xf32>
    %96 = vector.extract_strided_slice %95 {offsets = [0, 0, 0], sizes = [8, 16, 16], strides = [1, 1, 1]} : vector<14x16x16xf32> to vector<8x16x16xf32>
    %97 = vector.extract_strided_slice %43 {offsets = [0, 1, 0], sizes = [1, 1, 16], strides = [1, 1, 1]} : vector<7x7x16xf32> to vector<1x1x16xf32>
    %98 = vector.shape_cast %97 : vector<1x1x16xf32> to vector<16xf32>
    %99 = vector.shape_cast %98 : vector<16xf32> to vector<1x1x16xf32>
    %100 = vector.broadcast %99 : vector<1x1x16xf32> to vector<8x16x16xf32>
    %101 = arith.mulf %96, %100 : vector<8x16x16xf32>
    %102 = arith.addf %94, %101 : vector<8x16x16xf32>
    %103 = vector.extract_strided_slice %95 {offsets = [1, 0, 0], sizes = [8, 16, 16], strides = [1, 1, 1]} : vector<14x16x16xf32> to vector<8x16x16xf32>
    %104 = vector.extract_strided_slice %43 {offsets = [1, 1, 0], sizes = [1, 1, 16], strides = [1, 1, 1]} : vector<7x7x16xf32> to vector<1x1x16xf32>
    %105 = vector.shape_cast %104 : vector<1x1x16xf32> to vector<16xf32>
    %106 = vector.shape_cast %105 : vector<16xf32> to vector<1x1x16xf32>
    %107 = vector.broadcast %106 : vector<1x1x16xf32> to vector<8x16x16xf32>
    %108 = arith.mulf %103, %107 : vector<8x16x16xf32>
    %109 = arith.addf %102, %108 : vector<8x16x16xf32>
    %110 = vector.extract_strided_slice %95 {offsets = [2, 0, 0], sizes = [8, 16, 16], strides = [1, 1, 1]} : vector<14x16x16xf32> to vector<8x16x16xf32>
    %111 = vector.extract_strided_slice %43 {offsets = [2, 1, 0], sizes = [1, 1, 16], strides = [1, 1, 1]} : vector<7x7x16xf32> to vector<1x1x16xf32>
    %112 = vector.shape_cast %111 : vector<1x1x16xf32> to vector<16xf32>
    %113 = vector.shape_cast %112 : vector<16xf32> to vector<1x1x16xf32>
    %114 = vector.broadcast %113 : vector<1x1x16xf32> to vector<8x16x16xf32>
    %115 = arith.mulf %110, %114 : vector<8x16x16xf32>
    %116 = arith.addf %109, %115 : vector<8x16x16xf32>
    %117 = vector.extract_strided_slice %95 {offsets = [3, 0, 0], sizes = [8, 16, 16], strides = [1, 1, 1]} : vector<14x16x16xf32> to vector<8x16x16xf32>
    %118 = vector.extract_strided_slice %43 {offsets = [3, 1, 0], sizes = [1, 1, 16], strides = [1, 1, 1]} : vector<7x7x16xf32> to vector<1x1x16xf32>
    %119 = vector.shape_cast %118 : vector<1x1x16xf32> to vector<16xf32>
    %120 = vector.shape_cast %119 : vector<16xf32> to vector<1x1x16xf32>
    %121 = vector.broadcast %120 : vector<1x1x16xf32> to vector<8x16x16xf32>
    %122 = arith.mulf %117, %121 : vector<8x16x16xf32>
    %123 = arith.addf %116, %122 : vector<8x16x16xf32>
    %124 = vector.extract_strided_slice %95 {offsets = [4, 0, 0], sizes = [8, 16, 16], strides = [1, 1, 1]} : vector<14x16x16xf32> to vector<8x16x16xf32>
    %125 = vector.extract_strided_slice %43 {offsets = [4, 1, 0], sizes = [1, 1, 16], strides = [1, 1, 1]} : vector<7x7x16xf32> to vector<1x1x16xf32>
    %126 = vector.shape_cast %125 : vector<1x1x16xf32> to vector<16xf32>
    %127 = vector.shape_cast %126 : vector<16xf32> to vector<1x1x16xf32>
    %128 = vector.broadcast %127 : vector<1x1x16xf32> to vector<8x16x16xf32>
    %129 = arith.mulf %124, %128 : vector<8x16x16xf32>
    %130 = arith.addf %123, %129 : vector<8x16x16xf32>
    %131 = vector.extract_strided_slice %95 {offsets = [5, 0, 0], sizes = [8, 16, 16], strides = [1, 1, 1]} : vector<14x16x16xf32> to vector<8x16x16xf32>
    %132 = vector.extract_strided_slice %43 {offsets = [5, 1, 0], sizes = [1, 1, 16], strides = [1, 1, 1]} : vector<7x7x16xf32> to vector<1x1x16xf32>
    %133 = vector.shape_cast %132 : vector<1x1x16xf32> to vector<16xf32>
    %134 = vector.shape_cast %133 : vector<16xf32> to vector<1x1x16xf32>
    %135 = vector.broadcast %134 : vector<1x1x16xf32> to vector<8x16x16xf32>
    %136 = arith.mulf %131, %135 : vector<8x16x16xf32>
    %137 = arith.addf %130, %136 : vector<8x16x16xf32>
    %138 = vector.extract_strided_slice %95 {offsets = [6, 0, 0], sizes = [8, 16, 16], strides = [1, 1, 1]} : vector<14x16x16xf32> to vector<8x16x16xf32>
    %139 = vector.extract_strided_slice %43 {offsets = [6, 1, 0], sizes = [1, 1, 16], strides = [1, 1, 1]} : vector<7x7x16xf32> to vector<1x1x16xf32>
    %140 = vector.shape_cast %139 : vector<1x1x16xf32> to vector<16xf32>
    %141 = vector.shape_cast %140 : vector<16xf32> to vector<1x1x16xf32>
    %142 = vector.broadcast %141 : vector<1x1x16xf32> to vector<8x16x16xf32>
    %143 = arith.mulf %138, %142 : vector<8x16x16xf32>
    %144 = arith.addf %137, %143 : vector<8x16x16xf32>
    %c0_37 = arith.constant 0 : index
    %c2 = arith.constant 2 : index
    %c0_38 = arith.constant 0 : index
    %145 = vector.load %arg11[%c0_37, %c2, %c0_38] : memref<14x32x16xf32, #tpu.memory_space<vmem>>, vector<14x16x16xf32>
    %146 = vector.extract_strided_slice %145 {offsets = [0, 0, 0], sizes = [8, 16, 16], strides = [1, 1, 1]} : vector<14x16x16xf32> to vector<8x16x16xf32>
    %147 = vector.extract_strided_slice %43 {offsets = [0, 2, 0], sizes = [1, 1, 16], strides = [1, 1, 1]} : vector<7x7x16xf32> to vector<1x1x16xf32>
    %148 = vector.shape_cast %147 : vector<1x1x16xf32> to vector<16xf32>
    %149 = vector.shape_cast %148 : vector<16xf32> to vector<1x1x16xf32>
    %150 = vector.broadcast %149 : vector<1x1x16xf32> to vector<8x16x16xf32>
    %151 = arith.mulf %146, %150 : vector<8x16x16xf32>
    %152 = arith.addf %144, %151 : vector<8x16x16xf32>
    %153 = vector.extract_strided_slice %145 {offsets = [1, 0, 0], sizes = [8, 16, 16], strides = [1, 1, 1]} : vector<14x16x16xf32> to vector<8x16x16xf32>
    %154 = vector.extract_strided_slice %43 {offsets = [1, 2, 0], sizes = [1, 1, 16], strides = [1, 1, 1]} : vector<7x7x16xf32> to vector<1x1x16xf32>
    %155 = vector.shape_cast %154 : vector<1x1x16xf32> to vector<16xf32>
    %156 = vector.shape_cast %155 : vector<16xf32> to vector<1x1x16xf32>
    %157 = vector.broadcast %156 : vector<1x1x16xf32> to vector<8x16x16xf32>
    %158 = arith.mulf %153, %157 : vector<8x16x16xf32>
    %159 = arith.addf %152, %158 : vector<8x16x16xf32>
    %160 = vector.extract_strided_slice %145 {offsets = [2, 0, 0], sizes = [8, 16, 16], strides = [1, 1, 1]} : vector<14x16x16xf32> to vector<8x16x16xf32>
    %161 = vector.extract_strided_slice %43 {offsets = [2, 2, 0], sizes = [1, 1, 16], strides = [1, 1, 1]} : vector<7x7x16xf32> to vector<1x1x16xf32>
    %162 = vector.shape_cast %161 : vector<1x1x16xf32> to vector<16xf32>
    %163 = vector.shape_cast %162 : vector<16xf32> to vector<1x1x16xf32>
    %164 = vector.broadcast %163 : vector<1x1x16xf32> to vector<8x16x16xf32>
    %165 = arith.mulf %160, %164 : vector<8x16x16xf32>
    %166 = arith.addf %159, %165 : vector<8x16x16xf32>
    %167 = vector.extract_strided_slice %145 {offsets = [3, 0, 0], sizes = [8, 16, 16], strides = [1, 1, 1]} : vector<14x16x16xf32> to vector<8x16x16xf32>
    %168 = vector.extract_strided_slice %43 {offsets = [3, 2, 0], sizes = [1, 1, 16], strides = [1, 1, 1]} : vector<7x7x16xf32> to vector<1x1x16xf32>
    %169 = vector.shape_cast %168 : vector<1x1x16xf32> to vector<16xf32>
    %170 = vector.shape_cast %169 : vector<16xf32> to vector<1x1x16xf32>
    %171 = vector.broadcast %170 : vector<1x1x16xf32> to vector<8x16x16xf32>
    %172 = arith.mulf %167, %171 : vector<8x16x16xf32>
    %173 = arith.addf %166, %172 : vector<8x16x16xf32>
    %174 = vector.extract_strided_slice %145 {offsets = [4, 0, 0], sizes = [8, 16, 16], strides = [1, 1, 1]} : vector<14x16x16xf32> to vector<8x16x16xf32>
    %175 = vector.extract_strided_slice %43 {offsets = [4, 2, 0], sizes = [1, 1, 16], strides = [1, 1, 1]} : vector<7x7x16xf32> to vector<1x1x16xf32>
    %176 = vector.shape_cast %175 : vector<1x1x16xf32> to vector<16xf32>
    %177 = vector.shape_cast %176 : vector<16xf32> to vector<1x1x16xf32>
    %178 = vector.broadcast %177 : vector<1x1x16xf32> to vector<8x16x16xf32>
    %179 = arith.mulf %174, %178 : vector<8x16x16xf32>
    %180 = arith.addf %173, %179 : vector<8x16x16xf32>
    %181 = vector.extract_strided_slice %145 {offsets = [5, 0, 0], sizes = [8, 16, 16], strides = [1, 1, 1]} : vector<14x16x16xf32> to vector<8x16x16xf32>
    %182 = vector.extract_strided_slice %43 {offsets = [5, 2, 0], sizes = [1, 1, 16], strides = [1, 1, 1]} : vector<7x7x16xf32> to vector<1x1x16xf32>
    %183 = vector.shape_cast %182 : vector<1x1x16xf32> to vector<16xf32>
    %184 = vector.shape_cast %183 : vector<16xf32> to vector<1x1x16xf32>
    %185 = vector.broadcast %184 : vector<1x1x16xf32> to vector<8x16x16xf32>
    %186 = arith.mulf %181, %185 : vector<8x16x16xf32>
    %187 = arith.addf %180, %186 : vector<8x16x16xf32>
    %188 = vector.extract_strided_slice %145 {offsets = [6, 0, 0], sizes = [8, 16, 16], strides = [1, 1, 1]} : vector<14x16x16xf32> to vector<8x16x16xf32>
    %189 = vector.extract_strided_slice %43 {offsets = [6, 2, 0], sizes = [1, 1, 16], strides = [1, 1, 1]} : vector<7x7x16xf32> to vector<1x1x16xf32>
    %190 = vector.shape_cast %189 : vector<1x1x16xf32> to vector<16xf32>
    %191 = vector.shape_cast %190 : vector<16xf32> to vector<1x1x16xf32>
    %192 = vector.broadcast %191 : vector<1x1x16xf32> to vector<8x16x16xf32>
    %193 = arith.mulf %188, %192 : vector<8x16x16xf32>
    %194 = arith.addf %187, %193 : vector<8x16x16xf32>
    %c0_39 = arith.constant 0 : index
    %c3 = arith.constant 3 : index
    %c0_40 = arith.constant 0 : index
    %195 = vector.load %arg11[%c0_39, %c3, %c0_40] : memref<14x32x16xf32, #tpu.memory_space<vmem>>, vector<14x16x16xf32>
    %196 = vector.extract_strided_slice %195 {offsets = [0, 0, 0], sizes = [8, 16, 16], strides = [1, 1, 1]} : vector<14x16x16xf32> to vector<8x16x16xf32>
    %197 = vector.extract_strided_slice %43 {offsets = [0, 3, 0], sizes = [1, 1, 16], strides = [1, 1, 1]} : vector<7x7x16xf32> to vector<1x1x16xf32>
    %198 = vector.shape_cast %197 : vector<1x1x16xf32> to vector<16xf32>
    %199 = vector.shape_cast %198 : vector<16xf32> to vector<1x1x16xf32>
    %200 = vector.broadcast %199 : vector<1x1x16xf32> to vector<8x16x16xf32>
    %201 = arith.mulf %196, %200 : vector<8x16x16xf32>
    %202 = arith.addf %194, %201 : vector<8x16x16xf32>
    %203 = vector.extract_strided_slice %195 {offsets = [1, 0, 0], sizes = [8, 16, 16], strides = [1, 1, 1]} : vector<14x16x16xf32> to vector<8x16x16xf32>
    %204 = vector.extract_strided_slice %43 {offsets = [1, 3, 0], sizes = [1, 1, 16], strides = [1, 1, 1]} : vector<7x7x16xf32> to vector<1x1x16xf32>
    %205 = vector.shape_cast %204 : vector<1x1x16xf32> to vector<16xf32>
    %206 = vector.shape_cast %205 : vector<16xf32> to vector<1x1x16xf32>
    %207 = vector.broadcast %206 : vector<1x1x16xf32> to vector<8x16x16xf32>
    %208 = arith.mulf %203, %207 : vector<8x16x16xf32>
    %209 = arith.addf %202, %208 : vector<8x16x16xf32>
    %210 = vector.extract_strided_slice %195 {offsets = [2, 0, 0], sizes = [8, 16, 16], strides = [1, 1, 1]} : vector<14x16x16xf32> to vector<8x16x16xf32>
    %211 = vector.extract_strided_slice %43 {offsets = [2, 3, 0], sizes = [1, 1, 16], strides = [1, 1, 1]} : vector<7x7x16xf32> to vector<1x1x16xf32>
    %212 = vector.shape_cast %211 : vector<1x1x16xf32> to vector<16xf32>
    %213 = vector.shape_cast %212 : vector<16xf32> to vector<1x1x16xf32>
    %214 = vector.broadcast %213 : vector<1x1x16xf32> to vector<8x16x16xf32>
    %215 = arith.mulf %210, %214 : vector<8x16x16xf32>
    %216 = arith.addf %209, %215 : vector<8x16x16xf32>
    %217 = vector.extract_strided_slice %195 {offsets = [3, 0, 0], sizes = [8, 16, 16], strides = [1, 1, 1]} : vector<14x16x16xf32> to vector<8x16x16xf32>
    %218 = vector.extract_strided_slice %43 {offsets = [3, 3, 0], sizes = [1, 1, 16], strides = [1, 1, 1]} : vector<7x7x16xf32> to vector<1x1x16xf32>
    %219 = vector.shape_cast %218 : vector<1x1x16xf32> to vector<16xf32>
    %220 = vector.shape_cast %219 : vector<16xf32> to vector<1x1x16xf32>
    %221 = vector.broadcast %220 : vector<1x1x16xf32> to vector<8x16x16xf32>
    %222 = arith.mulf %217, %221 : vector<8x16x16xf32>
    %223 = arith.addf %216, %222 : vector<8x16x16xf32>
    %224 = vector.extract_strided_slice %195 {offsets = [4, 0, 0], sizes = [8, 16, 16], strides = [1, 1, 1]} : vector<14x16x16xf32> to vector<8x16x16xf32>
    %225 = vector.extract_strided_slice %43 {offsets = [4, 3, 0], sizes = [1, 1, 16], strides = [1, 1, 1]} : vector<7x7x16xf32> to vector<1x1x16xf32>
    %226 = vector.shape_cast %225 : vector<1x1x16xf32> to vector<16xf32>
    %227 = vector.shape_cast %226 : vector<16xf32> to vector<1x1x16xf32>
    %228 = vector.broadcast %227 : vector<1x1x16xf32> to vector<8x16x16xf32>
    %229 = arith.mulf %224, %228 : vector<8x16x16xf32>
    %230 = arith.addf %223, %229 : vector<8x16x16xf32>
    %231 = vector.extract_strided_slice %195 {offsets = [5, 0, 0], sizes = [8, 16, 16], strides = [1, 1, 1]} : vector<14x16x16xf32> to vector<8x16x16xf32>
    %232 = vector.extract_strided_slice %43 {offsets = [5, 3, 0], sizes = [1, 1, 16], strides = [1, 1, 1]} : vector<7x7x16xf32> to vector<1x1x16xf32>
    %233 = vector.shape_cast %232 : vector<1x1x16xf32> to vector<16xf32>
    %234 = vector.shape_cast %233 : vector<16xf32> to vector<1x1x16xf32>
    %235 = vector.broadcast %234 : vector<1x1x16xf32> to vector<8x16x16xf32>
    %236 = arith.mulf %231, %235 : vector<8x16x16xf32>
    %237 = arith.addf %230, %236 : vector<8x16x16xf32>
    %238 = vector.extract_strided_slice %195 {offsets = [6, 0, 0], sizes = [8, 16, 16], strides = [1, 1, 1]} : vector<14x16x16xf32> to vector<8x16x16xf32>
    %239 = vector.extract_strided_slice %43 {offsets = [6, 3, 0], sizes = [1, 1, 16], strides = [1, 1, 1]} : vector<7x7x16xf32> to vector<1x1x16xf32>
    %240 = vector.shape_cast %239 : vector<1x1x16xf32> to vector<16xf32>
    %241 = vector.shape_cast %240 : vector<16xf32> to vector<1x1x16xf32>
    %242 = vector.broadcast %241 : vector<1x1x16xf32> to vector<8x16x16xf32>
    %243 = arith.mulf %238, %242 : vector<8x16x16xf32>
    %244 = arith.addf %237, %243 : vector<8x16x16xf32>
    %c0_41 = arith.constant 0 : index
    %c4 = arith.constant 4 : index
    %c0_42 = arith.constant 0 : index
    %245 = vector.load %arg11[%c0_41, %c4, %c0_42] : memref<14x32x16xf32, #tpu.memory_space<vmem>>, vector<14x16x16xf32>
    %246 = vector.extract_strided_slice %245 {offsets = [0, 0, 0], sizes = [8, 16, 16], strides = [1, 1, 1]} : vector<14x16x16xf32> to vector<8x16x16xf32>
    %247 = vector.extract_strided_slice %43 {offsets = [0, 4, 0], sizes = [1, 1, 16], strides = [1, 1, 1]} : vector<7x7x16xf32> to vector<1x1x16xf32>
    %248 = vector.shape_cast %247 : vector<1x1x16xf32> to vector<16xf32>
    %249 = vector.shape_cast %248 : vector<16xf32> to vector<1x1x16xf32>
    %250 = vector.broadcast %249 : vector<1x1x16xf32> to vector<8x16x16xf32>
    %251 = arith.mulf %246, %250 : vector<8x16x16xf32>
    %252 = arith.addf %244, %251 : vector<8x16x16xf32>
    %253 = vector.extract_strided_slice %245 {offsets = [1, 0, 0], sizes = [8, 16, 16], strides = [1, 1, 1]} : vector<14x16x16xf32> to vector<8x16x16xf32>
    %254 = vector.extract_strided_slice %43 {offsets = [1, 4, 0], sizes = [1, 1, 16], strides = [1, 1, 1]} : vector<7x7x16xf32> to vector<1x1x16xf32>
    %255 = vector.shape_cast %254 : vector<1x1x16xf32> to vector<16xf32>
    %256 = vector.shape_cast %255 : vector<16xf32> to vector<1x1x16xf32>
    %257 = vector.broadcast %256 : vector<1x1x16xf32> to vector<8x16x16xf32>
    %258 = arith.mulf %253, %257 : vector<8x16x16xf32>
    %259 = arith.addf %252, %258 : vector<8x16x16xf32>
    %260 = vector.extract_strided_slice %245 {offsets = [2, 0, 0], sizes = [8, 16, 16], strides = [1, 1, 1]} : vector<14x16x16xf32> to vector<8x16x16xf32>
    %261 = vector.extract_strided_slice %43 {offsets = [2, 4, 0], sizes = [1, 1, 16], strides = [1, 1, 1]} : vector<7x7x16xf32> to vector<1x1x16xf32>
    %262 = vector.shape_cast %261 : vector<1x1x16xf32> to vector<16xf32>
    %263 = vector.shape_cast %262 : vector<16xf32> to vector<1x1x16xf32>
    %264 = vector.broadcast %263 : vector<1x1x16xf32> to vector<8x16x16xf32>
    %265 = arith.mulf %260, %264 : vector<8x16x16xf32>
    %266 = arith.addf %259, %265 : vector<8x16x16xf32>
    %267 = vector.extract_strided_slice %245 {offsets = [3, 0, 0], sizes = [8, 16, 16], strides = [1, 1, 1]} : vector<14x16x16xf32> to vector<8x16x16xf32>
    %268 = vector.extract_strided_slice %43 {offsets = [3, 4, 0], sizes = [1, 1, 16], strides = [1, 1, 1]} : vector<7x7x16xf32> to vector<1x1x16xf32>
    %269 = vector.shape_cast %268 : vector<1x1x16xf32> to vector<16xf32>
    %270 = vector.shape_cast %269 : vector<16xf32> to vector<1x1x16xf32>
    %271 = vector.broadcast %270 : vector<1x1x16xf32> to vector<8x16x16xf32>
    %272 = arith.mulf %267, %271 : vector<8x16x16xf32>
    %273 = arith.addf %266, %272 : vector<8x16x16xf32>
    %274 = vector.extract_strided_slice %245 {offsets = [4, 0, 0], sizes = [8, 16, 16], strides = [1, 1, 1]} : vector<14x16x16xf32> to vector<8x16x16xf32>
    %275 = vector.extract_strided_slice %43 {offsets = [4, 4, 0], sizes = [1, 1, 16], strides = [1, 1, 1]} : vector<7x7x16xf32> to vector<1x1x16xf32>
    %276 = vector.shape_cast %275 : vector<1x1x16xf32> to vector<16xf32>
    %277 = vector.shape_cast %276 : vector<16xf32> to vector<1x1x16xf32>
    %278 = vector.broadcast %277 : vector<1x1x16xf32> to vector<8x16x16xf32>
    %279 = arith.mulf %274, %278 : vector<8x16x16xf32>
    %280 = arith.addf %273, %279 : vector<8x16x16xf32>
    %281 = vector.extract_strided_slice %245 {offsets = [5, 0, 0], sizes = [8, 16, 16], strides = [1, 1, 1]} : vector<14x16x16xf32> to vector<8x16x16xf32>
    %282 = vector.extract_strided_slice %43 {offsets = [5, 4, 0], sizes = [1, 1, 16], strides = [1, 1, 1]} : vector<7x7x16xf32> to vector<1x1x16xf32>
    %283 = vector.shape_cast %282 : vector<1x1x16xf32> to vector<16xf32>
    %284 = vector.shape_cast %283 : vector<16xf32> to vector<1x1x16xf32>
    %285 = vector.broadcast %284 : vector<1x1x16xf32> to vector<8x16x16xf32>
    %286 = arith.mulf %281, %285 : vector<8x16x16xf32>
    %287 = arith.addf %280, %286 : vector<8x16x16xf32>
    %288 = vector.extract_strided_slice %245 {offsets = [6, 0, 0], sizes = [8, 16, 16], strides = [1, 1, 1]} : vector<14x16x16xf32> to vector<8x16x16xf32>
    %289 = vector.extract_strided_slice %43 {offsets = [6, 4, 0], sizes = [1, 1, 16], strides = [1, 1, 1]} : vector<7x7x16xf32> to vector<1x1x16xf32>
    %290 = vector.shape_cast %289 : vector<1x1x16xf32> to vector<16xf32>
    %291 = vector.shape_cast %290 : vector<16xf32> to vector<1x1x16xf32>
    %292 = vector.broadcast %291 : vector<1x1x16xf32> to vector<8x16x16xf32>
    %293 = arith.mulf %288, %292 : vector<8x16x16xf32>
    %294 = arith.addf %287, %293 : vector<8x16x16xf32>
    %c0_43 = arith.constant 0 : index
    %c5 = arith.constant 5 : index
    %c0_44 = arith.constant 0 : index
    %295 = vector.load %arg11[%c0_43, %c5, %c0_44] : memref<14x32x16xf32, #tpu.memory_space<vmem>>, vector<14x16x16xf32>
    %296 = vector.extract_strided_slice %295 {offsets = [0, 0, 0], sizes = [8, 16, 16], strides = [1, 1, 1]} : vector<14x16x16xf32> to vector<8x16x16xf32>
    %297 = vector.extract_strided_slice %43 {offsets = [0, 5, 0], sizes = [1, 1, 16], strides = [1, 1, 1]} : vector<7x7x16xf32> to vector<1x1x16xf32>
    %298 = vector.shape_cast %297 : vector<1x1x16xf32> to vector<16xf32>
    %299 = vector.shape_cast %298 : vector<16xf32> to vector<1x1x16xf32>
    %300 = vector.broadcast %299 : vector<1x1x16xf32> to vector<8x16x16xf32>
    %301 = arith.mulf %296, %300 : vector<8x16x16xf32>
    %302 = arith.addf %294, %301 : vector<8x16x16xf32>
    %303 = vector.extract_strided_slice %295 {offsets = [1, 0, 0], sizes = [8, 16, 16], strides = [1, 1, 1]} : vector<14x16x16xf32> to vector<8x16x16xf32>
    %304 = vector.extract_strided_slice %43 {offsets = [1, 5, 0], sizes = [1, 1, 16], strides = [1, 1, 1]} : vector<7x7x16xf32> to vector<1x1x16xf32>
    %305 = vector.shape_cast %304 : vector<1x1x16xf32> to vector<16xf32>
    %306 = vector.shape_cast %305 : vector<16xf32> to vector<1x1x16xf32>
    %307 = vector.broadcast %306 : vector<1x1x16xf32> to vector<8x16x16xf32>
    %308 = arith.mulf %303, %307 : vector<8x16x16xf32>
    %309 = arith.addf %302, %308 : vector<8x16x16xf32>
    %310 = vector.extract_strided_slice %295 {offsets = [2, 0, 0], sizes = [8, 16, 16], strides = [1, 1, 1]} : vector<14x16x16xf32> to vector<8x16x16xf32>
    %311 = vector.extract_strided_slice %43 {offsets = [2, 5, 0], sizes = [1, 1, 16], strides = [1, 1, 1]} : vector<7x7x16xf32> to vector<1x1x16xf32>
    %312 = vector.shape_cast %311 : vector<1x1x16xf32> to vector<16xf32>
    %313 = vector.shape_cast %312 : vector<16xf32> to vector<1x1x16xf32>
    %314 = vector.broadcast %313 : vector<1x1x16xf32> to vector<8x16x16xf32>
    %315 = arith.mulf %310, %314 : vector<8x16x16xf32>
    %316 = arith.addf %309, %315 : vector<8x16x16xf32>
    %317 = vector.extract_strided_slice %295 {offsets = [3, 0, 0], sizes = [8, 16, 16], strides = [1, 1, 1]} : vector<14x16x16xf32> to vector<8x16x16xf32>
    %318 = vector.extract_strided_slice %43 {offsets = [3, 5, 0], sizes = [1, 1, 16], strides = [1, 1, 1]} : vector<7x7x16xf32> to vector<1x1x16xf32>
    %319 = vector.shape_cast %318 : vector<1x1x16xf32> to vector<16xf32>
    %320 = vector.shape_cast %319 : vector<16xf32> to vector<1x1x16xf32>
    %321 = vector.broadcast %320 : vector<1x1x16xf32> to vector<8x16x16xf32>
    %322 = arith.mulf %317, %321 : vector<8x16x16xf32>
    %323 = arith.addf %316, %322 : vector<8x16x16xf32>
    %324 = vector.extract_strided_slice %295 {offsets = [4, 0, 0], sizes = [8, 16, 16], strides = [1, 1, 1]} : vector<14x16x16xf32> to vector<8x16x16xf32>
    %325 = vector.extract_strided_slice %43 {offsets = [4, 5, 0], sizes = [1, 1, 16], strides = [1, 1, 1]} : vector<7x7x16xf32> to vector<1x1x16xf32>
    %326 = vector.shape_cast %325 : vector<1x1x16xf32> to vector<16xf32>
    %327 = vector.shape_cast %326 : vector<16xf32> to vector<1x1x16xf32>
    %328 = vector.broadcast %327 : vector<1x1x16xf32> to vector<8x16x16xf32>
    %329 = arith.mulf %324, %328 : vector<8x16x16xf32>
    %330 = arith.addf %323, %329 : vector<8x16x16xf32>
    %331 = vector.extract_strided_slice %295 {offsets = [5, 0, 0], sizes = [8, 16, 16], strides = [1, 1, 1]} : vector<14x16x16xf32> to vector<8x16x16xf32>
    %332 = vector.extract_strided_slice %43 {offsets = [5, 5, 0], sizes = [1, 1, 16], strides = [1, 1, 1]} : vector<7x7x16xf32> to vector<1x1x16xf32>
    %333 = vector.shape_cast %332 : vector<1x1x16xf32> to vector<16xf32>
    %334 = vector.shape_cast %333 : vector<16xf32> to vector<1x1x16xf32>
    %335 = vector.broadcast %334 : vector<1x1x16xf32> to vector<8x16x16xf32>
    %336 = arith.mulf %331, %335 : vector<8x16x16xf32>
    %337 = arith.addf %330, %336 : vector<8x16x16xf32>
    %338 = vector.extract_strided_slice %295 {offsets = [6, 0, 0], sizes = [8, 16, 16], strides = [1, 1, 1]} : vector<14x16x16xf32> to vector<8x16x16xf32>
    %339 = vector.extract_strided_slice %43 {offsets = [6, 5, 0], sizes = [1, 1, 16], strides = [1, 1, 1]} : vector<7x7x16xf32> to vector<1x1x16xf32>
    %340 = vector.shape_cast %339 : vector<1x1x16xf32> to vector<16xf32>
    %341 = vector.shape_cast %340 : vector<16xf32> to vector<1x1x16xf32>
    %342 = vector.broadcast %341 : vector<1x1x16xf32> to vector<8x16x16xf32>
    %343 = arith.mulf %338, %342 : vector<8x16x16xf32>
    %344 = arith.addf %337, %343 : vector<8x16x16xf32>
    %c0_45 = arith.constant 0 : index
    %c6 = arith.constant 6 : index
    %c0_46 = arith.constant 0 : index
    %345 = vector.load %arg11[%c0_45, %c6, %c0_46] : memref<14x32x16xf32, #tpu.memory_space<vmem>>, vector<14x16x16xf32>
    %346 = vector.extract_strided_slice %345 {offsets = [0, 0, 0], sizes = [8, 16, 16], strides = [1, 1, 1]} : vector<14x16x16xf32> to vector<8x16x16xf32>
    %347 = vector.extract_strided_slice %43 {offsets = [0, 6, 0], sizes = [1, 1, 16], strides = [1, 1, 1]} : vector<7x7x16xf32> to vector<1x1x16xf32>
    %348 = vector.shape_cast %347 : vector<1x1x16xf32> to vector<16xf32>
    %349 = vector.shape_cast %348 : vector<16xf32> to vector<1x1x16xf32>
    %350 = vector.broadcast %349 : vector<1x1x16xf32> to vector<8x16x16xf32>
    %351 = arith.mulf %346, %350 : vector<8x16x16xf32>
    %352 = arith.addf %344, %351 : vector<8x16x16xf32>
    %353 = vector.extract_strided_slice %345 {offsets = [1, 0, 0], sizes = [8, 16, 16], strides = [1, 1, 1]} : vector<14x16x16xf32> to vector<8x16x16xf32>
    %354 = vector.extract_strided_slice %43 {offsets = [1, 6, 0], sizes = [1, 1, 16], strides = [1, 1, 1]} : vector<7x7x16xf32> to vector<1x1x16xf32>
    %355 = vector.shape_cast %354 : vector<1x1x16xf32> to vector<16xf32>
    %356 = vector.shape_cast %355 : vector<16xf32> to vector<1x1x16xf32>
    %357 = vector.broadcast %356 : vector<1x1x16xf32> to vector<8x16x16xf32>
    %358 = arith.mulf %353, %357 : vector<8x16x16xf32>
    %359 = arith.addf %352, %358 : vector<8x16x16xf32>
    %360 = vector.extract_strided_slice %345 {offsets = [2, 0, 0], sizes = [8, 16, 16], strides = [1, 1, 1]} : vector<14x16x16xf32> to vector<8x16x16xf32>
    %361 = vector.extract_strided_slice %43 {offsets = [2, 6, 0], sizes = [1, 1, 16], strides = [1, 1, 1]} : vector<7x7x16xf32> to vector<1x1x16xf32>
    %362 = vector.shape_cast %361 : vector<1x1x16xf32> to vector<16xf32>
    %363 = vector.shape_cast %362 : vector<16xf32> to vector<1x1x16xf32>
    %364 = vector.broadcast %363 : vector<1x1x16xf32> to vector<8x16x16xf32>
    %365 = arith.mulf %360, %364 : vector<8x16x16xf32>
    %366 = arith.addf %359, %365 : vector<8x16x16xf32>
    %367 = vector.extract_strided_slice %345 {offsets = [3, 0, 0], sizes = [8, 16, 16], strides = [1, 1, 1]} : vector<14x16x16xf32> to vector<8x16x16xf32>
    %368 = vector.extract_strided_slice %43 {offsets = [3, 6, 0], sizes = [1, 1, 16], strides = [1, 1, 1]} : vector<7x7x16xf32> to vector<1x1x16xf32>
    %369 = vector.shape_cast %368 : vector<1x1x16xf32> to vector<16xf32>
    %370 = vector.shape_cast %369 : vector<16xf32> to vector<1x1x16xf32>
    %371 = vector.broadcast %370 : vector<1x1x16xf32> to vector<8x16x16xf32>
    %372 = arith.mulf %367, %371 : vector<8x16x16xf32>
    %373 = arith.addf %366, %372 : vector<8x16x16xf32>
    %374 = vector.extract_strided_slice %345 {offsets = [4, 0, 0], sizes = [8, 16, 16], strides = [1, 1, 1]} : vector<14x16x16xf32> to vector<8x16x16xf32>
    %375 = vector.extract_strided_slice %43 {offsets = [4, 6, 0], sizes = [1, 1, 16], strides = [1, 1, 1]} : vector<7x7x16xf32> to vector<1x1x16xf32>
    %376 = vector.shape_cast %375 : vector<1x1x16xf32> to vector<16xf32>
    %377 = vector.shape_cast %376 : vector<16xf32> to vector<1x1x16xf32>
    %378 = vector.broadcast %377 : vector<1x1x16xf32> to vector<8x16x16xf32>
    %379 = arith.mulf %374, %378 : vector<8x16x16xf32>
    %380 = arith.addf %373, %379 : vector<8x16x16xf32>
    %381 = vector.extract_strided_slice %345 {offsets = [5, 0, 0], sizes = [8, 16, 16], strides = [1, 1, 1]} : vector<14x16x16xf32> to vector<8x16x16xf32>
    %382 = vector.extract_strided_slice %43 {offsets = [5, 6, 0], sizes = [1, 1, 16], strides = [1, 1, 1]} : vector<7x7x16xf32> to vector<1x1x16xf32>
    %383 = vector.shape_cast %382 : vector<1x1x16xf32> to vector<16xf32>
    %384 = vector.shape_cast %383 : vector<16xf32> to vector<1x1x16xf32>
    %385 = vector.broadcast %384 : vector<1x1x16xf32> to vector<8x16x16xf32>
    %386 = arith.mulf %381, %385 : vector<8x16x16xf32>
    %387 = arith.addf %380, %386 : vector<8x16x16xf32>
    %388 = vector.extract_strided_slice %345 {offsets = [6, 0, 0], sizes = [8, 16, 16], strides = [1, 1, 1]} : vector<14x16x16xf32> to vector<8x16x16xf32>
    %389 = vector.extract_strided_slice %43 {offsets = [6, 6, 0], sizes = [1, 1, 16], strides = [1, 1, 1]} : vector<7x7x16xf32> to vector<1x1x16xf32>
    %390 = vector.shape_cast %389 : vector<1x1x16xf32> to vector<16xf32>
    %391 = vector.shape_cast %390 : vector<16xf32> to vector<1x1x16xf32>
    %392 = vector.broadcast %391 : vector<1x1x16xf32> to vector<8x16x16xf32>
    %393 = arith.mulf %388, %392 : vector<8x16x16xf32>
    %394 = arith.addf %387, %393 : vector<8x16x16xf32>
    %c0_47 = arith.constant 0 : index
    %c0_48 = arith.constant 0 : index
    %395 = vector.load %arg6[%c0_47, %c0_48] : memref<1x16xf32, #tpu.memory_space<vmem>>, vector<1x16xf32>
    %396 = vector.shape_cast %395 : vector<1x16xf32> to vector<1x1x16xf32>
    %397 = vector.broadcast %396 : vector<1x1x16xf32> to vector<8x16x16xf32>
    %398 = arith.addf %394, %397 : vector<8x16x16xf32>
    %cst_49 = arith.constant 0.000000e+00 : f32
    %399 = vector.broadcast %cst_49 : f32 to vector<8x16x16xf32>
    %400 = arith.maximumf %398, %399 : vector<8x16x16xf32>
    %401 = vector.shape_cast %400 : vector<8x16x16xf32> to vector<128x16xf32>
    %402 = arith.truncf %401 : vector<128x16xf32> to vector<128x16xbf16>
    %c0_50 = arith.constant 0 : index
    %c0_51 = arith.constant 0 : index
    %403 = vector.load %arg7[%c0_50, %c0_51] : memref<16x4xbf16, #tpu.memory_space<vmem>>, vector<16x4xbf16>
    %cst_52 = arith.constant dense<0.000000e+00> : vector<128x4xf32>
    %404 = tpu.matmul %402, %403, %cst_52 {dimension_numbers = #tpu.dot_dimension_numbers<[1], [0], [0], [1], [0, 0, 1, 1], [], []>} : vector<128x16xbf16>, vector<16x4xbf16>, vector<128x4xf32> -> vector<128x4xf32>
    %c0_53 = arith.constant 0 : index
    %c0_54 = arith.constant 0 : index
    %405 = vector.load %arg8[%c0_53, %c0_54] : memref<1x4xf32, #tpu.memory_space<vmem>>, vector<1x4xf32>
    %406 = vector.broadcast %405 : vector<1x4xf32> to vector<128x4xf32>
    %407 = arith.addf %404, %406 : vector<128x4xf32>
    %408 = vector.shape_cast %407 : vector<128x4xf32> to vector<8x16x4xf32>
    %c0_55 = arith.constant 0 : index
    %c0_56 = arith.constant 0 : index
    %c0_57 = arith.constant 0 : index
    %c0_58 = arith.constant 0 : index
    %409 = vector.load %arg9[%c0_55, %c0_56, %c0_57, %c0_58] : memref<1x8x16x4xf32, #tpu.memory_space<vmem>>, vector<1x8x16x4xf32>
    %410 = vector.shape_cast %409 : vector<1x8x16x4xf32> to vector<8x16x4xf32>
    %411 = arith.addf %408, %410 : vector<8x16x4xf32>
    %412 = vector.extract_strided_slice %411 {offsets = [0, 0, 0], sizes = [8, 1, 4], strides = [1, 1, 1]} : vector<8x16x4xf32> to vector<8x1x4xf32>
    %413 = vector.shape_cast %412 : vector<8x1x4xf32> to vector<8x4xf32>
    %c0_59 = arith.constant 0 : index
    %c0_60 = arith.constant 0 : index
    %c0_61 = arith.constant 0 : index
    %414 = vector.load %arg10[%c0_59, %c0_60, %c0_61] : memref<1x8x64xf32, #tpu.memory_space<vmem>>, vector<1x8x4xf32>
    %415 = vector.shape_cast %414 : vector<1x8x4xf32> to vector<8x4xf32>
    %416 = vector.shape_cast %413 : vector<8x4xf32> to vector<1x8x4xf32>
    tpu.vector_store %arg10[%c0_59, %c0_60, %c0_61], %416 {strides = array<i32>} : memref<1x8x64xf32, #tpu.memory_space<vmem>>, vector<1x8x4xf32>,
    %417 = vector.extract_strided_slice %411 {offsets = [0, 1, 0], sizes = [8, 1, 4], strides = [1, 1, 1]} : vector<8x16x4xf32> to vector<8x1x4xf32>
    %418 = vector.shape_cast %417 : vector<8x1x4xf32> to vector<8x4xf32>
    %c0_62 = arith.constant 0 : index
    %c0_63 = arith.constant 0 : index
    %c4_64 = arith.constant 4 : index
    %419 = vector.load %arg10[%c0_62, %c0_63, %c4_64] : memref<1x8x64xf32, #tpu.memory_space<vmem>>, vector<1x8x4xf32>
    %420 = vector.shape_cast %419 : vector<1x8x4xf32> to vector<8x4xf32>
    %421 = vector.shape_cast %418 : vector<8x4xf32> to vector<1x8x4xf32>
    tpu.vector_store %arg10[%c0_62, %c0_63, %c4_64], %421 {strides = array<i32>} : memref<1x8x64xf32, #tpu.memory_space<vmem>>, vector<1x8x4xf32>,
    %422 = vector.extract_strided_slice %411 {offsets = [0, 2, 0], sizes = [8, 1, 4], strides = [1, 1, 1]} : vector<8x16x4xf32> to vector<8x1x4xf32>
    %423 = vector.shape_cast %422 : vector<8x1x4xf32> to vector<8x4xf32>
    %c0_65 = arith.constant 0 : index
    %c0_66 = arith.constant 0 : index
    %c8 = arith.constant 8 : index
    %424 = vector.load %arg10[%c0_65, %c0_66, %c8] : memref<1x8x64xf32, #tpu.memory_space<vmem>>, vector<1x8x4xf32>
    %425 = vector.shape_cast %424 : vector<1x8x4xf32> to vector<8x4xf32>
    %426 = vector.shape_cast %423 : vector<8x4xf32> to vector<1x8x4xf32>
    tpu.vector_store %arg10[%c0_65, %c0_66, %c8], %426 {strides = array<i32>} : memref<1x8x64xf32, #tpu.memory_space<vmem>>, vector<1x8x4xf32>,
    %427 = vector.extract_strided_slice %411 {offsets = [0, 3, 0], sizes = [8, 1, 4], strides = [1, 1, 1]} : vector<8x16x4xf32> to vector<8x1x4xf32>
    %428 = vector.shape_cast %427 : vector<8x1x4xf32> to vector<8x4xf32>
    %c0_67 = arith.constant 0 : index
    %c0_68 = arith.constant 0 : index
    %c12 = arith.constant 12 : index
    %429 = vector.load %arg10[%c0_67, %c0_68, %c12] : memref<1x8x64xf32, #tpu.memory_space<vmem>>, vector<1x8x4xf32>
    %430 = vector.shape_cast %429 : vector<1x8x4xf32> to vector<8x4xf32>
    %431 = vector.shape_cast %428 : vector<8x4xf32> to vector<1x8x4xf32>
    tpu.vector_store %arg10[%c0_67, %c0_68, %c12], %431 {strides = array<i32>} : memref<1x8x64xf32, #tpu.memory_space<vmem>>, vector<1x8x4xf32>,
    %432 = vector.extract_strided_slice %411 {offsets = [0, 4, 0], sizes = [8, 1, 4], strides = [1, 1, 1]} : vector<8x16x4xf32> to vector<8x1x4xf32>
    %433 = vector.shape_cast %432 : vector<8x1x4xf32> to vector<8x4xf32>
    %c0_69 = arith.constant 0 : index
    %c0_70 = arith.constant 0 : index
    %c16 = arith.constant 16 : index
    %434 = vector.load %arg10[%c0_69, %c0_70, %c16] : memref<1x8x64xf32, #tpu.memory_space<vmem>>, vector<1x8x4xf32>
    %435 = vector.shape_cast %434 : vector<1x8x4xf32> to vector<8x4xf32>
    %436 = vector.shape_cast %433 : vector<8x4xf32> to vector<1x8x4xf32>
    tpu.vector_store %arg10[%c0_69, %c0_70, %c16], %436 {strides = array<i32>} : memref<1x8x64xf32, #tpu.memory_space<vmem>>, vector<1x8x4xf32>,
    %437 = vector.extract_strided_slice %411 {offsets = [0, 5, 0], sizes = [8, 1, 4], strides = [1, 1, 1]} : vector<8x16x4xf32> to vector<8x1x4xf32>
    %438 = vector.shape_cast %437 : vector<8x1x4xf32> to vector<8x4xf32>
    %c0_71 = arith.constant 0 : index
    %c0_72 = arith.constant 0 : index
    %c20 = arith.constant 20 : index
    %439 = vector.load %arg10[%c0_71, %c0_72, %c20] : memref<1x8x64xf32, #tpu.memory_space<vmem>>, vector<1x8x4xf32>
    %440 = vector.shape_cast %439 : vector<1x8x4xf32> to vector<8x4xf32>
    %441 = vector.shape_cast %438 : vector<8x4xf32> to vector<1x8x4xf32>
    tpu.vector_store %arg10[%c0_71, %c0_72, %c20], %441 {strides = array<i32>} : memref<1x8x64xf32, #tpu.memory_space<vmem>>, vector<1x8x4xf32>,
    %442 = vector.extract_strided_slice %411 {offsets = [0, 6, 0], sizes = [8, 1, 4], strides = [1, 1, 1]} : vector<8x16x4xf32> to vector<8x1x4xf32>
    %443 = vector.shape_cast %442 : vector<8x1x4xf32> to vector<8x4xf32>
    %c0_73 = arith.constant 0 : index
    %c0_74 = arith.constant 0 : index
    %c24 = arith.constant 24 : index
    %444 = vector.load %arg10[%c0_73, %c0_74, %c24] : memref<1x8x64xf32, #tpu.memory_space<vmem>>, vector<1x8x4xf32>
    %445 = vector.shape_cast %444 : vector<1x8x4xf32> to vector<8x4xf32>
    %446 = vector.shape_cast %443 : vector<8x4xf32> to vector<1x8x4xf32>
    tpu.vector_store %arg10[%c0_73, %c0_74, %c24], %446 {strides = array<i32>} : memref<1x8x64xf32, #tpu.memory_space<vmem>>, vector<1x8x4xf32>,
    %447 = vector.extract_strided_slice %411 {offsets = [0, 7, 0], sizes = [8, 1, 4], strides = [1, 1, 1]} : vector<8x16x4xf32> to vector<8x1x4xf32>
    %448 = vector.shape_cast %447 : vector<8x1x4xf32> to vector<8x4xf32>
    %c0_75 = arith.constant 0 : index
    %c0_76 = arith.constant 0 : index
    %c28 = arith.constant 28 : index
    %449 = vector.load %arg10[%c0_75, %c0_76, %c28] : memref<1x8x64xf32, #tpu.memory_space<vmem>>, vector<1x8x4xf32>
    %450 = vector.shape_cast %449 : vector<1x8x4xf32> to vector<8x4xf32>
    %451 = vector.shape_cast %448 : vector<8x4xf32> to vector<1x8x4xf32>
    tpu.vector_store %arg10[%c0_75, %c0_76, %c28], %451 {strides = array<i32>} : memref<1x8x64xf32, #tpu.memory_space<vmem>>, vector<1x8x4xf32>,
    %452 = vector.extract_strided_slice %411 {offsets = [0, 8, 0], sizes = [8, 1, 4], strides = [1, 1, 1]} : vector<8x16x4xf32> to vector<8x1x4xf32>
    %453 = vector.shape_cast %452 : vector<8x1x4xf32> to vector<8x4xf32>
    %c0_77 = arith.constant 0 : index
    %c0_78 = arith.constant 0 : index
    %c32 = arith.constant 32 : index
    %454 = vector.load %arg10[%c0_77, %c0_78, %c32] : memref<1x8x64xf32, #tpu.memory_space<vmem>>, vector<1x8x4xf32>
    %455 = vector.shape_cast %454 : vector<1x8x4xf32> to vector<8x4xf32>
    %456 = vector.shape_cast %453 : vector<8x4xf32> to vector<1x8x4xf32>
    tpu.vector_store %arg10[%c0_77, %c0_78, %c32], %456 {strides = array<i32>} : memref<1x8x64xf32, #tpu.memory_space<vmem>>, vector<1x8x4xf32>,
    %457 = vector.extract_strided_slice %411 {offsets = [0, 9, 0], sizes = [8, 1, 4], strides = [1, 1, 1]} : vector<8x16x4xf32> to vector<8x1x4xf32>
    %458 = vector.shape_cast %457 : vector<8x1x4xf32> to vector<8x4xf32>
    %c0_79 = arith.constant 0 : index
    %c0_80 = arith.constant 0 : index
    %c36 = arith.constant 36 : index
    %459 = vector.load %arg10[%c0_79, %c0_80, %c36] : memref<1x8x64xf32, #tpu.memory_space<vmem>>, vector<1x8x4xf32>
    %460 = vector.shape_cast %459 : vector<1x8x4xf32> to vector<8x4xf32>
    %461 = vector.shape_cast %458 : vector<8x4xf32> to vector<1x8x4xf32>
    tpu.vector_store %arg10[%c0_79, %c0_80, %c36], %461 {strides = array<i32>} : memref<1x8x64xf32, #tpu.memory_space<vmem>>, vector<1x8x4xf32>,
    %462 = vector.extract_strided_slice %411 {offsets = [0, 10, 0], sizes = [8, 1, 4], strides = [1, 1, 1]} : vector<8x16x4xf32> to vector<8x1x4xf32>
    %463 = vector.shape_cast %462 : vector<8x1x4xf32> to vector<8x4xf32>
    %c0_81 = arith.constant 0 : index
    %c0_82 = arith.constant 0 : index
    %c40 = arith.constant 40 : index
    %464 = vector.load %arg10[%c0_81, %c0_82, %c40] : memref<1x8x64xf32, #tpu.memory_space<vmem>>, vector<1x8x4xf32>
    %465 = vector.shape_cast %464 : vector<1x8x4xf32> to vector<8x4xf32>
    %466 = vector.shape_cast %463 : vector<8x4xf32> to vector<1x8x4xf32>
    tpu.vector_store %arg10[%c0_81, %c0_82, %c40], %466 {strides = array<i32>} : memref<1x8x64xf32, #tpu.memory_space<vmem>>, vector<1x8x4xf32>,
    %467 = vector.extract_strided_slice %411 {offsets = [0, 11, 0], sizes = [8, 1, 4], strides = [1, 1, 1]} : vector<8x16x4xf32> to vector<8x1x4xf32>
    %468 = vector.shape_cast %467 : vector<8x1x4xf32> to vector<8x4xf32>
    %c0_83 = arith.constant 0 : index
    %c0_84 = arith.constant 0 : index
    %c44 = arith.constant 44 : index
    %469 = vector.load %arg10[%c0_83, %c0_84, %c44] : memref<1x8x64xf32, #tpu.memory_space<vmem>>, vector<1x8x4xf32>
    %470 = vector.shape_cast %469 : vector<1x8x4xf32> to vector<8x4xf32>
    %471 = vector.shape_cast %468 : vector<8x4xf32> to vector<1x8x4xf32>
    tpu.vector_store %arg10[%c0_83, %c0_84, %c44], %471 {strides = array<i32>} : memref<1x8x64xf32, #tpu.memory_space<vmem>>, vector<1x8x4xf32>,
    %472 = vector.extract_strided_slice %411 {offsets = [0, 12, 0], sizes = [8, 1, 4], strides = [1, 1, 1]} : vector<8x16x4xf32> to vector<8x1x4xf32>
    %473 = vector.shape_cast %472 : vector<8x1x4xf32> to vector<8x4xf32>
    %c0_85 = arith.constant 0 : index
    %c0_86 = arith.constant 0 : index
    %c48 = arith.constant 48 : index
    %474 = vector.load %arg10[%c0_85, %c0_86, %c48] : memref<1x8x64xf32, #tpu.memory_space<vmem>>, vector<1x8x4xf32>
    %475 = vector.shape_cast %474 : vector<1x8x4xf32> to vector<8x4xf32>
    %476 = vector.shape_cast %473 : vector<8x4xf32> to vector<1x8x4xf32>
    tpu.vector_store %arg10[%c0_85, %c0_86, %c48], %476 {strides = array<i32>} : memref<1x8x64xf32, #tpu.memory_space<vmem>>, vector<1x8x4xf32>,
    %477 = vector.extract_strided_slice %411 {offsets = [0, 13, 0], sizes = [8, 1, 4], strides = [1, 1, 1]} : vector<8x16x4xf32> to vector<8x1x4xf32>
    %478 = vector.shape_cast %477 : vector<8x1x4xf32> to vector<8x4xf32>
    %c0_87 = arith.constant 0 : index
    %c0_88 = arith.constant 0 : index
    %c52 = arith.constant 52 : index
    %479 = vector.load %arg10[%c0_87, %c0_88, %c52] : memref<1x8x64xf32, #tpu.memory_space<vmem>>, vector<1x8x4xf32>
    %480 = vector.shape_cast %479 : vector<1x8x4xf32> to vector<8x4xf32>
    %481 = vector.shape_cast %478 : vector<8x4xf32> to vector<1x8x4xf32>
    tpu.vector_store %arg10[%c0_87, %c0_88, %c52], %481 {strides = array<i32>} : memref<1x8x64xf32, #tpu.memory_space<vmem>>, vector<1x8x4xf32>,
    %482 = vector.extract_strided_slice %411 {offsets = [0, 14, 0], sizes = [8, 1, 4], strides = [1, 1, 1]} : vector<8x16x4xf32> to vector<8x1x4xf32>
    %483 = vector.shape_cast %482 : vector<8x1x4xf32> to vector<8x4xf32>
    %c0_89 = arith.constant 0 : index
    %c0_90 = arith.constant 0 : index
    %c56 = arith.constant 56 : index
    %484 = vector.load %arg10[%c0_89, %c0_90, %c56] : memref<1x8x64xf32, #tpu.memory_space<vmem>>, vector<1x8x4xf32>
    %485 = vector.shape_cast %484 : vector<1x8x4xf32> to vector<8x4xf32>
    %486 = vector.shape_cast %483 : vector<8x4xf32> to vector<1x8x4xf32>
    tpu.vector_store %arg10[%c0_89, %c0_90, %c56], %486 {strides = array<i32>} : memref<1x8x64xf32, #tpu.memory_space<vmem>>, vector<1x8x4xf32>,
    %487 = vector.extract_strided_slice %411 {offsets = [0, 15, 0], sizes = [8, 1, 4], strides = [1, 1, 1]} : vector<8x16x4xf32> to vector<8x1x4xf32>
    %488 = vector.shape_cast %487 : vector<8x1x4xf32> to vector<8x4xf32>
    %c0_91 = arith.constant 0 : index
    %c0_92 = arith.constant 0 : index
    %c60 = arith.constant 60 : index
    %489 = vector.load %arg10[%c0_91, %c0_92, %c60] : memref<1x8x64xf32, #tpu.memory_space<vmem>>, vector<1x8x4xf32>
    %490 = vector.shape_cast %489 : vector<1x8x4xf32> to vector<8x4xf32>
    %491 = vector.shape_cast %488 : vector<8x4xf32> to vector<1x8x4xf32>
    tpu.vector_store %arg10[%c0_91, %c0_92, %c60], %491 {strides = array<i32>} : memref<1x8x64xf32, #tpu.memory_space<vmem>>, vector<1x8x4xf32>,
    return
  }
  func.func @transform_0(%arg0: i32, %arg1: i32) -> (i32, i32, i32, i32) {
    %c0_i32 = arith.constant 0 : i32
    %c0_i32_0 = arith.constant 0 : i32
    %c0_i32_1 = arith.constant 0 : i32
    %c0_i32_2 = arith.constant 0 : i32
    return %arg0, %c0_i32, %c0_i32_0, %c0_i32_1 : i32, i32, i32, i32
  }
  func.func @transform_1(%arg0: i32, %arg1: i32) -> (i32, i32) {
    %c0_i32 = arith.constant 0 : i32
    %c0_i32_0 = arith.constant 0 : i32
    %c0_i32_1 = arith.constant 0 : i32
    return %c0_i32, %c0_i32_0 : i32, i32
  }
  func.func @transform_2(%arg0: i32, %arg1: i32) -> (i32, i32) {
    %c0_i32 = arith.constant 0 : i32
    %c0_i32_0 = arith.constant 0 : i32
    %c0_i32_1 = arith.constant 0 : i32
    return %c0_i32, %c0_i32_0 : i32, i32
  }
  func.func @transform_3(%arg0: i32, %arg1: i32) -> (i32, i32, i32) {
    %c0_i32 = arith.constant 0 : i32
    %c0_i32_0 = arith.constant 0 : i32
    %c0_i32_1 = arith.constant 0 : i32
    %c0_i32_2 = arith.constant 0 : i32
    return %c0_i32, %c0_i32_0, %c0_i32_1 : i32, i32, i32
  }
  func.func @transform_4(%arg0: i32, %arg1: i32) -> (i32, i32) {
    %c0_i32 = arith.constant 0 : i32
    %c0_i32_0 = arith.constant 0 : i32
    %c0_i32_1 = arith.constant 0 : i32
    return %c0_i32, %c0_i32_0 : i32, i32
  }
  func.func @transform_5(%arg0: i32, %arg1: i32) -> (i32, i32) {
    %c0_i32 = arith.constant 0 : i32
    %c0_i32_0 = arith.constant 0 : i32
    %c0_i32_1 = arith.constant 0 : i32
    return %c0_i32, %c0_i32_0 : i32, i32
  }
  func.func @transform_6(%arg0: i32, %arg1: i32) -> (i32, i32) {
    %c0_i32 = arith.constant 0 : i32
    %c0_i32_0 = arith.constant 0 : i32
    %c0_i32_1 = arith.constant 0 : i32
    return %c0_i32, %c0_i32_0 : i32, i32
  }
  func.func @transform_7(%arg0: i32, %arg1: i32) -> (i32, i32, i32, i32) {
    %c0_i32 = arith.constant 0 : i32
    %c0_i32_0 = arith.constant 0 : i32
    %c0_i32_1 = arith.constant 0 : i32
    return %arg0, %arg1, %c0_i32, %c0_i32_0 : i32, i32, i32, i32
  }
  func.func @transform_8(%arg0: i32, %arg1: i32) -> (i32, i32, i32) {
    %c0_i32 = arith.constant 0 : i32
    %c0_i32_0 = arith.constant 0 : i32
    return %arg0, %arg1, %c0_i32 : i32, i32, i32
  }
}

</mosaic_0001>

<bundles_post_ra>
// kernel: tpu_custom_call.1
= control target key start
LH: loop header
LB: loop body
LE: loop exit
PB: predicated region body
PF: predicated region fallthrough
CT: control target
= control target key end

     0   :  { %s7562_s0 = inlined_call_operand.vmem [shape: bf16[2,22,32,4], index: 0, kind: input, shape index: {}]   ;;  %s7563_s1 = inlined_call_operand.vmem [shape: bf16[4,16], index: 1, kind: input, shape index: {}]   ;;  %s7564_s2 = inlined_call_operand.vmem [shape: f32[1,16], index: 2, kind: input, shape index: {}]   ;;  %s7565_s3 = inlined_call_operand.vmem [shape: f32[7,7,16], index: 3, kind: input, shape index: {}]   ;;  %s7566_s4 = inlined_call_operand.vmem [shape: f32[1,16], index: 4, kind: input, shape index: {}]   ;;  %s7567_s5 = inlined_call_operand.vmem [shape: bf16[16,4], index: 5, kind: input, shape index: {}]   ;;  %s7568_s6 = inlined_call_operand.vmem [shape: f32[1,4], index: 6, kind: input, shape index: {}]   ;;  %s7569_s7 = inlined_call_operand.vmem [shape: f32[2,16,16,4], index: 7, kind: input, shape index: {}]   ;;  %s7570_s8 = inlined_call_operand.hbm [shape: f32[2,16,64], index: 8, kind: output, shape index: {}]  }
   0x1   :  { %8179 = sst [smem:[#allocation147_spill]] %s7563_s1 }
   0x2   :  { %13 = vsyncpa [#allocation4], 0 }
   0x3   :  { %15 = vsyncpa [#allocation4 + $0x1], 0  ;;  %s4335_s27 = smov 0   ;;  %s4337_s28 = smov 0  }
   0x4   :  { %s4339_s29 = smov 0   ;;  %s4341_s30 = smov 0  }
   0x5   :  { %s4343_s9 = smov 0   ;;  %s4345_s10 = smov 0  }
   0x6   :  { %s4347_s11 = smov 0   ;;  %s4349_s12 = smov 0  }
   0x7 LB: > { %8180 = sst [smem:[#allocation6_spill]] %s4257_s10  ;;  %s3702_s13 = sadd.s32 4294967295, %s4265_s12   ;;  %s4265_s12 = sphi %s4349_s12, %s21_s12   ;;  %s4261_s11 = sphi %s4347_s11, %s9026_s11   ;;  %s4257_s10 = sphi %s4345_s10, %s9025_s10   ;;  %s4253_s9 = sphi %s4343_s9, %s9024_s9   ;;  %s4249_s30 = sphi %s4341_s30, %s9023_s30   ;;  %s4245_s29 = sphi %s4339_s29, %s9029_s29   ;;  %s4241_s28 = sphi %s4337_s28, %s9028_s28   ;;  %s4237_s27 = sphi %s4335_s27, %s9027_s27  }
   0x8   : > { %8181 = sst [smem:[#allocation7_spill]] %s4261_s11  ;;  %s3703_s14 = sadd.s32 4294967294, %s4265_s12  }
   0x9   : > { %s30_s15 = sadd.s32 1, %s4257_s10  ;;  %s33_s16 = sadd.s32 1, %s4261_s11 }
   0xa   : > { %p31_p0 = scmp.ge.s32.totalorder %s30_s15, 2  ;;  %p232_p1 = scmp.ne.s32.totalorder %s4245_s29, %s4241_s28 }
   0xb   : > { %p233_p2 = scmp.eq.s32.totalorder %s3702_s13, 3  ;;  %p238_p5 = scmp.ne.s32.totalorder %s4241_s28, %s4237_s27 }
   0xc   : > { %s9031_s15 = smov (%p31_p0, %s30_s15), 0  ;;  %s9033_s16 = smov (!%p31_p0, %s33_s16), %s4261_s11 }
   0xd   : > { %8182 = sst [smem:[#allocation8_spill]] %s9031_s15  ;;  %s218_s17 = ssub.s32 %s4257_s10, %s9031_s15 }
   0xe   : > { %p4386_p3 = por %p233_p2, %p232_p1  ;;  %p35_p4 = scmp.ge.s32.totalorder %s9033_s16, 2 }
   0xf   : > { %p239_p6 = scmp.eq.s32.totalorder %s3703_s14, 3  ;;  %p3706_p7 = scmp.ge.s32.totalorder %s4265_s12, 1 }
  0x10   : > { %s9035_s16 = smov (%p35_p4, %s9033_s16), 0  ;;  %p297_p9 = scmp.lt.s32.totalorder %s4265_s12, 5 }
  0x11   : > { %8184 = sst [smem:[#allocation9_spill]] %s9035_s16  ;;  %p4395_p8 = por %p239_p6, %p238_p5 }
  0x12   : > { %s217_s20 = ssub.s32 %s4261_s11, %s9035_s16  ;;  %s222_s21 = sadd.s32 1, %s4245_s29 }
  0x13   : > { %s219_s22 = sor.u32 %s218_s17, %s217_s20  ;;  %p298_p10 = pnand %p3706_p7, %p297_p9 }
  0x14   : > { %p220_p11 = scmp.eq.s32.totalorder %s219_s22, 0 }
  0x15   : > { %301 = sbr.rel (%p298_p10) target bundleno = 1215 (0x4bf), region = 52 }
  0x16   : > { %s4404_s23 = scalar_select %p220_p11, %s4245_s29, %s222_s21  }
  0x18   : > { %8186 = sst [smem:[#allocation10_spill]] %s4404_s23 }
  0x1a   : > { %s7572_s24 = sand.u32 1, %s4241_s28   ;;  %s8187_s1 = sld [smem:[#allocation147_spill]]  ;;  %vm651_vm0 = vcmask 1041408   ;;  %vm566_vm1 = vcmask 31744   ;;  %v4491_v30 = vld [vmem:[%s7564_s2] ss:$0 sm:$0xff] }
  0x1b   : > { %p341_p12 = scmp.lt.s32.totalorder %s4253_s9, 1  ;;  %s4413_s13 = sshll.u32 %s7572_s24, 3  ;;  %vm968_vm2 = vcmask 130048   ;;  %vm1025_vm3 = vcmask 124928   ;;  %v4267_v40 = vmov 0.0  }
  0x1c   : > { %s4416_s14 = sshll.u32 %s4249_s30, 3  ;;  %s3796_s26 = sshll.u32 %s4249_s30, 7 }
  0x1d   : > { %p349_p13 = scmp.lt.s32.totalorder %s4416_s14, 15  ;;  %p3773_p0 = scmp.ge.s32.totalorder %s4416_s14, 3 }
  0x1e   : > { %s342_s17 = scalar_select %p341_p12, %s4253_s9, 1 }
  0x1f   : > { %s350_s20 = scalar_select %p349_p13, %s4416_s14, 15 }
  0x20   : > { %v418_v0 = vld [vmem:[%s8187_s1] sm:$0x3]  ;;  %s3915_s21 = smul.u32 352, %s342_s17  ;;  %s3711_s22 = sshll.u32 %s342_s17, 5 }
  0x21   : > { %3913 = vmatprep.subr.msk.bf16.mxu0 %vm651_vm0, %v418_v0  ;;  %v653_v1 = vsel %vm651_vm0, %v418_v0, 0  ;;  %3914 = vmatprep.subr.msk.bf16.mxu1 %vm651_vm0, %v418_v0  ;;  %s3710_s25 = sshll.u32 %s350_s20, 1 }
  0x22   : > { %3836 = vmatpush3.bf16.msra.mxu0 %v653_v1  ;;  %3912 = vmatpush3.bf16.msra.mxu1 %v653_v1  ;;  %s345_s24 = scalar_lea.vmem %s7562_s0, %s3915_s21  ;;  %s353_s15 = sadd.s32 %s3711_s22, %s3710_s25 }
  0x23   : > { %s3712_s11 = sshll.u32 %s353_s15, 3  ;;  %s4425_s10 = scalar_lea.vmem %s345_s24, %s3796_s26 }
  0x24   : > { %s4430_s20 = scalar_lea.vmem %s7569_s7, %s3712_s11  ;;  %v4009_v2 = vld [vmem:[%s4425_s10] sm:$0xff]   ;;  %v4010_v3 = vld [vmem:[%s4425_s10 + $0x8] sm:$0xff]   ;;  %v4011_v4 = vld [vmem:[%s4425_s10 + $0x10] sm:$0xff]  }
  0x25   : > { %3837 = vmatprep.mubr.msk.bf16.mxu0 %vm566_vm1, %v4009_v2  ;;  %v4012_v5 = vld [vmem:[%s4425_s10 + $0x18] sm:$0xff]   ;;  %v4013_v6 = vld [vmem:[%s4425_s10 + $0x20] sm:$0xff]   ;;  %v4017_v7 = vld [vmem:[%s4425_s10 + $0x90] sm:$0xff]  }
  0x26   : > { %3838 = vmatmul.mubr.msk.bf16.vlgmr.msra.gmra.mxu0 %vm566_vm1, %v4010_v3  ;;  %v4018_v8 = vld [vmem:[%s4425_s10 + $0x98] sm:$0xff]   ;;  %3873 = vmatprep.mubr.msk.bf16.mxu1 %vm566_vm1, %v4017_v7  ;;  %v4021_v9 = vld [vmem:[%s4425_s10 + $0xa0] sm:$0xff]   ;;  %v4014_v10 = vld [vmem:[%s4425_s10 + $0x28] sm:$0xff]  }
  0x27   : > { %3841 = vmatprep.mubr.msk.bf16.mxu0 %vm566_vm1, %v4011_v4  ;;  %3874 = vmatmul.mubr.msk.bf16.vlgmr.msra.gmra.mxu1 %vm566_vm1, %v4018_v8  ;;  %v4015_v11 = vld [vmem:[%s4425_s10 + $0x30] sm:$0xff]   ;;  %v4022_v12 = vld [vmem:[%s4425_s10 + $0xa8] sm:$0xff]   ;;  %v4016_v14 = vld [vmem:[%s4425_s10 + $0x38] sm:$0xff]  }
  0x28   : > { %3877 = vmatprep.mubr.msk.bf16.mxu1 %vm566_vm1, %v4021_v9  ;;  %v4025_v13 = vld [vmem:[%s4425_s10 + $0xb0] sm:$0xff]   ;;  %v4019_v15 = vld [vmem:[%s4425_s10 + $0x40] sm:$0xff]   ;;  %v4026_v16 = vld [vmem:[%s4425_s10 + $0xb8] sm:$0xff]  }
  0x29   : > { %v4029_v17 = vld [vmem:[%s4425_s10 + $0xc0] sm:$0xff]   ;;  %v4020_v18 = vld [vmem:[%s4425_s10 + $0x48] sm:$0xff]   ;;  %v4023_v20 = vld [vmem:[%s4425_s10 + $0x50] sm:$0xff]  }
  0x2a   : > { %v4030_v19 = vld [vmem:[%s4425_s10 + $0xc8] sm:$0xff]   ;;  %v4033_v21 = vld [vmem:[%s4425_s10 + $0xd0] sm:$0xff]   ;;  %v4024_v22 = vld [vmem:[%s4425_s10 + $0x58] sm:$0xff]  }
  0x2b   : > { %v4034_v23 = vld [vmem:[%s4425_s10 + $0xd8] sm:$0xff]   ;;  %v4027_v24 = vld [vmem:[%s4425_s10 + $0x60] sm:$0xff]   ;;  %v4028_v25 = vld [vmem:[%s4425_s10 + $0x68] sm:$0xff]  }
  0x2c   : > { %v4031_v26 = vld [vmem:[%s4425_s10 + $0x70] sm:$0xff]   ;;  %v4032_v27 = vld [vmem:[%s4425_s10 + $0x78] sm:$0xff]   ;;  %v4035_v28 = vld [vmem:[%s4425_s10 + $0x80] sm:$0xff]  }
  0x2d   : > { %v4036_v29 = vld [vmem:[%s4425_s10 + $0x88] sm:$0xff]   ;;  %s4634_s10 = scalar_lea.vmem [#allocation3], %s4413_s13 }
  0x2e   : > { %3842 = vmatmul.mubr.msk.bf16.gmra.mxu0 %vm566_vm1, %v4012_v5 }
  0x2f   : > { %3845 = vmatprep.mubr.msk.bf16.mxu0 %vm566_vm1, %v4013_v6  ;;  %3878 = vmatmul.mubr.msk.bf16.gmra.mxu1 %vm566_vm1, %v4022_v12 }
  0x30   : > { %3881 = vmatprep.mubr.msk.bf16.mxu1 %vm566_vm1, %v4025_v13 }
  0x36   : > { %3846 = vmatmul.mubr.msk.bf16.gmra.mxu0 %vm566_vm1, %v4014_v10 }
  0x37   : > { %3849 = vmatprep.mubr.msk.bf16.mxu0 %vm566_vm1, %v4015_v11  ;;  %3882 = vmatmul.mubr.msk.bf16.gmra.mxu1 %vm566_vm1, %v4026_v16 }
  0x38   : > { %3885 = vmatprep.mubr.msk.bf16.mxu1 %vm566_vm1, %v4029_v17 }
  0x3e   : > { %3850 = vmatmul.mubr.msk.bf16.gmra.mxu0 %vm566_vm1, %v4016_v14 }
  0x3f   : > { %3853 = vmatprep.mubr.msk.bf16.mxu0 %vm566_vm1, %v4019_v15  ;;  %3886 = vmatmul.mubr.msk.bf16.gmra.mxu1 %vm566_vm1, %v4030_v19 }
  0x40   : > { %3889 = vmatprep.mubr.msk.bf16.mxu1 %vm566_vm1, %v4033_v21 }
  0x46   : > { %3854 = vmatmul.mubr.msk.bf16.gmra.mxu0 %vm566_vm1, %v4020_v18 }
  0x47   : > { %3857 = vmatprep.mubr.msk.bf16.mxu0 %vm566_vm1, %v4023_v20  ;;  %3890 = vmatmul.mubr.msk.bf16.gmra.mxu1 %vm566_vm1, %v4034_v23 }
  0x4e   : > { %3858 = vmatmul.mubr.msk.bf16.gmra.mxu0 %vm566_vm1, %v4024_v22 }
  0x4f   : > { %3861 = vmatprep.mubr.msk.bf16.mxu0 %vm566_vm1, %v4027_v24 }
  0x56   : > { %3862 = vmatmul.mubr.msk.bf16.gmra.mxu0 %vm566_vm1, %v4028_v25 }
  0x57   : > { %3865 = vmatprep.mubr.msk.bf16.mxu0 %vm566_vm1, %v4031_v26 }
  0x5e   : > { %3866 = vmatmul.mubr.msk.bf16.gmra.mxu0 %vm566_vm1, %v4032_v27 }
  0x5f   : > { %3869 = vmatprep.mubr.msk.bf16.mxu0 %vm566_vm1, %v4035_v28 }
  0x66   : > { %3870 = vmatmul.mubr.msk.bf16.gmra.mxu0 %vm566_vm1, %v4036_v29 }
  0xe6   : > { %v3839_v31 = vpop.f32.mrf.mxu0 }
  0xe7   : > { %v698_v32 = vadd.f32 %v3839_v31, %v4491_v30  ;;  %v3875_v42 = vpop.f32.mrf.mxu1 }
  0xe8   : > { %v689_v33 = vpop.f32.mrf.mxu0  ;;  %v842_v45 = vadd.f32 %v3875_v42, %v4491_v30 }
  0xe9   : > { %v914_v34 = vmax.f32 %v698_v32, 0.0  ;;  %v690_v35 = vadd.f32 %v4491_v30, %v689_v33  ;;  %v833_v47 = vpop.f32.mrf.mxu1 }
  0xea   : > { %v3840_v36 = vpop.f32.mrf.mxu0  ;;  %v950_v50 = vmax.f32 %v842_v45, 0.0  ;;  %v834_v51 = vadd.f32 %v4491_v30, %v833_v47 }
  0xeb   : > { %971 = vst.msk [vmem:[#allocation2 + $0x10] sm:$0xff] %vm968_vm2, %v914_v34  ;;  %v912_v37 = vmax.f32 %v690_v35, 0.0  ;;  %v3876_v53 = vpop.f32.mrf.mxu1 }
  0xec   : > { %v692_v38 = vpop.f32.mrf.mxu0  ;;  %1040 = vst.msk [vmem:[#allocation2 + $0x13] sm:$0xff] %vm968_vm2, %v4267_v40  ;;  %1007 = vst.msk [vmem:[#allocation2 + $0x130] sm:$0xff] %vm968_vm2, %v950_v50  ;;  %v948_v55 = vmax.f32 %v834_v51, 0.0 }
  0xed   : > { %969 = vst.msk [vmem:[#allocation2] sm:$0xff] %vm968_vm2, %v912_v37  ;;  %v693_v39 = vadd.f32 %v4491_v30, %v692_v38  ;;  %v836_v57 = vpop.f32.mrf.mxu1  ;;  %1059 = vst.msk [vmem:[#allocation2 + $0x133] sm:$0xff] %vm968_vm2, %v4267_v40 }
  0xee   : > { %1026 = vst.msk [vmem:[#allocation2] sm:$0x7] %vm1025_vm3, %v4267_v40  ;;  %v3843_v41 = vpop.f32.mrf.mxu0  ;;  %v837_v59 = vadd.f32 %v4491_v30, %v836_v57 }
  0xef   : > { %v913_v43 = vmax.f32 %v693_v39, 0.0  ;;  %v714_v44 = vadd.f32 %v3843_v41, %v4491_v30  ;;  %1005 = vst.msk [vmem:[#allocation2 + $0x120] sm:$0xff] %vm968_vm2, %v948_v55  ;;  %v3879_v61 = vpop.f32.mrf.mxu1 }
  0xf0   : > { %v705_v46 = vpop.f32.mrf.mxu0  ;;  %1035 = vst.msk [vmem:[#allocation2 + $0x120] sm:$0x7] %vm1025_vm3, %v4267_v40  ;;  %v949_v0 = vmax.f32 %v837_v59, 0.0  ;;  %v858_v1 = vadd.f32 %v3879_v61, %v4491_v30 }
  0xf1   : > { %970 = vst.msk [vmem:[#allocation2 + $0x8] sm:$0xff] %vm968_vm2, %v913_v43  ;;  %v918_v48 = vmax.f32 %v714_v44, 0.0  ;;  %v706_v49 = vadd.f32 %v4491_v30, %v705_v46  ;;  %v849_v3 = vpop.f32.mrf.mxu1 }
  0xf2   : > { %v3844_v52 = vpop.f32.mrf.mxu0  ;;  %1006 = vst.msk [vmem:[#allocation2 + $0x128] sm:$0xff] %vm968_vm2, %v949_v0  ;;  %v954_v6 = vmax.f32 %v858_v1, 0.0  ;;  %v850_v7 = vadd.f32 %v4491_v30, %v849_v3 }
  0xf3   : > { %975 = vst.msk [vmem:[#allocation2 + $0x30] sm:$0xff] %vm968_vm2, %v918_v48  ;;  %v916_v54 = vmax.f32 %v706_v49, 0.0  ;;  %v3880_v9 = vpop.f32.mrf.mxu1 }
  0xf4   : > { %v708_v56 = vpop.f32.mrf.mxu0  ;;  %1043 = vst.msk [vmem:[#allocation2 + $0x33] sm:$0xff] %vm968_vm2, %v4267_v40  ;;  %1011 = vst.msk [vmem:[#allocation2 + $0x150] sm:$0xff] %vm968_vm2, %v954_v6  ;;  %v952_v11 = vmax.f32 %v850_v7, 0.0 }
  0xf5   : > { %973 = vst.msk [vmem:[#allocation2 + $0x20] sm:$0xff] %vm968_vm2, %v916_v54  ;;  %v709_v58 = vadd.f32 %v4491_v30, %v708_v56  ;;  %v852_v13 = vpop.f32.mrf.mxu1  ;;  %1061 = vst.msk [vmem:[#allocation2 + $0x153] sm:$0xff] %vm968_vm2, %v4267_v40 }
  0xf6   : > { %1027 = vst.msk [vmem:[#allocation2 + $0x20] sm:$0x7] %vm1025_vm3, %v4267_v40  ;;  %v3847_v60 = vpop.f32.mrf.mxu0  ;;  %v853_v15 = vadd.f32 %v4491_v30, %v852_v13 }
  0xf7   : > { %v917_v62 = vmax.f32 %v709_v58, 0.0  ;;  %v730_v63 = vadd.f32 %v3847_v60, %v4491_v30  ;;  %1009 = vst.msk [vmem:[#allocation2 + $0x140] sm:$0xff] %vm968_vm2, %v952_v11  ;;  %v3883_v17 = vpop.f32.mrf.mxu1 }
  0xf8   : > { %v721_v2 = vpop.f32.mrf.mxu0  ;;  %1036 = vst.msk [vmem:[#allocation2 + $0x140] sm:$0x7] %vm1025_vm3, %v4267_v40  ;;  %v953_v20 = vmax.f32 %v853_v15, 0.0  ;;  %v874_v21 = vadd.f32 %v3883_v17, %v4491_v30 }
  0xf9   : > { %974 = vst.msk [vmem:[#allocation2 + $0x28] sm:$0xff] %vm968_vm2, %v917_v62  ;;  %v922_v4 = vmax.f32 %v730_v63, 0.0  ;;  %v722_v5 = vadd.f32 %v4491_v30, %v721_v2  ;;  %v865_v23 = vpop.f32.mrf.mxu1 }
  0xfa   : > { %v3848_v8 = vpop.f32.mrf.mxu0  ;;  %1010 = vst.msk [vmem:[#allocation2 + $0x148] sm:$0xff] %vm968_vm2, %v953_v20  ;;  %v958_v26 = vmax.f32 %v874_v21, 0.0  ;;  %v866_v27 = vadd.f32 %v4491_v30, %v865_v23 }
  0xfb   : > { %979 = vst.msk [vmem:[#allocation2 + $0x50] sm:$0xff] %vm968_vm2, %v922_v4  ;;  %v920_v10 = vmax.f32 %v722_v5, 0.0  ;;  %v3884_v29 = vpop.f32.mrf.mxu1 }
  0xfc   : > { %v724_v12 = vpop.f32.mrf.mxu0  ;;  %1045 = vst.msk [vmem:[#allocation2 + $0x53] sm:$0xff] %vm968_vm2, %v4267_v40  ;;  %1015 = vst.msk [vmem:[#allocation2 + $0x170] sm:$0xff] %vm968_vm2, %v958_v26  ;;  %v956_v32 = vmax.f32 %v866_v27, 0.0 }
  0xfd   : > { %977 = vst.msk [vmem:[#allocation2 + $0x40] sm:$0xff] %vm968_vm2, %v920_v10  ;;  %v725_v14 = vadd.f32 %v4491_v30, %v724_v12  ;;  %v868_v34 = vpop.f32.mrf.mxu1  ;;  %1063 = vst.msk [vmem:[#allocation2 + $0x173] sm:$0xff] %vm968_vm2, %v4267_v40 }
  0xfe   : > { %1028 = vst.msk [vmem:[#allocation2 + $0x40] sm:$0x7] %vm1025_vm3, %v4267_v40  ;;  %v3851_v16 = vpop.f32.mrf.mxu0  ;;  %v869_v36 = vadd.f32 %v4491_v30, %v868_v34 }
  0xff   : > { %v921_v18 = vmax.f32 %v725_v14, 0.0  ;;  %v746_v19 = vadd.f32 %v3851_v16, %v4491_v30  ;;  %1013 = vst.msk [vmem:[#allocation2 + $0x160] sm:$0xff] %vm968_vm2, %v956_v32  ;;  %v3887_v38 = vpop.f32.mrf.mxu1 }
 0x100   : > { %v737_v22 = vpop.f32.mrf.mxu0  ;;  %1037 = vst.msk [vmem:[#allocation2 + $0x160] sm:$0x7] %vm1025_vm3, %v4267_v40  ;;  %v957_v42 = vmax.f32 %v869_v36, 0.0  ;;  %v890_v43 = vadd.f32 %v3887_v38, %v4491_v30 }
 0x101   : > { %978 = vst.msk [vmem:[#allocation2 + $0x48] sm:$0xff] %vm968_vm2, %v921_v18  ;;  %v926_v24 = vmax.f32 %v746_v19, 0.0  ;;  %v738_v25 = vadd.f32 %v4491_v30, %v737_v22  ;;  %v881_v45 = vpop.f32.mrf.mxu1 }
 0x102   : > { %v3852_v28 = vpop.f32.mrf.mxu0  ;;  %1014 = vst.msk [vmem:[#allocation2 + $0x168] sm:$0xff] %vm968_vm2, %v957_v42  ;;  %v962_v48 = vmax.f32 %v890_v43, 0.0  ;;  %v882_v49 = vadd.f32 %v4491_v30, %v881_v45 }
 0x103   : > { %983 = vst.msk [vmem:[#allocation2 + $0x70] sm:$0xff] %vm968_vm2, %v926_v24  ;;  %v924_v31 = vmax.f32 %v738_v25, 0.0  ;;  %v3888_v51 = vpop.f32.mrf.mxu1 }
 0x104   : > { %v740_v33 = vpop.f32.mrf.mxu0  ;;  %1047 = vst.msk [vmem:[#allocation2 + $0x73] sm:$0xff] %vm968_vm2, %v4267_v40  ;;  %1019 = vst.msk [vmem:[#allocation2 + $0x190] sm:$0xff] %vm968_vm2, %v962_v48  ;;  %v960_v53 = vmax.f32 %v882_v49, 0.0 }
 0x105   : > { %981 = vst.msk [vmem:[#allocation2 + $0x60] sm:$0xff] %vm968_vm2, %v924_v31  ;;  %v741_v35 = vadd.f32 %v4491_v30, %v740_v33  ;;  %v884_v55 = vpop.f32.mrf.mxu1  ;;  %1065 = vst.msk [vmem:[#allocation2 + $0x193] sm:$0xff] %vm968_vm2, %v4267_v40 }
 0x106   : > { %1029 = vst.msk [vmem:[#allocation2 + $0x60] sm:$0x7] %vm1025_vm3, %v4267_v40  ;;  %v3855_v37 = vpop.f32.mrf.mxu0  ;;  %v885_v57 = vadd.f32 %v4491_v30, %v884_v55 }
 0x107   : > { %v925_v39 = vmax.f32 %v741_v35, 0.0  ;;  %v762_v41 = vadd.f32 %v3855_v37, %v4491_v30  ;;  %1017 = vst.msk [vmem:[#allocation2 + $0x180] sm:$0xff] %vm968_vm2, %v960_v53  ;;  %v3891_v59 = vpop.f32.mrf.mxu1 }
 0x108   : > { %v753_v44 = vpop.f32.mrf.mxu0  ;;  %1038 = vst.msk [vmem:[#allocation2 + $0x180] sm:$0x7] %vm1025_vm3, %v4267_v40  ;;  %v961_v62 = vmax.f32 %v885_v57, 0.0  ;;  %v906_v63 = vadd.f32 %v3891_v59, %v4491_v30 }
 0x109   : > { %982 = vst.msk [vmem:[#allocation2 + $0x68] sm:$0xff] %vm968_vm2, %v925_v39  ;;  %v930_v46 = vmax.f32 %v762_v41, 0.0  ;;  %v754_v47 = vadd.f32 %v4491_v30, %v753_v44  ;;  %v897_v1 = vpop.f32.mrf.mxu1 }
 0x10a   : > { %v3856_v50 = vpop.f32.mrf.mxu0  ;;  %1018 = vst.msk [vmem:[#allocation2 + $0x188] sm:$0xff] %vm968_vm2, %v961_v62  ;;  %v966_v4 = vmax.f32 %v906_v63, 0.0  ;;  %v898_v5 = vadd.f32 %v4491_v30, %v897_v1 }
 0x10b   : > { %987 = vst.msk [vmem:[#allocation2 + $0x90] sm:$0xff] %vm968_vm2, %v930_v46  ;;  %v928_v52 = vmax.f32 %v754_v47, 0.0  ;;  %v3892_v7 = vpop.f32.mrf.mxu1 }
 0x10c   : > { %v756_v54 = vpop.f32.mrf.mxu0  ;;  %1049 = vst.msk [vmem:[#allocation2 + $0x93] sm:$0xff] %vm968_vm2, %v4267_v40  ;;  %1023 = vst.msk [vmem:[#allocation2 + $0x1b0] sm:$0xff] %vm968_vm2, %v966_v4  ;;  %v964_v9 = vmax.f32 %v898_v5, 0.0 }
 0x10d   : > { %985 = vst.msk [vmem:[#allocation2 + $0x80] sm:$0xff] %vm968_vm2, %v928_v52  ;;  %v757_v56 = vadd.f32 %v4491_v30, %v756_v54  ;;  %v900_v11 = vpop.f32.mrf.mxu1  ;;  %1067 = vst.msk [vmem:[#allocation2 + $0x1b3] sm:$0xff] %vm968_vm2, %v4267_v40 }
 0x10e   : > { %1030 = vst.msk [vmem:[#allocation2 + $0x80] sm:$0x7] %vm1025_vm3, %v4267_v40  ;;  %v3859_v58 = vpop.f32.mrf.mxu0  ;;  %v901_v13 = vadd.f32 %v4491_v30, %v900_v11 }
 0x10f   : > { %v929_v60 = vmax.f32 %v757_v56, 0.0  ;;  %v778_v61 = vadd.f32 %v3859_v58, %v4491_v30  ;;  %1021 = vst.msk [vmem:[#allocation2 + $0x1a0] sm:$0xff] %vm968_vm2, %v964_v9 }
 0x110   : > { %v769_v0 = vpop.f32.mrf.mxu0  ;;  %1039 = vst.msk [vmem:[#allocation2 + $0x1a0] sm:$0x7] %vm1025_vm3, %v4267_v40  ;;  %v965_v17 = vmax.f32 %v901_v13, 0.0 }
 0x111   : > { %986 = vst.msk [vmem:[#allocation2 + $0x88] sm:$0xff] %vm968_vm2, %v929_v60  ;;  %v934_v2 = vmax.f32 %v778_v61, 0.0  ;;  %v770_v3 = vadd.f32 %v4491_v30, %v769_v0 }
 0x112   : > { %v3860_v6 = vpop.f32.mrf.mxu0  ;;  %1022 = vst.msk [vmem:[#allocation2 + $0x1a8] sm:$0xff] %vm968_vm2, %v965_v17 }
 0x113   : > { %991 = vst.msk [vmem:[#allocation2 + $0xb0] sm:$0xff] %vm968_vm2, %v934_v2  ;;  %v932_v8 = vmax.f32 %v770_v3, 0.0 }
 0x114   : > { %v772_v10 = vpop.f32.mrf.mxu0  ;;  %1051 = vst.msk [vmem:[#allocation2 + $0xb3] sm:$0xff] %vm968_vm2, %v4267_v40 }
 0x115   : > { %989 = vst.msk [vmem:[#allocation2 + $0xa0] sm:$0xff] %vm968_vm2, %v932_v8  ;;  %v773_v12 = vadd.f32 %v4491_v30, %v772_v10 }
 0x116   : > { %1031 = vst.msk [vmem:[#allocation2 + $0xa0] sm:$0x7] %vm1025_vm3, %v4267_v40  ;;  %v3863_v14 = vpop.f32.mrf.mxu0 }
 0x117   : > { %v933_v15 = vmax.f32 %v773_v12, 0.0  ;;  %v794_v16 = vadd.f32 %v3863_v14, %v4491_v30 }
 0x118   : > { %v785_v18 = vpop.f32.mrf.mxu0 }
 0x119   : > { %990 = vst.msk [vmem:[#allocation2 + $0xa8] sm:$0xff] %vm968_vm2, %v933_v15  ;;  %v938_v19 = vmax.f32 %v794_v16, 0.0  ;;  %v786_v20 = vadd.f32 %v4491_v30, %v785_v18 }
 0x11a   : > { %v3864_v21 = vpop.f32.mrf.mxu0 }
 0x11b   : > { %995 = vst.msk [vmem:[#allocation2 + $0xd0] sm:$0xff] %vm968_vm2, %v938_v19  ;;  %v936_v22 = vmax.f32 %v786_v20, 0.0 }
 0x11c   : > { %v788_v23 = vpop.f32.mrf.mxu0  ;;  %1053 = vst.msk [vmem:[#allocation2 + $0xd3] sm:$0xff] %vm968_vm2, %v4267_v40 }
 0x11d   : > { %993 = vst.msk [vmem:[#allocation2 + $0xc0] sm:$0xff] %vm968_vm2, %v936_v22  ;;  %v789_v24 = vadd.f32 %v4491_v30, %v788_v23 }
 0x11e   : > { %1032 = vst.msk [vmem:[#allocation2 + $0xc0] sm:$0x7] %vm1025_vm3, %v4267_v40  ;;  %v3867_v25 = vpop.f32.mrf.mxu0 }
 0x11f   : > { %v937_v26 = vmax.f32 %v789_v24, 0.0  ;;  %v810_v27 = vadd.f32 %v3867_v25, %v4491_v30 }
 0x120   : > { %v801_v28 = vpop.f32.mrf.mxu0 }
 0x121   : > { %994 = vst.msk [vmem:[#allocation2 + $0xc8] sm:$0xff] %vm968_vm2, %v937_v26  ;;  %v942_v29 = vmax.f32 %v810_v27, 0.0  ;;  %v802_v31 = vadd.f32 %v4491_v30, %v801_v28 }
 0x122   : > { %v3868_v32 = vpop.f32.mrf.mxu0 }
 0x123   : > { %999 = vst.msk [vmem:[#allocation2 + $0xf0] sm:$0xff] %vm968_vm2, %v942_v29  ;;  %v940_v33 = vmax.f32 %v802_v31, 0.0 }
 0x124   : > { %v804_v34 = vpop.f32.mrf.mxu0  ;;  %1055 = vst.msk [vmem:[#allocation2 + $0xf3] sm:$0xff] %vm968_vm2, %v4267_v40 }
 0x125   : > { %997 = vst.msk [vmem:[#allocation2 + $0xe0] sm:$0xff] %vm968_vm2, %v940_v33  ;;  %v805_v35 = vadd.f32 %v4491_v30, %v804_v34 }
 0x126   : > { %1033 = vst.msk [vmem:[#allocation2 + $0xe0] sm:$0x7] %vm1025_vm3, %v4267_v40  ;;  %v3871_v36 = vpop.f32.mrf.mxu0 }
 0x127   : > { %v941_v37 = vmax.f32 %v805_v35, 0.0  ;;  %v826_v38 = vadd.f32 %v3871_v36, %v4491_v30 }
 0x128   : > { %v817_v39 = vpop.f32.mrf.mxu0 }
 0x129   : > { %998 = vst.msk [vmem:[#allocation2 + $0xe8] sm:$0xff] %vm968_vm2, %v941_v37  ;;  %v946_v41 = vmax.f32 %v826_v38, 0.0  ;;  %v818_v42 = vadd.f32 %v4491_v30, %v817_v39 }
 0x12a   : > { %v3872_v43 = vpop.f32.mrf.mxu0 }
 0x12b   : > { %1003 = vst.msk [vmem:[#allocation2 + $0x110] sm:$0xff] %vm968_vm2, %v946_v41  ;;  %v944_v44 = vmax.f32 %v818_v42, 0.0 }
 0x12c   : > { %v820_v45 = vpop.f32.mrf.mxu0  ;;  %1057 = vst.msk [vmem:[#allocation2 + $0x113] sm:$0xff] %vm968_vm2, %v4267_v40 }
 0x12d   : > { %1001 = vst.msk [vmem:[#allocation2 + $0x100] sm:$0xff] %vm968_vm2, %v944_v44  ;;  %v821_v46 = vadd.f32 %v4491_v30, %v820_v45  ;;  %1072 = sbr.rel (%p3773_p0) target bundleno = 309 (0x135), region = 56 }
 0x12e   : > { %1034 = vst.msk [vmem:[#allocation2 + $0x100] sm:$0x7] %vm1025_vm3, %v4267_v40 }
 0x12f   : > { %v945_v47 = vmax.f32 %v821_v46, 0.0 }
 0x131   : > { %1002 = vst.msk [vmem:[#allocation2 + $0x108] sm:$0xff] %vm968_vm2, %v945_v47 }
 0x132   : > { %v4268_v48 = vmov 0.0  }
 0x133   : > { %1073 = vst.msk [vmem:[#allocation2] sm:$0xff] %vm968_vm2, %v4268_v48  ;;  %1074 = vst.msk [vmem:[#allocation2 + $0x8] sm:$0xff] %vm968_vm2, %v4268_v48 }
 0x134   : > { %1075 = vst.msk [vmem:[#allocation2 + $0x10] sm:$0xff] %vm968_vm2, %v4268_v48 }
 0x135 PF: > { %s1077_s15 = sadd.s32 1, %s4416_s14 }
 0x136   : > { %p3774_p1 = scmp.ge.s32.totalorder %s1077_s15, 3 }
 0x138   : > { %1081 = sbr.rel (%p3774_p1) target bundleno = 320 (0x140), region = 60 }
 0x13d   : > { %v4269_v30 = vmov 0.0  }
 0x13e   : > { %1083 = vst.msk [vmem:[#allocation2 + $0x20] sm:$0xff] %vm968_vm2, %v4269_v30  ;;  %1084 = vst.msk [vmem:[#allocation2 + $0x28] sm:$0xff] %vm968_vm2, %v4269_v30 }
 0x13f   : > { %1085 = vst.msk [vmem:[#allocation2 + $0x30] sm:$0xff] %vm968_vm2, %v4269_v30 }
 0x140 PF: > { %s1087_s16 = sadd.s32 2, %s4416_s14 }
 0x141   : > { %p3775_p2 = scmp.ge.s32.totalorder %s1087_s16, 3 }
 0x143   : > { %1091 = sbr.rel (%p3775_p2) target bundleno = 331 (0x14b), region = 64 }
 0x148   : > { %v4270_v40 = vmov 0.0  }
 0x149   : > { %1093 = vst.msk [vmem:[#allocation2 + $0x40] sm:$0xff] %vm968_vm2, %v4270_v40  ;;  %1094 = vst.msk [vmem:[#allocation2 + $0x48] sm:$0xff] %vm968_vm2, %v4270_v40 }
 0x14a   : > { %1095 = vst.msk [vmem:[#allocation2 + $0x50] sm:$0xff] %vm968_vm2, %v4270_v40 }
 0x14b PF: > { %s1097_s23 = sadd.s32 13, %s4416_s14 }
 0x14c   : > { %p3776_p4 = scmp.lt.s32.totalorder %s1097_s23, 19 }
 0x14e   : > { %1101 = sbr.rel (%p3776_p4) target bundleno = 342 (0x156), region = 68 }
 0x153   : > { %v4271_v49 = vmov 0.0  }
 0x154   : > { %1103 = vst.msk [vmem:[#allocation2 + $0x1a0] sm:$0xff] %vm968_vm2, %v4271_v49  ;;  %1104 = vst.msk [vmem:[#allocation2 + $0x1a8] sm:$0xff] %vm968_vm2, %v4271_v49 }
 0x155   : > { %1105 = vst.msk [vmem:[#allocation2 + $0x1b0] sm:$0xff] %vm968_vm2, %v4271_v49 }
 0x156 PF: > { %s1107_s24 = sadd.s32 12, %s4416_s14 }
 0x157   : > { %p3777_p5 = scmp.lt.s32.totalorder %s1107_s24, 19 }
 0x159   : > { %1111 = sbr.rel (%p3777_p5) target bundleno = 353 (0x161), region = 72 }
 0x15e   : > { %v4272_v50 = vmov 0.0  }
 0x15f   : > { %1113 = vst.msk [vmem:[#allocation2 + $0x180] sm:$0xff] %vm968_vm2, %v4272_v50  ;;  %1114 = vst.msk [vmem:[#allocation2 + $0x188] sm:$0xff] %vm968_vm2, %v4272_v50 }
 0x160   : > { %1115 = vst.msk [vmem:[#allocation2 + $0x190] sm:$0xff] %vm968_vm2, %v4272_v50 }
 0x161 PF: > { %s1117_s13 = sadd.s32 11, %s4416_s14 }
 0x162   : > { %p3778_p6 = scmp.lt.s32.totalorder %s1117_s13, 19 }
 0x164   : > { %1121 = sbr.rel (%p3778_p6) target bundleno = 364 (0x16c), region = 76 }
 0x169   : > { %v4273_v51 = vmov 0.0  }
 0x16a   : > { %1123 = vst.msk [vmem:[#allocation2 + $0x160] sm:$0xff] %vm968_vm2, %v4273_v51  ;;  %1124 = vst.msk [vmem:[#allocation2 + $0x168] sm:$0xff] %vm968_vm2, %v4273_v51 }
 0x16b   : > { %1125 = vst.msk [vmem:[#allocation2 + $0x170] sm:$0xff] %vm968_vm2, %v4273_v51 }
 0x16c PF: > { %v4037_v52 = vld [vmem:[%s7567_s5] sm:$0xff]   ;;  %v1162_v53 = vlaneseq  ;;  %v4673_v56 = vld [vmem:[%s7565_s3 + $0x8] sm:$0x7f]  ;;  %v4678_v57 = vld [vmem:[%s7565_s3 + $0x10] sm:$0x7f]  ;;  %s4274_s24 = smov 28  }
 0x16d   : > { %3893 = vmatprep.subr.bf16.mxu1 %v4037_v52  ;;  %v4668_v55 = vld [vmem:[%s7565_s3] sm:$0x7f]  ;;  %v4683_v58 = vld [vmem:[%s7565_s3 + $0x18] sm:$0x7f]  ;;  %v1135_v61 = vld [vmem:[#allocation2 + $0x8] sm:$0xff]  ;;  %vm3336_vm4 = vcmask 1047559  }
 0x16e   : > { %3894 = vmatpush3.bf16.msra.mxu1 %v4037_v52  ;;  %v4663_v54 = vshrl.u32 %v1162_v53, 7  ;;  %v1134_v60 = vld [vmem:[#allocation2] sm:$0xff]  ;;  %v4693_v0 = vld [vmem:[#allocation2 + $0x28] sm:$0xff]  ;;  %v4725_v12 = vld [vmem:[%s7565_s3 + $0x30] sm:$0x7f]  ;;  %s4275_s13 = smov 24  }
 0x16f   : > { %v4689_v62 = vld [vmem:[%s7565_s3 + $0x20] sm:$0x7f]  ;;  %v4707_v4 = vld [vmem:[%s7565_s3 + $0x28] sm:$0x7f]  ;;  %vm3333_vm5 = vcmask 1046534   ;;  %vm3330_vm6 = vcmask 1045509  }
 0x170   : > { %v1164_v59 = vsub.s32 0, %v4663_v54  ;;  %v4691_v63 = vld [vmem:[#allocation2 + $0x20] sm:$0xff]  ;;  %v4711_v6 = vld [vmem:[#allocation2 + $0x48] sm:$0xff]  ;;  %v4746_v21 = vsub.s32 1, %v4663_v54  ;;  %s4276_s21 = smov 20   ;;  %s4277_s22 = smov 52  }
 0x171   : > { %v4709_v5 = vld [vmem:[#allocation2 + $0x40] sm:$0xff]  ;;  %v4718_v9 = vld [vmem:[#allocation2 + $0x68] sm:$0xff]  ;;  %s4278_s14 = smov 16   ;;  %vm3327_vm7 = vcmask 1044484   ;;  %vm3324_vm8 = vcmask 1043459   ;;  %vm3321_vm9 = vcmask 1042434  }
 0x172   : > { %v4696_v1 = vrot.slane %v4668_v55, %v1164_v59  ;;  %v4699_v2 = vrot.slane %v4673_v56, %v1164_v59  ;;  %v4702_v3 = vrot.slane %v4678_v57, %v1164_v59  ;;  %v4714_v7 = vrot.slane %v4683_v58, %v1164_v59  ;;  %v4716_v8 = vld [vmem:[#allocation2 + $0x60] sm:$0xff]  ;;  %v4736_v17 = vld [vmem:[#allocation2 + $0x88] sm:$0xff]  ;;  %s4279_s25 = smov 48   ;;  %s4280_s26 = smov 12  }
 0x173   : > { %v4732_v15 = vrot.slane %v4689_v62, %v1164_v59  ;;  %v4734_v16 = vld [vmem:[#allocation2 + $0x80] sm:$0xff]  ;;  %v4743_v20 = vrot.slane %v4707_v4, %v1164_v59  ;;  %v4754_v27 = vld [vmem:[#allocation2 + $0xa8] sm:$0xff]  ;;  %v4757_v28 = vrot.slane %v4725_v12, %v1164_v59  ;;  %v4769_v36 = vrot.slane %v4668_v55, %v4746_v21  ;;  %s4281_s17 = smov 8   ;;  %s4282_s1 = smov 44  }
 0x174   : > { %8188 = vst [vmem:[#allocation11_spill] sm:$0xff] %v4696_v1  ;;  %8189 = vst [vmem:[#allocation12_spill] sm:$0xff] %v4699_v2  ;;  %v1166_v10 = vmul.f32 %v4696_v1, %v1134_v60  ;;  %v1167_v11 = vmul.f32 %v4696_v1, %v1135_v61  ;;  %v1202_v13 = vmul.f32 %v4699_v2, %v4691_v63  ;;  %v4752_v26 = vld [vmem:[#allocation2 + $0xa0] sm:$0xff]  ;;  %v4765_v35 = vld [vmem:[#allocation2 + $0xc8] sm:$0xff]  ;;  %vm3318_vm10 = vcmask 1041409   ;;  %s4283_s11 = smov 40  }
 0x175   : > { %8190 = vst [vmem:[#allocation13_spill] sm:$0xff] %v4702_v3  ;;  %8191 = vst [vmem:[#allocation14_spill] sm:$0xff] %v4714_v7  ;;  %v1203_v14 = vmul.f32 %v4699_v2, %v4693_v0  ;;  %v1238_v18 = vmul.f32 %v4702_v3, %v4709_v5  ;;  %v1239_v19 = vmul.f32 %v4702_v3, %v4711_v6  ;;  %v4759_v29 = vld [vmem:[#allocation2 + $0xc0] sm:$0xff]  ;;  %v1415_v44 = vld [vmem:[#allocation2 + $0x9] sm:$0xff]  ;;  %s4284_s15 = smov 4   ;;  %s4286_s16 = smov 32  }
 0x176   : > { %8192 = vst [vmem:[#allocation15_spill] sm:$0xff] %v4732_v15  ;;  %8193 = vst [vmem:[#allocation16_spill] sm:$0xff] %v4743_v20  ;;  %v1218_v22 = vadd.f32 %v1202_v13, %v1166_v10  ;;  %v1274_v24 = vmul.f32 %v4714_v7, %v4716_v8  ;;  %v1275_v25 = vmul.f32 %v4714_v7, %v4718_v9  ;;  %v1414_v42 = vld [vmem:[#allocation2 + $0x1] sm:$0xff]  ;;  %v1417_v40 = vld [vmem:[#allocation2 + $0x29] sm:$0xff]  ;;  %s4287_s23 = smov 56   ;;  %vm3354_vm11 = vcmask 57376  }
 0x177   : > { %v1219_v23 = vadd.f32 %v1203_v14, %v1167_v11  ;;  %8194 = vst [vmem:[#allocation17_spill] sm:$0xff] %v4757_v28  ;;  %v1310_v33 = vmul.f32 %v4732_v15, %v4734_v16  ;;  %v1311_v34 = vmul.f32 %v4732_v15, %v4736_v17  ;;  %8195 = vst [vmem:[#allocation18_spill] sm:$0xff] %v4769_v36  ;;  %v1416_v30 = vld [vmem:[#allocation2 + $0x21] sm:$0xff]  ;;  %v4791_v60 = vld [vmem:[#allocation2 + $0x49] sm:$0xff]  ;;  %vm3352_vm12 = vcmask 64545  }
 0x178   : > { %v1254_v31 = vadd.f32 %v1238_v18, %v1218_v22  ;;  %v1346_v39 = vmul.f32 %v4743_v20, %v4752_v26  ;;  %v1347_v41 = vmul.f32 %v4743_v20, %v4754_v27  ;;  %v1382_v43 = vmul.f32 %v4757_v28, %v4759_v29  ;;  %v4789_v59 = vld [vmem:[#allocation2 + $0x41] sm:$0xff] }
 0x179   : > { %v1255_v32 = vadd.f32 %v1239_v19, %v1219_v23  ;;  %v1383_v47 = vmul.f32 %v4757_v28, %v4765_v35  ;;  %v4781_v48 = vrot.slane %v4673_v56, %v4746_v21  ;;  %v1446_v49 = vmul.f32 %v4769_v36, %v1414_v42  ;;  %v4797_v13 = vld [vmem:[#allocation2 + $0x61] sm:$0xff]  ;;  %v4801_v19 = vld [vmem:[#allocation2 + $0x69] sm:$0xff] }
 0x17a   : > { %v1290_v37 = vadd.f32 %v1274_v24, %v1254_v31  ;;  %v1447_v52 = vmul.f32 %v4769_v36, %v1415_v44  ;;  %v4787_v53 = vrot.slane %v4678_v57, %v4746_v21  ;;  %v4795_v61 = vrot.slane %v4683_v58, %v4746_v21  ;;  %8199 = vst [vmem:[#allocation22_spill] sm:$0xff] %v4797_v13  ;;  %v4807_v23 = vld [vmem:[#allocation2 + $0x81] sm:$0xff]  ;;  %v4828_v44 = vld [vmem:[#allocation2 + $0xa9] sm:$0xff] }
 0x17b   : > { %v1291_v38 = vadd.f32 %v1275_v25, %v1255_v32  ;;  %8196 = vst [vmem:[#allocation19_spill] sm:$0xff] %v4781_v48  ;;  %v1482_v14 = vmul.f32 %v4781_v48, %v1416_v30  ;;  %v1483_v18 = vmul.f32 %v4781_v48, %v1417_v40  ;;  %8200 = vst [vmem:[#allocation23_spill] sm:$0xff] %v4801_v19  ;;  %vm3368_vm13 = vcmask 97346  }
 0x17c   : > { %v1326_v45 = vadd.f32 %v1310_v33, %v1290_v37  ;;  %8197 = vst [vmem:[#allocation20_spill] sm:$0xff] %v4787_v53  ;;  %8198 = vst [vmem:[#allocation21_spill] sm:$0xff] %v4795_v61  ;;  %v4805_v22 = vrot.slane %v4689_v62, %v4746_v21  ;;  %v1518_v31 = vmul.f32 %v4787_v53, %v4789_v59  ;;  %v4813_v33 = vld [vmem:[#allocation2 + $0x89] sm:$0xff]  ;;  %v4818_v37 = vsub.s32 2, %v4663_v54 }
 0x17d   : > { %v1327_v46 = vadd.f32 %v1311_v34, %v1291_v38  ;;  %8202 = vst [vmem:[#allocation25_spill] sm:$0xff] %v4807_v23  ;;  %v1519_v32 = vmul.f32 %v4787_v53, %v4791_v60  ;;  %8203 = vst [vmem:[#allocation26_spill] sm:$0xff] %v4813_v33  ;;  %v1554_v34 = vmul.f32 %v4795_v61, %v4797_v13  ;;  %vm3370_vm14 = vcmask 91200  }
 0x17e   : > { %v1362_v50 = vadd.f32 %v1346_v39, %v1326_v45  ;;  %8201 = vst [vmem:[#allocation24_spill] sm:$0xff] %v4805_v22  ;;  %v4824_v42 = vrot.slane %v4707_v4, %v4746_v21  ;;  %8206 = vst [vmem:[#allocation29_spill] sm:$0xff] %v4828_v44  ;;  %v1590_v45 = vmul.f32 %v4805_v22, %v4807_v23  ;;  %vm3384_vm15 = vcmask 130147  }
 0x17f   : > { %v1363_v51 = vadd.f32 %v1347_v41, %v1327_v46  ;;  %v1555_v41 = vmul.f32 %v4795_v61, %v4801_v19  ;;  %v4833_v46 = vsub.s32 3, %v4663_v54  ;;  %vm3386_vm0 = vcmask 125024  }
 0x180   : > { %v1398_v10 = vadd.f32 %v1382_v43, %v1362_v50  ;;  %8204 = vst [vmem:[#allocation27_spill] sm:$0xff] %v4824_v42  ;;  %v4826_v43 = vld [vmem:[#allocation2 + $0xa1] sm:$0xff]  ;;  %vm3432_vm3 = vcmask 228550  }
 0x181   : > { %v1399_v11 = vadd.f32 %v1383_v47, %v1363_v51  ;;  %8205 = vst [vmem:[#allocation28_spill] sm:$0xff] %v4826_v43  ;;  %v4836_v47 = vsub.s32 4, %v4663_v54  ;;  %v1591_v51 = vmul.f32 %v4805_v22, %v4813_v33  ;;  %v1696_v22 = vld [vmem:[#allocation2 + $0x22] sm:$0xff] }
 0x182   : > { %v1462_v24 = vadd.f32 %v1446_v49, %v1398_v10  ;;  %v4846_v10 = vmul.f32 %v4696_v1, %v4691_v63  ;;  %v1626_v63 = vmul.f32 %v4824_v42, %v4826_v43  ;;  %v1697_v43 = vld [vmem:[#allocation2 + $0x2a] sm:$0xff] }
 0x183   : > { %v1463_v25 = vadd.f32 %v1447_v52, %v1399_v11  ;;  %v4842_v52 = vrot.slane %v4725_v12, %v4746_v21  ;;  %v4850_v11 = vmul.f32 %v4696_v1, %v4693_v0  ;;  %v1627_v0 = vmul.f32 %v4824_v42, %v4828_v44 }
 0x184   : > { %v1498_v38 = vadd.f32 %v1482_v14, %v1462_v24  ;;  %v4852_v14 = vld [vmem:[#allocation2 + $0xc1] sm:$0xff]  ;;  %v4858_v24 = vrot.slane %v4668_v55, %v4818_v37  ;;  %v5169_v53 = vrot.slane %v4689_v62, %v4836_v47 }
 0x185   : > { %v1499_v39 = vadd.f32 %v1483_v18, %v1463_v25  ;;  %8207 = vst [vmem:[#allocation30_spill] sm:$0xff] %v4842_v52  ;;  %8208 = vst [vmem:[#allocation31_spill] sm:$0xff] %v4852_v14  ;;  %v4854_v18 = vld [vmem:[#allocation2 + $0xc9] sm:$0xff]  ;;  %v4861_v25 = vsub.s32 5, %v4663_v54  ;;  %v1662_v44 = vmul.f32 %v4842_v52, %v4852_v14 }
 0x186   : > { %v1534_v49 = vadd.f32 %v1518_v31, %v1498_v38  ;;  %8209 = vst [vmem:[#allocation32_spill] sm:$0xff] %v4854_v18  ;;  %8210 = vst [vmem:[#allocation33_spill] sm:$0xff] %v4858_v24  ;;  %v4873_v38 = vmul.f32 %v4696_v1, %v4711_v6  ;;  %v4948_v33 = vmul.f32 %v4858_v24, %v1696_v22 }
 0x187   : > { %v1535_v50 = vadd.f32 %v1519_v32, %v1499_v39  ;;  %v4869_v32 = vmul.f32 %v4696_v1, %v4709_v5  ;;  %v4877_v39 = vmul.f32 %v4699_v2, %v4709_v5  ;;  %v4889_v1 = vmul.f32 %v4699_v2, %v4711_v6  ;;  %8284 = vst [vmem:[#allocation107_spill] sm:$0xff] %v5169_v53 }
 0x188   : > { %v1570_v21 = vadd.f32 %v1554_v34, %v1534_v49  ;;  %8212 = vst [vmem:[#allocation35_spill] sm:$0xff] %v4873_v38  ;;  %v1694_v34 = vld [vmem:[#allocation2 + $0x2] sm:$0xff]  ;;  %v4881_v49 = vrot.slane %v4673_v56, %v4818_v37  ;;  %v4892_v5 = vmul.f32 %v4769_v36, %v1416_v30  ;;  %v4895_v38 = vmul.f32 %v4769_v36, %v1417_v40 }
 0x189   : > { %v1571_v31 = vadd.f32 %v1555_v41, %v1535_v50  ;;  %8211 = vst [vmem:[#allocation34_spill] sm:$0xff] %v4869_v32  ;;  %v1695_v41 = vld [vmem:[#allocation2 + $0xa] sm:$0xff]  ;;  %v1663_v32 = vmul.f32 %v4842_v52, %v4854_v18  ;;  %v1726_v52 = vmul.f32 %v4858_v24, %v1694_v34  ;;  %v4905_v30 = vmul.f32 %v4769_v36, %v4789_v59  ;;  %v4919_v34 = vld [vmem:[#allocation2 + $0x62] sm:$0xff] }
 0x18a   : > { %8213 = vst [vmem:[#allocation36_spill] sm:$0xff] %v4881_v49  ;;  %v1606_v50 = vadd.f32 %v1590_v45, %v1570_v21  ;;  %8214 = vst [vmem:[#allocation37_spill] sm:$0xff] %v4892_v5  ;;  %v4899_v45 = vrot.slane %v4678_v57, %v4818_v37  ;;  %v1727_v6 = vmul.f32 %v4858_v24, %v1695_v41  ;;  %v1699_v18 = vld [vmem:[#allocation2 + $0x4a] sm:$0xff] }
 0x18b   : > { %v1607_v42 = vadd.f32 %v1591_v51, %v1571_v31  ;;  %8215 = vst [vmem:[#allocation38_spill] sm:$0xff] %v4895_v38  ;;  %v1698_v31 = vld [vmem:[#allocation2 + $0x42] sm:$0xff]  ;;  %8217 = vst [vmem:[#allocation40_spill] sm:$0xff] %v4905_v30  ;;  %v4909_v40 = vmul.f32 %v4769_v36, %v4791_v60  ;;  %v4913_v2 = vmul.f32 %v4769_v36, %v4797_v13 }
 0x18c   : > { %8216 = vst [vmem:[#allocation39_spill] sm:$0xff] %v4899_v45  ;;  %v1642_v51 = vadd.f32 %v1626_v63, %v1606_v50  ;;  %8221 = vst [vmem:[#allocation44_spill] sm:$0xff] %v4919_v34  ;;  %v1762_v41 = vmul.f32 %v4881_v49, %v1696_v22  ;;  %v1763_v50 = vmul.f32 %v4881_v49, %v1697_v43  ;;  %v4964_v22 = vld [vmem:[#allocation2 + $0xa2] sm:$0xff] }
 0x18d   : > { %v1643_v21 = vadd.f32 %v1627_v0, %v1607_v42  ;;  %8218 = vst [vmem:[#allocation41_spill] sm:$0xff] %v4909_v40  ;;  %8219 = vst [vmem:[#allocation42_spill] sm:$0xff] %v4913_v2  ;;  %v4917_v42 = vrot.slane %v4683_v58, %v4818_v37  ;;  %v4925_v40 = vmul.f32 %v4769_v36, %v4801_v19  ;;  %v2534_v13 = vld [vmem:[#allocation2 + $0x5] sm:$0xff] }
 0x18e   : > { %v1678_v63 = vadd.f32 %v1662_v44, %v1642_v51  ;;  %v4929_v2 = vmul.f32 %v4781_v48, %v4789_v59  ;;  %v4933_v30 = vmul.f32 %v4781_v48, %v4791_v60  ;;  %v4935_v44 = vld [vmem:[#allocation2 + $0x6a] sm:$0xff]  ;;  %v1799_v14 = vmul.f32 %v4899_v45, %v1699_v18  ;;  %8229 = vst [vmem:[#allocation52_spill] sm:$0xff] %v4948_v33 }
 0x18f   : > { %8220 = vst [vmem:[#allocation43_spill] sm:$0xff] %v4917_v42  ;;  %v1679_v0 = vadd.f32 %v1663_v32, %v1643_v21  ;;  %8222 = vst [vmem:[#allocation45_spill] sm:$0xff] %v4925_v40  ;;  %v1798_v32 = vmul.f32 %v4899_v45, %v1698_v31  ;;  %v4941_v36 = vrot.slane %v4689_v62, %v4818_v37  ;;  %v4943_v40 = vld [vmem:[#allocation2 + $0x82] sm:$0xff]  ;;  %v4945_v59 = vld [vmem:[#allocation2 + $0x8a] sm:$0xff] }
 0x190   : > { %8223 = vst [vmem:[#allocation46_spill] sm:$0xff] %v4929_v2  ;;  %8224 = vst [vmem:[#allocation47_spill] sm:$0xff] %v4933_v30  ;;  %v1742_v51 = vadd.f32 %v1726_v52, %v1678_v63  ;;  %v4951_v60 = vmul.f32 %v4858_v24, %v1697_v43  ;;  %v4954_v48 = vmul.f32 %v4858_v24, %v1698_v31  ;;  %v4966_v33 = vld [vmem:[#allocation2 + $0xaa] sm:$0xff] }
 0x191   : > { %8225 = vst [vmem:[#allocation48_spill] sm:$0xff] %v4935_v44  ;;  %v1743_v21 = vadd.f32 %v1727_v6, %v1679_v0  ;;  %8226 = vst [vmem:[#allocation49_spill] sm:$0xff] %v4941_v36  ;;  %v1834_v52 = vmul.f32 %v4917_v42, %v4919_v34  ;;  %v1835_v0 = vmul.f32 %v4917_v42, %v4935_v44  ;;  %v1975_v30 = vld [vmem:[#allocation2 + $0xb] sm:$0xff] }
 0x192   : > { %8227 = vst [vmem:[#allocation50_spill] sm:$0xff] %v4943_v40  ;;  %8228 = vst [vmem:[#allocation51_spill] sm:$0xff] %v4945_v59  ;;  %v1778_v6 = vadd.f32 %v1762_v41, %v1742_v51  ;;  %v4962_v45 = vrot.slane %v4707_v4, %v4818_v37  ;;  %v4969_v43 = vmul.f32 %v4858_v24, %v1699_v18  ;;  %v4983_v51 = vld [vmem:[#allocation2 + $0xc2] sm:$0xff] }
 0x193   : > { %8230 = vst [vmem:[#allocation53_spill] sm:$0xff] %v4951_v60  ;;  %8231 = vst [vmem:[#allocation54_spill] sm:$0xff] %v4954_v48  ;;  %v1779_v63 = vadd.f32 %v1763_v50, %v1743_v21  ;;  %v4973_v48 = vmul.f32 %v4858_v24, %v4919_v34  ;;  %v4977_v41 = vrot.slane %v4725_v12, %v4818_v37  ;;  %v4985_v21 = vld [vmem:[#allocation2 + $0xca] sm:$0xff] }
 0x194   : > { %8232 = vst [vmem:[#allocation55_spill] sm:$0xff] %v4962_v45  ;;  %8233 = vst [vmem:[#allocation56_spill] sm:$0xff] %v4964_v22  ;;  %v4981_v50 = vrot.slane %v4668_v55, %v4833_v46  ;;  %v1814_v60 = vadd.f32 %v1798_v32, %v1778_v6  ;;  %v1974_v34 = vld [vmem:[#allocation2 + $0x3] sm:$0xff]  ;;  %v4993_v37 = vmul.f32 %v4858_v24, %v4935_v44 }
 0x195   : > { %8234 = vst [vmem:[#allocation57_spill] sm:$0xff] %v4966_v33  ;;  %8235 = vst [vmem:[#allocation58_spill] sm:$0xff] %v4969_v43  ;;  %v1815_v42 = vadd.f32 %v1799_v14, %v1779_v63  ;;  %v1870_v43 = vmul.f32 %v4941_v36, %v4943_v40  ;;  %v4996_v61 = vmul.f32 %v4881_v49, %v1698_v31  ;;  %v1976_v32 = vld [vmem:[#allocation2 + $0x23] sm:$0xff] }
 0x196   : > { %8236 = vst [vmem:[#allocation59_spill] sm:$0xff] %v4973_v48  ;;  %8237 = vst [vmem:[#allocation60_spill] sm:$0xff] %v4977_v41  ;;  %v1871_v48 = vmul.f32 %v4941_v36, %v4945_v59  ;;  %v4999_v23 = vmul.f32 %v4881_v49, %v1699_v18  ;;  %v5003_v14 = vrot.slane %v4673_v56, %v4833_v46  ;;  %v2254_v2 = vld [vmem:[#allocation2 + $0x4] sm:$0xff] }
 0x197   : > { %8238 = vst [vmem:[#allocation61_spill] sm:$0xff] %v4981_v50  ;;  %8239 = vst [vmem:[#allocation62_spill] sm:$0xff] %v4983_v51  ;;  %v1850_v6 = vadd.f32 %v1834_v52, %v1814_v60  ;;  %v1851_v63 = vadd.f32 %v1835_v0, %v1815_v42  ;;  %v1906_v36 = vmul.f32 %v4962_v45, %v4964_v22  ;;  %v1978_v52 = vld [vmem:[#allocation2 + $0x43] sm:$0xff]  ;;  %v1979_v0 = vld [vmem:[#allocation2 + $0x4b] sm:$0xff] }
 0x198   : > { %8240 = vst [vmem:[#allocation63_spill] sm:$0xff] %v4985_v21  ;;  %8241 = vst [vmem:[#allocation64_spill] sm:$0xff] %v4993_v37  ;;  %v1907_v24 = vmul.f32 %v4962_v45, %v4966_v33  ;;  %v1977_v37 = vld [vmem:[#allocation2 + $0x2b] sm:$0xff]  ;;  %v1942_v31 = vmul.f32 %v4977_v41, %v4983_v51  ;;  %v1943_v18 = vmul.f32 %v4977_v41, %v4985_v21 }
 0x199   : > { %8242 = vst [vmem:[#allocation65_spill] sm:$0xff] %v4996_v61  ;;  %8243 = vst [vmem:[#allocation66_spill] sm:$0xff] %v4999_v23  ;;  %v2006_v49 = vmul.f32 %v4981_v50, %v1974_v34  ;;  %v5016_v23 = vrot.slane %v4678_v57, %v4833_v46  ;;  %v1886_v42 = vadd.f32 %v1870_v43, %v1850_v6  ;;  %v5018_v61 = vld [vmem:[#allocation2 + $0x63] sm:$0xff]  ;;  %v5024_v51 = vld [vmem:[#allocation2 + $0x6b] sm:$0xff] }
 0x19a   : > { %8244 = vst [vmem:[#allocation67_spill] sm:$0xff] %v5003_v14  ;;  %v1887_v60 = vadd.f32 %v1871_v48, %v1851_v63  ;;  %8246 = vst [vmem:[#allocation69_spill] sm:$0xff] %v5018_v61  ;;  %v2007_v45 = vmul.f32 %v4981_v50, %v1975_v30  ;;  %v5022_v33 = vmul.f32 %v4981_v50, %v1976_v32 }
 0x19b   : > { %8245 = vst [vmem:[#allocation68_spill] sm:$0xff] %v5016_v23  ;;  %8248 = vst [vmem:[#allocation71_spill] sm:$0xff] %v5024_v51  ;;  %v5027_v41 = vmul.f32 %v4981_v50, %v1977_v37  ;;  %v5030_v34 = vmul.f32 %v4981_v50, %v1978_v52  ;;  %v5033_v43 = vmul.f32 %v4981_v50, %v1979_v0 }
 0x19c   : > { %8247 = vst [vmem:[#allocation70_spill] sm:$0xff] %v5022_v33  ;;  %v5037_v48 = vmul.f32 %v4981_v50, %v5018_v61  ;;  %v1922_v6 = vadd.f32 %v1906_v36, %v1886_v42  ;;  %v1923_v30 = vadd.f32 %v1907_v24, %v1887_v60  ;;  %v5041_v63 = vmul.f32 %v4981_v50, %v5024_v51  ;;  %v5056_v42 = vld [vmem:[#allocation2 + $0x83] sm:$0xff] }
 0x19d   : > { %8249 = vst [vmem:[#allocation72_spill] sm:$0xff] %v5027_v41  ;;  %8250 = vst [vmem:[#allocation73_spill] sm:$0xff] %v5030_v34  ;;  %v2042_v33 = vmul.f32 %v5003_v14, %v1976_v32  ;;  %v2043_v41 = vmul.f32 %v5003_v14, %v1977_v37  ;;  %v5046_v21 = vmul.f32 %v5003_v14, %v1978_v52  ;;  %v5065_v32 = vld [vmem:[#allocation2 + $0x8b] sm:$0xff]  ;;  %v5067_v50 = vld [vmem:[#allocation2 + $0xa3] sm:$0xff] }
 0x19e   : > { %8251 = vst [vmem:[#allocation74_spill] sm:$0xff] %v5033_v43  ;;  %8252 = vst [vmem:[#allocation75_spill] sm:$0xff] %v5037_v48  ;;  %v5050_v43 = vrot.slane %v4683_v58, %v4833_v46  ;;  %v5054_v48 = vrot.slane %v4689_v62, %v4833_v46  ;;  %v1958_v36 = vadd.f32 %v1942_v31, %v1922_v6  ;;  %v5087_v34 = vld [vmem:[#allocation2 + $0xc3] sm:$0xff] }
 0x19f   : > { %8253 = vst [vmem:[#allocation76_spill] sm:$0xff] %v5041_v63  ;;  %8254 = vst [vmem:[#allocation77_spill] sm:$0xff] %v5046_v21  ;;  %v1959_v24 = vadd.f32 %v1943_v18, %v1923_v30  ;;  %v5059_v60 = vmul.f32 %v5003_v14, %v1979_v0  ;;  %v5063_v37 = vrot.slane %v4707_v4, %v4833_v46  ;;  %v5085_v30 = vld [vmem:[#allocation2 + $0xab] sm:$0xff] }
 0x1a0   : > { %8255 = vst [vmem:[#allocation78_spill] sm:$0xff] %v5050_v43  ;;  %8256 = vst [vmem:[#allocation79_spill] sm:$0xff] %v5054_v48  ;;  %v5071_v63 = vrot.slane %v4725_v12, %v4833_v46  ;;  %v5075_v31 = vrot.slane %v4668_v55, %v4861_v25  ;;  %v5079_v18 = vrot.slane %v4673_v56, %v4861_v25  ;;  %v5089_v14 = vld [vmem:[#allocation2 + $0xcb] sm:$0xff] }
 0x1a1   : > { %8257 = vst [vmem:[#allocation80_spill] sm:$0xff] %v5056_v42  ;;  %8258 = vst [vmem:[#allocation81_spill] sm:$0xff] %v5059_v60  ;;  %v5083_v6 = vrot.slane %v4678_v57, %v4861_v25  ;;  %v2022_v46 = vadd.f32 %v2006_v49, %v1958_v36  ;;  %v2023_v60 = vadd.f32 %v2007_v45, %v1959_v24  ;;  %v2255_v36 = vld [vmem:[#allocation2 + $0xc] sm:$0xff]  ;;  %v2256_v24 = vld [vmem:[#allocation2 + $0x24] sm:$0xff] }
 0x1a2   : > { %8259 = vst [vmem:[#allocation82_spill] sm:$0xff] %v5063_v37  ;;  %8260 = vst [vmem:[#allocation83_spill] sm:$0xff] %v5065_v32  ;;  %v2078_v21 = vmul.f32 %v5016_v23, %v1978_v52  ;;  %v2079_v22 = vmul.f32 %v5016_v23, %v1979_v0  ;;  %v2114_v59 = vmul.f32 %v5050_v43, %v5018_v61  ;;  %v2257_v23 = vld [vmem:[#allocation2 + $0x2c] sm:$0xff] }
 0x1a3   : > { %8261 = vst [vmem:[#allocation84_spill] sm:$0xff] %v5067_v50  ;;  %8262 = vst [vmem:[#allocation85_spill] sm:$0xff] %v5071_v63  ;;  %v2115_v40 = vmul.f32 %v5050_v43, %v5024_v51  ;;  %v2150_v44 = vmul.f32 %v5054_v48, %v5056_v42  ;;  %v5101_v19 = vrot.slane %v4668_v55, %v4836_v47 }
 0x1a4   : > { %8263 = vst [vmem:[#allocation86_spill] sm:$0xff] %v5075_v31  ;;  %8264 = vst [vmem:[#allocation87_spill] sm:$0xff] %v5079_v18  ;;  %v2058_v49 = vadd.f32 %v2042_v33, %v2022_v46  ;;  %v2059_v45 = vadd.f32 %v2043_v41, %v2023_v60  ;;  %v2151_v52 = vmul.f32 %v5054_v48, %v5065_v32  ;;  %v5139_v32 = vld [vmem:[#allocation2 + $0x64] sm:$0xff] }
 0x1a5   : > { %8265 = vst [vmem:[#allocation88_spill] sm:$0xff] %v5083_v6  ;;  %8266 = vst [vmem:[#allocation89_spill] sm:$0xff] %v5085_v30  ;;  %v2186_v0 = vmul.f32 %v5063_v37, %v5067_v50  ;;  %v2187_v43 = vmul.f32 %v5063_v37, %v5085_v30  ;;  %v2222_v42 = vmul.f32 %v5071_v63, %v5087_v34  ;;  %v2258_v37 = vld [vmem:[#allocation2 + $0x44] sm:$0xff]  ;;  %v2259_v30 = vld [vmem:[#allocation2 + $0x4c] sm:$0xff] }
 0x1a6   : > { %8267 = vst [vmem:[#allocation90_spill] sm:$0xff] %v5087_v34  ;;  %8268 = vst [vmem:[#allocation91_spill] sm:$0xff] %v5089_v14  ;;  %v2223_v51 = vmul.f32 %v5071_v63, %v5089_v14  ;;  %v5115_v33 = vrot.slane %v4673_v56, %v4836_v47  ;;  %v2094_v41 = vadd.f32 %v2078_v21, %v2058_v49 }
 0x1a7   : > { %8269 = vst [vmem:[#allocation92_spill] sm:$0xff] %v5101_v19  ;;  %v2095_v60 = vadd.f32 %v2079_v22, %v2059_v45  ;;  %v5119_v46 = vrot.slane %v4678_v57, %v4836_v47  ;;  %v5123_v48 = vrot.slane %v4683_v58, %v4836_v47  ;;  %v2286_v34 = vmul.f32 %v5101_v19, %v2254_v2 }
 0x1a8   : > { %8270 = vst [vmem:[#allocation93_spill] sm:$0xff] %v5115_v33  ;;  %v2287_v63 = vmul.f32 %v5101_v19, %v2255_v36  ;;  %v5128_v14 = vmul.f32 %v5101_v19, %v2256_v24  ;;  %v5131_v21 = vmul.f32 %v5101_v19, %v2257_v23  ;;  %v2130_v22 = vadd.f32 %v2114_v59, %v2094_v41 }
 0x1a9   : > { %8271 = vst [vmem:[#allocation94_spill] sm:$0xff] %v5119_v46  ;;  %8272 = vst [vmem:[#allocation95_spill] sm:$0xff] %v5123_v48  ;;  %v2131_v49 = vadd.f32 %v2115_v40, %v2095_v60  ;;  %v5134_v45 = vmul.f32 %v5101_v19, %v2258_v37  ;;  %v5137_v50 = vmul.f32 %v5101_v19, %v2259_v30 }
 0x1aa   : > { %8273 = vst [vmem:[#allocation96_spill] sm:$0xff] %v5128_v14  ;;  %8274 = vst [vmem:[#allocation97_spill] sm:$0xff] %v5131_v21  ;;  %v5143_v2 = vrot.slane %v4683_v58, %v4861_v25  ;;  %v5147_v36 = vrot.slane %v4689_v62, %v4861_v25  ;;  %v5151_v59 = vrot.slane %v4707_v4, %v4861_v25 }
 0x1ab   : > { %8275 = vst [vmem:[#allocation98_spill] sm:$0xff] %v5134_v45  ;;  %8276 = vst [vmem:[#allocation99_spill] sm:$0xff] %v5137_v50  ;;  %v5155_v40 = vrot.slane %v4725_v12, %v4861_v25  ;;  %v2166_v41 = vadd.f32 %v2150_v44, %v2130_v22  ;;  %v2167_v60 = vadd.f32 %v2151_v52, %v2131_v49  ;;  %v2844_v45 = vsub.s32 6, %v4663_v54  ;;  %v5171_v52 = vld [vmem:[#allocation2 + $0x6c] sm:$0xff]  ;;  %v5173_v22 = vld [vmem:[#allocation2 + $0x84] sm:$0xff] }
 0x1ac   : > { %8277 = vst [vmem:[#allocation100_spill] sm:$0xff] %v5139_v32  ;;  %8278 = vst [vmem:[#allocation101_spill] sm:$0xff] %v5143_v2  ;;  %v5159_v50 = vmul.f32 %v5101_v19, %v5139_v32  ;;  %v2322_v21 = vmul.f32 %v5115_v33, %v2256_v24  ;;  %v2323_v14 = vmul.f32 %v5115_v33, %v2257_v23  ;;  %v5182_v23 = vld [vmem:[#allocation2 + $0x8c] sm:$0xff]  ;;  %v5184_v24 = vld [vmem:[#allocation2 + $0xa4] sm:$0xff] }
 0x1ad   : > { %8279 = vst [vmem:[#allocation102_spill] sm:$0xff] %v5147_v36  ;;  %8280 = vst [vmem:[#allocation103_spill] sm:$0xff] %v5151_v59  ;;  %v5165_v61 = vmul.f32 %v5115_v33, %v2258_v37  ;;  %v2202_v25 = vadd.f32 %v2186_v0, %v2166_v41  ;;  %v2203_v44 = vadd.f32 %v2187_v43, %v2167_v60 }
 0x1ae   : > { %8281 = vst [vmem:[#allocation104_spill] sm:$0xff] %v5155_v40  ;;  %8282 = vst [vmem:[#allocation105_spill] sm:$0xff] %v5159_v50  ;;  %v5176_v49 = vmul.f32 %v5115_v33, %v2259_v30  ;;  %v5180_v54 = vrot.slane %v4707_v4, %v4836_v47  ;;  %v5186_v50 = vld [vmem:[#allocation2 + $0xac] sm:$0xff]  ;;  %v2358_v0 = vmul.f32 %v5119_v46, %v2258_v37 }
 0x1af   : > { %8283 = vst [vmem:[#allocation106_spill] sm:$0xff] %v5165_v61  ;;  %8285 = vst [vmem:[#allocation108_spill] sm:$0xff] %v5171_v52  ;;  %v5191_v43 = vrot.slane %v4725_v12, %v4836_v47  ;;  %v5194_v41 = vrot.slane %v4668_v55, %v2844_v45  ;;  %v5197_v60 = vrot.slane %v4673_v56, %v2844_v45  ;;  %v5201_v61 = vld [vmem:[#allocation2 + $0xcc] sm:$0xff] }
 0x1b0   : > { %8286 = vst [vmem:[#allocation109_spill] sm:$0xff] %v5173_v22  ;;  %8287 = vst [vmem:[#allocation110_spill] sm:$0xff] %v5176_v49  ;;  %v2238_v19 = vadd.f32 %v2222_v42, %v2202_v25  ;;  %v2239_v33 = vadd.f32 %v2223_v51, %v2203_v44  ;;  %v5199_v49 = vld [vmem:[#allocation2 + $0xc4] sm:$0xff]  ;;  %v5204_v38 = vrot.slane %v4678_v57, %v2844_v45  ;;  %v2535_v42 = vld [vmem:[#allocation2 + $0xd] sm:$0xff] }
 0x1b1   : > { %8288 = vst [vmem:[#allocation111_spill] sm:$0xff] %v5180_v54  ;;  %8289 = vst [vmem:[#allocation112_spill] sm:$0xff] %v5182_v23  ;;  %v5207_v37 = vrot.slane %v4683_v58, %v2844_v45  ;;  %v2359_v47 = vmul.f32 %v5119_v46, %v2259_v30  ;;  %v2394_v55 = vmul.f32 %v5123_v48, %v5139_v32  ;;  %v2536_v25 = vld [vmem:[#allocation2 + $0x25] sm:$0xff]  ;;  %v2537_v30 = vld [vmem:[#allocation2 + $0x2d] sm:$0xff] }
 0x1b2   : > { %8290 = vst [vmem:[#allocation113_spill] sm:$0xff] %v5184_v24  ;;  %8291 = vst [vmem:[#allocation114_spill] sm:$0xff] %v5191_v43  ;;  %v2395_v56 = vmul.f32 %v5123_v48, %v5171_v52  ;;  %v2430_v51 = vmul.f32 %v5169_v53, %v5173_v22  ;;  %v2302_v44 = vadd.f32 %v2286_v34, %v2238_v19 }
 0x1b3   : > { %8292 = vst [vmem:[#allocation115_spill] sm:$0xff] %v5194_v41  ;;  %8293 = vst [vmem:[#allocation116_spill] sm:$0xff] %v5197_v60  ;;  %v2303_v5 = vadd.f32 %v2287_v63, %v2239_v33  ;;  %v2431_v57 = vmul.f32 %v5169_v53, %v5182_v23  ;;  %v2466_v58 = vmul.f32 %v5180_v54, %v5184_v24  ;;  %v2538_v63 = vld [vmem:[#allocation2 + $0x45] sm:$0xff] }
 0x1b4   : > { %8294 = vst [vmem:[#allocation117_spill] sm:$0xff] %v5199_v49  ;;  %8295 = vst [vmem:[#allocation118_spill] sm:$0xff] %v5204_v38  ;;  %v2467_v46 = vmul.f32 %v5180_v54, %v5186_v50  ;;  %v2502_v48 = vmul.f32 %v5191_v43, %v5199_v49  ;;  %v2503_v22 = vmul.f32 %v5191_v43, %v5201_v61 }
 0x1b5   : > { %8296 = vst [vmem:[#allocation119_spill] sm:$0xff] %v5207_v37  ;;  %v5227_v52 = vmul.f32 %v5075_v31, %v2534_v13  ;;  %v2338_v19 = vadd.f32 %v2322_v21, %v2302_v44  ;;  %v2339_v34 = vadd.f32 %v2323_v14, %v2303_v5  ;;  %v2567_v33 = vmul.f32 %v5075_v31, %v2535_v42  ;;  %v5244_v14 = vld [vmem:[#allocation2 + $0x4d] sm:$0xff]  ;;  %v5246_v42 = vld [vmem:[#allocation2 + $0x65] sm:$0xff] }
 0x1b6   : > { %v5231_v53 = vmul.f32 %v5075_v31, %v2536_v25  ;;  %v5234_v24 = vmul.f32 %v5075_v31, %v2537_v30  ;;  %v5237_v54 = vmul.f32 %v5075_v31, %v2538_v63  ;;  %v5240_v49 = vmul.f32 %v5079_v18, %v2536_v25  ;;  %8300 = vst [vmem:[#allocation123_spill] sm:$0xff] %v5244_v14  ;;  %v5284_v31 = vld [vmem:[#allocation2 + $0xa5] sm:$0xff] }
 0x1b7   : > { %v1220_v13 = vadd.f32 %v4877_v39, %v4846_v10  ;;  %v2374_v21 = vadd.f32 %v2358_v0, %v2338_v19  ;;  %v2375_v5 = vadd.f32 %v2359_v47, %v2339_v34  ;;  %8301 = vst [vmem:[#allocation124_spill] sm:$0xff] %v5246_v42  ;;  %v5249_v44 = vrot.slane %v4689_v62, %v2844_v45 }
 0x1b8   : > { %8297 = vst [vmem:[#allocation120_spill] sm:$0xff] %v5231_v53  ;;  %8298 = vst [vmem:[#allocation121_spill] sm:$0xff] %v5234_v24  ;;  %v5252_v24 = vrot.slane %v4707_v4, %v2844_v45  ;;  %v1221_v25 = vadd.f32 %v4889_v1, %v4850_v11  ;;  %v1240_v10 = vmul.f32 %v4702_v3, %v4716_v8  ;;  %v5267_v4 = vld [vmem:[#allocation2 + $0x6d] sm:$0xff] }
 0x1b9   : > { %8299 = vst [vmem:[#allocation122_spill] sm:$0xff] %v5237_v54  ;;  %8302 = vst [vmem:[#allocation125_spill] sm:$0xff] %v5249_v44  ;;  %v5255_v54 = vrot.slane %v4725_v12, %v2844_v45  ;;  %v1241_v39 = vmul.f32 %v4702_v3, %v4718_v9  ;;  %v2410_v0 = vadd.f32 %v2394_v55, %v2374_v21  ;;  %v5269_v12 = vld [vmem:[#allocation2 + $0x85] sm:$0xff] }
 0x1ba   : > { %8303 = vst [vmem:[#allocation126_spill] sm:$0xff] %v5252_v24  ;;  %v2411_v47 = vadd.f32 %v2395_v56, %v2375_v5  ;;  %v2603_v62 = vmul.f32 %v5079_v18, %v2537_v30  ;;  %v5265_v19 = vmul.f32 %v5079_v18, %v2538_v63  ;;  %8306 = vst [vmem:[#allocation129_spill] sm:$0xff] %v5267_v4  ;;  %v5282_v5 = vld [vmem:[#allocation2 + $0x8d] sm:$0xff] }
 0x1bb   : > { %8304 = vst [vmem:[#allocation127_spill] sm:$0xff] %v5255_v54  ;;  %8307 = vst [vmem:[#allocation130_spill] sm:$0xff] %v5269_v12  ;;  %v5273_v1 = vmul.f32 %v5079_v18, %v5244_v14  ;;  %v2638_v11 = vmul.f32 %v5083_v6, %v2538_v63  ;;  %v2639_v45 = vmul.f32 %v5083_v6, %v5244_v14  ;;  %v2814_v6 = vld [vmem:[#allocation2 + $0x6] sm:$0xff] }
 0x1bc   : > { %8305 = vst [vmem:[#allocation128_spill] sm:$0xff] %v5265_v19  ;;  %v5280_v55 = vmul.f32 %v5143_v2, %v5246_v42  ;;  %v2446_v56 = vadd.f32 %v2430_v51, %v2410_v0  ;;  %v2447_v30 = vadd.f32 %v2431_v57, %v2411_v47  ;;  %v1256_v34 = vadd.f32 %v1240_v10, %v1220_v13  ;;  %v5298_v10 = vld [vmem:[#allocation2 + $0xe0] sm:$0xff]  ;;  %v5302_v0 = vld [vmem:[#allocation2 + $0xad] sm:$0xff] }
 0x1bd   : > { %8308 = vst [vmem:[#allocation131_spill] sm:$0xff] %v5273_v1  ;;  %v1257_v21 = vadd.f32 %v1241_v39, %v1221_v25  ;;  %8309 = vst [vmem:[#allocation132_spill] sm:$0xff] %v5282_v5  ;;  %v1276_v18 = vmul.f32 %v4714_v7, %v4734_v16  ;;  %v1277_v63 = vmul.f32 %v4714_v7, %v4736_v17  ;;  %v5300_v39 = vld [vmem:[#allocation2 + $0xe8] sm:$0xff] }
 0x1be   : > { %8310 = vst [vmem:[#allocation133_spill] sm:$0xff] %v5284_v31  ;;  %v1312_v14 = vmul.f32 %v4732_v15, %v4752_v26  ;;  %v1313_v1 = vmul.f32 %v4732_v15, %v4754_v27  ;;  %v2482_v51 = vadd.f32 %v2466_v58, %v2446_v56  ;;  %v2483_v57 = vadd.f32 %v2467_v46, %v2447_v30  ;;  %v5304_v47 = vld [vmem:[#allocation2 + $0xc5] sm:$0xff]  ;;  %v2815_v42 = vld [vmem:[#allocation2 + $0xe] sm:$0xff] }
 0x1bf   : > { %v2675_v13 = vmul.f32 %v5143_v2, %v5267_v4  ;;  %v2710_v25 = vmul.f32 %v5147_v36, %v5269_v12  ;;  %8311 = vst [vmem:[#allocation134_spill] sm:$0xff] %v5302_v0  ;;  %8312 = vst [vmem:[#allocation135_spill] sm:$0xff] %v5304_v47  ;;  %v1292_v19 = vadd.f32 %v1276_v18, %v1256_v34  ;;  %v5310_v2 = vld [vmem:[#allocation2 + $0xcd] sm:$0xff] }
 0x1c0   : > { %v1293_v53 = vadd.f32 %v1277_v63, %v1257_v21  ;;  %v1348_v58 = vmul.f32 %v4743_v20, %v4759_v29  ;;  %v1349_v46 = vmul.f32 %v4743_v20, %v4765_v35  ;;  %v2518_v56 = vadd.f32 %v2502_v48, %v2482_v51  ;;  %8313 = vst [vmem:[#allocation136_spill] sm:$0xff] %v5310_v2  ;;  %v2816_v18 = vld [vmem:[#allocation2 + $0x26] sm:$0xff] }
 0x1c1   : > { %v2519_v30 = vadd.f32 %v2503_v22, %v2483_v57  ;;  %v2711_v12 = vmul.f32 %v5147_v36, %v5282_v5  ;;  %v2746_v4 = vmul.f32 %v5151_v59, %v5284_v31  ;;  %v1328_v34 = vadd.f32 %v1312_v14, %v1292_v19  ;;  %v2817_v31 = vld [vmem:[#allocation2 + $0x2e] sm:$0xff] }
 0x1c2   : > { %v1329_v21 = vadd.f32 %v1313_v1, %v1293_v53  ;;  %v1384_v63 = vmul.f32 %v4757_v28, %v5298_v10  ;;  %v1385_v48 = vmul.f32 %v4757_v28, %v5300_v39  ;;  %v2582_v22 = vadd.f32 %v5227_v52, %v2518_v56  ;;  %v5327_v53 = vld [vmem:[#allocation2 + $0x46] sm:$0xff] }
 0x1c3   : > { %v2583_v51 = vadd.f32 %v2567_v33, %v2519_v30  ;;  %v2747_v57 = vmul.f32 %v5151_v59, %v5302_v0  ;;  %v2782_v36 = vmul.f32 %v5155_v40, %v5304_v47  ;;  %v2783_v14 = vmul.f32 %v5155_v40, %v5310_v2  ;;  %8314 = vst [vmem:[#allocation137_spill] sm:$0xff] %v5327_v53  ;;  %v5335_v30 = vld [vmem:[#allocation2 + $0x4e] sm:$0xff] }
 0x1c4   : > { %v2846_v19 = vmul.f32 %v5194_v41, %v2814_v6  ;;  %v1364_v1 = vadd.f32 %v1348_v58, %v1328_v34  ;;  %v1365_v5 = vadd.f32 %v1349_v46, %v1329_v21  ;;  %v2618_v43 = vadd.f32 %v5240_v49, %v2582_v22  ;;  %8316 = vst [vmem:[#allocation139_spill] sm:$0xff] %v5335_v30  ;;  %v8321_v21 = vld [vmem:[#allocation38_spill] sm:$0xff] }
 0x1c5   : > { %v2619_v52 = vadd.f32 %v2603_v62, %v2583_v51  ;;  %v2847_v33 = vmul.f32 %v5194_v41, %v2815_v42  ;;  %v5333_v56 = vmul.f32 %v5194_v41, %v2816_v18  ;;  %v5338_v59 = vmul.f32 %v5194_v41, %v2817_v31  ;;  %v5346_v42 = vld [vmem:[#allocation2 + $0x66] sm:$0xff]  ;;  %v8323_v41 = vld [vmem:[#allocation20_spill] sm:$0xff] }
 0x1c6   : > { %v2882_v40 = vmul.f32 %v5197_v60, %v2816_v18  ;;  %v1400_v2 = vadd.f32 %v1384_v63, %v1364_v1  ;;  %v1401_v47 = vadd.f32 %v1385_v48, %v1365_v5  ;;  %v2654_v6 = vadd.f32 %v2638_v11, %v2618_v43  ;;  %8319 = vst [vmem:[#allocation142_spill] sm:$0xff] %v5346_v42  ;;  %v8320_v62 = vld [vmem:[#allocation37_spill] sm:$0xff]  ;;  %v8322_v51 = vld [vmem:[#allocation22_spill] sm:$0xff]  ;;  %v8324_v18 = vld [vmem:[#allocation23_spill] sm:$0xff] }
 0x1c7   : > { %8315 = vst [vmem:[#allocation138_spill] sm:$0xff] %v5333_v56  ;;  %8317 = vst [vmem:[#allocation140_spill] sm:$0xff] %v5338_v59  ;;  %v2655_v58 = vadd.f32 %v2639_v45, %v2619_v52  ;;  %v2883_v46 = vmul.f32 %v5197_v60, %v2817_v31  ;;  %v5344_v49 = vmul.f32 %v5197_v60, %v5327_v53  ;;  %v5361_v63 = vld [vmem:[#allocation2 + $0x6e] sm:$0xff]  ;;  %v5377_v56 = vld [vmem:[#allocation2 + $0xa6] sm:$0xff] }
 0x1c8   : > { %v1464_v34 = vadd.f32 %v8320_v62, %v1400_v2  ;;  %v1465_v22 = vadd.f32 %v8321_v21, %v1401_v47  ;;  %v1520_v59 = vmul.f32 %v8323_v41, %v8322_v51  ;;  %v1521_v5 = vmul.f32 %v8323_v41, %v8324_v18  ;;  %8326 = vst [vmem:[#allocation38_spill] sm:$0xff] %v5361_v63  ;;  %v5363_v2 = vld [vmem:[#allocation2 + $0x86] sm:$0xff]  ;;  %v8329_v1 = vld [vmem:[#allocation47_spill] sm:$0xff] }
 0x1c9   : > { %8318 = vst [vmem:[#allocation141_spill] sm:$0xff] %v5344_v49  ;;  %v2690_v43 = vadd.f32 %v5280_v55, %v2654_v6  ;;  %v2691_v11 = vadd.f32 %v2675_v13, %v2655_v58  ;;  %v5357_v31 = vmul.f32 %v5197_v60, %v5335_v30  ;;  %v2918_v45 = vmul.f32 %v5204_v38, %v5327_v53  ;;  %v8328_v47 = vld [vmem:[#allocation46_spill] sm:$0xff]  ;;  %v8330_v62 = vld [vmem:[#allocation25_spill] sm:$0xff] }
 0x1ca   : > { %8327 = vst [vmem:[#allocation22_spill] sm:$0xff] %v5363_v2  ;;  %v1500_v48 = vadd.f32 %v8328_v47, %v1464_v34  ;;  %v1501_v52 = vadd.f32 %v8329_v1, %v1465_v22  ;;  %v8331_v21 = vld [vmem:[#allocation21_spill] sm:$0xff]  ;;  %v8332_v55 = vld [vmem:[#allocation26_spill] sm:$0xff]  ;;  %v2919_v60 = vmul.f32 %v5204_v38, %v5335_v30  ;;  %v2954_v53 = vmul.f32 %v5207_v37, %v5346_v42  ;;  %v8335_v47 = vld [vmem:[#allocation28_spill] sm:$0xff] }
 0x1cb   : > { %8325 = vst [vmem:[#allocation37_spill] sm:$0xff] %v5357_v31  ;;  %v1556_v49 = vmul.f32 %v8331_v21, %v8330_v62  ;;  %v1557_v13 = vmul.f32 %v8331_v21, %v8332_v55  ;;  %v2726_v6 = vadd.f32 %v2710_v25, %v2690_v43  ;;  %v2727_v58 = vadd.f32 %v2711_v12, %v2691_v11  ;;  %v5375_v31 = vld [vmem:[#allocation2 + $0x8e] sm:$0xff]  ;;  %v8336_v1 = vld [vmem:[#allocation24_spill] sm:$0xff]  ;;  %v8337_v62 = vld [vmem:[#allocation29_spill] sm:$0xff] }
 0x1cc   : > { %8333 = vst [vmem:[#allocation23_spill] sm:$0xff] %v5375_v31  ;;  %8334 = vst [vmem:[#allocation46_spill] sm:$0xff] %v5377_v56  ;;  %v1536_v34 = vadd.f32 %v1520_v59, %v1500_v48  ;;  %v1537_v22 = vadd.f32 %v1521_v5, %v1501_v52  ;;  %v1592_v41 = vmul.f32 %v8336_v1, %v8335_v47  ;;  %v5387_v30 = vld [vmem:[#allocation2 + $0xe1] sm:$0xff]  ;;  %v5389_v38 = vld [vmem:[#allocation2 + $0xe9] sm:$0xff] }
 0x1cd   : > { %v1593_v21 = vmul.f32 %v8336_v1, %v8337_v62  ;;  %v2762_v25 = vadd.f32 %v2746_v4, %v2726_v6  ;;  %v2763_v12 = vadd.f32 %v2747_v57, %v2727_v58  ;;  %v2955_v43 = vmul.f32 %v5207_v37, %v5361_v63  ;;  %8338 = vst [vmem:[#allocation47_spill] sm:$0xff] %v5387_v30  ;;  %v5391_v59 = vld [vmem:[#allocation2 + $0xae] sm:$0xff]  ;;  %v5393_v5 = vld [vmem:[#allocation2 + $0xc6] sm:$0xff]  ;;  %v8344_v57 = vld [vmem:[#allocation32_spill] sm:$0xff] }
 0x1ce   : > { %v2990_v11 = vmul.f32 %v5249_v44, %v5363_v2  ;;  %8339 = vst [vmem:[#allocation143_spill] sm:$0xff] %v5389_v38  ;;  %8340 = vst [vmem:[#allocation144_spill] sm:$0xff] %v5391_v59  ;;  %v1572_v48 = vadd.f32 %v1556_v49, %v1536_v34  ;;  %v1573_v52 = vadd.f32 %v1557_v13, %v1537_v22  ;;  %v8342_v42 = vld [vmem:[#allocation31_spill] sm:$0xff]  ;;  %v8346_v49 = vld [vmem:[#allocation30_spill] sm:$0xff] }
 0x1cf   : > { %8341 = vst [vmem:[#allocation145_spill] sm:$0xff] %v5393_v5  ;;  %v8343_v1 = vld [vmem:[#allocation27_spill] sm:$0xff]  ;;  %v2798_v58 = vadd.f32 %v2782_v36, %v2762_v25  ;;  %v2799_v37 = vadd.f32 %v2783_v14, %v2763_v12  ;;  %v2991_v2 = vmul.f32 %v5249_v44, %v5375_v31  ;;  %v3026_v62 = vmul.f32 %v5252_v24, %v5377_v56  ;;  %v5417_v31 = vld [vmem:[#allocation2 + $0xe2] sm:$0xff] }
 0x1d0   : > { %v1628_v4 = vmul.f32 %v8343_v1, %v8342_v42  ;;  %v1629_v6 = vmul.f32 %v8343_v1, %v8344_v57  ;;  %v5399_v63 = vld [vmem:[#allocation2 + $0xce] sm:$0xff]  ;;  %v1608_v47 = vadd.f32 %v1592_v41, %v1572_v48  ;;  %v1609_v55 = vadd.f32 %v1593_v21, %v1573_v52  ;;  %v8347_v21 = vld [vmem:[#allocation44_spill] sm:$0xff]  ;;  %8349 = vst [vmem:[#allocation32_spill] sm:$0xff] %v5417_v31 }
 0x1d1   : > { %8345 = vst [vmem:[#allocation31_spill] sm:$0xff] %v5399_v63  ;;  %v1664_v13 = vmul.f32 %v8346_v49, %v5387_v30  ;;  %v1665_v34 = vmul.f32 %v8346_v49, %v5389_v38  ;;  %v2862_v22 = vadd.f32 %v2846_v19, %v2798_v58  ;;  %v2863_v1 = vadd.f32 %v2847_v33, %v2799_v37  ;;  %v8348_v48 = vld [vmem:[#allocation39_spill] sm:$0xff]  ;;  %v8350_v19 = vld [vmem:[#allocation48_spill] sm:$0xff]  ;;  %v8351_v33 = vld [vmem:[#allocation50_spill] sm:$0xff] }
 0x1d2   : > { %v3027_v36 = vmul.f32 %v5252_v24, %v5391_v59  ;;  %v3062_v14 = vmul.f32 %v5255_v54, %v5393_v5  ;;  %v3063_v25 = vmul.f32 %v5255_v54, %v5399_v63  ;;  %v1644_v12 = vadd.f32 %v1628_v4, %v1608_v47  ;;  %v8352_v58 = vld [vmem:[#allocation43_spill] sm:$0xff]  ;;  %v8355_v47 = vld [vmem:[#allocation56_spill] sm:$0xff]  ;;  %v8356_v4 = vld [vmem:[#allocation49_spill] sm:$0xff] }
 0x1d3   : > { %v1645_v41 = vadd.f32 %v1629_v6, %v1609_v55  ;;  %v1800_v52 = vmul.f32 %v8348_v48, %v8347_v21  ;;  %v2898_v44 = vadd.f32 %v2882_v40, %v2862_v22  ;;  %v2899_v56 = vadd.f32 %v2883_v46, %v2863_v1  ;;  %v5423_v49 = vld [vmem:[#allocation2 + $0xea] sm:$0xff]  ;;  %v8357_v1 = vld [vmem:[#allocation57_spill] sm:$0xff]  ;;  %v8360_v63 = vld [vmem:[#allocation52_spill] sm:$0xff] }
 0x1d4   : > { %v1801_v37 = vmul.f32 %v8348_v48, %v8350_v19  ;;  %v1836_v24 = vmul.f32 %v8352_v58, %v8351_v33  ;;  %v1680_v59 = vadd.f32 %v1664_v13, %v1644_v12  ;;  %8353 = vst [vmem:[#allocation146_spill] sm:$0xff] %v5423_v49  ;;  %v8354_v54 = vld [vmem:[#allocation51_spill] sm:$0xff]  ;;  %v1872_v6 = vmul.f32 %v8356_v4, %v8355_v47  ;;  %v8358_v21 = vld [vmem:[#allocation62_spill] sm:$0xff]  ;;  %v8361_v13 = vld [vmem:[#allocation53_spill] sm:$0xff] }
 0x1d5   : > { %v1681_v5 = vadd.f32 %v1665_v34, %v1645_v41  ;;  %v1837_v55 = vmul.f32 %v8352_v58, %v8354_v54  ;;  %v2934_v40 = vadd.f32 %v2918_v45, %v2898_v44  ;;  %v2935_v46 = vadd.f32 %v2919_v60, %v2899_v56  ;;  %v8359_v48 = vld [vmem:[#allocation55_spill] sm:$0xff]  ;;  %v8363_v58 = vld [vmem:[#allocation60_spill] sm:$0xff]  ;;  %v8364_v44 = vld [vmem:[#allocation69_spill] sm:$0xff] }
 0x1d6   : > { %v1873_v22 = vmul.f32 %v8356_v4, %v8357_v1  ;;  %v1908_v19 = vmul.f32 %v8359_v48, %v8358_v21  ;;  %v1744_v33 = vadd.f32 %v8360_v63, %v1680_v59  ;;  %v8362_v12 = vld [vmem:[#allocation63_spill] sm:$0xff]  ;;  %v1944_v54 = vmul.f32 %v8363_v58, %v5417_v31  ;;  %v8365_v56 = vld [vmem:[#allocation68_spill] sm:$0xff]  ;;  %v8366_v4 = vld [vmem:[#allocation65_spill] sm:$0xff] }
 0x1d7   : > { %v1745_v34 = vadd.f32 %v8361_v13, %v1681_v5  ;;  %v1909_v41 = vmul.f32 %v8359_v48, %v8362_v12  ;;  %v2970_v38 = vadd.f32 %v2954_v53, %v2934_v40  ;;  %v2971_v47 = vadd.f32 %v2955_v43, %v2935_v46  ;;  %v8367_v63 = vld [vmem:[#allocation66_spill] sm:$0xff]  ;;  %v8369_v13 = vld [vmem:[#allocation71_spill] sm:$0xff]  ;;  %v8370_v31 = vld [vmem:[#allocation80_spill] sm:$0xff] }
 0x1d8   : > { %v1945_v60 = vmul.f32 %v8363_v58, %v5423_v49  ;;  %v5443_v45 = vmul.f32 %v8365_v56, %v8364_v44  ;;  %v1780_v21 = vadd.f32 %v8366_v4, %v1744_v33  ;;  %v5447_v5 = vld [vmem:[#allocation2 + $0xe3] sm:$0xff]  ;;  %v5451_v48 = vmul.f32 %v8365_v56, %v8369_v13  ;;  %v5457_v58 = vld [vmem:[#allocation2 + $0xeb] sm:$0xff]  ;;  %v8374_v33 = vld [vmem:[#allocation84_spill] sm:$0xff] }
 0x1d9   : > { %v1781_v59 = vadd.f32 %v8367_v63, %v1745_v34  ;;  %8368 = vst [vmem:[#allocation52_spill] sm:$0xff] %v5447_v5  ;;  %v8371_v53 = vld [vmem:[#allocation78_spill] sm:$0xff]  ;;  %v3006_v40 = vadd.f32 %v2990_v11, %v2970_v38  ;;  %v3007_v46 = vadd.f32 %v2991_v2, %v2971_v47  ;;  %8372 = vst [vmem:[#allocation53_spill] sm:$0xff] %v5457_v58  ;;  %v8373_v44 = vld [vmem:[#allocation83_spill] sm:$0xff] }
 0x1da   : > { %v5455_v43 = vmul.f32 %v8371_v53, %v8370_v31  ;;  %v5461_v49 = vmul.f32 %v8371_v53, %v8373_v44  ;;  %v8375_v4 = vld [vmem:[#allocation79_spill] sm:$0xff]  ;;  %v1816_v63 = vadd.f32 %v1800_v52, %v1780_v21  ;;  %v8376_v56 = vld [vmem:[#allocation89_spill] sm:$0xff]  ;;  %v8377_v31 = vld [vmem:[#allocation90_spill] sm:$0xff] }
 0x1db   : > { %v5465_v34 = vmul.f32 %v8375_v4, %v8374_v33  ;;  %v1817_v12 = vadd.f32 %v1801_v37, %v1781_v59  ;;  %v5469_v13 = vmul.f32 %v8375_v4, %v8376_v56  ;;  %v8378_v1 = vld [vmem:[#allocation82_spill] sm:$0xff]  ;;  %v3042_v2 = vadd.f32 %v3026_v62, %v3006_v40  ;;  %v8379_v47 = vld [vmem:[#allocation91_spill] sm:$0xff]  ;;  %v8380_v44 = vld [vmem:[#allocation85_spill] sm:$0xff] }
 0x1dc   : > { %v5473_v38 = vmul.f32 %v8378_v1, %v8377_v31  ;;  %v3043_v11 = vadd.f32 %v3027_v36, %v3007_v46  ;;  %v5477_v53 = vmul.f32 %v8378_v1, %v8379_v47  ;;  %v5481_v33 = vmul.f32 %v8380_v44, %v5447_v5  ;;  %v5486_v21 = vld [vmem:[%s7566_s4] ss:$0 sm:$0xff]  ;;  %v8382_v62 = vld [vmem:[#allocation94_spill] sm:$0xff]  ;;  %v8383_v1 = vld [vmem:[#allocation108_spill] sm:$0xff] }
 0x1dd   : > { %8381 = vst [vmem:[#allocation65_spill] sm:$0xff] %v5486_v21  ;;  %v1852_v52 = vadd.f32 %v1836_v24, %v1816_v63  ;;  %v1853_v37 = vadd.f32 %v1837_v55, %v1817_v12  ;;  %v5490_v59 = vmul.f32 %v8380_v44, %v5457_v58  ;;  %v5494_v36 = vmul.f32 %v8382_v62, %v5139_v32  ;;  %v8384_v47 = vld [vmem:[#allocation109_spill] sm:$0xff]  ;;  %v8385_v4 = vld [vmem:[#allocation95_spill] sm:$0xff] }
 0x1de   : > { %v3078_v40 = vadd.f32 %v3062_v14, %v3042_v2  ;;  %v3079_v46 = vadd.f32 %v3063_v25, %v3043_v11  ;;  %v5498_v5 = vmul.f32 %v8382_v62, %v8383_v1  ;;  %v5502_v31 = vmul.f32 %v8385_v4, %v8384_v47  ;;  %v8386_v63 = vld [vmem:[#allocation113_spill] sm:$0xff]  ;;  %v8387_v44 = vld [vmem:[#allocation107_spill] sm:$0xff]  ;;  %v8388_v2 = vld [vmem:[#allocation12_spill] sm:$0xff] }
 0x1df   : > { %v1888_v24 = vadd.f32 %v1872_v6, %v1852_v52  ;;  %v1889_v55 = vadd.f32 %v1873_v22, %v1853_v37  ;;  %v5506_v12 = vmul.f32 %v8385_v4, %v5182_v23  ;;  %v5510_v32 = vmul.f32 %v8387_v44, %v8386_v63  ;;  %v8389_v23 = vld [vmem:[#allocation34_spill] sm:$0xff]  ;;  %v8390_v47 = vld [vmem:[#allocation35_spill] sm:$0xff] }
 0x1e0   : > { %v3101_v14 = vadd.f32 %v5486_v21, %v3078_v40  ;;  %v3102_v25 = vadd.f32 %v5486_v21, %v3079_v46  ;;  %v1206_v11 = vmul.f32 %v8388_v2, %v4716_v8  ;;  %v1207_v62 = vmul.f32 %v8388_v2, %v4718_v9 }
 0x1e1   : > { %v1924_v6 = vadd.f32 %v1908_v19, %v1888_v24  ;;  %v1925_v22 = vadd.f32 %v1909_v41, %v1889_v55  ;;  %v1242_v52 = vmul.f32 %v4702_v3, %v4734_v16  ;;  %v1243_v37 = vmul.f32 %v4702_v3, %v4736_v17  ;;  %v8391_v24 = vld [vmem:[#allocation70_spill] sm:$0xff] }
 0x1e2   : > { %v3117_v4 = vmax.f32 %v3101_v14, 0.0  ;;  %v3118_v63 = vmax.f32 %v3102_v25, 0.0  ;;  %v1222_v40 = vadd.f32 %v1206_v11, %v8389_v23  ;;  %v1223_v46 = vadd.f32 %v1207_v62, %v8390_v47  ;;  %v8392_v14 = vld [vmem:[#allocation72_spill] sm:$0xff]  ;;  %v8397_v11 = vld [vmem:[#allocation81_spill] sm:$0xff] }
 0x1e3   : > { %v1960_v21 = vadd.f32 %v1944_v54, %v1924_v6  ;;  %v1961_v1 = vadd.f32 %v1945_v60, %v1925_v22  ;;  %v1278_v8 = vmul.f32 %v4714_v7, %v4752_v26  ;;  %v1279_v9 = vmul.f32 %v4714_v7, %v4754_v27  ;;  %v5536_v60 = vld [vmem:[#allocation2 + $0x100] sm:$0xff]  ;;  %v5538_v26 = vld [vmem:[#allocation2 + $0x108] sm:$0xff] }
 0x1e4   : > { %v3133_v19 = vpack.c.bf16 %v3118_v63, %v3117_v4  ;;  %v1258_v41 = vadd.f32 %v1242_v52, %v1222_v40  ;;  %v1259_v16 = vadd.f32 %v1243_v37, %v1223_v46  ;;  %v1314_v17 = vmul.f32 %v4732_v15, %v4759_v29  ;;  %8393 = vst [vmem:[#allocation66_spill] sm:$0xff] %v5536_v60  ;;  %v5543_v4 = vld [vmem:[#allocation2 + $0xe4] sm:$0xff]  ;;  %v5545_v29 = vld [vmem:[#allocation2 + $0xec] sm:$0xff] }
 0x1e5   : > { %v2024_v55 = vadd.f32 %v8391_v24, %v1960_v21  ;;  %v2025_v23 = vadd.f32 %v8392_v14, %v1961_v1  ;;  %v5534_v54 = vmul.f32 %v8387_v44, %v5186_v50  ;;  %8394 = vst [vmem:[#allocation89_spill] sm:$0xff] %v5538_v26  ;;  %v1315_v27 = vmul.f32 %v4732_v15, %v4765_v35  ;;  %v8396_v63 = vld [vmem:[#allocation77_spill] sm:$0xff]  ;;  %v8399_v35 = vld [vmem:[#allocation111_spill] sm:$0xff]  ;;  %v8402_v14 = vld [vmem:[#allocation88_spill] sm:$0xff] }
 0x1e6   : > { %3895 = vmatprep.mubr.msk.bf16.mxu1 %vm968_vm2, %v3133_v19  ;;  %8395 = vst [vmem:[#allocation34_spill] sm:$0xff] %v5545_v29  ;;  %v1294_v47 = vadd.f32 %v1278_v8, %v1258_v41  ;;  %v1295_v21 = vadd.f32 %v1279_v9, %v1259_v16  ;;  %v1350_v1 = vmul.f32 %v4743_v20, %v5298_v10  ;;  %v8398_v22 = vld [vmem:[#allocation117_spill] sm:$0xff]  ;;  %v8400_v16 = vld [vmem:[#allocation114_spill] sm:$0xff] }
 0x1e7   : > { %v1351_v62 = vmul.f32 %v4743_v20, %v5300_v39  ;;  %v2060_v25 = vadd.f32 %v8396_v63, %v2024_v55  ;;  %v2061_v6 = vadd.f32 %v8397_v11, %v2025_v23  ;;  %v5555_v52 = vmul.f32 %v8399_v35, %v8398_v22  ;;  %v8405_v11 = vld [vmem:[#allocation101_spill] sm:$0xff] }
 0x1e8   : > { %v5559_v37 = vmul.f32 %v8399_v35, %v5201_v61  ;;  %v1330_v40 = vadd.f32 %v1314_v17, %v1294_v47  ;;  %v1331_v46 = vadd.f32 %v1315_v27, %v1295_v21  ;;  %v1386_v8 = vmul.f32 %v4757_v28, %v5536_v60  ;;  %v8401_v17 = vld [vmem:[#allocation124_spill] sm:$0xff]  ;;  %v8403_v27 = vld [vmem:[#allocation129_spill] sm:$0xff]  ;;  %v8407_v60 = vld [vmem:[#allocation19_spill] sm:$0xff] }
 0x1e9   : > { %v1387_v9 = vmul.f32 %v4757_v28, %v5538_v26  ;;  %v2096_v19 = vadd.f32 %v5443_v45, %v2060_v25  ;;  %v2097_v41 = vadd.f32 %v5451_v48, %v2061_v6  ;;  %v5569_v24 = vmul.f32 %v8400_v16, %v5543_v4  ;;  %v8404_v25 = vld [vmem:[#allocation130_spill] sm:$0xff]  ;;  %v8406_v28 = vld [vmem:[#allocation132_spill] sm:$0xff] }
 0x1ea   : > { %v5573_v55 = vmul.f32 %v8400_v16, %v5545_v29  ;;  %v5577_v23 = vmul.f32 %v8402_v14, %v8401_v17  ;;  %v5581_v47 = vmul.f32 %v8402_v14, %v8403_v27  ;;  %v1366_v21 = vadd.f32 %v1350_v1, %v1330_v40  ;;  %v8409_v40 = vld [vmem:[#allocation102_spill] sm:$0xff] }
 0x1eb   : > { %v1367_v45 = vadd.f32 %v1351_v62, %v1331_v46  ;;  %v2132_v48 = vadd.f32 %v5455_v43, %v2096_v19  ;;  %v2133_v63 = vadd.f32 %v5461_v49, %v2097_v41  ;;  %v5587_v6 = vmul.f32 %v8405_v11, %v8404_v25  ;;  %v8408_v62 = vld [vmem:[#allocation133_spill] sm:$0xff]  ;;  %v8419_v25 = vld [vmem:[#allocation136_spill] sm:$0xff] }
 0x1ec   : > { %v5591_v26 = vmul.f32 %v8405_v11, %v8406_v28  ;;  %v1402_v17 = vadd.f32 %v1386_v8, %v1366_v21  ;;  %v1486_v14 = vmul.f32 %v8407_v60, %v8322_v51  ;;  %v1487_v1 = vmul.f32 %v8407_v60, %v8324_v18  ;;  %v5607_v8 = vld [vmem:[#allocation2 + $0xe5] sm:$0xff]  ;;  %v8412_v51 = vld [vmem:[#allocation40_spill] sm:$0xff] }
 0x1ed   : > { %v1403_v20 = vadd.f32 %v1387_v9, %v1367_v45  ;;  %v2168_v43 = vadd.f32 %v5465_v34, %v2132_v48  ;;  %v2169_v49 = vadd.f32 %v5469_v13, %v2133_v63  ;;  %v5601_v46 = vmul.f32 %v8409_v40, %v8408_v62  ;;  %8410 = vst [vmem:[#allocation35_spill] sm:$0xff] %v5607_v8  ;;  %v5609_v9 = vld [vmem:[#allocation2 + $0xed] sm:$0xff]  ;;  %v8413_v21 = vld [vmem:[#allocation41_spill] sm:$0xff]  ;;  %v8415_v34 = vld [vmem:[#allocation20_spill] sm:$0xff] }
 0x1ee   : > { %v5605_v19 = vmul.f32 %v8409_v40, %v5302_v0  ;;  %8411 = vst [vmem:[#allocation70_spill] sm:$0xff] %v5609_v9  ;;  %v1466_v41 = vadd.f32 %v8412_v51, %v1402_v17  ;;  %v8414_v45 = vld [vmem:[#allocation25_spill] sm:$0xff]  ;;  %v8416_v13 = vld [vmem:[#allocation26_spill] sm:$0xff]  ;;  %v8417_v40 = vld [vmem:[#allocation135_spill] sm:$0xff] }
 0x1ef   : > { %v1467_v18 = vadd.f32 %v8413_v21, %v1403_v20  ;;  %v1522_v48 = vmul.f32 %v8415_v34, %v8414_v45  ;;  %v1523_v63 = vmul.f32 %v8415_v34, %v8416_v13  ;;  %v2204_v11 = vadd.f32 %v5473_v38, %v2168_v43  ;;  %v8418_v0 = vld [vmem:[#allocation103_spill] sm:$0xff]  ;;  %v8420_v51 = vld [vmem:[#allocation28_spill] sm:$0xff]  ;;  %v8421_v21 = vld [vmem:[#allocation21_spill] sm:$0xff] }
 0x1f0   : > { %v2205_v62 = vadd.f32 %v5477_v53, %v2169_v49  ;;  %v5621_v28 = vmul.f32 %v8418_v0, %v8417_v40  ;;  %v5625_v27 = vmul.f32 %v8418_v0, %v8419_v25  ;;  %v1502_v17 = vadd.f32 %v1486_v14, %v1466_v41  ;;  %v8422_v60 = vld [vmem:[#allocation29_spill] sm:$0xff]  ;;  %v8423_v43 = vld [vmem:[#allocation104_spill] sm:$0xff]  ;;  %v8428_v25 = vld [vmem:[#allocation118_spill] sm:$0xff] }
 0x1f1   : > { %v1503_v20 = vadd.f32 %v1487_v1, %v1467_v18  ;;  %v1558_v45 = vmul.f32 %v8421_v21, %v8420_v51  ;;  %v1559_v13 = vmul.f32 %v8421_v21, %v8422_v60  ;;  %v2240_v38 = vadd.f32 %v5481_v33, %v2204_v11  ;;  %v8424_v41 = vld [vmem:[#allocation24_spill] sm:$0xff]  ;;  %v8426_v11 = vld [vmem:[#allocation97_spill] sm:$0xff]  ;;  %v8429_v40 = vld [vmem:[#allocation38_spill] sm:$0xff] }
 0x1f2   : > { %v2241_v53 = vadd.f32 %v5490_v59, %v2205_v62  ;;  %v5635_v49 = vmul.f32 %v8423_v43, %v5607_v8  ;;  %v5639_v0 = vmul.f32 %v8423_v43, %v5609_v9  ;;  %v1538_v14 = vadd.f32 %v1522_v48, %v1502_v17  ;;  %v8425_v51 = vld [vmem:[#allocation96_spill] sm:$0xff]  ;;  %v8427_v62 = vld [vmem:[#allocation142_spill] sm:$0xff]  ;;  %v8437_v21 = vld [vmem:[#allocation119_spill] sm:$0xff] }
 0x1f3   : > { %v1539_v1 = vadd.f32 %v1523_v63, %v1503_v20  ;;  %v1594_v18 = vmul.f32 %v8424_v41, %v8342_v42  ;;  %v1595_v60 = vmul.f32 %v8424_v41, %v8344_v57  ;;  %v2304_v33 = vadd.f32 %v8425_v51, %v2240_v38  ;;  %v5655_v48 = vld [vmem:[#allocation2 + $0x101] sm:$0xff]  ;;  %v5657_v63 = vld [vmem:[#allocation2 + $0x109] sm:$0xff] }
 0x1f4   : > { %v2305_v59 = vadd.f32 %v8426_v11, %v2241_v53  ;;  %v5649_v8 = vmul.f32 %v8428_v25, %v8427_v62  ;;  %v5653_v43 = vmul.f32 %v8428_v25, %v8429_v40  ;;  %8430 = vst [vmem:[#allocation72_spill] sm:$0xff] %v5655_v48  ;;  %8431 = vst [vmem:[#allocation77_spill] sm:$0xff] %v5657_v63  ;;  %v8432_v57 = vld [vmem:[#allocation27_spill] sm:$0xff]  ;;  %v8434_v51 = vld [vmem:[#allocation106_spill] sm:$0xff] }
 0x1f5   : > { %v1574_v42 = vadd.f32 %v1558_v45, %v1538_v14  ;;  %v1575_v17 = vadd.f32 %v1559_v13, %v1539_v1  ;;  %v1630_v20 = vmul.f32 %v8432_v57, %v5387_v30  ;;  %v8433_v38 = vld [vmem:[#allocation143_spill] sm:$0xff]  ;;  %v2340_v11 = vadd.f32 %v8434_v51, %v2304_v33  ;;  %v8435_v62 = vld [vmem:[#allocation110_spill] sm:$0xff] }
 0x1f6   : > { %v1631_v53 = vmul.f32 %v8432_v57, %v8433_v38  ;;  %v2341_v9 = vadd.f32 %v8435_v62, %v2305_v59  ;;  %v8436_v41 = vld [vmem:[#allocation22_spill] sm:$0xff]  ;;  %v8438_v40 = vld [vmem:[#allocation23_spill] sm:$0xff] }
 0x1f7   : > { %v5667_v25 = vmul.f32 %v8437_v21, %v8436_v41  ;;  %v5671_v34 = vmul.f32 %v8437_v21, %v8438_v40  ;;  %v5673_v45 = vld [vmem:[#allocation2 + $0xe6] sm:$0xff]  ;;  %v5675_v13 = vld [vmem:[#allocation2 + $0xee] sm:$0xff]  ;;  %v1610_v14 = vadd.f32 %v1594_v18, %v1574_v42  ;;  %v1611_v1 = vadd.f32 %v1595_v60, %v1575_v17  ;;  %v8444_v40 = vld [vmem:[#allocation144_spill] sm:$0xff] }
 0x1f8   : > { %8439 = vst [vmem:[#allocation81_spill] sm:$0xff] %v5673_v45  ;;  %8440 = vst [vmem:[#allocation117_spill] sm:$0xff] %v5675_v13  ;;  %v8441_v57 = vld [vmem:[#allocation30_spill] sm:$0xff]  ;;  %v2376_v59 = vadd.f32 %v5494_v36, %v2340_v11  ;;  %v2377_v62 = vadd.f32 %v5498_v5, %v2341_v9  ;;  %v8443_v41 = vld [vmem:[#allocation125_spill] sm:$0xff] }
 0x1f9   : > { %v1666_v38 = vmul.f32 %v8441_v57, %v5655_v48  ;;  %v1667_v33 = vmul.f32 %v8441_v57, %v5657_v63  ;;  %v8442_v51 = vld [vmem:[#allocation46_spill] sm:$0xff]  ;;  %v5689_v30 = vmul.f32 %v8443_v41, %v8444_v40  ;;  %v8446_v18 = vld [vmem:[#allocation145_spill] sm:$0xff]  ;;  %v8449_v17 = vld [vmem:[#allocation31_spill] sm:$0xff]  ;;  %v1646_v57 = vadd.f32 %v1630_v20, %v1610_v14 }
 0x1fa   : > { %v5685_v21 = vmul.f32 %v8443_v41, %v8442_v51  ;;  %v8447_v60 = vld [vmem:[#allocation126_spill] sm:$0xff]  ;;  %v1647_v36 = vadd.f32 %v1631_v53, %v1611_v1  ;;  %v2412_v5 = vadd.f32 %v5502_v31, %v2376_v59  ;;  %v2413_v9 = vadd.f32 %v5506_v12, %v2377_v62  ;;  %v8451_v11 = vld [vmem:[#allocation127_spill] sm:$0xff]  ;;  %v8454_v63 = vld [vmem:[#allocation44_spill] sm:$0xff] }
 0x1fb   : > { %8445 = vst [vmem:[#allocation40_spill] sm:$0xff] %v5689_v30  ;;  %v5693_v42 = vmul.f32 %v8447_v60, %v8446_v18  ;;  %v5697_v48 = vmul.f32 %v8447_v60, %v8449_v17  ;;  %v5703_v51 = vmul.f32 %v8451_v11, %v5673_v45  ;;  %v5707_v41 = vmul.f32 %v8451_v11, %v5675_v13  ;;  %v8456_v17 = vld [vmem:[#allocation48_spill] sm:$0xff]  ;;  %v8457_v53 = vld [vmem:[#allocation50_spill] sm:$0xff]  ;;  %v8458_v14 = vld [vmem:[#allocation39_spill] sm:$0xff] }
 0x1fc   : > { %v1682_v18 = vadd.f32 %v1666_v38, %v1646_v57  ;;  %v1683_v40 = vadd.f32 %v1667_v33, %v1647_v36  ;;  %v2448_v31 = vadd.f32 %v5510_v32, %v2412_v5  ;;  %v2449_v12 = vadd.f32 %v5534_v54, %v2413_v9  ;;  %v8459_v59 = vld [vmem:[#allocation51_spill] sm:$0xff]  ;;  %v5719_v11 = vld [vmem:[#allocation2 + $0x102] sm:$0xff]  ;;  %v8464_v13 = vld [vmem:[#allocation56_spill] sm:$0xff] }
 0x1fd   : > { %8448 = vst [vmem:[#allocation41_spill] sm:$0xff] %v5693_v42  ;;  %8450 = vst [vmem:[#allocation25_spill] sm:$0xff] %v5697_v48  ;;  %v8455_v42 = vld [vmem:[#allocation36_spill] sm:$0xff]  ;;  %v1802_v1 = vmul.f32 %v8458_v14, %v8457_v53  ;;  %v1803_v62 = vmul.f32 %v8458_v14, %v8459_v59  ;;  %v5721_v57 = vld [vmem:[#allocation2 + $0x10a] sm:$0xff] }
 0x1fe   : > { %8452 = vst [vmem:[#allocation26_spill] sm:$0xff] %v5703_v51  ;;  %8453 = vst [vmem:[#allocation28_spill] sm:$0xff] %v5707_v41  ;;  %v1766_v60 = vmul.f32 %v8455_v42, %v8454_v63  ;;  %v1767_v20 = vmul.f32 %v8455_v42, %v8456_v17  ;;  %v8462_v38 = vld [vmem:[#allocation54_spill] sm:$0xff]  ;;  %v8465_v17 = vld [vmem:[#allocation43_spill] sm:$0xff]  ;;  %v2484_v5 = vadd.f32 %v5555_v52, %v2448_v31 }
 0x1ff   : > { %8460 = vst [vmem:[#allocation29_spill] sm:$0xff] %v5719_v11  ;;  %8461 = vst [vmem:[#allocation96_spill] sm:$0xff] %v5721_v57  ;;  %v1746_v33 = vadd.f32 %v8462_v38, %v1682_v18  ;;  %v8463_v63 = vld [vmem:[#allocation58_spill] sm:$0xff]  ;;  %v1838_v45 = vmul.f32 %v8465_v17, %v8464_v13  ;;  %v8466_v32 = vld [vmem:[#allocation57_spill] sm:$0xff]  ;;  %v2485_v9 = vadd.f32 %v5559_v37, %v2449_v12 }
 0x200   : > { %v1747_v36 = vadd.f32 %v8463_v63, %v1683_v40  ;;  %v1839_v54 = vmul.f32 %v8465_v17, %v8466_v32  ;;  %v8467_v53 = vld [vmem:[#allocation62_spill] sm:$0xff]  ;;  %v8468_v59 = vld [vmem:[#allocation49_spill] sm:$0xff]  ;;  %v8469_v42 = vld [vmem:[#allocation63_spill] sm:$0xff]  ;;  %v2520_v32 = vadd.f32 %v5569_v24, %v2484_v5 }
 0x201   : > { %v1874_v14 = vmul.f32 %v8468_v59, %v8467_v53  ;;  %v1875_v41 = vmul.f32 %v8468_v59, %v8469_v42  ;;  %v1782_v51 = vadd.f32 %v1766_v60, %v1746_v33  ;;  %v8470_v38 = vld [vmem:[#allocation32_spill] sm:$0xff]  ;;  %v8471_v40 = vld [vmem:[#allocation55_spill] sm:$0xff]  ;;  %v8472_v48 = vld [vmem:[#allocation146_spill] sm:$0xff]  ;;  %v2521_v52 = vadd.f32 %v5573_v55, %v2485_v9 }
 0x202   : > { %v1783_v18 = vadd.f32 %v1767_v20, %v1747_v36  ;;  %v1910_v63 = vmul.f32 %v8471_v40, %v8470_v38  ;;  %v1911_v13 = vmul.f32 %v8471_v40, %v8472_v48  ;;  %v8473_v37 = vld [vmem:[#allocation60_spill] sm:$0xff]  ;;  %v8474_v60 = vld [vmem:[#allocation69_spill] sm:$0xff]  ;;  %v8475_v20 = vld [vmem:[#allocation67_spill] sm:$0xff] }
 0x203   : > { %v1946_v31 = vmul.f32 %v8473_v37, %v5719_v11  ;;  %v1947_v12 = vmul.f32 %v8473_v37, %v5721_v57  ;;  %v1818_v53 = vadd.f32 %v1802_v1, %v1782_v51  ;;  %v2046_v33 = vmul.f32 %v8475_v20, %v8474_v60  ;;  %v8476_v36 = vld [vmem:[#allocation71_spill] sm:$0xff]  ;;  %v8477_v38 = vld [vmem:[#allocation120_spill] sm:$0xff]  ;;  %v8478_v48 = vld [vmem:[#allocation121_spill] sm:$0xff] }
 0x204   : > { %v1819_v42 = vadd.f32 %v1803_v62, %v1783_v18  ;;  %v2047_v59 = vmul.f32 %v8475_v20, %v8476_v36  ;;  %v2584_v40 = vadd.f32 %v8477_v38, %v2520_v32  ;;  %v2585_v24 = vadd.f32 %v8478_v48, %v2521_v52  ;;  %v8479_v5 = vld [vmem:[#allocation80_spill] sm:$0xff]  ;;  %v8481_v17 = vld [vmem:[#allocation83_spill] sm:$0xff]  ;;  %v5755_v51 = vld [vmem:[#allocation2 + $0x103] sm:$0xff] }
 0x205   : > { %v8480_v55 = vld [vmem:[#allocation68_spill] sm:$0xff]  ;;  %v1854_v30 = vadd.f32 %v1838_v45, %v1818_v53  ;;  %8482 = vst [vmem:[#allocation97_spill] sm:$0xff] %v5755_v51  ;;  %v5757_v1 = vld [vmem:[#allocation2 + $0x10b] sm:$0xff] }
 0x206   : > { %v2082_v9 = vmul.f32 %v8480_v55, %v8479_v5  ;;  %v2083_v11 = vmul.f32 %v8480_v55, %v8481_v17  ;;  %v1855_v37 = vadd.f32 %v1839_v54, %v1819_v42  ;;  %8483 = vst [vmem:[#allocation106_spill] sm:$0xff] %v5757_v1  ;;  %v8484_v62 = vld [vmem:[#allocation84_spill] sm:$0xff]  ;;  %v8485_v18 = vld [vmem:[#allocation78_spill] sm:$0xff]  ;;  %v8487_v52 = vld [vmem:[#allocation131_spill] sm:$0xff] }
 0x207   : > { %v2118_v60 = vmul.f32 %v8485_v18, %v8484_v62  ;;  %v2119_v38 = vmul.f32 %v8485_v18, %v8376_v56  ;;  %v8486_v32 = vld [vmem:[#allocation128_spill] sm:$0xff]  ;;  %v2621_v36 = vadd.f32 %v8487_v52, %v2585_v24  ;;  %v8488_v5 = vld [vmem:[#allocation90_spill] sm:$0xff]  ;;  %v8489_v20 = vld [vmem:[#allocation79_spill] sm:$0xff]  ;;  %v1890_v54 = vadd.f32 %v1874_v14, %v1854_v30 }
 0x208   : > { %v2620_v48 = vadd.f32 %v8486_v32, %v2584_v40  ;;  %v5767_v57 = vmul.f32 %v8489_v20, %v8488_v5  ;;  %v8490_v45 = vld [vmem:[#allocation91_spill] sm:$0xff]  ;;  %v1891_v53 = vadd.f32 %v1875_v41, %v1855_v37  ;;  %v8491_v42 = vld [vmem:[#allocation52_spill] sm:$0xff]  ;;  %v8492_v55 = vld [vmem:[#allocation82_spill] sm:$0xff] }
 0x209   : > { %v5771_v17 = vmul.f32 %v8489_v20, %v8490_v45  ;;  %v5775_v62 = vmul.f32 %v8492_v55, %v8491_v42  ;;  %v5779_v56 = vmul.f32 %v8492_v55, %v5457_v58  ;;  %v2657_v24 = vadd.f32 %v5581_v47, %v2621_v36  ;;  %v8493_v32 = vld [vmem:[#allocation85_spill] sm:$0xff]  ;;  %v8494_v37 = vld [vmem:[#allocation100_spill] sm:$0xff]  ;;  %v8498_v36 = vld [vmem:[#allocation94_spill] sm:$0xff] }
 0x20a   : > { %v2656_v40 = vadd.f32 %v5577_v23, %v2620_v48  ;;  %v5785_v52 = vmul.f32 %v8493_v32, %v5755_v51  ;;  %v5789_v30 = vmul.f32 %v8493_v32, %v5757_v1  ;;  %v1926_v41 = vadd.f32 %v1910_v63, %v1890_v54  ;;  %v8495_v5 = vld [vmem:[#allocation93_spill] sm:$0xff]  ;;  %v8496_v55 = vld [vmem:[#allocation108_spill] sm:$0xff]  ;;  %v8502_v1 = vld [vmem:[#allocation95_spill] sm:$0xff] }
 0x20b   : > { %v1927_v14 = vadd.f32 %v1911_v13, %v1891_v53  ;;  %v5793_v45 = vmul.f32 %v8495_v5, %v8494_v37  ;;  %v5797_v58 = vmul.f32 %v8495_v5, %v8496_v55  ;;  %v2693_v47 = vadd.f32 %v5591_v26, %v2657_v24  ;;  %v8497_v48 = vld [vmem:[#allocation109_spill] sm:$0xff]  ;;  %v8499_v32 = vld [vmem:[#allocation112_spill] sm:$0xff] }
 0x20c   : > { %v2692_v23 = vadd.f32 %v5587_v6, %v2656_v40  ;;  %v5803_v51 = vmul.f32 %v8498_v36, %v8497_v48  ;;  %v5807_v63 = vmul.f32 %v8498_v36, %v8499_v32  ;;  %v1962_v13 = vadd.f32 %v1946_v31, %v1926_v41  ;;  %v5809_v53 = vld [vmem:[#allocation2 + $0x104] sm:$0xff] }
 0x20d   : > { %v1963_v54 = vadd.f32 %v1947_v12, %v1927_v14  ;;  %8500 = vst [vmem:[#allocation110_spill] sm:$0xff] %v5809_v53  ;;  %v8501_v37 = vld [vmem:[#allocation113_spill] sm:$0xff]  ;;  %v5817_v6 = vmul.f32 %v8502_v1, %v5186_v50  ;;  %v2729_v40 = vadd.f32 %v5605_v19, %v2693_v47  ;;  %v5823_v24 = vmul.f32 %v8387_v44, %v8398_v22  ;;  %v8504_v41 = vld [vmem:[#allocation74_spill] sm:$0xff]  ;;  %v8505_v47 = vld [vmem:[#allocation11_spill] sm:$0xff] }
 0x20e   : > { %v5813_v55 = vmul.f32 %v8502_v1, %v8501_v37  ;;  %v2728_v26 = vadd.f32 %v5601_v46, %v2692_v23  ;;  %v5827_v31 = vmul.f32 %v8387_v44, %v5201_v61  ;;  %v8503_v12 = vld [vmem:[#allocation73_spill] sm:$0xff]  ;;  %v5833_v50 = vmul.f32 %v8399_v35, %v5543_v4  ;;  %v4039_v37 = vld [vmem:[#allocation2 + $0x68] sm:$0xff] }
 0x20f   : > { %v2026_v32 = vadd.f32 %v8503_v12, %v1962_v13  ;;  %v2027_v14 = vadd.f32 %v8504_v41, %v1963_v54  ;;  %v5837_v46 = vmul.f32 %v8399_v35, %v5545_v29  ;;  %v2765_v22 = vadd.f32 %v5625_v27, %v2729_v40  ;;  %v4038_v23 = vld [vmem:[#allocation2 + $0x60] sm:$0xff] }
 0x210   : > { %v2764_v19 = vadd.f32 %v5621_v28, %v2728_v26  ;;  %v5843_v61 = vmul.f32 %v8400_v16, %v5809_v53  ;;  %v1172_v48 = vmul.f32 %v4038_v23, %v8505_v47  ;;  %v1173_v12 = vmul.f32 %v4039_v37, %v8505_v47  ;;  %v5847_v41 = vld [vmem:[#allocation2 + $0x80] sm:$0xff]  ;;  %v5853_v26 = vld [vmem:[#allocation2 + $0x88] sm:$0xff] }
 0x211   : > { %v2062_v13 = vadd.f32 %v2046_v33, %v2026_v32  ;;  %v2063_v54 = vadd.f32 %v2047_v59, %v2027_v14  ;;  %8506 = vst [vmem:[#allocation44_spill] sm:$0xff] %v5847_v41  ;;  %v1208_v35 = vmul.f32 %v5847_v41, %v8388_v2  ;;  %v2801_v27 = vadd.f32 %v5639_v0, %v2765_v22  ;;  %v5857_v23 = vld [vmem:[#allocation2 + $0xa0] sm:$0xff]  ;;  %v5861_v37 = vld [vmem:[#allocation2 + $0xa8] sm:$0xff]  ;;  %v8510_v22 = vld [vmem:[#allocation140_spill] sm:$0xff] }
 0x212   : > { %v2800_v28 = vadd.f32 %v5635_v49, %v2764_v19  ;;  %8507 = vst [vmem:[#allocation48_spill] sm:$0xff] %v5853_v26  ;;  %v1209_v40 = vmul.f32 %v5853_v26, %v8388_v2  ;;  %8508 = vst [vmem:[#allocation50_spill] sm:$0xff] %v5857_v23  ;;  %v1244_v59 = vmul.f32 %v5857_v23, %v4702_v3  ;;  %v8509_v19 = vld [vmem:[#allocation138_spill] sm:$0xff]  ;;  %v5867_v41 = vld [vmem:[#allocation2 + $0xc0] sm:$0xff] }
 0x213   : > { %v2098_v33 = vadd.f32 %v2082_v9, %v2062_v13  ;;  %v2099_v32 = vadd.f32 %v2083_v11, %v2063_v54  ;;  %v1224_v14 = vadd.f32 %v1208_v35, %v1172_v48  ;;  %v1245_v49 = vmul.f32 %v5861_v37, %v4702_v3  ;;  %v5871_v11 = vld [vmem:[#allocation2 + $0xc8] sm:$0xff]  ;;  %v8511_v48 = vld [vmem:[#allocation141_spill] sm:$0xff] }
 0x214   : > { %v2864_v0 = vadd.f32 %v8509_v19, %v2800_v28  ;;  %v2865_v53 = vadd.f32 %v8510_v22, %v2801_v27  ;;  %v1225_v29 = vadd.f32 %v1209_v40, %v1173_v12  ;;  %v1280_v2 = vmul.f32 %v5867_v41, %v4714_v7  ;;  %v8512_v54 = vld [vmem:[#allocation37_spill] sm:$0xff] }
 0x215   : > { %v2134_v26 = vadd.f32 %v2118_v60, %v2098_v33  ;;  %v2135_v23 = vadd.f32 %v2119_v38, %v2099_v32  ;;  %v1260_v9 = vadd.f32 %v1244_v59, %v1224_v14  ;;  %v1281_v35 = vmul.f32 %v5871_v11, %v4714_v7  ;;  %v5881_v60 = vld [vmem:[#allocation2 + $0x120] sm:$0xff]  ;;  %v5887_v14 = vld [vmem:[#allocation2 + $0x128] sm:$0xff] }
 0x216   : > { %v2900_v13 = vadd.f32 %v8511_v48, %v2864_v0  ;;  %v2901_v28 = vadd.f32 %v8512_v54, %v2865_v53  ;;  %v1261_v19 = vadd.f32 %v1245_v49, %v1225_v29  ;;  %v1316_v12 = vmul.f32 %v4732_v15, %v5298_v10  ;;  %v8513_v53 = vld [vmem:[#allocation66_spill] sm:$0xff]  ;;  %v8514_v49 = vld [vmem:[#allocation16_spill] sm:$0xff]  ;;  %v8516_v22 = vld [vmem:[#allocation17_spill] sm:$0xff] }
 0x217   : > { %v2170_v27 = vadd.f32 %v5767_v57, %v2134_v26  ;;  %v2171_v40 = vadd.f32 %v5771_v17, %v2135_v23  ;;  %v1296_v38 = vadd.f32 %v1280_v2, %v1260_v9  ;;  %v1317_v59 = vmul.f32 %v4732_v15, %v5300_v39  ;;  %v5893_v26 = vld [vmem:[#allocation2 + $0x10c] sm:$0xff]  ;;  %v8515_v23 = vld [vmem:[#allocation89_spill] sm:$0xff]  ;;  %v8517_v54 = vld [vmem:[#allocation40_spill] sm:$0xff] }
 0x218   : > { %v2936_v33 = vadd.f32 %v5649_v8, %v2900_v13  ;;  %v2937_v32 = vadd.f32 %v5653_v43, %v2901_v28  ;;  %v1297_v29 = vadd.f32 %v1281_v35, %v1261_v19  ;;  %v1352_v10 = vmul.f32 %v8514_v49, %v8513_v53  ;;  %v8518_v19 = vld [vmem:[#allocation98_spill] sm:$0xff] }
 0x219   : > { %v2206_v57 = vadd.f32 %v5775_v62, %v2170_v27  ;;  %v2207_v17 = vadd.f32 %v5779_v56, %v2171_v40  ;;  %v1332_v2 = vadd.f32 %v1316_v12, %v1296_v38  ;;  %v1353_v39 = vmul.f32 %v8514_v49, %v8515_v23  ;;  %v8519_v27 = vld [vmem:[#allocation99_spill] sm:$0xff] }
 0x21a   : > { %v2972_v8 = vadd.f32 %v5667_v25, %v2936_v33  ;;  %v2973_v43 = vadd.f32 %v5671_v34, %v2937_v32  ;;  %v1333_v0 = vadd.f32 %v1317_v59, %v1297_v29  ;;  %v1388_v9 = vmul.f32 %v8516_v22, %v5881_v60  ;;  %v8521_v33 = vld [vmem:[#allocation41_spill] sm:$0xff] }
 0x21b   : > { %v2242_v35 = vadd.f32 %v5785_v52, %v2206_v57  ;;  %v2243_v62 = vadd.f32 %v5789_v30, %v2207_v17  ;;  %v1368_v48 = vadd.f32 %v1352_v10, %v1332_v2  ;;  %v1389_v56 = vmul.f32 %v8516_v22, %v5887_v14  ;;  %v5911_v52 = vld [vmem:[#allocation2 + $0x81] sm:$0xff]  ;;  %v8520_v30 = vld [vmem:[#allocation19_spill] sm:$0xff] }
 0x21c   : > { %v3008_v13 = vadd.f32 %v5685_v21, %v2972_v8  ;;  %v3009_v28 = vadd.f32 %v8517_v54, %v2973_v43  ;;  %v2507_v25 = vmul.f32 %v8400_v16, %v5893_v26  ;;  %v1369_v34 = vadd.f32 %v1353_v39, %v1333_v0  ;;  %v8522_v29 = vld [vmem:[#allocation25_spill] sm:$0xff]  ;;  %v5917_v57 = vld [vmem:[#allocation2 + $0x89] sm:$0xff] }
 0x21d   : > { %v2306_v12 = vadd.f32 %v8518_v19, %v2242_v35  ;;  %v2307_v40 = vadd.f32 %v8519_v27, %v2243_v62  ;;  %v1404_v38 = vadd.f32 %v1388_v9, %v1368_v48  ;;  %v1488_v59 = vmul.f32 %v5911_v52, %v8520_v30  ;;  %v8523_v8 = vld [vmem:[#allocation42_spill] sm:$0xff]  ;;  %v8525_v9 = vld [vmem:[#allocation20_spill] sm:$0xff]  ;;  %v8528_v54 = vld [vmem:[#allocation45_spill] sm:$0xff] }
 0x21e   : > { %v3044_v32 = vadd.f32 %v8521_v33, %v3008_v13  ;;  %v3045_v21 = vadd.f32 %v8522_v29, %v3009_v28  ;;  %v1405_v10 = vadd.f32 %v1389_v56, %v1369_v34  ;;  %v1489_v17 = vmul.f32 %v5917_v57, %v8520_v30  ;;  %v5924_v0 = vld [vmem:[#allocation2 + $0xa1] sm:$0xff]  ;;  %v8527_v13 = vld [vmem:[#allocation28_spill] sm:$0xff]  ;;  %v5931_v34 = vld [vmem:[#allocation2 + $0xa9] sm:$0xff] }
 0x21f   : > { %v2342_v2 = vadd.f32 %v5793_v45, %v2306_v12  ;;  %v2343_v39 = vadd.f32 %v5797_v58, %v2307_v40  ;;  %v1468_v43 = vadd.f32 %v8523_v8, %v1404_v38  ;;  %8524 = vst [vmem:[#allocation51_spill] sm:$0xff] %v5924_v0  ;;  %v1524_v35 = vmul.f32 %v5924_v0, %v8525_v9  ;;  %v8526_v62 = vld [vmem:[#allocation26_spill] sm:$0xff]  ;;  %v8531_v40 = vld [vmem:[#allocation21_spill] sm:$0xff] }
 0x220   : > { %v3080_v48 = vadd.f32 %v8526_v62, %v3044_v32  ;;  %v3081_v56 = vadd.f32 %v8527_v13, %v3045_v21  ;;  %v1469_v28 = vadd.f32 %v8528_v54, %v1405_v10  ;;  %8529 = vst [vmem:[#allocation54_spill] sm:$0xff] %v5931_v34  ;;  %v1525_v45 = vmul.f32 %v5931_v34, %v8525_v9  ;;  %v5937_v27 = vld [vmem:[#allocation2 + $0xc1] sm:$0xff]  ;;  %v5943_v10 = vld [vmem:[#allocation2 + $0xc9] sm:$0xff]  ;;  %v8588_v34 = vld [vmem:[#allocation96_spill] sm:$0xff] }
 0x221   : > { %v2378_v58 = vadd.f32 %v5803_v51, %v2342_v2  ;;  %v2379_v19 = vadd.f32 %v5807_v63, %v2343_v39  ;;  %v1504_v12 = vadd.f32 %v1488_v59, %v1468_v43  ;;  %8530 = vst [vmem:[#allocation58_spill] sm:$0xff] %v5937_v27  ;;  %v1560_v38 = vmul.f32 %v5937_v27, %v8531_v40  ;;  %v8532_v33 = vld [vmem:[#allocation65_spill] sm:$0xff]  ;;  %v8534_v2 = vld [vmem:[#allocation47_spill] sm:$0xff]  ;;  %v8535_v39 = vld [vmem:[#allocation24_spill] sm:$0xff] }
 0x222   : > { %v3103_v32 = vadd.f32 %v8532_v33, %v3080_v48  ;;  %v3104_v29 = vadd.f32 %v8532_v33, %v3081_v56  ;;  %v1505_v21 = vadd.f32 %v1489_v17, %v1469_v28  ;;  %8533 = vst [vmem:[#allocation56_spill] sm:$0xff] %v5943_v10  ;;  %v1561_v8 = vmul.f32 %v5943_v10, %v8531_v40  ;;  %v5951_v54 = vld [vmem:[#allocation2 + $0x121] sm:$0xff]  ;;  %v8537_v56 = vld [vmem:[#allocation143_spill] sm:$0xff] }
 0x223   : > { %v2414_v51 = vadd.f32 %v5813_v55, %v2378_v58  ;;  %v2415_v63 = vadd.f32 %v5817_v6, %v2379_v19  ;;  %v1540_v59 = vadd.f32 %v1524_v35, %v1504_v12  ;;  %v1596_v43 = vmul.f32 %v8535_v39, %v8534_v2  ;;  %8536 = vst [vmem:[#allocation57_spill] sm:$0xff] %v5951_v54  ;;  %v5957_v10 = vld [vmem:[#allocation2 + $0x129] sm:$0xff]  ;;  %v8539_v6 = vld [vmem:[#allocation72_spill] sm:$0xff]  ;;  %v8543_v27 = vld [vmem:[#allocation77_spill] sm:$0xff] }
 0x224   : > { %v3119_v62 = vmax.f32 %v3103_v32, 0.0  ;;  %v3120_v13 = vmax.f32 %v3104_v29, 0.0  ;;  %v1541_v48 = vadd.f32 %v1525_v45, %v1505_v21  ;;  %v1597_v17 = vmul.f32 %v8535_v39, %v8537_v56  ;;  %8538 = vst [vmem:[#allocation62_spill] sm:$0xff] %v5957_v10  ;;  %v8540_v35 = vld [vmem:[#allocation27_spill] sm:$0xff]  ;;  %v8542_v12 = vld [vmem:[#allocation86_spill] sm:$0xff] }
 0x225   : > { %v2450_v28 = vadd.f32 %v5823_v24, %v2414_v51  ;;  %v2451_v40 = vadd.f32 %v5827_v31, %v2415_v63  ;;  %v1576_v55 = vadd.f32 %v1560_v38, %v1540_v59  ;;  %v1632_v58 = vmul.f32 %v8540_v35, %v8539_v6  ;;  %v8541_v19 = vld [vmem:[#allocation123_spill] sm:$0xff]  ;;  %v8544_v31 = vld [vmem:[#allocation30_spill] sm:$0xff]  ;;  %v8545_v59 = vld [vmem:[#allocation92_spill] sm:$0xff] }
 0x226   : > { %v2571_v32 = vmul.f32 %v8542_v12, %v8541_v19  ;;  %v3134_v29 = vpack.c.bf16 %v3120_v13, %v3119_v62  ;;  %v1577_v2 = vadd.f32 %v1561_v8, %v1541_v48  ;;  %v1633_v45 = vmul.f32 %v8540_v35, %v8543_v27  ;;  %v4052_v38 = vld [vmem:[#allocation2 + $0x6c] sm:$0xff]  ;;  %v8546_v19 = vld [vmem:[#allocation124_spill] sm:$0xff]  ;;  %v6037_v12 = vld [vmem:[#allocation2 + $0x122] sm:$0xff] }
 0x227   : > { %v2486_v21 = vadd.f32 %v5833_v50, %v2450_v28  ;;  %v2487_v24 = vadd.f32 %v5837_v46, %v2451_v40  ;;  %v1612_v51 = vadd.f32 %v1596_v43, %v1576_v55  ;;  %v1668_v63 = vmul.f32 %v8544_v31, %v5951_v54  ;;  %v8547_v62 = vld [vmem:[#allocation87_spill] sm:$0xff]  ;;  %v8548_v40 = vld [vmem:[#allocation129_spill] sm:$0xff]  ;;  %v8553_v27 = vld [vmem:[#allocation132_spill] sm:$0xff]  ;;  %8580 = vst [vmem:[#allocation128_spill] sm:$0xff] %v6037_v12 }
 0x228   : > { %v5970_v56 = vmul.f32 %v4052_v38, %v8545_v59  ;;  %3896 = vmatmul.mubr.msk.bf16.vlgmr.msra.gmra.mxu1 %vm968_vm2, %v3134_v29  ;;  %v2606_v8 = vmul.f32 %v8547_v62, %v8546_v19  ;;  %v1613_v13 = vadd.f32 %v1597_v17, %v1577_v2  ;;  %v1669_v48 = vmul.f32 %v8544_v31, %v5957_v10  ;;  %v8549_v55 = vld [vmem:[#allocation137_spill] sm:$0xff]  ;;  %v8550_v35 = vld [vmem:[#allocation115_spill] sm:$0xff]  ;;  %v8551_v59 = vld [vmem:[#allocation130_spill] sm:$0xff] }
 0x229   : > { %v2522_v50 = vadd.f32 %v5843_v61, %v2486_v21  ;;  %v2523_v46 = vadd.f32 %v2507_v25, %v2487_v24  ;;  %v2607_v43 = vmul.f32 %v8547_v62, %v8548_v40  ;;  %v1648_v28 = vadd.f32 %v1632_v58, %v1612_v51  ;;  %v8552_v29 = vld [vmem:[#allocation88_spill] sm:$0xff]  ;;  %v8554_v19 = vld [vmem:[#allocation122_spill] sm:$0xff]  ;;  %v8557_v24 = vld [vmem:[#allocation133_spill] sm:$0xff] }
 0x22a   : > { %v5982_v38 = vmul.f32 %v8550_v35, %v8549_v55  ;;  %v2642_v54 = vmul.f32 %v8552_v29, %v8551_v59  ;;  %v2643_v17 = vmul.f32 %v8552_v29, %v8553_v27  ;;  %v1649_v2 = vadd.f32 %v1633_v45, %v1613_v13  ;;  %v5989_v25 = vld [vmem:[#allocation2 + $0x82] sm:$0xff]  ;;  %v8556_v21 = vld [vmem:[#allocation36_spill] sm:$0xff]  ;;  %v5997_v6 = vld [vmem:[#allocation2 + $0x8a] sm:$0xff] }
 0x22b   : > { %v2586_v31 = vadd.f32 %v8554_v19, %v2522_v50  ;;  %v2587_v10 = vadd.f32 %v2571_v32, %v2523_v46  ;;  %v1684_v61 = vadd.f32 %v1668_v63, %v1648_v28  ;;  %8555 = vst [vmem:[#allocation63_spill] sm:$0xff] %v5989_v25  ;;  %v1768_v58 = vmul.f32 %v5989_v25, %v8556_v21  ;;  %v8558_v51 = vld [vmem:[#allocation101_spill] sm:$0xff]  ;;  %v8559_v55 = vld [vmem:[#allocation134_spill] sm:$0xff]  ;;  %v8561_v63 = vld [vmem:[#allocation59_spill] sm:$0xff] }
 0x22c   : > { %v2678_v40 = vmul.f32 %v8558_v51, %v8557_v24  ;;  %v2679_v39 = vmul.f32 %v8558_v51, %v8559_v55  ;;  %v1685_v59 = vadd.f32 %v1669_v48, %v1649_v2  ;;  %8560 = vst [vmem:[#allocation69_spill] sm:$0xff] %v5997_v6  ;;  %v1769_v27 = vmul.f32 %v5997_v6, %v8556_v21  ;;  %v6002_v50 = vld [vmem:[#allocation2 + $0xa2] sm:$0xff]  ;;  %v8563_v46 = vld [vmem:[#allocation39_spill] sm:$0xff]  ;;  %v8566_v29 = vld [vmem:[#allocation136_spill] sm:$0xff] }
 0x22d   : > { %v2622_v45 = vadd.f32 %v2606_v8, %v2586_v31  ;;  %v2623_v32 = vadd.f32 %v2607_v43, %v2587_v10  ;;  %v1748_v13 = vadd.f32 %v8561_v63, %v1684_v61  ;;  %8562 = vst [vmem:[#allocation71_spill] sm:$0xff] %v6002_v50  ;;  %v1804_v28 = vmul.f32 %v6002_v50, %v8563_v46  ;;  %v8564_v19 = vld [vmem:[#allocation135_spill] sm:$0xff]  ;;  %v8565_v24 = vld [vmem:[#allocation102_spill] sm:$0xff]  ;;  %v8567_v2 = vld [vmem:[#allocation64_spill] sm:$0xff] }
 0x22e   : > { %v2714_v25 = vmul.f32 %v8565_v24, %v8564_v19  ;;  %v2715_v48 = vmul.f32 %v8565_v24, %v8566_v29  ;;  %v1749_v55 = vadd.f32 %v8567_v2, %v1685_v59  ;;  %v6011_v51 = vld [vmem:[#allocation2 + $0xaa] sm:$0xff]  ;;  %v6019_v50 = vld [vmem:[#allocation2 + $0xc2] sm:$0xff] }
 0x22f   : > { %8568 = vst [vmem:[#allocation120_spill] sm:$0xff] %v6011_v51  ;;  %v1805_v10 = vmul.f32 %v6011_v51, %v8563_v46  ;;  %v6015_v31 = vld [vmem:[#allocation2 + $0x105] sm:$0xff]  ;;  %v6017_v8 = vld [vmem:[#allocation2 + $0x10d] sm:$0xff]  ;;  %v2658_v43 = vadd.f32 %v2642_v54, %v2622_v45  ;;  %v2659_v61 = vadd.f32 %v2643_v17, %v2623_v32  ;;  %v1784_v63 = vadd.f32 %v1768_v58, %v1748_v13  ;;  %v8577_v45 = vld [vmem:[#allocation32_spill] sm:$0xff] }
 0x230   : > { %8569 = vst [vmem:[#allocation121_spill] sm:$0xff] %v6015_v31  ;;  %8570 = vst [vmem:[#allocation80_spill] sm:$0xff] %v6017_v8  ;;  %v8572_v19 = vld [vmem:[#allocation43_spill] sm:$0xff]  ;;  %v8575_v2 = vld [vmem:[#allocation70_spill] sm:$0xff]  ;;  %v1785_v62 = vadd.f32 %v1769_v27, %v1749_v55 }
 0x231   : > { %8571 = vst [vmem:[#allocation83_spill] sm:$0xff] %v6019_v50  ;;  %v1840_v21 = vmul.f32 %v6019_v50, %v8572_v19  ;;  %v8573_v29 = vld [vmem:[#allocation35_spill] sm:$0xff]  ;;  %v2694_v54 = vadd.f32 %v2678_v40, %v2658_v43  ;;  %v2695_v17 = vadd.f32 %v2679_v39, %v2659_v61  ;;  %v1820_v58 = vadd.f32 %v1804_v28, %v1784_v63  ;;  %v8578_v32 = vld [vmem:[#allocation49_spill] sm:$0xff]  ;;  %v8579_v50 = vld [vmem:[#allocation104_spill] sm:$0xff] }
 0x232   : > { %v8574_v6 = vld [vmem:[#allocation103_spill] sm:$0xff]  ;;  %v1876_v13 = vmul.f32 %v8578_v32, %v8577_v45  ;;  %v2786_v9 = vmul.f32 %v8579_v50, %v6015_v31  ;;  %v1821_v27 = vadd.f32 %v1805_v10, %v1785_v62  ;;  %v8581_v55 = vld [vmem:[#allocation146_spill] sm:$0xff]  ;;  %v8583_v28 = vld [vmem:[#allocation29_spill] sm:$0xff] }
 0x233   : > { %v2750_v59 = vmul.f32 %v8574_v6, %v8573_v29  ;;  %v2751_v24 = vmul.f32 %v8574_v6, %v8575_v2  ;;  %v6027_v46 = vld [vmem:[#allocation2 + $0xca] sm:$0xff]  ;;  %v2787_v29 = vmul.f32 %v8579_v50, %v6017_v8  ;;  %v1877_v6 = vmul.f32 %v8578_v32, %v8581_v55  ;;  %v8587_v31 = vld [vmem:[#allocation116_spill] sm:$0xff] }
 0x234   : > { %8576 = vst [vmem:[#allocation84_spill] sm:$0xff] %v6027_v46  ;;  %v1841_v51 = vmul.f32 %v6027_v46, %v8572_v19  ;;  %v2730_v2 = vadd.f32 %v2714_v25, %v2694_v54  ;;  %v2731_v19 = vadd.f32 %v2715_v48, %v2695_v17  ;;  %v6041_v40 = vld [vmem:[#allocation2 + $0x12a] sm:$0xff]  ;;  %v1856_v39 = vadd.f32 %v1840_v21, %v1820_v58  ;;  %v8589_v48 = vld [vmem:[#allocation60_spill] sm:$0xff] }
 0x235   : > { %8582 = vst [vmem:[#allocation131_spill] sm:$0xff] %v6041_v40  ;;  %v8584_v43 = vld [vmem:[#allocation55_spill] sm:$0xff]  ;;  %v8586_v46 = vld [vmem:[#allocation142_spill] sm:$0xff]  ;;  %v1948_v54 = vmul.f32 %v8589_v48, %v6037_v12  ;;  %v8598_v12 = vld [vmem:[#allocation125_spill] sm:$0xff] }
 0x236   : > { %v1912_v61 = vmul.f32 %v8584_v43, %v8583_v28  ;;  %v8585_v63 = vld [vmem:[#allocation139_spill] sm:$0xff]  ;;  %v2886_v50 = vmul.f32 %v8587_v31, %v8586_v46  ;;  %v1857_v8 = vadd.f32 %v1841_v51, %v1821_v27  ;;  %v1913_v62 = vmul.f32 %v8584_v43, %v8588_v34  ;;  %v8590_v21 = vld [vmem:[#allocation38_spill] sm:$0xff] }
 0x237   : > { %v2851_v45 = vmul.f32 %v8550_v35, %v8585_v63  ;;  %v2766_v10 = vadd.f32 %v2750_v59, %v2730_v2  ;;  %v2767_v55 = vadd.f32 %v2751_v24, %v2731_v19  ;;  %v1892_v25 = vadd.f32 %v1876_v13, %v1856_v39  ;;  %v8591_v58 = vld [vmem:[#allocation22_spill] sm:$0xff]  ;;  %v8593_v35 = vld [vmem:[#allocation23_spill] sm:$0xff]  ;;  %v8596_v39 = vld [vmem:[#allocation144_spill] sm:$0xff] }
 0x238   : > { %v2887_v17 = vmul.f32 %v8587_v31, %v8590_v21  ;;  %v8592_v32 = vld [vmem:[#allocation118_spill] sm:$0xff]  ;;  %v1893_v63 = vadd.f32 %v1877_v6, %v1857_v8  ;;  %v1949_v46 = vmul.f32 %v8589_v48, %v6041_v40  ;;  %v8595_v2 = vld [vmem:[#allocation119_spill] sm:$0xff]  ;;  %v8597_v21 = vld [vmem:[#allocation145_spill] sm:$0xff] }
 0x239   : > { %v2922_v28 = vmul.f32 %v8592_v32, %v8591_v58  ;;  %v2802_v51 = vadd.f32 %v2786_v9, %v2766_v10  ;;  %v2803_v27 = vadd.f32 %v2787_v29, %v2767_v55  ;;  %v2923_v59 = vmul.f32 %v8592_v32, %v8593_v35  ;;  %v8594_v19 = vld [vmem:[#allocation46_spill] sm:$0xff]  ;;  %v8601_v35 = vld [vmem:[#allocation67_spill] sm:$0xff] }
 0x23a   : > { %v1928_v24 = vadd.f32 %v1912_v61, %v1892_v25  ;;  %v2958_v13 = vmul.f32 %v8595_v2, %v8594_v19  ;;  %v2959_v43 = vmul.f32 %v8595_v2, %v8596_v39  ;;  %v2994_v34 = vmul.f32 %v8598_v12, %v8597_v21  ;;  %v6067_v6 = vld [vmem:[#allocation2 + $0x106] sm:$0xff]  ;;  %v8602_v55 = vld [vmem:[#allocation31_spill] sm:$0xff] }
 0x23b   : > { %v1929_v58 = vadd.f32 %v1913_v62, %v1893_v63  ;;  %8599 = vst [vmem:[#allocation90_spill] sm:$0xff] %v6067_v6  ;;  %v2866_v8 = vadd.f32 %v5982_v38, %v2802_v51  ;;  %v2867_v9 = vadd.f32 %v2851_v45, %v2803_v27  ;;  %v6070_v10 = vld [vmem:[#allocation2 + $0x83] sm:$0xff]  ;;  %v2995_v25 = vmul.f32 %v8598_v12, %v8602_v55  ;;  %v6078_v21 = vld [vmem:[#allocation2 + $0x8b] sm:$0xff] }
 0x23c   : > { %v1964_v29 = vadd.f32 %v1948_v54, %v1928_v24  ;;  %8600 = vst [vmem:[#allocation91_spill] sm:$0xff] %v6070_v10  ;;  %v2048_v61 = vmul.f32 %v6070_v10, %v8601_v35  ;;  %v8603_v19 = vld [vmem:[#allocation81_spill] sm:$0xff]  ;;  %v8604_v39 = vld [vmem:[#allocation126_spill] sm:$0xff]  ;;  %8605 = vst [vmem:[#allocation52_spill] sm:$0xff] %v6078_v21  ;;  %v2049_v62 = vmul.f32 %v6078_v21, %v8601_v35 }
 0x23d   : > { %v3030_v48 = vmul.f32 %v8604_v39, %v8603_v19  ;;  %v1965_v40 = vadd.f32 %v1949_v46, %v1929_v58  ;;  %v6082_v38 = vld [vmem:[#allocation2 + $0x10e] sm:$0xff]  ;;  %v2902_v45 = vadd.f32 %v2886_v50, %v2866_v8  ;;  %v2903_v54 = vadd.f32 %v2887_v17, %v2867_v9  ;;  %v6085_v27 = vld [vmem:[#allocation2 + $0xa3] sm:$0xff]  ;;  %v8609_v24 = vld [vmem:[#allocation68_spill] sm:$0xff] }
 0x23e   : > { %8606 = vst [vmem:[#allocation100_spill] sm:$0xff] %v6082_v38  ;;  %v8607_v63 = vld [vmem:[#allocation75_spill] sm:$0xff]  ;;  %8608 = vst [vmem:[#allocation108_spill] sm:$0xff] %v6085_v27  ;;  %v2084_v55 = vmul.f32 %v6085_v27, %v8609_v24  ;;  %v8610_v10 = vld [vmem:[#allocation117_spill] sm:$0xff] }
 0x23f   : > { %v2028_v51 = vadd.f32 %v8607_v63, %v1964_v29  ;;  %v3031_v12 = vmul.f32 %v8604_v39, %v8610_v10  ;;  %v8611_v46 = vld [vmem:[#allocation127_spill] sm:$0xff]  ;;  %v8612_v19 = vld [vmem:[#allocation76_spill] sm:$0xff]  ;;  %v2938_v17 = vadd.f32 %v2922_v28, %v2902_v45  ;;  %v2939_v8 = vadd.f32 %v2923_v59, %v2903_v54  ;;  %v6098_v9 = vld [vmem:[#allocation2 + $0x123] sm:$0xff] }
 0x240   : > { %v3066_v58 = vmul.f32 %v8611_v46, %v6067_v6  ;;  %v2029_v2 = vadd.f32 %v8612_v19, %v1965_v40  ;;  %v6094_v35 = vld [vmem:[#allocation2 + $0xab] sm:$0xff]  ;;  %v6100_v63 = vld [vmem:[#allocation2 + $0xc3] sm:$0xff]  ;;  %v3067_v21 = vmul.f32 %v8611_v46, %v6082_v38  ;;  %v2156_v59 = vmul.f32 %v8489_v20, %v8491_v42 }
 0x241   : > { %8613 = vst [vmem:[#allocation109_spill] sm:$0xff] %v6094_v35  ;;  %v2085_v50 = vmul.f32 %v6094_v35, %v8609_v24  ;;  %v2064_v29 = vadd.f32 %v2048_v61, %v2028_v51  ;;  %8614 = vst [vmem:[#allocation112_spill] sm:$0xff] %v6100_v63  ;;  %v2120_v27 = vmul.f32 %v6100_v63, %v8485_v18  ;;  %v6106_v39 = vld [vmem:[#allocation2 + $0x12b] sm:$0xff]  ;;  %v8616_v51 = vld [vmem:[#allocation53_spill] sm:$0xff] }
 0x242   : > { %v2065_v40 = vadd.f32 %v2049_v62, %v2029_v2  ;;  %v6108_v19 = vld [vmem:[#allocation2 + $0xcb] sm:$0xff]  ;;  %v2974_v61 = vadd.f32 %v2958_v13, %v2938_v17  ;;  %v2975_v45 = vadd.f32 %v2959_v43, %v2939_v8  ;;  %v2157_v63 = vmul.f32 %v8489_v20, %v8616_v51  ;;  %v8617_v35 = vld [vmem:[#allocation97_spill] sm:$0xff] }
 0x243   : > { %8615 = vst [vmem:[#allocation113_spill] sm:$0xff] %v6108_v19  ;;  %v2121_v28 = vmul.f32 %v6108_v19, %v8485_v18  ;;  %v2100_v54 = vadd.f32 %v2084_v55, %v2064_v29  ;;  %v8618_v46 = vld [vmem:[#allocation82_spill] sm:$0xff]  ;;  %v8620_v62 = vld [vmem:[#allocation85_spill] sm:$0xff] }
 0x244   : > { %v2101_v24 = vadd.f32 %v2085_v50, %v2065_v40  ;;  %v2192_v38 = vmul.f32 %v8618_v46, %v8617_v35  ;;  %v8619_v6 = vld [vmem:[#allocation106_spill] sm:$0xff]  ;;  %v2228_v10 = vmul.f32 %v8620_v62, %v6098_v9  ;;  %v3010_v18 = vadd.f32 %v2994_v34, %v2974_v61 }
 0x245   : > { %v2193_v2 = vmul.f32 %v8618_v46, %v8619_v6  ;;  %v3011_v19 = vadd.f32 %v2995_v25, %v2975_v45  ;;  %v2136_v32 = vadd.f32 %v2120_v27, %v2100_v54  ;;  %v2229_v42 = vmul.f32 %v8620_v62, %v6106_v39  ;;  %v6124_v13 = vld [vmem:[#allocation2 + $0x84] sm:$0xff]  ;;  %v6128_v50 = vld [vmem:[#allocation2 + $0x8c] sm:$0xff] }
 0x246   : > { %v2137_v43 = vadd.f32 %v2121_v28, %v2101_v24  ;;  %v2328_v55 = vmul.f32 %v6124_v13, %v8495_v5  ;;  %v2329_v17 = vmul.f32 %v6128_v50, %v8495_v5  ;;  %v6132_v8 = vld [vmem:[#allocation2 + $0xa4] sm:$0xff]  ;;  %v3046_v25 = vadd.f32 %v3030_v48, %v3010_v18  ;;  %v6136_v40 = vld [vmem:[#allocation2 + $0xac] sm:$0xff] }
 0x247   : > { %8621 = vst [vmem:[#allocation73_spill] sm:$0xff] %v6132_v8  ;;  %v2364_v34 = vmul.f32 %v6132_v8, %v8498_v36  ;;  %v3047_v27 = vadd.f32 %v3031_v12, %v3011_v19  ;;  %v2172_v29 = vadd.f32 %v2156_v59, %v2136_v32  ;;  %8622 = vst [vmem:[#allocation74_spill] sm:$0xff] %v6136_v40  ;;  %v6140_v61 = vld [vmem:[#allocation2 + $0xc4] sm:$0xff]  ;;  %v6144_v54 = vld [vmem:[#allocation2 + $0xcc] sm:$0xff] }
 0x248   : > { %v2365_v24 = vmul.f32 %v6136_v40, %v8498_v36  ;;  %v2173_v28 = vadd.f32 %v2157_v63, %v2137_v43  ;;  %8623 = vst [vmem:[#allocation138_spill] sm:$0xff] %v6140_v61  ;;  %v2400_v45 = vmul.f32 %v6140_v61, %v8502_v1  ;;  %8624 = vst [vmem:[#allocation140_spill] sm:$0xff] %v6144_v54  ;;  %v8625_v19 = vld [vmem:[#allocation44_spill] sm:$0xff]  ;;  %v8628_v61 = vld [vmem:[#allocation50_spill] sm:$0xff] }
 0x249   : > { %v2401_v51 = vmul.f32 %v6144_v54, %v8502_v1  ;;  %v2436_v18 = vmul.f32 %v8387_v44, %v5543_v4  ;;  %v3082_v12 = vadd.f32 %v3066_v58, %v3046_v25  ;;  %v3083_v32 = vadd.f32 %v3067_v21, %v3047_v27  ;;  %v8626_v43 = vld [vmem:[#allocation48_spill] sm:$0xff]  ;;  %v6165_v54 = vld [vmem:[#allocation2 + $0xe0] sm:$0xff] }
 0x24a   : > { %v2208_v48 = vadd.f32 %v2192_v38, %v2172_v29  ;;  %v1174_v59 = vmul.f32 %v8625_v19, %v8505_v47  ;;  %v2209_v63 = vadd.f32 %v2193_v2, %v2173_v28  ;;  %v1175_v36 = vmul.f32 %v8626_v43, %v8505_v47  ;;  %v8627_v40 = vld [vmem:[#allocation12_spill] sm:$0xff]  ;;  %v8629_v19 = vld [vmem:[#allocation105_spill] sm:$0xff]  ;;  %8630 = vst [vmem:[#allocation141_spill] sm:$0xff] %v6165_v54 }
 0x24b   : > { %v1210_v8 = vmul.f32 %v8628_v61, %v8627_v40  ;;  %v1211_v5 = vmul.f32 %v5861_v37, %v8627_v40  ;;  %v3105_v1 = vadd.f32 %v8532_v33, %v3082_v12  ;;  %v3106_v4 = vadd.f32 %v8532_v33, %v3083_v32 }
 0x24c   : > { %v2244_v58 = vadd.f32 %v2228_v10, %v2208_v48  ;;  %v1246_v21 = vmul.f32 %v5867_v41, %v4702_v3  ;;  %v2245_v38 = vadd.f32 %v2229_v42, %v2209_v63  ;;  %v1247_v27 = vmul.f32 %v5871_v11, %v4702_v3  ;;  %v6170_v10 = vld [vmem:[#allocation2 + $0x140] sm:$0xff]  ;;  %v6176_v48 = vld [vmem:[#allocation2 + $0x148] sm:$0xff] }
 0x24d   : > { %v1226_v25 = vadd.f32 %v1210_v8, %v1174_v59  ;;  %v1227_v2 = vadd.f32 %v1211_v5, %v1175_v36  ;;  %v3121_v29 = vmax.f32 %v3105_v1, 0.0  ;;  %v3122_v28 = vmax.f32 %v3106_v4, 0.0  ;;  %v6172_v8 = vld [vmem:[#allocation2 + $0xe8] sm:$0xff]  ;;  %8631 = vst [vmem:[#allocation37_spill] sm:$0xff] %v6176_v48 }
 0x24e   : > { %v2308_v43 = vadd.f32 %v8629_v19, %v2244_v58  ;;  %v1282_v12 = vmul.f32 %v6165_v54, %v4714_v7  ;;  %v2309_v33 = vadd.f32 %v5970_v56, %v2245_v38  ;;  %v1283_v5 = vmul.f32 %v6172_v8, %v4714_v7 }
 0x24f   : > { %v1262_v32 = vadd.f32 %v1246_v21, %v1226_v25  ;;  %v1263_v42 = vadd.f32 %v1247_v27, %v1227_v2  ;;  %v3135_v1 = vpack.c.bf16 %v3122_v28, %v3121_v29  ;;  %v1318_v59 = vmul.f32 %v4732_v15, %v8513_v53  ;;  %v8632_v25 = vld [vmem:[#allocation34_spill] sm:$0xff] }
 0x250   : > { %v2344_v36 = vadd.f32 %v2328_v55, %v2308_v43  ;;  %v1319_v63 = vmul.f32 %v4732_v15, %v8515_v23  ;;  %v2345_v56 = vadd.f32 %v2329_v17, %v2309_v33  ;;  %v1354_v21 = vmul.f32 %v8514_v49, %v5881_v60  ;;  %v6191_v27 = vld [vmem:[#allocation2 + $0x124] sm:$0xff]  ;;  %v6193_v23 = vld [vmem:[#allocation2 + $0x12c] sm:$0xff] }
 0x251   : > { %v1298_v4 = vadd.f32 %v1282_v12, %v1262_v32  ;;  %v1299_v58 = vadd.f32 %v1283_v5, %v1263_v42  ;;  %3899 = vmatprep.mubr.msk.bf16.mxu1 %vm968_vm2, %v3135_v1  ;;  %v2437_v55 = vmul.f32 %v8387_v44, %v8632_v25  ;;  %v1355_v2 = vmul.f32 %v8514_v49, %v5887_v14  ;;  %v8635_v43 = vld [vmem:[#allocation110_spill] sm:$0xff]  ;;  %v8636_v12 = vld [vmem:[#allocation111_spill] sm:$0xff] }
 0x252   : > { %v2380_v38 = vadd.f32 %v2364_v34, %v2344_v36  ;;  %v1390_v53 = vmul.f32 %v8516_v22, %v6170_v10  ;;  %8633 = vst [vmem:[#allocation66_spill] sm:$0xff] %v6191_v27  ;;  %8634 = vst [vmem:[#allocation89_spill] sm:$0xff] %v6193_v23  ;;  %v2381_v17 = vadd.f32 %v2365_v24, %v2345_v56  ;;  %v8637_v42 = vld [vmem:[#allocation18_spill] sm:$0xff] }
 0x253   : > { %v1334_v29 = vadd.f32 %v1318_v59, %v1298_v4  ;;  %v1335_v28 = vadd.f32 %v1319_v63, %v1299_v58  ;;  %v1391_v19 = vmul.f32 %v8516_v22, %v6176_v48  ;;  %v2472_v33 = vmul.f32 %v8636_v12, %v8635_v43 }
 0x254   : > { %v2416_v34 = vadd.f32 %v2400_v45, %v2380_v38  ;;  %v2473_v32 = vmul.f32 %v8636_v12, %v5893_v26  ;;  %v1454_v5 = vmul.f32 %v5911_v52, %v8637_v42  ;;  %v2417_v1 = vadd.f32 %v2401_v51, %v2381_v17  ;;  %v8638_v52 = vld [vmem:[#allocation54_spill] sm:$0xff] }
 0x255   : > { %v1370_v36 = vadd.f32 %v1354_v21, %v1334_v29  ;;  %v1371_v25 = vadd.f32 %v1355_v2, %v1335_v28  ;;  %v1455_v24 = vmul.f32 %v5917_v57, %v8637_v42  ;;  %v2508_v63 = vmul.f32 %v8400_v16, %v6191_v27  ;;  %v4073_v21 = vld [vmem:[#allocation2 + $0x65] sm:$0xff]  ;;  %v4074_v57 = vld [vmem:[#allocation2 + $0x6d] sm:$0xff]  ;;  %v8640_v28 = vld [vmem:[#allocation20_spill] sm:$0xff] }
 0x256   : > { %v2452_v59 = vadd.f32 %v2436_v18, %v2416_v34  ;;  %v2509_v45 = vmul.f32 %v8400_v16, %v6193_v23  ;;  %v1490_v56 = vmul.f32 %v5924_v0, %v8520_v30  ;;  %v2453_v4 = vadd.f32 %v2437_v55, %v2417_v1  ;;  %v8639_v2 = vld [vmem:[#allocation86_spill] sm:$0xff]  ;;  %v8642_v55 = vld [vmem:[#allocation56_spill] sm:$0xff] }
 0x257   : > { %v1406_v58 = vadd.f32 %v1390_v53, %v1370_v36  ;;  %v1407_v38 = vadd.f32 %v1391_v19, %v1371_v25  ;;  %v1491_v51 = vmul.f32 %v8638_v52, %v8520_v30  ;;  %v2572_v17 = vmul.f32 %v4073_v21, %v8639_v2  ;;  %v8641_v34 = vld [vmem:[#allocation58_spill] sm:$0xff]  ;;  %v8644_v36 = vld [vmem:[#allocation87_spill] sm:$0xff] }
 0x258   : > { %v2573_v18 = vmul.f32 %v4074_v57, %v8639_v2  ;;  %v2488_v29 = vadd.f32 %v2472_v33, %v2452_v59  ;;  %v1526_v42 = vmul.f32 %v8641_v34, %v8640_v28  ;;  %v2489_v16 = vadd.f32 %v2473_v32, %v2453_v4  ;;  %v6219_v1 = vld [vmem:[#allocation2 + $0x85] sm:$0xff]  ;;  %v6223_v21 = vld [vmem:[#allocation2 + $0x8d] sm:$0xff] }
 0x259   : > { %v1470_v22 = vadd.f32 %v1454_v5, %v1406_v58  ;;  %v1471_v23 = vadd.f32 %v1455_v24, %v1407_v38  ;;  %v1527_v53 = vmul.f32 %v8642_v55, %v8640_v28  ;;  %8643 = vst [vmem:[#allocation40_spill] sm:$0xff] %v6219_v1  ;;  %v2608_v25 = vmul.f32 %v6219_v1, %v8644_v36  ;;  %v6227_v59 = vld [vmem:[#allocation2 + $0xe1] sm:$0xff]  ;;  %v6231_v58 = vld [vmem:[#allocation2 + $0xe9] sm:$0xff]  ;;  %v8650_v28 = vld [vmem:[#allocation88_spill] sm:$0xff] }
 0x25a   : > { %v2524_v19 = vadd.f32 %v2508_v63, %v2488_v29  ;;  %8645 = vst [vmem:[#allocation98_spill] sm:$0xff] %v6223_v21  ;;  %v2609_v33 = vmul.f32 %v6223_v21, %v8644_v36  ;;  %8646 = vst [vmem:[#allocation99_spill] sm:$0xff] %v6227_v59  ;;  %v8647_v57 = vld [vmem:[#allocation21_spill] sm:$0xff]  ;;  %v2525_v5 = vadd.f32 %v2509_v45, %v2489_v16  ;;  %v6239_v36 = vld [vmem:[#allocation2 + $0xad] sm:$0xff] }
 0x25b   : > { %v1562_v32 = vmul.f32 %v6227_v59, %v8647_v57  ;;  %v1506_v24 = vadd.f32 %v1490_v56, %v1470_v22  ;;  %v1507_v4 = vadd.f32 %v1491_v51, %v1471_v23  ;;  %8648 = vst [vmem:[#allocation41_spill] sm:$0xff] %v6231_v58  ;;  %v1563_v63 = vmul.f32 %v6231_v58, %v8647_v57  ;;  %v6235_v29 = vld [vmem:[#allocation2 + $0xa5] sm:$0xff]  ;;  %v8652_v59 = vld [vmem:[#allocation72_spill] sm:$0xff]  ;;  %v6253_v21 = vld [vmem:[#allocation2 + $0xcd] sm:$0xff] }
 0x25c   : > { %v2588_v38 = vadd.f32 %v2572_v17, %v2524_v19  ;;  %8649 = vst [vmem:[#allocation25_spill] sm:$0xff] %v6235_v29  ;;  %v2644_v55 = vmul.f32 %v6235_v29, %v8650_v28  ;;  %8651 = vst [vmem:[#allocation42_spill] sm:$0xff] %v6239_v36  ;;  %v2645_v34 = vmul.f32 %v6239_v36, %v8650_v28  ;;  %v8653_v16 = vld [vmem:[#allocation24_spill] sm:$0xff]  ;;  %v6245_v45 = vld [vmem:[#allocation2 + $0x141] sm:$0xff] }
 0x25d   : > { %v1598_v22 = vmul.f32 %v8653_v16, %v8652_v59  ;;  %v2589_v23 = vadd.f32 %v2573_v18, %v2525_v5  ;;  %8654 = vst [vmem:[#allocation26_spill] sm:$0xff] %v6245_v45  ;;  %v1542_v56 = vadd.f32 %v1526_v42, %v1506_v24  ;;  %v1543_v51 = vadd.f32 %v1527_v53, %v1507_v4  ;;  %v8655_v57 = vld [vmem:[#allocation77_spill] sm:$0xff]  ;;  %v6257_v59 = vld [vmem:[#allocation2 + $0x149] sm:$0xff] }
 0x25e   : > { %v1599_v17 = vmul.f32 %v8653_v16, %v8655_v57  ;;  %v2624_v19 = vadd.f32 %v2608_v25, %v2588_v38  ;;  %v6249_v58 = vld [vmem:[#allocation2 + $0xc5] sm:$0xff]  ;;  %8658 = vst [vmem:[#allocation45_spill] sm:$0xff] %v6253_v21  ;;  %8659 = vst [vmem:[#allocation65_spill] sm:$0xff] %v6257_v59  ;;  %v8661_v5 = vld [vmem:[#allocation27_spill] sm:$0xff] }
 0x25f   : > { %8656 = vst [vmem:[#allocation28_spill] sm:$0xff] %v6249_v58  ;;  %v8657_v29 = vld [vmem:[#allocation101_spill] sm:$0xff]  ;;  %v2625_v53 = vadd.f32 %v2609_v33, %v2589_v23  ;;  %v1578_v24 = vadd.f32 %v1562_v32, %v1542_v56  ;;  %v1579_v4 = vadd.f32 %v1563_v63, %v1543_v51  ;;  %v8662_v57 = vld [vmem:[#allocation62_spill] sm:$0xff]  ;;  %v8663_v16 = vld [vmem:[#allocation35_spill] sm:$0xff] }
 0x260   : > { %v2680_v30 = vmul.f32 %v6249_v58, %v8657_v29  ;;  %v2681_v28 = vmul.f32 %v6253_v21, %v8657_v29  ;;  %v8660_v18 = vld [vmem:[#allocation57_spill] sm:$0xff]  ;;  %v1635_v25 = vmul.f32 %v8661_v5, %v8662_v57  ;;  %v2660_v38 = vadd.f32 %v2644_v55, %v2624_v19  ;;  %v8664_v36 = vld [vmem:[#allocation102_spill] sm:$0xff]  ;;  %v8670_v51 = vld [vmem:[#allocation103_spill] sm:$0xff] }
 0x261   : > { %v1634_v42 = vmul.f32 %v8661_v5, %v8660_v18  ;;  %v2716_v58 = vmul.f32 %v8664_v36, %v8663_v16  ;;  %v8665_v1 = vld [vmem:[#allocation70_spill] sm:$0xff]  ;;  %v2661_v33 = vadd.f32 %v2645_v34, %v2625_v53  ;;  %v1614_v32 = vadd.f32 %v1598_v22, %v1578_v24  ;;  %v8669_v56 = vld [vmem:[#allocation121_spill] sm:$0xff]  ;;  %v8671_v19 = vld [vmem:[#allocation80_spill] sm:$0xff] }
 0x262   : > { %v2717_v2 = vmul.f32 %v8664_v36, %v8665_v1  ;;  %v8666_v29 = vld [vmem:[#allocation30_spill] sm:$0xff]  ;;  %v1615_v63 = vadd.f32 %v1599_v17, %v1579_v4  ;;  %v2696_v55 = vadd.f32 %v2680_v30, %v2660_v38  ;;  %v2752_v16 = vmul.f32 %v8670_v51, %v8669_v56  ;;  %v8672_v5 = vld [vmem:[#allocation33_spill] sm:$0xff]  ;;  %v8673_v36 = vld [vmem:[#allocation63_spill] sm:$0xff] }
 0x263   : > { %v1670_v21 = vmul.f32 %v8666_v29, %v6245_v45  ;;  %v6269_v52 = vld [vmem:[#allocation2 + $0x125] sm:$0xff]  ;;  %v6271_v0 = vld [vmem:[#allocation2 + $0x12d] sm:$0xff]  ;;  %v1671_v23 = vmul.f32 %v8666_v29, %v6257_v59  ;;  %v2753_v1 = vmul.f32 %v8670_v51, %v8671_v19  ;;  %v1734_v45 = vmul.f32 %v8673_v36, %v8672_v5  ;;  %v8675_v53 = vld [vmem:[#allocation104_spill] sm:$0xff] }
 0x264   : > { %8667 = vst [vmem:[#allocation47_spill] sm:$0xff] %v6269_v52  ;;  %8668 = vst [vmem:[#allocation143_spill] sm:$0xff] %v6271_v0  ;;  %v2697_v57 = vadd.f32 %v2681_v28, %v2661_v33  ;;  %v1650_v18 = vadd.f32 %v1634_v42, %v1614_v32  ;;  %v1651_v12 = vadd.f32 %v1635_v25, %v1615_v63  ;;  %v8674_v34 = vld [vmem:[#allocation69_spill] sm:$0xff]  ;;  %v8676_v4 = vld [vmem:[#allocation36_spill] sm:$0xff] }
 0x265   : > { %v1735_v22 = vmul.f32 %v8674_v34, %v8672_v5  ;;  %v2732_v17 = vadd.f32 %v2716_v58, %v2696_v55  ;;  %v2788_v24 = vmul.f32 %v8675_v53, %v6269_v52  ;;  %v2789_v30 = vmul.f32 %v8675_v53, %v6271_v0  ;;  %v8677_v38 = vld [vmem:[#allocation71_spill] sm:$0xff]  ;;  %v8678_v28 = vld [vmem:[#allocation120_spill] sm:$0xff]  ;;  %v4083_v42 = vld [vmem:[#allocation2 + $0x66] sm:$0xff] }
 0x266   : > { %v1770_v29 = vmul.f32 %v8677_v38, %v8676_v4  ;;  %v2733_v51 = vadd.f32 %v2717_v2, %v2697_v57  ;;  %v1686_v59 = vadd.f32 %v1670_v21, %v1650_v18  ;;  %v1687_v19 = vadd.f32 %v1671_v23, %v1651_v12  ;;  %v8679_v25 = vld [vmem:[#allocation115_spill] sm:$0xff]  ;;  %v8682_v2 = vld [vmem:[#allocation84_spill] sm:$0xff]  ;;  %v6297_v18 = vld [vmem:[#allocation2 + $0x86] sm:$0xff] }
 0x267   : > { %v1771_v36 = vmul.f32 %v8678_v28, %v8676_v4  ;;  %v2852_v33 = vmul.f32 %v4083_v42, %v8679_v25  ;;  %v4084_v32 = vld [vmem:[#allocation2 + $0x6e] sm:$0xff]  ;;  %v2768_v63 = vadd.f32 %v2752_v16, %v2732_v17  ;;  %8683 = vst [vmem:[#allocation123_spill] sm:$0xff] %v6297_v18  ;;  %v2888_v57 = vmul.f32 %v6297_v18, %v8587_v31  ;;  %v6305_v17 = vld [vmem:[#allocation2 + $0xe2] sm:$0xff] }
 0x268   : > { %v2853_v58 = vmul.f32 %v4084_v32, %v8679_v25  ;;  %v8680_v55 = vld [vmem:[#allocation39_spill] sm:$0xff]  ;;  %v2769_v53 = vadd.f32 %v2753_v1, %v2733_v51  ;;  %v1750_v0 = vadd.f32 %v1734_v45, %v1686_v59  ;;  %v1751_v52 = vadd.f32 %v1735_v22, %v1687_v19  ;;  %8685 = vst [vmem:[#allocation129_spill] sm:$0xff] %v6305_v17  ;;  %v6313_v32 = vld [vmem:[#allocation2 + $0xa6] sm:$0xff] }
 0x269   : > { %v8681_v34 = vld [vmem:[#allocation83_spill] sm:$0xff]  ;;  %v1807_v21 = vmul.f32 %v8682_v2, %v8680_v55  ;;  %v2804_v12 = vadd.f32 %v2788_v24, %v2768_v63  ;;  %8688 = vst [vmem:[#allocation130_spill] sm:$0xff] %v6313_v32  ;;  %v8689_v63 = vld [vmem:[#allocation118_spill] sm:$0xff] }
 0x26a   : > { %v1806_v5 = vmul.f32 %v8681_v34, %v8680_v55  ;;  %v6301_v23 = vld [vmem:[#allocation2 + $0x8e] sm:$0xff]  ;;  %v2805_v59 = vadd.f32 %v2789_v30, %v2769_v53  ;;  %v1786_v51 = vadd.f32 %v1770_v29, %v1750_v0  ;;  %v1787_v19 = vadd.f32 %v1771_v36, %v1751_v52  ;;  %v8692_v53 = vld [vmem:[#allocation49_spill] sm:$0xff] }
 0x26b   : > { %8684 = vst [vmem:[#allocation124_spill] sm:$0xff] %v6301_v23  ;;  %v2889_v16 = vmul.f32 %v6301_v23, %v8587_v31  ;;  %v8686_v42 = vld [vmem:[#allocation43_spill] sm:$0xff]  ;;  %v2868_v24 = vadd.f32 %v2852_v33, %v2804_v12  ;;  %v2924_v55 = vmul.f32 %v6313_v32, %v8689_v63  ;;  %v6323_v29 = vld [vmem:[#allocation2 + $0x142] sm:$0xff] }
 0x26c   : > { %v1842_v45 = vmul.f32 %v6305_v17, %v8686_v42  ;;  %v6309_v1 = vld [vmem:[#allocation2 + $0xea] sm:$0xff]  ;;  %v8691_v17 = vld [vmem:[#allocation29_spill] sm:$0xff]  ;;  %v2869_v52 = vadd.f32 %v2853_v58, %v2805_v59  ;;  %8693 = vst [vmem:[#allocation122_spill] sm:$0xff] %v6323_v29  ;;  %v1822_v30 = vadd.f32 %v1806_v5, %v1786_v51  ;;  %v1823_v36 = vadd.f32 %v1807_v21, %v1787_v19  ;;  %v8699_v58 = vld [vmem:[#allocation128_spill] sm:$0xff] }
 0x26d   : > { %8687 = vst [vmem:[#allocation137_spill] sm:$0xff] %v6309_v1  ;;  %v1843_v22 = vmul.f32 %v6309_v1, %v8686_v42  ;;  %v6317_v31 = vld [vmem:[#allocation2 + $0xae] sm:$0xff]  ;;  %v1878_v0 = vmul.f32 %v8692_v53, %v8691_v17  ;;  %v8694_v42 = vld [vmem:[#allocation96_spill] sm:$0xff]  ;;  %v2904_v12 = vadd.f32 %v2888_v57, %v2868_v24  ;;  %v6327_v1 = vld [vmem:[#allocation2 + $0xc6] sm:$0xff] }
 0x26e   : > { %8690 = vst [vmem:[#allocation132_spill] sm:$0xff] %v6317_v31  ;;  %v2925_v2 = vmul.f32 %v6317_v31, %v8689_v63  ;;  %v1879_v33 = vmul.f32 %v8692_v53, %v8694_v42  ;;  %8695 = vst [vmem:[#allocation133_spill] sm:$0xff] %v6327_v1  ;;  %v8696_v32 = vld [vmem:[#allocation119_spill] sm:$0xff]  ;;  %v2905_v21 = vadd.f32 %v2889_v16, %v2869_v52  ;;  %v8702_v53 = vld [vmem:[#allocation81_spill] sm:$0xff] }
 0x26f   : > { %v2960_v34 = vmul.f32 %v6327_v1, %v8696_v32  ;;  %v6331_v4 = vld [vmem:[#allocation2 + $0xce] sm:$0xff]  ;;  %v1858_v51 = vadd.f32 %v1842_v45, %v1822_v30  ;;  %v1859_v19 = vadd.f32 %v1843_v22, %v1823_v36  ;;  %v2940_v24 = vadd.f32 %v2924_v55, %v2904_v12  ;;  %v8703_v31 = vld [vmem:[#allocation125_spill] sm:$0xff]  ;;  %v8710_v12 = vld [vmem:[#allocation100_spill] sm:$0xff] }
 0x270   : > { %8697 = vst [vmem:[#allocation134_spill] sm:$0xff] %v6331_v4  ;;  %v2961_v63 = vmul.f32 %v6331_v4, %v8696_v32  ;;  %v6335_v17 = vld [vmem:[#allocation2 + $0x14a] sm:$0xff]  ;;  %v2996_v1 = vmul.f32 %v8703_v31, %v8702_v53  ;;  %v8704_v23 = vld [vmem:[#allocation117_spill] sm:$0xff]  ;;  %v8705_v32 = vld [vmem:[#allocation60_spill] sm:$0xff]  ;;  %v2941_v16 = vadd.f32 %v2925_v2, %v2905_v21 }
 0x271   : > { %8698 = vst [vmem:[#allocation59_spill] sm:$0xff] %v6335_v17  ;;  %v8700_v59 = vld [vmem:[#allocation55_spill] sm:$0xff]  ;;  %v2997_v18 = vmul.f32 %v8703_v31, %v8704_v23  ;;  %v1950_v4 = vmul.f32 %v8705_v32, %v6323_v29  ;;  %v6347_v25 = vld [vmem:[#allocation2 + $0x126] sm:$0xff]  ;;  %v1894_v45 = vadd.f32 %v1878_v0, %v1858_v51  ;;  %v1895_v22 = vadd.f32 %v1879_v33, %v1859_v19  ;;  %v8713_v2 = vld [vmem:[#allocation52_spill] sm:$0xff] }
 0x272   : > { %v1914_v5 = vmul.f32 %v8700_v59, %v8699_v58  ;;  %v8701_v42 = vld [vmem:[#allocation131_spill] sm:$0xff]  ;;  %8706 = vst [vmem:[#allocation135_spill] sm:$0xff] %v6347_v25  ;;  %v1951_v52 = vmul.f32 %v8705_v32, %v6335_v17  ;;  %v2976_v55 = vadd.f32 %v2960_v34, %v2940_v24  ;;  %v8708_v30 = vld [vmem:[#allocation90_spill] sm:$0xff]  ;;  %v8716_v24 = vld [vmem:[#allocation108_spill] sm:$0xff] }
 0x273   : > { %v1915_v57 = vmul.f32 %v8700_v59, %v8701_v42  ;;  %v6349_v28 = vld [vmem:[#allocation2 + $0x12e] sm:$0xff]  ;;  %v8711_v59 = vld [vmem:[#allocation61_spill] sm:$0xff]  ;;  %v2977_v42 = vadd.f32 %v2961_v63, %v2941_v16  ;;  %v8719_v16 = vld [vmem:[#allocation112_spill] sm:$0xff] }
 0x274   : > { %8707 = vst [vmem:[#allocation136_spill] sm:$0xff] %v6349_v28  ;;  %v8709_v36 = vld [vmem:[#allocation126_spill] sm:$0xff]  ;;  %v8712_v31 = vld [vmem:[#allocation91_spill] sm:$0xff]  ;;  %v1930_v58 = vadd.f32 %v1914_v5, %v1894_v45  ;;  %v2015_v0 = vmul.f32 %v8713_v2, %v8711_v59  ;;  %v3012_v33 = vadd.f32 %v2996_v1, %v2976_v55  ;;  %v8720_v2 = vld [vmem:[#allocation113_spill] sm:$0xff] }
 0x275   : > { %v3032_v53 = vmul.f32 %v8709_v36, %v8708_v30  ;;  %v3033_v23 = vmul.f32 %v8709_v36, %v8710_v12  ;;  %v2014_v29 = vmul.f32 %v8712_v31, %v8711_v59  ;;  %v1931_v38 = vadd.f32 %v1915_v57, %v1895_v22  ;;  %v8714_v21 = vld [vmem:[#allocation127_spill] sm:$0xff]  ;;  %v8717_v31 = vld [vmem:[#allocation109_spill] sm:$0xff]  ;;  %v8718_v57 = vld [vmem:[#allocation68_spill] sm:$0xff] }
 0x276   : > { %v3068_v51 = vmul.f32 %v8714_v21, %v6347_v25  ;;  %v3069_v34 = vmul.f32 %v8714_v21, %v6349_v28  ;;  %v8715_v19 = vld [vmem:[#allocation67_spill] sm:$0xff]  ;;  %v3013_v36 = vadd.f32 %v2997_v18, %v2977_v42  ;;  %v1966_v17 = vadd.f32 %v1950_v4, %v1930_v58  ;;  %v6373_v28 = vld [vmem:[#allocation2 + $0xe3] sm:$0xff] }
 0x277   : > { %v2050_v32 = vmul.f32 %v8716_v24, %v8715_v19  ;;  %v1967_v12 = vadd.f32 %v1951_v52, %v1931_v38  ;;  %v2051_v63 = vmul.f32 %v8717_v31, %v8715_v19  ;;  %v3048_v5 = vadd.f32 %v3032_v53, %v3012_v33  ;;  %v8721_v24 = vld [vmem:[#allocation78_spill] sm:$0xff] }
 0x278   : > { %v2086_v45 = vmul.f32 %v8719_v16, %v8718_v57  ;;  %v3049_v1 = vadd.f32 %v3033_v23, %v3013_v36  ;;  %v2030_v22 = vadd.f32 %v2014_v29, %v1966_v17  ;;  %v2087_v59 = vmul.f32 %v8720_v2, %v8718_v57  ;;  %v6377_v18 = vld [vmem:[#allocation2 + $0x143] sm:$0xff]  ;;  %v6379_v58 = vld [vmem:[#allocation2 + $0x14b] sm:$0xff]  ;;  %v6388_v17 = vld [vmem:[%s7566_s4] ss:$0 sm:$0xff] }
 0x279   : > { %v2031_v55 = vadd.f32 %v2015_v0, %v1967_v12  ;;  %v3084_v21 = vadd.f32 %v3068_v51, %v3048_v5  ;;  %v2122_v4 = vmul.f32 %v6373_v28, %v8721_v24  ;;  %v6381_v53 = vld [vmem:[#allocation2 + $0xeb] sm:$0xff]  ;;  %8722 = vst [vmem:[#allocation64_spill] sm:$0xff] %v6388_v17  ;;  %v2158_v12 = vmul.f32 %v8489_v20, %v8617_v35 }
 0x27a   : > { %v3085_v38 = vadd.f32 %v3069_v34, %v3049_v1  ;;  %v2066_v42 = vadd.f32 %v2050_v32, %v2030_v22  ;;  %v2123_v29 = vmul.f32 %v6381_v53, %v8721_v24  ;;  %v2159_v23 = vmul.f32 %v8489_v20, %v8619_v6  ;;  %v8723_v22 = vld [vmem:[#allocation92_spill] sm:$0xff] }
 0x27b   : > { %v2067_v52 = vadd.f32 %v2051_v63, %v2031_v55  ;;  %v3107_v36 = vadd.f32 %v6388_v17, %v3084_v21  ;;  %v2194_v51 = vmul.f32 %v8618_v46, %v6098_v9  ;;  %v2195_v63 = vmul.f32 %v8618_v46, %v6106_v39  ;;  %v8724_v55 = vld [vmem:[#allocation93_spill] sm:$0xff] }
 0x27c   : > { %v3108_v32 = vadd.f32 %v6388_v17, %v3085_v38  ;;  %v2102_v0 = vadd.f32 %v2086_v45, %v2066_v42  ;;  %v2230_v21 = vmul.f32 %v8620_v62, %v6377_v18  ;;  %v2231_v35 = vmul.f32 %v8620_v62, %v6379_v58  ;;  %v8725_v38 = vld [vmem:[#allocation73_spill] sm:$0xff] }
 0x27d   : > { %v2103_v33 = vadd.f32 %v2087_v59, %v2067_v52  ;;  %v3123_v34 = vmax.f32 %v3107_v36, 0.0  ;;  %v2294_v45 = vmul.f32 %v6124_v13, %v8723_v22  ;;  %v2295_v59 = vmul.f32 %v6128_v50, %v8723_v22  ;;  %v8726_v52 = vld [vmem:[#allocation74_spill] sm:$0xff] }
 0x27e   : > { %v3124_v5 = vmax.f32 %v3108_v32, 0.0  ;;  %v2138_v1 = vadd.f32 %v2122_v4, %v2102_v0  ;;  %v2330_v42 = vmul.f32 %v8725_v38, %v8724_v55  ;;  %v2331_v36 = vmul.f32 %v8726_v52, %v8724_v55 }
 0x27f   : > { %v2139_v6 = vadd.f32 %v2123_v29, %v2103_v33  ;;  %v1176_v17 = vmul.f32 %v8628_v61, %v8505_v47  ;;  %v1177_v4 = vmul.f32 %v5861_v37, %v8505_v47  ;;  %v1212_v13 = vmul.f32 %v5867_v41, %v8627_v40  ;;  %v8728_v33 = vld [vmem:[#allocation138_spill] sm:$0xff]  ;;  %v8729_v37 = vld [vmem:[#allocation140_spill] sm:$0xff] }
 0x280   : > { %v3136_v46 = vpack.c.bf16 %v3124_v5, %v3123_v34  ;;  %v2174_v62 = vadd.f32 %v2158_v12, %v2138_v1  ;;  %v1213_v50 = vmul.f32 %v5871_v11, %v8627_v40  ;;  %v1248_v29 = vmul.f32 %v6165_v54, %v4702_v3  ;;  %v6433_v54 = vld [vmem:[#allocation2 + $0x108] sm:$0xff] }
 0x281   : > { %v2175_v32 = vadd.f32 %v2159_v23, %v2139_v6  ;;  %v1249_v0 = vmul.f32 %v6172_v8, %v4702_v3  ;;  %v8727_v23 = vld [vmem:[#allocation94_spill] sm:$0xff]  ;;  %v1228_v41 = vadd.f32 %v1212_v13, %v1176_v17  ;;  %v6429_v6 = vld [vmem:[#allocation2 + $0x100] sm:$0xff]  ;;  %8731 = vst [vmem:[#allocation146_spill] sm:$0xff] %v6433_v54 }
 0x282   : > { %3900 = vmatmul.mubr.msk.bf16.gmra.mxu1 %vm968_vm2, %v3136_v46  ;;  %v2210_v61 = vadd.f32 %v2194_v51, %v2174_v62  ;;  %v2366_v34 = vmul.f32 %v8728_v33, %v8727_v23  ;;  %v2367_v5 = vmul.f32 %v8729_v37, %v8727_v23  ;;  %v1229_v1 = vadd.f32 %v1213_v50, %v1177_v4  ;;  %v6441_v23 = vld [vmem:[#allocation2 + $0xec] sm:$0xff] }
 0x283   : > { %v2211_v12 = vadd.f32 %v2195_v63, %v2175_v32  ;;  %8730 = vst [vmem:[#allocation32_spill] sm:$0xff] %v6429_v6  ;;  %v1284_v11 = vmul.f32 %v6429_v6, %v4714_v7  ;;  %v1285_v46 = vmul.f32 %v6433_v54, %v4714_v7  ;;  %v6437_v63 = vld [vmem:[#allocation2 + $0xe4] sm:$0xff]  ;;  %v8733_v32 = vld [vmem:[#allocation95_spill] sm:$0xff]  ;;  %8734 = vst [vmem:[#allocation142_spill] sm:$0xff] %v6441_v23 }
 0x284   : > { %v2246_v62 = vadd.f32 %v2230_v21, %v2210_v61  ;;  %8732 = vst [vmem:[#allocation139_spill] sm:$0xff] %v6437_v63  ;;  %v2402_v3 = vmul.f32 %v6437_v63, %v8733_v32  ;;  %v2403_v17 = vmul.f32 %v6441_v23, %v8733_v32  ;;  %v1264_v4 = vadd.f32 %v1248_v29, %v1228_v41  ;;  %v6453_v63 = vld [vmem:[#allocation2 + $0x160] sm:$0xff]  ;;  %v6455_v54 = vld [vmem:[#allocation2 + $0x168] sm:$0xff] }
 0x285   : > { %v2247_v51 = vadd.f32 %v2231_v35, %v2211_v12  ;;  %v1265_v13 = vadd.f32 %v1249_v0, %v1229_v1  ;;  %v1320_v50 = vmul.f32 %v4732_v15, %v5881_v60  ;;  %v1321_v7 = vmul.f32 %v4732_v15, %v5887_v14  ;;  %8735 = vst [vmem:[#allocation38_spill] sm:$0xff] %v6453_v63  ;;  %v6457_v29 = vld [vmem:[#allocation2 + $0x144] sm:$0xff]  ;;  %v6459_v0 = vld [vmem:[#allocation2 + $0x14c] sm:$0xff] }
 0x286   : > { %v2310_v21 = vadd.f32 %v2294_v45, %v2246_v62  ;;  %v2438_v61 = vmul.f32 %v8387_v44, %v8635_v43  ;;  %v2439_v12 = vmul.f32 %v8387_v44, %v5893_v26  ;;  %8736 = vst [vmem:[#allocation22_spill] sm:$0xff] %v6455_v54  ;;  %8737 = vst [vmem:[#allocation23_spill] sm:$0xff] %v6457_v29  ;;  %v8739_v26 = vld [vmem:[#allocation111_spill] sm:$0xff]  ;;  %v8740_v62 = vld [vmem:[#allocation89_spill] sm:$0xff] }
 0x287   : > { %v2311_v35 = vadd.f32 %v2295_v59, %v2247_v51  ;;  %8738 = vst [vmem:[#allocation46_spill] sm:$0xff] %v6459_v0  ;;  %v1300_v60 = vadd.f32 %v1284_v11, %v1264_v4  ;;  %v1301_v41 = vadd.f32 %v1285_v46, %v1265_v13  ;;  %v1356_v14 = vmul.f32 %v8514_v49, %v6170_v10  ;;  %v8741_v23 = vld [vmem:[#allocation17_spill] sm:$0xff] }
 0x288   : > { %v1357_v45 = vmul.f32 %v8514_v49, %v6176_v48  ;;  %v2346_v43 = vadd.f32 %v2330_v42, %v2310_v21  ;;  %v2474_v1 = vmul.f32 %v8739_v26, %v6191_v27  ;;  %v2475_v51 = vmul.f32 %v8739_v26, %v8740_v62  ;;  %v8742_v49 = vld [vmem:[#allocation114_spill] sm:$0xff]  ;;  %v8744_v26 = vld [vmem:[#allocation51_spill] sm:$0xff] }
 0x289   : > { %v2347_v59 = vadd.f32 %v2331_v36, %v2311_v35  ;;  %v1336_v44 = vadd.f32 %v1320_v50, %v1300_v60  ;;  %v1337_v32 = vadd.f32 %v1321_v7, %v1301_v41  ;;  %v1392_v11 = vmul.f32 %v8741_v23, %v6453_v63  ;;  %v8743_v27 = vld [vmem:[#allocation18_spill] sm:$0xff] }
 0x28a   : > { %v1393_v46 = vmul.f32 %v8741_v23, %v6455_v54  ;;  %v2382_v4 = vadd.f32 %v2366_v34, %v2346_v43  ;;  %v2510_v42 = vmul.f32 %v8742_v49, %v6457_v29  ;;  %v2511_v36 = vmul.f32 %v8742_v49, %v6459_v0  ;;  %v8745_v7 = vld [vmem:[#allocation54_spill] sm:$0xff]  ;;  %v8747_v23 = vld [vmem:[#allocation40_spill] sm:$0xff]  ;;  %v8749_v54 = vld [vmem:[#allocation19_spill] sm:$0xff] }
 0x28b   : > { %v2383_v13 = vadd.f32 %v2367_v5, %v2347_v59  ;;  %v1372_v21 = vadd.f32 %v1356_v14, %v1336_v44  ;;  %v1373_v35 = vadd.f32 %v1357_v45, %v1337_v32  ;;  %v1456_v50 = vmul.f32 %v8744_v26, %v8743_v27  ;;  %v8746_v63 = vld [vmem:[#allocation86_spill] sm:$0xff]  ;;  %v8751_v32 = vld [vmem:[#allocation56_spill] sm:$0xff]  ;;  %v8752_v0 = vld [vmem:[#allocation87_spill] sm:$0xff] }
 0x28c   : > { %v1457_v60 = vmul.f32 %v8745_v7, %v8743_v27  ;;  %v2418_v41 = vadd.f32 %v2402_v3, %v2382_v4  ;;  %v2574_v34 = vmul.f32 %v8747_v23, %v8746_v63  ;;  %v8748_v5 = vld [vmem:[#allocation98_spill] sm:$0xff]  ;;  %v1493_v14 = vmul.f32 %v8751_v32, %v8749_v54  ;;  %v8753_v7 = vld [vmem:[#allocation25_spill] sm:$0xff]  ;;  %v8755_v27 = vld [vmem:[#allocation20_spill] sm:$0xff] }
 0x28d   : > { %v2419_v62 = vadd.f32 %v2403_v17, %v2383_v13  ;;  %v2575_v43 = vmul.f32 %v8748_v5, %v8746_v63  ;;  %v1408_v59 = vadd.f32 %v1392_v11, %v1372_v21  ;;  %v1409_v29 = vadd.f32 %v1393_v46, %v1373_v35  ;;  %v8750_v49 = vld [vmem:[#allocation58_spill] sm:$0xff]  ;;  %v8756_v5 = vld [vmem:[#allocation99_spill] sm:$0xff]  ;;  %v8757_v46 = vld [vmem:[#allocation41_spill] sm:$0xff] }
 0x28e   : > { %v1492_v44 = vmul.f32 %v8750_v49, %v8749_v54  ;;  %v2454_v45 = vadd.f32 %v2438_v61, %v2418_v41  ;;  %v2610_v3 = vmul.f32 %v8753_v7, %v8752_v0  ;;  %v8754_v17 = vld [vmem:[#allocation42_spill] sm:$0xff]  ;;  %v1528_v11 = vmul.f32 %v8756_v5, %v8755_v27  ;;  %v8758_v63 = vld [vmem:[#allocation88_spill] sm:$0xff] }
 0x28f   : > { %v2455_v26 = vadd.f32 %v2439_v12, %v2419_v62  ;;  %v2611_v4 = vmul.f32 %v8754_v17, %v8752_v0  ;;  %v1472_v23 = vadd.f32 %v1456_v50, %v1408_v59  ;;  %v1473_v13 = vadd.f32 %v1457_v60, %v1409_v29  ;;  %v8759_v32 = vld [vmem:[#allocation28_spill] sm:$0xff]  ;;  %v8760_v12 = vld [vmem:[#allocation45_spill] sm:$0xff]  ;;  %v6505_v60 = vld [vmem:[#allocation2 + $0x109] sm:$0xff] }
 0x290   : > { %v1529_v21 = vmul.f32 %v8757_v46, %v8755_v27  ;;  %v2490_v49 = vadd.f32 %v2474_v1, %v2454_v45  ;;  %v2646_v61 = vmul.f32 %v8759_v32, %v8758_v63  ;;  %v2647_v62 = vmul.f32 %v8760_v12, %v8758_v63  ;;  %v6501_v54 = vld [vmem:[#allocation2 + $0x101] sm:$0xff]  ;;  %8763 = vst [vmem:[#allocation145_spill] sm:$0xff] %v6505_v60  ;;  %v6513_v63 = vld [vmem:[#allocation2 + $0xed] sm:$0xff]  ;;  %v8768_v12 = vld [vmem:[#allocation24_spill] sm:$0xff] }
 0x291   : > { %v2491_v35 = vadd.f32 %v2475_v51, %v2455_v26  ;;  %v1508_v41 = vadd.f32 %v1492_v44, %v1472_v23  ;;  %v1509_v7 = vadd.f32 %v1493_v14, %v1473_v13  ;;  %8761 = vst [vmem:[#allocation144_spill] sm:$0xff] %v6501_v54  ;;  %v8762_v50 = vld [vmem:[#allocation21_spill] sm:$0xff]  ;;  %8766 = vst [vmem:[#allocation75_spill] sm:$0xff] %v6513_v63  ;;  %v8769_v17 = vld [vmem:[#allocation62_spill] sm:$0xff] }
 0x292   : > { %v1564_v29 = vmul.f32 %v6501_v54, %v8762_v50  ;;  %v1565_v59 = vmul.f32 %v6505_v60, %v8762_v50  ;;  %v2526_v1 = vadd.f32 %v2510_v42, %v2490_v49  ;;  %v6509_v45 = vld [vmem:[#allocation2 + $0xe5] sm:$0xff]  ;;  %v1601_v50 = vmul.f32 %v8768_v12, %v8769_v17  ;;  %v8771_v60 = vld [vmem:[#allocation80_spill] sm:$0xff]  ;;  %v8777_v17 = vld [vmem:[#allocation27_spill] sm:$0xff] }
 0x293   : > { %v2527_v51 = vadd.f32 %v2511_v36, %v2491_v35  ;;  %8764 = vst [vmem:[#allocation31_spill] sm:$0xff] %v6509_v45  ;;  %v8765_v26 = vld [vmem:[#allocation101_spill] sm:$0xff]  ;;  %v1544_v14 = vadd.f32 %v1528_v11, %v1508_v41  ;;  %v1545_v23 = vadd.f32 %v1529_v21, %v1509_v7  ;;  %v8770_v49 = vld [vmem:[#allocation102_spill] sm:$0xff] }
 0x294   : > { %v2682_v32 = vmul.f32 %v6509_v45, %v8765_v26  ;;  %v2683_v44 = vmul.f32 %v6513_v63, %v8765_v26  ;;  %v8767_v13 = vld [vmem:[#allocation57_spill] sm:$0xff]  ;;  %v2590_v42 = vadd.f32 %v2574_v34, %v2526_v1  ;;  %v2718_v35 = vmul.f32 %v8770_v49, %v8669_v56  ;;  %v6527_v27 = vld [vmem:[#allocation2 + $0x169] sm:$0xff] }
 0x295   : > { %v1600_v0 = vmul.f32 %v8768_v12, %v8767_v13  ;;  %v2591_v36 = vadd.f32 %v2575_v43, %v2527_v51  ;;  %v2719_v45 = vmul.f32 %v8770_v49, %v8771_v60  ;;  %v6525_v54 = vld [vmem:[#allocation2 + $0x161] sm:$0xff]  ;;  %8773 = vst [vmem:[#allocation53_spill] sm:$0xff] %v6527_v27  ;;  %v6531_v7 = vld [vmem:[#allocation2 + $0x14d] sm:$0xff]  ;;  %v1580_v21 = vadd.f32 %v1564_v29, %v1544_v14 }
 0x296   : > { %8772 = vst [vmem:[#allocation76_spill] sm:$0xff] %v6525_v54  ;;  %v6529_v11 = vld [vmem:[#allocation2 + $0x145] sm:$0xff]  ;;  %8775 = vst [vmem:[#allocation106_spill] sm:$0xff] %v6531_v7  ;;  %v1581_v41 = vadd.f32 %v1565_v59, %v1545_v23  ;;  %v2626_v56 = vadd.f32 %v2610_v3, %v2590_v42  ;;  %v8779_v26 = vld [vmem:[#allocation47_spill] sm:$0xff] }
 0x297   : > { %8774 = vst [vmem:[#allocation97_spill] sm:$0xff] %v6529_v11  ;;  %v8776_v13 = vld [vmem:[#allocation26_spill] sm:$0xff]  ;;  %v8778_v43 = vld [vmem:[#allocation65_spill] sm:$0xff]  ;;  %v2627_v51 = vadd.f32 %v2611_v4, %v2591_v36  ;;  %v8780_v60 = vld [vmem:[#allocation103_spill] sm:$0xff]  ;;  %v1616_v46 = vadd.f32 %v1600_v0, %v1580_v21 }
 0x298   : > { %v1636_v34 = vmul.f32 %v8777_v17, %v8776_v13  ;;  %v1637_v1 = vmul.f32 %v8777_v17, %v8778_v43  ;;  %v2754_v49 = vmul.f32 %v8780_v60, %v8779_v26  ;;  %v8781_v63 = vld [vmem:[#allocation143_spill] sm:$0xff]  ;;  %v1617_v5 = vadd.f32 %v1601_v50, %v1581_v41  ;;  %v8782_v48 = vld [vmem:[#allocation30_spill] sm:$0xff]  ;;  %v8783_v17 = vld [vmem:[#allocation104_spill] sm:$0xff] }
 0x299   : > { %v2755_v12 = vmul.f32 %v8780_v60, %v8781_v63  ;;  %v1672_v29 = vmul.f32 %v8782_v48, %v6525_v54  ;;  %v1673_v59 = vmul.f32 %v8782_v48, %v6527_v27  ;;  %v2662_v14 = vadd.f32 %v2646_v61, %v2626_v56  ;;  %v8784_v26 = vld [vmem:[#allocation33_spill] sm:$0xff]  ;;  %v8785_v60 = vld [vmem:[#allocation71_spill] sm:$0xff]  ;;  %v8786_v50 = vld [vmem:[#allocation120_spill] sm:$0xff] }
 0x29a   : > { %v2663_v23 = vadd.f32 %v2647_v62, %v2627_v51  ;;  %v2790_v3 = vmul.f32 %v8783_v17, %v6529_v11  ;;  %v2791_v4 = vmul.f32 %v8783_v17, %v6531_v7  ;;  %v1652_v42 = vadd.f32 %v1636_v34, %v1616_v46  ;;  %v8787_v54 = vld [vmem:[#allocation115_spill] sm:$0xff]  ;;  %v8789_v62 = vld [vmem:[#allocation124_spill] sm:$0xff] }
 0x29b   : > { %v1653_v36 = vadd.f32 %v1637_v1, %v1617_v5  ;;  %v1736_v0 = vmul.f32 %v8785_v60, %v8784_v26  ;;  %v1737_v21 = vmul.f32 %v8786_v50, %v8784_v26  ;;  %v2698_v41 = vadd.f32 %v2682_v32, %v2662_v14  ;;  %v8788_v48 = vld [vmem:[#allocation123_spill] sm:$0xff]  ;;  %v8790_v27 = vld [vmem:[#allocation36_spill] sm:$0xff]  ;;  %v8794_v50 = vld [vmem:[#allocation130_spill] sm:$0xff] }
 0x29c   : > { %v2699_v63 = vadd.f32 %v2683_v44, %v2663_v23  ;;  %v2854_v61 = vmul.f32 %v8788_v48, %v8787_v54  ;;  %v2855_v56 = vmul.f32 %v8789_v62, %v8787_v54  ;;  %v1688_v51 = vadd.f32 %v1672_v29, %v1652_v42  ;;  %v8791_v17 = vld [vmem:[#allocation83_spill] sm:$0xff]  ;;  %v8792_v5 = vld [vmem:[#allocation84_spill] sm:$0xff]  ;;  %v8797_v62 = vld [vmem:[#allocation129_spill] sm:$0xff] }
 0x29d   : > { %v1689_v11 = vadd.f32 %v1673_v59, %v1653_v36  ;;  %v1772_v46 = vmul.f32 %v8791_v17, %v8790_v27  ;;  %v1773_v34 = vmul.f32 %v8792_v5, %v8790_v27  ;;  %v2734_v1 = vadd.f32 %v2718_v35, %v2698_v41  ;;  %v8793_v7 = vld [vmem:[#allocation116_spill] sm:$0xff]  ;;  %v8796_v26 = vld [vmem:[#allocation39_spill] sm:$0xff]  ;;  %v8798_v59 = vld [vmem:[#allocation137_spill] sm:$0xff] }
 0x29e   : > { %v2735_v60 = vadd.f32 %v2719_v45, %v2699_v63  ;;  %v2890_v32 = vmul.f32 %v8794_v50, %v8793_v7  ;;  %v8795_v44 = vld [vmem:[#allocation132_spill] sm:$0xff]  ;;  %v1752_v48 = vadd.f32 %v1736_v0, %v1688_v51  ;;  %v1808_v29 = vmul.f32 %v8797_v62, %v8796_v26  ;;  %v8799_v54 = vld [vmem:[#allocation118_spill] sm:$0xff]  ;;  %v8800_v5 = vld [vmem:[#allocation133_spill] sm:$0xff] }
 0x29f   : > { %v2891_v14 = vmul.f32 %v8795_v44, %v8793_v7  ;;  %v1753_v23 = vadd.f32 %v1737_v21, %v1689_v11  ;;  %v1809_v42 = vmul.f32 %v8798_v59, %v8796_v26  ;;  %v2770_v17 = vadd.f32 %v2754_v49, %v2734_v1  ;;  %v8801_v63 = vld [vmem:[#allocation134_spill] sm:$0xff]  ;;  %v8803_v0 = vld [vmem:[#allocation43_spill] sm:$0xff]  ;;  %v8819_v62 = vld [vmem:[#allocation60_spill] sm:$0xff] }
 0x2a0   : > { %v2771_v36 = vadd.f32 %v2755_v12, %v2735_v60  ;;  %v2926_v35 = vmul.f32 %v8800_v5, %v8799_v54  ;;  %v2927_v45 = vmul.f32 %v8801_v63, %v8799_v54  ;;  %v1788_v41 = vadd.f32 %v1772_v46, %v1752_v48  ;;  %v6573_v27 = vld [vmem:[#allocation2 + $0x102] sm:$0xff]  ;;  %v6577_v21 = vld [vmem:[#allocation2 + $0x10a] sm:$0xff] }
 0x2a1   : > { %v1789_v50 = vadd.f32 %v1773_v34, %v1753_v23  ;;  %8802 = vst [vmem:[#allocation44_spill] sm:$0xff] %v6573_v27  ;;  %v1844_v11 = vmul.f32 %v6573_v27, %v8803_v0  ;;  %8804 = vst [vmem:[#allocation48_spill] sm:$0xff] %v6577_v21  ;;  %v1845_v51 = vmul.f32 %v6577_v21, %v8803_v0  ;;  %v6581_v1 = vld [vmem:[#allocation2 + $0xe6] sm:$0xff]  ;;  %v8806_v60 = vld [vmem:[#allocation119_spill] sm:$0xff] }
 0x2a2   : > { %v2806_v49 = vadd.f32 %v2790_v3, %v2770_v17  ;;  %v2807_v12 = vadd.f32 %v2791_v4, %v2771_v36  ;;  %8805 = vst [vmem:[#allocation50_spill] sm:$0xff] %v6581_v1  ;;  %v2962_v5 = vmul.f32 %v6581_v1, %v8806_v60  ;;  %v6585_v54 = vld [vmem:[#allocation2 + $0xee] sm:$0xff]  ;;  %v1824_v34 = vadd.f32 %v1808_v29, %v1788_v41  ;;  %v8808_v23 = vld [vmem:[#allocation128_spill] sm:$0xff]  ;;  %v8809_v63 = vld [vmem:[#allocation49_spill] sm:$0xff] }
 0x2a3   : > { %8807 = vst [vmem:[#allocation105_spill] sm:$0xff] %v6585_v54  ;;  %v2963_v46 = vmul.f32 %v6585_v54, %v8806_v60  ;;  %v1825_v48 = vadd.f32 %v1809_v42, %v1789_v50  ;;  %v1880_v7 = vmul.f32 %v8809_v63, %v8808_v23  ;;  %v8810_v44 = vld [vmem:[#allocation131_spill] sm:$0xff]  ;;  %v8811_v17 = vld [vmem:[#allocation125_spill] sm:$0xff]  ;;  %v8812_v21 = vld [vmem:[#allocation100_spill] sm:$0xff] }
 0x2a4   : > { %v1881_v0 = vmul.f32 %v8809_v63, %v8810_v44  ;;  %v2870_v3 = vadd.f32 %v2854_v61, %v2806_v49  ;;  %v2871_v4 = vadd.f32 %v2855_v56, %v2807_v12  ;;  %v2998_v36 = vmul.f32 %v8811_v17, %v8708_v30  ;;  %v6597_v27 = vld [vmem:[#allocation2 + $0x162] sm:$0xff]  ;;  %v6599_v26 = vld [vmem:[#allocation2 + $0x16a] sm:$0xff]  ;;  %v8818_v60 = vld [vmem:[#allocation136_spill] sm:$0xff] }
 0x2a5   : > { %v2999_v1 = vmul.f32 %v8811_v17, %v8812_v21  ;;  %8813 = vst [vmem:[#allocation34_spill] sm:$0xff] %v6599_v26  ;;  %v6601_v29 = vld [vmem:[#allocation2 + $0x146] sm:$0xff]  ;;  %v6603_v50 = vld [vmem:[#allocation2 + $0x14e] sm:$0xff]  ;;  %v1860_v42 = vadd.f32 %v1844_v11, %v1824_v34  ;;  %v1861_v41 = vadd.f32 %v1845_v51, %v1825_v48  ;;  %v1952_v11 = vmul.f32 %v8819_v62, %v6597_v27 }
 0x2a6   : > { %v8814_v23 = vld [vmem:[#allocation122_spill] sm:$0xff]  ;;  %v8815_v44 = vld [vmem:[#allocation55_spill] sm:$0xff]  ;;  %v2906_v30 = vadd.f32 %v2890_v32, %v2870_v3  ;;  %v2907_v12 = vadd.f32 %v2891_v14, %v2871_v4  ;;  %v1953_v51 = vmul.f32 %v8819_v62, %v6599_v26 }
 0x2a7   : > { %v1916_v61 = vmul.f32 %v8815_v44, %v8814_v23  ;;  %v8816_v56 = vld [vmem:[#allocation59_spill] sm:$0xff]  ;;  %v8817_v21 = vld [vmem:[#allocation126_spill] sm:$0xff]  ;;  %v1896_v63 = vadd.f32 %v1880_v7, %v1860_v42  ;;  %v1897_v59 = vadd.f32 %v1881_v0, %v1861_v41 }
 0x2a8   : > { %v1917_v49 = vmul.f32 %v8815_v44, %v8816_v56  ;;  %v3034_v17 = vmul.f32 %v8817_v21, %v6347_v25  ;;  %v3035_v54 = vmul.f32 %v8817_v21, %v8818_v60  ;;  %v2942_v34 = vadd.f32 %v2926_v35, %v2906_v30  ;;  %v8820_v44 = vld [vmem:[#allocation127_spill] sm:$0xff]  ;;  %v8821_v25 = vld [vmem:[#allocation61_spill] sm:$0xff]  ;;  %v8822_v21 = vld [vmem:[#allocation108_spill] sm:$0xff] }
 0x2a9   : > { %v2943_v48 = vadd.f32 %v2927_v45, %v2907_v12  ;;  %v3070_v32 = vmul.f32 %v8820_v44, %v6601_v29  ;;  %v3071_v14 = vmul.f32 %v8820_v44, %v6603_v50  ;;  %v1932_v3 = vadd.f32 %v1916_v61, %v1896_v63 }
 0x2aa   : > { %v1933_v4 = vadd.f32 %v1917_v49, %v1897_v59  ;;  %v2016_v7 = vmul.f32 %v8822_v21, %v8821_v25  ;;  %v2017_v0 = vmul.f32 %v8717_v31, %v8821_v25  ;;  %v2978_v42 = vadd.f32 %v2962_v5, %v2942_v34  ;;  %v6633_v21 = vld [vmem:[#allocation2 + $0x163] sm:$0xff]  ;;  %v6635_v31 = vld [vmem:[#allocation2 + $0x16b] sm:$0xff] }
 0x2ab   : > { %v2979_v41 = vadd.f32 %v2963_v46, %v2943_v48  ;;  %v2052_v35 = vmul.f32 %v8719_v16, %v8715_v19  ;;  %v2053_v45 = vmul.f32 %v8720_v2, %v8715_v19  ;;  %v1968_v30 = vadd.f32 %v1952_v11, %v1932_v3  ;;  %8823 = vst [vmem:[#allocation110_spill] sm:$0xff] %v6635_v31  ;;  %v6637_v5 = vld [vmem:[#allocation2 + $0x103] sm:$0xff]  ;;  %v6641_v2 = vld [vmem:[#allocation2 + $0x10b] sm:$0xff] }
 0x2ac   : > { %v1969_v12 = vadd.f32 %v1953_v51, %v1933_v4  ;;  %v2088_v63 = vmul.f32 %v6373_v28, %v8718_v57  ;;  %v2089_v59 = vmul.f32 %v6381_v53, %v8718_v57  ;;  %v3014_v61 = vadd.f32 %v2998_v36, %v2978_v42  ;;  %8824 = vst [vmem:[#allocation72_spill] sm:$0xff] %v6637_v5  ;;  %v8825_v3 = vld [vmem:[#allocation82_spill] sm:$0xff] }
 0x2ad   : > { %v3015_v49 = vadd.f32 %v2999_v1, %v2979_v41  ;;  %v2124_v16 = vmul.f32 %v6637_v5, %v8721_v24  ;;  %v2125_v46 = vmul.f32 %v6641_v2, %v8721_v24  ;;  %v2032_v11 = vadd.f32 %v2016_v7, %v1968_v30  ;;  %v8826_v24 = vld [vmem:[#allocation85_spill] sm:$0xff] }
 0x2ae   : > { %v2033_v51 = vadd.f32 %v2017_v0, %v1969_v12  ;;  %v2160_v36 = vmul.f32 %v8489_v20, %v6098_v9  ;;  %v2161_v1 = vmul.f32 %v8489_v20, %v6106_v39  ;;  %v3050_v34 = vadd.f32 %v3034_v17, %v3014_v61  ;;  %v8827_v61 = vld [vmem:[#allocation64_spill] sm:$0xff] }
 0x2af   : > { %v3051_v48 = vadd.f32 %v3035_v54, %v3015_v49  ;;  %v2196_v4 = vmul.f32 %v8825_v3, %v6377_v18  ;;  %v2197_v42 = vmul.f32 %v8825_v3, %v6379_v58  ;;  %v2068_v41 = vadd.f32 %v2052_v35, %v2032_v11 }
 0x2b0   : > { %v2069_v5 = vadd.f32 %v2053_v45, %v2033_v51  ;;  %v2232_v7 = vmul.f32 %v8826_v24, %v6633_v21  ;;  %v2233_v0 = vmul.f32 %v8826_v24, %v6635_v31  ;;  %v3086_v9 = vadd.f32 %v3070_v32, %v3050_v34  ;;  %v4110_v32 = vld [vmem:[#allocation2 + $0xc0] sm:$0xff]  ;;  %v4111_v51 = vld [vmem:[#allocation2 + $0xc8] sm:$0xff] }
 0x2b1   : > { %v3087_v30 = vadd.f32 %v3071_v14, %v3051_v48  ;;  %v2296_v39 = vmul.f32 %v8725_v38, %v8723_v22  ;;  %v2297_v54 = vmul.f32 %v8726_v52, %v8723_v22  ;;  %v2104_v17 = vadd.f32 %v2088_v63, %v2068_v41  ;;  %v8828_v63 = vld [vmem:[#allocation141_spill] sm:$0xff] }
 0x2b2   : > { %v2105_v12 = vadd.f32 %v2089_v59, %v2069_v5  ;;  %v2332_v35 = vmul.f32 %v8728_v33, %v8724_v55  ;;  %v2333_v45 = vmul.f32 %v8729_v37, %v8724_v55  ;;  %v3109_v49 = vadd.f32 %v8827_v61, %v3086_v9  ;;  %v8829_v48 = vld [vmem:[#allocation13_spill] sm:$0xff]  ;;  %v8830_v9 = vld [vmem:[#allocation146_spill] sm:$0xff] }
 0x2b3   : > { %v3110_v11 = vadd.f32 %v8827_v61, %v3087_v30  ;;  %v1178_v14 = vmul.f32 %v4110_v32, %v8505_v47  ;;  %v1179_v38 = vmul.f32 %v4111_v51, %v8505_v47  ;;  %v2140_v34 = vadd.f32 %v2124_v16, %v2104_v17  ;;  %v8832_v17 = vld [vmem:[#allocation14_spill] sm:$0xff] }
 0x2b4   : > { %v2141_v52 = vadd.f32 %v2125_v46, %v2105_v12  ;;  %v1214_v59 = vmul.f32 %v8828_v63, %v8627_v40  ;;  %v1215_v33 = vmul.f32 %v6172_v8, %v8627_v40  ;;  %v3125_v5 = vmax.f32 %v3109_v49, 0.0  ;;  %v6677_v46 = vld [vmem:[#allocation2 + $0x120] sm:$0xff]  ;;  %v6681_v63 = vld [vmem:[#allocation2 + $0x128] sm:$0xff] }
 0x2b5   : > { %v3126_v37 = vmax.f32 %v3110_v11, 0.0  ;;  %v1250_v41 = vmul.f32 %v6429_v6, %v8829_v48  ;;  %v1251_v30 = vmul.f32 %v8830_v9, %v8829_v48  ;;  %v2176_v32 = vadd.f32 %v2160_v36, %v2140_v34  ;;  %8831 = vst [vmem:[#allocation77_spill] sm:$0xff] %v6677_v46  ;;  %8833 = vst [vmem:[#allocation35_spill] sm:$0xff] %v6681_v63  ;;  %v6687_v36 = vld [vmem:[#allocation2 + $0x180] sm:$0xff]  ;;  %v8836_v34 = vld [vmem:[#allocation94_spill] sm:$0xff] }
 0x2b6   : > { %v2177_v61 = vadd.f32 %v2161_v1, %v2141_v52  ;;  %v1230_v55 = vadd.f32 %v1214_v59, %v1178_v14  ;;  %v1231_v51 = vadd.f32 %v1215_v33, %v1179_v38  ;;  %v1286_v12 = vmul.f32 %v6677_v46, %v8832_v17  ;;  %8834 = vst [vmem:[#allocation70_spill] sm:$0xff] %v6687_v36  ;;  %v6689_v1 = vld [vmem:[#allocation2 + $0x188] sm:$0xff]  ;;  %v8837_v52 = vld [vmem:[#allocation139_spill] sm:$0xff]  ;;  %v8838_v33 = vld [vmem:[#allocation37_spill] sm:$0xff] }
 0x2b7   : > { %v3137_v16 = vpack.c.bf16 %v3126_v37, %v3125_v5  ;;  %v1287_v8 = vmul.f32 %v6681_v63, %v8832_v17  ;;  %v1322_v49 = vmul.f32 %v4732_v15, %v6170_v10  ;;  %v2212_v11 = vadd.f32 %v2196_v4, %v2176_v32  ;;  %8835 = vst [vmem:[#allocation121_spill] sm:$0xff] %v6689_v1  ;;  %v8839_v37 = vld [vmem:[#allocation38_spill] sm:$0xff]  ;;  %v8840_v17 = vld [vmem:[#allocation16_spill] sm:$0xff] }
 0x2b8   : > { %v2213_v48 = vadd.f32 %v2197_v42, %v2177_v61  ;;  %v1266_v14 = vadd.f32 %v1250_v41, %v1230_v55  ;;  %v1267_v38 = vadd.f32 %v1251_v30, %v1231_v51  ;;  %v2368_v59 = vmul.f32 %v8837_v52, %v8836_v34  ;;  %v8841_v10 = vld [vmem:[#allocation22_spill] sm:$0xff]  ;;  %v8844_v51 = vld [vmem:[#allocation95_spill] sm:$0xff] }
 0x2b9   : > { %3903 = vmatprep.mubr.msk.bf16.mxu1 %vm968_vm2, %v3137_v16  ;;  %v1323_v5 = vmul.f32 %v4732_v15, %v8838_v33  ;;  %v1358_v63 = vmul.f32 %v8840_v17, %v8839_v37  ;;  %v1359_v4 = vmul.f32 %v8840_v17, %v8841_v10  ;;  %v2248_v42 = vadd.f32 %v2232_v7, %v2212_v11  ;;  %v8842_v55 = vld [vmem:[#allocation142_spill] sm:$0xff]  ;;  %v8845_v33 = vld [vmem:[#allocation17_spill] sm:$0xff]  ;;  %v8848_v11 = vld [vmem:[#allocation107_spill] sm:$0xff] }
 0x2ba   : > { %v2249_v61 = vadd.f32 %v2233_v0, %v2213_v48  ;;  %v1302_v32 = vadd.f32 %v1286_v12, %v1266_v14  ;;  %v1303_v46 = vadd.f32 %v1287_v8, %v1267_v38  ;;  %v2369_v41 = vmul.f32 %v8842_v55, %v8836_v34  ;;  %v6702_v30 = vld [vmem:[#allocation2 + $0x104] sm:$0xff]  ;;  %v6710_v48 = vld [vmem:[#allocation2 + $0x10c] sm:$0xff] }
 0x2bb   : > { %8843 = vst [vmem:[#allocation63_spill] sm:$0xff] %v6702_v30  ;;  %v2404_v16 = vmul.f32 %v6702_v30, %v8844_v51  ;;  %v1394_v15 = vmul.f32 %v8845_v33, %v6687_v36  ;;  %v1395_v37 = vmul.f32 %v8845_v33, %v6689_v1  ;;  %v2312_v9 = vadd.f32 %v2296_v39, %v2248_v42  ;;  %v8847_v8 = vld [vmem:[#allocation66_spill] sm:$0xff]  ;;  %v8854_v33 = vld [vmem:[#allocation19_spill] sm:$0xff] }
 0x2bc   : > { %v2313_v17 = vadd.f32 %v2297_v54, %v2249_v61  ;;  %v1338_v7 = vadd.f32 %v1322_v49, %v1302_v32  ;;  %v1339_v0 = vadd.f32 %v1323_v5, %v1303_v46  ;;  %8846 = vst [vmem:[#allocation69_spill] sm:$0xff] %v6710_v48  ;;  %v2405_v12 = vmul.f32 %v6710_v48, %v8844_v51  ;;  %v4116_v38 = vld [vmem:[#allocation2 + $0xc1] sm:$0xff]  ;;  %v4117_v10 = vld [vmem:[#allocation2 + $0xc9] sm:$0xff] }
 0x2bd   : > { %v2440_v14 = vmul.f32 %v8848_v11, %v8847_v8  ;;  %v8849_v30 = vld [vmem:[#allocation18_spill] sm:$0xff]  ;;  %v2348_v39 = vadd.f32 %v2332_v35, %v2312_v9  ;;  %v8851_v5 = vld [vmem:[#allocation89_spill] sm:$0xff]  ;;  %v8852_v61 = vld [vmem:[#allocation23_spill] sm:$0xff] }
 0x2be   : > { %v1458_v34 = vmul.f32 %v4116_v38, %v8849_v30  ;;  %v1459_v36 = vmul.f32 %v4117_v10, %v8849_v30  ;;  %v6718_v6 = vld [vmem:[#allocation2 + $0x164] sm:$0xff]  ;;  %v2349_v54 = vadd.f32 %v2333_v45, %v2313_v17  ;;  %v1374_v49 = vadd.f32 %v1358_v63, %v1338_v7  ;;  %v8853_v32 = vld [vmem:[#allocation111_spill] sm:$0xff]  ;;  %v8860_v7 = vld [vmem:[#allocation20_spill] sm:$0xff] }
 0x2bf   : > { %8850 = vst [vmem:[#allocation29_spill] sm:$0xff] %v6718_v6  ;;  %v1375_v46 = vadd.f32 %v1359_v4, %v1339_v0  ;;  %v2441_v42 = vmul.f32 %v8848_v11, %v8851_v5  ;;  %v2476_v51 = vmul.f32 %v8853_v32, %v8852_v61  ;;  %v8855_v8 = vld [vmem:[#allocation99_spill] sm:$0xff]  ;;  %v8856_v38 = vld [vmem:[#allocation41_spill] sm:$0xff]  ;;  %v2384_v10 = vadd.f32 %v2368_v59, %v2348_v39  ;;  %v8858_v9 = vld [vmem:[#allocation46_spill] sm:$0xff] }
 0x2c0   : > { %v1494_v1 = vmul.f32 %v8855_v8, %v8854_v33  ;;  %v1495_v48 = vmul.f32 %v8856_v38, %v8854_v33  ;;  %v6728_v40 = vld [vmem:[#allocation2 + $0x16c] sm:$0xff]  ;;  %v2385_v30 = vadd.f32 %v2369_v41, %v2349_v54  ;;  %v1410_v35 = vadd.f32 %v1394_v15, %v1374_v49  ;;  %v8861_v0 = vld [vmem:[#allocation144_spill] sm:$0xff]  ;;  %v8862_v8 = vld [vmem:[#allocation145_spill] sm:$0xff] }
 0x2c1   : > { %8857 = vst [vmem:[#allocation96_spill] sm:$0xff] %v6728_v40  ;;  %v1411_v45 = vadd.f32 %v1395_v37, %v1375_v46  ;;  %v2477_v17 = vmul.f32 %v8853_v32, %v8858_v9  ;;  %v8859_v63 = vld [vmem:[#allocation114_spill] sm:$0xff]  ;;  %v1530_v5 = vmul.f32 %v8861_v0, %v8860_v7  ;;  %v1531_v11 = vmul.f32 %v8862_v8, %v8860_v7  ;;  %v8864_v37 = vld [vmem:[#allocation25_spill] sm:$0xff] }
 0x2c2   : > { %v2512_v4 = vmul.f32 %v8859_v63, %v6718_v6  ;;  %v2420_v61 = vadd.f32 %v2404_v16, %v2384_v10  ;;  %v2421_v38 = vadd.f32 %v2405_v12, %v2385_v30  ;;  %v1474_v33 = vadd.f32 %v1458_v34, %v1410_v35  ;;  %v8863_v59 = vld [vmem:[#allocation86_spill] sm:$0xff]  ;;  %v8866_v54 = vld [vmem:[#allocation21_spill] sm:$0xff]  ;;  %v8869_v35 = vld [vmem:[#allocation87_spill] sm:$0xff] }
 0x2c3   : > { %v1475_v47 = vadd.f32 %v1459_v36, %v1411_v45  ;;  %v2513_v15 = vmul.f32 %v8859_v63, %v6728_v40  ;;  %v2576_v41 = vmul.f32 %v8864_v37, %v8863_v59  ;;  %v6742_v39 = vld [vmem:[#allocation2 + $0x121] sm:$0xff]  ;;  %v6746_v46 = vld [vmem:[#allocation2 + $0x129] sm:$0xff]  ;;  %v8870_v45 = vld [vmem:[#allocation28_spill] sm:$0xff] }
 0x2c4   : > { %8865 = vst [vmem:[#allocation81_spill] sm:$0xff] %v6742_v39  ;;  %v1566_v49 = vmul.f32 %v6742_v39, %v8866_v54  ;;  %8867 = vst [vmem:[#allocation117_spill] sm:$0xff] %v6746_v46  ;;  %v1567_v7 = vmul.f32 %v6746_v46, %v8866_v54  ;;  %v2456_v16 = vadd.f32 %v2440_v14, %v2420_v61  ;;  %v8868_v12 = vld [vmem:[#allocation42_spill] sm:$0xff]  ;;  %v8871_v63 = vld [vmem:[#allocation24_spill] sm:$0xff] }
 0x2c5   : > { %v2457_v30 = vadd.f32 %v2441_v42, %v2421_v38  ;;  %v1510_v34 = vadd.f32 %v1494_v1, %v1474_v33  ;;  %v1511_v36 = vadd.f32 %v1495_v48, %v1475_v47  ;;  %v2577_v10 = vmul.f32 %v8868_v12, %v8863_v59  ;;  %v6758_v6 = vld [vmem:[#allocation2 + $0x181] sm:$0xff]  ;;  %v6760_v14 = vld [vmem:[#allocation2 + $0x189] sm:$0xff]  ;;  %v8875_v42 = vld [vmem:[#allocation88_spill] sm:$0xff] }
 0x2c6   : > { %v2612_v37 = vmul.f32 %v8870_v45, %v8869_v35  ;;  %v1602_v8 = vmul.f32 %v8871_v63, %v8776_v13  ;;  %v1603_v39 = vmul.f32 %v8871_v63, %v8778_v43  ;;  %v2492_v40 = vadd.f32 %v2476_v51, %v2456_v16  ;;  %8872 = vst [vmem:[#allocation90_spill] sm:$0xff] %v6758_v6  ;;  %v8874_v33 = vld [vmem:[#allocation45_spill] sm:$0xff]  ;;  %v8876_v61 = vld [vmem:[#allocation31_spill] sm:$0xff]  ;;  %v8877_v12 = vld [vmem:[#allocation76_spill] sm:$0xff] }
 0x2c7   : > { %v2493_v32 = vadd.f32 %v2477_v17, %v2457_v30  ;;  %8873 = vst [vmem:[#allocation91_spill] sm:$0xff] %v6760_v14  ;;  %v1546_v1 = vadd.f32 %v1530_v5, %v1510_v34  ;;  %v1547_v47 = vadd.f32 %v1531_v11, %v1511_v36  ;;  %v2613_v48 = vmul.f32 %v8874_v33, %v8869_v35  ;;  %v8878_v45 = vld [vmem:[#allocation27_spill] sm:$0xff]  ;;  %v8879_v59 = vld [vmem:[#allocation53_spill] sm:$0xff]  ;;  %v8883_v33 = vld [vmem:[#allocation30_spill] sm:$0xff] }
 0x2c8   : > { %v2648_v38 = vmul.f32 %v8876_v61, %v8875_v42  ;;  %v1638_v13 = vmul.f32 %v8878_v45, %v8877_v12  ;;  %v1639_v43 = vmul.f32 %v8878_v45, %v8879_v59  ;;  %v2528_v51 = vadd.f32 %v2512_v4, %v2492_v40  ;;  %v8880_v63 = vld [vmem:[#allocation75_spill] sm:$0xff]  ;;  %v6772_v11 = vld [vmem:[#allocation2 + $0x105] sm:$0xff] }
 0x2c9   : > { %v2529_v17 = vadd.f32 %v2513_v15, %v2493_v32  ;;  %v1582_v16 = vadd.f32 %v1566_v49, %v1546_v1  ;;  %v1583_v30 = vadd.f32 %v1567_v7, %v1547_v47  ;;  %v2649_v5 = vmul.f32 %v8880_v63, %v8875_v42  ;;  %8881 = vst [vmem:[#allocation52_spill] sm:$0xff] %v6772_v11  ;;  %v8882_v34 = vld [vmem:[#allocation101_spill] sm:$0xff]  ;;  %v6780_v4 = vld [vmem:[#allocation2 + $0x10d] sm:$0xff] }
 0x2ca   : > { %v2684_v36 = vmul.f32 %v6772_v11, %v8882_v34  ;;  %v1674_v61 = vmul.f32 %v8883_v33, %v6758_v6  ;;  %v1675_v35 = vmul.f32 %v8883_v33, %v6760_v14  ;;  %v2592_v12 = vadd.f32 %v2576_v41, %v2528_v51  ;;  %8884 = vst [vmem:[#allocation67_spill] sm:$0xff] %v6780_v4  ;;  %v8885_v15 = vld [vmem:[#allocation47_spill] sm:$0xff]  ;;  %v8886_v49 = vld [vmem:[#allocation102_spill] sm:$0xff]  ;;  %v8887_v11 = vld [vmem:[#allocation33_spill] sm:$0xff] }
 0x2cb   : > { %v2593_v45 = vadd.f32 %v2577_v10, %v2529_v17  ;;  %v1618_v40 = vadd.f32 %v1602_v8, %v1582_v16  ;;  %v1619_v32 = vadd.f32 %v1603_v39, %v1583_v30  ;;  %v2685_v7 = vmul.f32 %v6780_v4, %v8882_v34  ;;  %v4122_v47 = vld [vmem:[#allocation2 + $0xc2] sm:$0xff]  ;;  %v4123_v59 = vld [vmem:[#allocation2 + $0xca] sm:$0xff]  ;;  %v8892_v33 = vld [vmem:[#allocation36_spill] sm:$0xff] }
 0x2cc   : > { %v2720_v1 = vmul.f32 %v8886_v49, %v8885_v15  ;;  %v1738_v42 = vmul.f32 %v4122_v47, %v8887_v11  ;;  %v1739_v6 = vmul.f32 %v4123_v59, %v8887_v11  ;;  %v6788_v63 = vld [vmem:[#allocation2 + $0x165] sm:$0xff]  ;;  %v2628_v41 = vadd.f32 %v2612_v37, %v2592_v12  ;;  %v8889_v51 = vld [vmem:[#allocation143_spill] sm:$0xff] }
 0x2cd   : > { %8888 = vst [vmem:[#allocation109_spill] sm:$0xff] %v6788_v63  ;;  %v2629_v10 = vadd.f32 %v2613_v48, %v2593_v45  ;;  %v1654_v8 = vadd.f32 %v1638_v13, %v1618_v40  ;;  %v1655_v39 = vadd.f32 %v1639_v43, %v1619_v32  ;;  %v2721_v17 = vmul.f32 %v8886_v49, %v8889_v51  ;;  %v8890_v16 = vld [vmem:[#allocation97_spill] sm:$0xff]  ;;  %v8891_v30 = vld [vmem:[#allocation103_spill] sm:$0xff]  ;;  %v8896_v12 = vld [vmem:[#allocation106_spill] sm:$0xff] }
 0x2ce   : > { %v2756_v34 = vmul.f32 %v8891_v30, %v8890_v16  ;;  %v8893_v15 = vld [vmem:[#allocation129_spill] sm:$0xff]  ;;  %v6798_v54 = vld [vmem:[#allocation2 + $0x16d] sm:$0xff]  ;;  %v2664_v59 = vadd.f32 %v2648_v38, %v2628_v41  ;;  %v2757_v45 = vmul.f32 %v8891_v30, %v8896_v12  ;;  %v8897_v13 = vld [vmem:[#allocation104_spill] sm:$0xff] }
 0x2cf   : > { %v1774_v14 = vmul.f32 %v8893_v15, %v8892_v33  ;;  %v8894_v47 = vld [vmem:[#allocation137_spill] sm:$0xff]  ;;  %8895 = vst [vmem:[#allocation68_spill] sm:$0xff] %v6798_v54  ;;  %v2665_v11 = vadd.f32 %v2649_v5, %v2629_v10  ;;  %v1690_v37 = vadd.f32 %v1674_v61, %v1654_v8  ;;  %v1691_v48 = vadd.f32 %v1675_v35, %v1655_v39  ;;  %v8898_v40 = vld [vmem:[#allocation39_spill] sm:$0xff]  ;;  %v8899_v32 = vld [vmem:[#allocation44_spill] sm:$0xff] }
 0x2d0   : > { %v1775_v4 = vmul.f32 %v8894_v47, %v8892_v33  ;;  %v2792_v43 = vmul.f32 %v8897_v13, %v6788_v63  ;;  %v1810_v51 = vmul.f32 %v8899_v32, %v8898_v40  ;;  %v8900_v15 = vld [vmem:[#allocation48_spill] sm:$0xff]  ;;  %v2700_v16 = vadd.f32 %v2684_v36, %v2664_v59  ;;  %v8901_v35 = vld [vmem:[#allocation115_spill] sm:$0xff]  ;;  %v8902_v38 = vld [vmem:[#allocation130_spill] sm:$0xff] }
 0x2d1   : > { %v1811_v49 = vmul.f32 %v8900_v15, %v8898_v40  ;;  %v2701_v47 = vadd.f32 %v2685_v7, %v2665_v11  ;;  %v1754_v33 = vadd.f32 %v1738_v42, %v1690_v37  ;;  %v1755_v46 = vadd.f32 %v1739_v6, %v1691_v48  ;;  %v6812_v41 = vld [vmem:[#allocation2 + $0x122] sm:$0xff]  ;;  %v8904_v10 = vld [vmem:[#allocation43_spill] sm:$0xff]  ;;  %v8905_v7 = vld [vmem:[#allocation132_spill] sm:$0xff] }
 0x2d2   : > { %v2793_v61 = vmul.f32 %v8897_v13, %v6798_v54  ;;  %v2856_v5 = vmul.f32 %v8902_v38, %v8901_v35  ;;  %8903 = vst [vmem:[#allocation112_spill] sm:$0xff] %v6812_v41  ;;  %v1846_v8 = vmul.f32 %v6812_v41, %v8904_v10  ;;  %v6816_v39 = vld [vmem:[#allocation2 + $0x12a] sm:$0xff]  ;;  %v2736_v36 = vadd.f32 %v2720_v1, %v2700_v16  ;;  %v8906_v37 = vld [vmem:[#allocation116_spill] sm:$0xff]  ;;  %v8907_v48 = vld [vmem:[#allocation133_spill] sm:$0xff] }
 0x2d3   : > { %v1847_v40 = vmul.f32 %v6816_v39, %v8904_v10  ;;  %v2737_v11 = vadd.f32 %v2721_v17, %v2701_v47  ;;  %v1790_v42 = vadd.f32 %v1774_v14, %v1754_v33  ;;  %v1791_v6 = vadd.f32 %v1775_v4, %v1755_v46  ;;  %v8908_v13 = vld [vmem:[#allocation49_spill] sm:$0xff]  ;;  %v6830_v1 = vld [vmem:[#allocation2 + $0x18a] sm:$0xff] }
 0x2d4   : > { %v2857_v59 = vmul.f32 %v8905_v7, %v8901_v35  ;;  %v2892_v38 = vmul.f32 %v8907_v48, %v8906_v37  ;;  %v1882_v15 = vmul.f32 %v8908_v13, %v8814_v23  ;;  %v1883_v41 = vmul.f32 %v8908_v13, %v8816_v56  ;;  %v6828_v63 = vld [vmem:[#allocation2 + $0x182] sm:$0xff]  ;;  %v8913_v7 = vld [vmem:[#allocation55_spill] sm:$0xff] }
 0x2d5   : > { %v2772_v54 = vadd.f32 %v2756_v34, %v2736_v36  ;;  %v2773_v30 = vadd.f32 %v2757_v45, %v2737_v11  ;;  %8909 = vst [vmem:[#allocation113_spill] sm:$0xff] %v6828_v63  ;;  %v1826_v14 = vadd.f32 %v1810_v51, %v1790_v42  ;;  %v1827_v46 = vadd.f32 %v1811_v49, %v1791_v6  ;;  %v8910_v33 = vld [vmem:[#allocation134_spill] sm:$0xff]  ;;  %v8914_v48 = vld [vmem:[#allocation105_spill] sm:$0xff]  ;;  %v8916_v42 = vld [vmem:[#allocation119_spill] sm:$0xff] }
 0x2d6   : > { %v2893_v4 = vmul.f32 %v8910_v33, %v8906_v37  ;;  %v8911_v17 = vld [vmem:[#allocation118_spill] sm:$0xff]  ;;  %v1918_v23 = vmul.f32 %v8913_v7, %v6597_v27  ;;  %v1919_v56 = vmul.f32 %v8913_v7, %v6599_v26  ;;  %v1954_v33 = vmul.f32 %v8819_v62, %v6828_v63 }
 0x2d7   : > { %v8912_v16 = vld [vmem:[#allocation50_spill] sm:$0xff]  ;;  %v2808_v34 = vadd.f32 %v2792_v43, %v2772_v54  ;;  %v2809_v45 = vadd.f32 %v2793_v61, %v2773_v30  ;;  %v1862_v36 = vadd.f32 %v1846_v8, %v1826_v14  ;;  %v1863_v11 = vadd.f32 %v1847_v40, %v1827_v46  ;;  %v8917_v61 = vld [vmem:[#allocation135_spill] sm:$0xff]  ;;  %v8918_v8 = vld [vmem:[#allocation125_spill] sm:$0xff] }
 0x2d8   : > { %v2928_v47 = vmul.f32 %v8912_v16, %v8911_v17  ;;  %v2929_v51 = vmul.f32 %v8914_v48, %v8911_v17  ;;  %v6842_v49 = vld [vmem:[#allocation2 + $0x106] sm:$0xff]  ;;  %v1955_v16 = vmul.f32 %v8819_v62, %v6830_v1  ;;  %v6850_v43 = vld [vmem:[#allocation2 + $0x10e] sm:$0xff]  ;;  %v3000_v14 = vmul.f32 %v8918_v8, %v8917_v61 }
 0x2d9   : > { %8915 = vst [vmem:[#allocation73_spill] sm:$0xff] %v6842_v49  ;;  %v2964_v6 = vmul.f32 %v6842_v49, %v8916_v42  ;;  %v2872_v37 = vadd.f32 %v2856_v5, %v2808_v34  ;;  %v2873_v7 = vadd.f32 %v2857_v59, %v2809_v45  ;;  %v1898_v54 = vadd.f32 %v1882_v15, %v1862_v36  ;;  %v4128_v46 = vld [vmem:[#allocation2 + $0xc3] sm:$0xff]  ;;  %v4129_v17 = vld [vmem:[#allocation2 + $0xcb] sm:$0xff] }
 0x2da   : > { %v1899_v30 = vadd.f32 %v1883_v41, %v1863_v11  ;;  %v2965_v40 = vmul.f32 %v6850_v43, %v8916_v42  ;;  %v2018_v49 = vmul.f32 %v4128_v46, %v8821_v25  ;;  %v2019_v63 = vmul.f32 %v4129_v17, %v8821_v25  ;;  %v6858_v26 = vld [vmem:[#allocation2 + $0x166] sm:$0xff]  ;;  %v6868_v46 = vld [vmem:[#allocation2 + $0x16e] sm:$0xff] }
 0x2db   : > { %v2908_v5 = vadd.f32 %v2892_v38, %v2872_v37  ;;  %v2909_v59 = vadd.f32 %v2893_v4, %v2873_v7  ;;  %v1934_v15 = vadd.f32 %v1918_v23, %v1898_v54  ;;  %v3001_v34 = vmul.f32 %v8918_v8, %v8818_v60  ;;  %v8919_v45 = vld [vmem:[#allocation126_spill] sm:$0xff]  ;;  %v8920_v7 = vld [vmem:[#allocation72_spill] sm:$0xff] }
 0x2dc   : > { %v1935_v41 = vadd.f32 %v1919_v56, %v1899_v30  ;;  %v3036_v36 = vmul.f32 %v8919_v45, %v6601_v29  ;;  %v2054_v11 = vmul.f32 %v6373_v28, %v8715_v19  ;;  %v2055_v61 = vmul.f32 %v6381_v53, %v8715_v19  ;;  %v6878_v54 = vld [vmem:[#allocation2 + $0x183] sm:$0xff] }
 0x2dd   : > { %v2944_v17 = vadd.f32 %v2928_v47, %v2908_v5  ;;  %v2945_v25 = vadd.f32 %v2929_v51, %v2909_v59  ;;  %v1970_v37 = vadd.f32 %v1954_v33, %v1934_v15  ;;  %v3037_v4 = vmul.f32 %v8919_v45, %v6603_v50  ;;  %8921 = vst [vmem:[#allocation74_spill] sm:$0xff] %v6878_v54  ;;  %v6882_v33 = vld [vmem:[#allocation2 + $0x123] sm:$0xff]  ;;  %v6886_v59 = vld [vmem:[#allocation2 + $0x12b] sm:$0xff] }
 0x2de   : > { %v1971_v38 = vadd.f32 %v1955_v16, %v1935_v41  ;;  %v3072_v60 = vmul.f32 %v8820_v44, %v6858_v26  ;;  %v2090_v23 = vmul.f32 %v8920_v7, %v8718_v57  ;;  %v2091_v28 = vmul.f32 %v6641_v2, %v8718_v57  ;;  %v8922_v30 = vld [vmem:[#allocation78_spill] sm:$0xff]  ;;  %8923 = vst [vmem:[#allocation138_spill] sm:$0xff] %v6886_v59 }
 0x2df   : > { %v2980_v56 = vadd.f32 %v2964_v6, %v2944_v17  ;;  %v2981_v53 = vadd.f32 %v2965_v40, %v2945_v25  ;;  %v2034_v47 = vadd.f32 %v2018_v49, %v1970_v37  ;;  %v3073_v16 = vmul.f32 %v8820_v44, %v6868_v46  ;;  %v6892_v49 = vld [vmem:[#allocation2 + $0x18b] sm:$0xff] }
 0x2e0   : > { %v2035_v51 = vadd.f32 %v2019_v63, %v1971_v38  ;;  %v2126_v5 = vmul.f32 %v6882_v33, %v8922_v30  ;;  %v2127_v15 = vmul.f32 %v6886_v59, %v8922_v30  ;;  %v2162_v25 = vmul.f32 %v8489_v20, %v6377_v18  ;;  %8924 = vst [vmem:[#allocation140_spill] sm:$0xff] %v6892_v49 }
 0x2e1   : > { %v3016_v6 = vadd.f32 %v3000_v14, %v2980_v56  ;;  %v3017_v40 = vadd.f32 %v3001_v34, %v2981_v53  ;;  %v2070_v63 = vadd.f32 %v2054_v11, %v2034_v47  ;;  %v2163_v17 = vmul.f32 %v8489_v20, %v6379_v58  ;;  %v4133_v58 = vld [vmem:[#allocation2 + $0xcc] sm:$0xff]  ;;  %v8925_v47 = vld [vmem:[#allocation93_spill] sm:$0xff] }
 0x2e2   : > { %v2071_v41 = vadd.f32 %v2055_v61, %v2035_v51  ;;  %v2198_v37 = vmul.f32 %v8825_v3, %v6633_v21  ;;  %v2199_v38 = vmul.f32 %v8825_v3, %v6635_v31  ;;  %v2234_v30 = vmul.f32 %v8826_v24, %v6878_v54  ;;  %v4132_v61 = vld [vmem:[#allocation2 + $0xc4] sm:$0xff] }
 0x2e3   : > { %v3052_v59 = vadd.f32 %v3036_v36, %v3016_v6  ;;  %v3053_v18 = vadd.f32 %v3037_v4, %v3017_v40  ;;  %v2106_v14 = vadd.f32 %v2090_v23, %v2070_v63  ;;  %v2235_v11 = vmul.f32 %v8826_v24, %v6892_v49  ;;  %v4134_v4 = vld [vmem:[#allocation2 + $0xe0] sm:$0xff]  ;;  %v8926_v23 = vld [vmem:[#allocation11_spill] sm:$0xff]  ;;  %v4135_v6 = vld [vmem:[#allocation2 + $0xe8] sm:$0xff] }
 0x2e4   : > { %v2107_v34 = vadd.f32 %v2091_v28, %v2071_v41  ;;  %v2298_v56 = vmul.f32 %v4132_v61, %v8723_v22  ;;  %v2299_v53 = vmul.f32 %v4133_v58, %v8723_v22  ;;  %v2334_v51 = vmul.f32 %v8837_v52, %v8925_v47  ;;  %v8927_v63 = vld [vmem:[#allocation12_spill] sm:$0xff]  ;;  %v4136_v49 = vld [vmem:[#allocation2 + $0x140] sm:$0xff] }
 0x2e5   : > { %v3088_v3 = vadd.f32 %v3072_v60, %v3052_v59  ;;  %v3089_v31 = vadd.f32 %v3073_v16, %v3053_v18  ;;  %v2142_v20 = vadd.f32 %v2126_v5, %v2106_v14  ;;  %v2335_v36 = vmul.f32 %v8842_v55, %v8925_v47  ;;  %v8928_v41 = vld [vmem:[#allocation32_spill] sm:$0xff]  ;;  %v8930_v5 = vld [vmem:[#allocation146_spill] sm:$0xff]  ;;  %v8931_v55 = vld [vmem:[#allocation13_spill] sm:$0xff] }
 0x2e6   : > { %v2143_v54 = vadd.f32 %v2127_v15, %v2107_v34  ;;  %v1180_v28 = vmul.f32 %v4134_v4, %v8926_v23  ;;  %v1181_v40 = vmul.f32 %v4135_v6, %v8926_v23  ;;  %v1216_v61 = vmul.f32 %v8928_v41, %v8927_v63  ;;  %v8929_v58 = vld [vmem:[#allocation64_spill] sm:$0xff]  ;;  %v8932_v18 = vld [vmem:[#allocation77_spill] sm:$0xff]  ;;  %v8933_v34 = vld [vmem:[#allocation35_spill] sm:$0xff] }
 0x2e7   : > { %v3111_v22 = vadd.f32 %v8929_v58, %v3088_v3  ;;  %v3112_v52 = vadd.f32 %v8929_v58, %v3089_v31  ;;  %v2178_v60 = vadd.f32 %v2162_v25, %v2142_v20  ;;  %v1217_v59 = vmul.f32 %v8930_v5, %v8927_v63  ;;  %v8934_v31 = vld [vmem:[#allocation14_spill] sm:$0xff]  ;;  %v8936_v5 = vld [vmem:[#allocation15_spill] sm:$0xff] }
 0x2e8   : > { %v2179_v16 = vadd.f32 %v2163_v17, %v2143_v54  ;;  %v1232_v15 = vadd.f32 %v1216_v61, %v1180_v28  ;;  %v1252_v14 = vmul.f32 %v8932_v18, %v8931_v55  ;;  %v1253_v4 = vmul.f32 %v8933_v34, %v8931_v55  ;;  %v4137_v54 = vld [vmem:[#allocation2 + $0x148] sm:$0xff]  ;;  %v1160_v61 = vld [vmem:[#allocation2 + $0x1a0] sm:$0xff] }
 0x2e9   : > { %v3127_v23 = vmax.f32 %v3111_v22, 0.0  ;;  %v3128_v6 = vmax.f32 %v3112_v52, 0.0  ;;  %v2214_v47 = vadd.f32 %v2198_v37, %v2178_v60  ;;  %v1233_v24 = vadd.f32 %v1217_v59, %v1181_v40  ;;  %v8935_v58 = vld [vmem:[#allocation38_spill] sm:$0xff]  ;;  %v8939_v40 = vld [vmem:[#allocation16_spill] sm:$0xff] }
 0x2ea   : > { %v2215_v41 = vadd.f32 %v2199_v38, %v2179_v16  ;;  %v1268_v3 = vadd.f32 %v1252_v14, %v1232_v15  ;;  %v1288_v20 = vmul.f32 %v4136_v49, %v8934_v31  ;;  %v1289_v25 = vmul.f32 %v4137_v54, %v8934_v31  ;;  %v8937_v52 = vld [vmem:[#allocation22_spill] sm:$0xff]  ;;  %v8941_v15 = vld [vmem:[#allocation63_spill] sm:$0xff] }
 0x2eb   : > { %v3138_v17 = vpack.c.bf16 %v3128_v6, %v3127_v23  ;;  %v2250_v28 = vadd.f32 %v2234_v30, %v2214_v47  ;;  %v1324_v18 = vmul.f32 %v8936_v5, %v8935_v58  ;;  %v1269_v55 = vadd.f32 %v1253_v4, %v1233_v24  ;;  %v8938_v38 = vld [vmem:[#allocation70_spill] sm:$0xff]  ;;  %v8943_v4 = vld [vmem:[#allocation121_spill] sm:$0xff] }
 0x2ec   : > { %v2251_v63 = vadd.f32 %v2235_v11, %v2215_v41  ;;  %v1304_v22 = vadd.f32 %v1288_v20, %v1268_v3  ;;  %v1325_v37 = vmul.f32 %v8936_v5, %v8937_v52  ;;  %v1360_v60 = vmul.f32 %v8939_v40, %v8938_v38  ;;  %v8940_v59 = vld [vmem:[#allocation94_spill] sm:$0xff]  ;;  %v8942_v11 = vld [vmem:[#allocation69_spill] sm:$0xff] }
 0x2ed   : > { %3904 = vmatmul.mubr.msk.bf16.gmra.mxu1 %vm968_vm2, %v3138_v17  ;;  %v2314_v49 = vadd.f32 %v2298_v56, %v2250_v28  ;;  %v2370_v30 = vmul.f32 %v8941_v15, %v8940_v59  ;;  %v2371_v47 = vmul.f32 %v8942_v11, %v8940_v59  ;;  %v1161_v14 = vld [vmem:[#allocation2 + $0x1a8] sm:$0xff]  ;;  %v1305_v34 = vadd.f32 %v1289_v25, %v1269_v55  ;;  %v8944_v6 = vld [vmem:[#allocation17_spill] sm:$0xff]  ;;  %v8945_v56 = vld [vmem:[#allocation95_spill] sm:$0xff] }
 0x2ee   : > { %v2315_v16 = vadd.f32 %v2299_v53, %v2251_v63  ;;  %v1340_v24 = vadd.f32 %v1324_v18, %v1304_v22  ;;  %v1361_v23 = vmul.f32 %v8939_v40, %v8943_v4  ;;  %v1396_v41 = vmul.f32 %v8944_v6, %v1160_v61  ;;  %v6938_v20 = vld [vmem:[#allocation2 + $0x124] sm:$0xff]  ;;  %v6942_v54 = vld [vmem:[#allocation2 + $0x12c] sm:$0xff] }
 0x2ef   : > { %v2350_v3 = vadd.f32 %v2334_v51, %v2314_v49  ;;  %v2406_v53 = vmul.f32 %v6938_v20, %v8945_v56  ;;  %v2407_v17 = vmul.f32 %v6942_v54, %v8945_v56  ;;  %v1341_v28 = vadd.f32 %v1325_v37, %v1305_v34  ;;  %v4140_v58 = vld [vmem:[#allocation2 + $0xe1] sm:$0xff]  ;;  %v8948_v55 = vld [vmem:[#allocation107_spill] sm:$0xff] }
 0x2f0   : > { %v2351_v31 = vadd.f32 %v2335_v36, %v2315_v16  ;;  %v1376_v25 = vadd.f32 %v1360_v60, %v1340_v24  ;;  %v1397_v63 = vmul.f32 %v8944_v6, %v1161_v14  ;;  %v8946_v5 = vld [vmem:[#allocation18_spill] sm:$0xff]  ;;  %v8947_v36 = vld [vmem:[#allocation23_spill] sm:$0xff]  ;;  %v2443_v52 = vmul.f32 %v8948_v55, %v8858_v9  ;;  %v8952_v24 = vld [vmem:[#allocation29_spill] sm:$0xff] }
 0x2f1   : > { %v1460_v18 = vmul.f32 %v4140_v58, %v8946_v5  ;;  %v2386_v61 = vadd.f32 %v2370_v30, %v2350_v3  ;;  %v2442_v22 = vmul.f32 %v8948_v55, %v8947_v36  ;;  %v6952_v38 = vld [vmem:[#allocation2 + $0x184] sm:$0xff]  ;;  %v6954_v40 = vld [vmem:[#allocation2 + $0x18c] sm:$0xff]  ;;  %v1377_v49 = vadd.f32 %v1361_v23, %v1341_v28  ;;  %v8954_v3 = vld [vmem:[#allocation96_spill] sm:$0xff] }
 0x2f2   : > { %v2387_v51 = vadd.f32 %v2371_v47, %v2351_v31  ;;  %8949 = vst [vmem:[#allocation51_spill] sm:$0xff] %v6952_v38  ;;  %8950 = vst [vmem:[#allocation54_spill] sm:$0xff] %v6954_v40  ;;  %v1412_v37 = vadd.f32 %v1396_v41, %v1376_v25  ;;  %v4141_v60 = vld [vmem:[#allocation2 + $0xe9] sm:$0xff]  ;;  %v8955_v36 = vld [vmem:[#allocation145_spill] sm:$0xff] }
 0x2f3   : > { %v1461_v16 = vmul.f32 %v4141_v60, %v8946_v5  ;;  %v8951_v14 = vld [vmem:[#allocation19_spill] sm:$0xff]  ;;  %v2422_v30 = vadd.f32 %v2406_v53, %v2386_v61  ;;  %v1413_v31 = vadd.f32 %v1397_v63, %v1377_v49  ;;  %v8956_v41 = vld [vmem:[#allocation20_spill] sm:$0xff]  ;;  %v8957_v28 = vld [vmem:[#allocation81_spill] sm:$0xff] }
 0x2f4   : > { %v1496_v34 = vmul.f32 %v8861_v0, %v8951_v14  ;;  %v2423_v47 = vadd.f32 %v2407_v17, %v2387_v51  ;;  %v8953_v4 = vld [vmem:[#allocation111_spill] sm:$0xff]  ;;  %v1476_v58 = vadd.f32 %v1460_v18, %v1412_v37  ;;  %v1497_v23 = vmul.f32 %v8955_v36, %v8951_v14  ;;  %v8958_v0 = vld [vmem:[#allocation114_spill] sm:$0xff]  ;;  %v8960_v49 = vld [vmem:[#allocation21_spill] sm:$0xff] }
 0x2f5   : > { %v2478_v6 = vmul.f32 %v8953_v4, %v8952_v24  ;;  %v2479_v9 = vmul.f32 %v8953_v4, %v8954_v3  ;;  %v1532_v25 = vmul.f32 %v8957_v28, %v8956_v41  ;;  %v2458_v5 = vadd.f32 %v2442_v22, %v2422_v30  ;;  %v8959_v4 = vld [vmem:[#allocation117_spill] sm:$0xff]  ;;  %v8961_v28 = vld [vmem:[#allocation86_spill] sm:$0xff] }
 0x2f6   : > { %v2459_v60 = vadd.f32 %v2443_v52, %v2423_v47  ;;  %v2514_v53 = vmul.f32 %v8958_v0, %v6952_v38  ;;  %v2515_v17 = vmul.f32 %v8958_v0, %v6954_v40  ;;  %v1477_v61 = vadd.f32 %v1461_v16, %v1413_v31  ;;  %v4142_v18 = vld [vmem:[#allocation2 + $0x141] sm:$0xff]  ;;  %v4144_v52 = vld [vmem:[#allocation2 + $0xcd] sm:$0xff]  ;;  %v8963_v31 = vld [vmem:[#allocation24_spill] sm:$0xff] }
 0x2f7   : > { %v1512_v51 = vadd.f32 %v1496_v34, %v1476_v58  ;;  %v1533_v63 = vmul.f32 %v8959_v4, %v8956_v41  ;;  %v1568_v37 = vmul.f32 %v4142_v18, %v8960_v49  ;;  %v2494_v14 = vadd.f32 %v2478_v6, %v2458_v5  ;;  %v4143_v3 = vld [vmem:[#allocation2 + $0xc5] sm:$0xff]  ;;  %v8962_v34 = vld [vmem:[#allocation76_spill] sm:$0xff]  ;;  %v8964_v0 = vld [vmem:[#allocation87_spill] sm:$0xff] }
 0x2f8   : > { %v2495_v36 = vadd.f32 %v2479_v9, %v2459_v60  ;;  %v2578_v22 = vmul.f32 %v4143_v3, %v8961_v28  ;;  %v2579_v30 = vmul.f32 %v4144_v52, %v8961_v28  ;;  %v1513_v47 = vadd.f32 %v1497_v23, %v1477_v61  ;;  %v4145_v55 = vld [vmem:[#allocation2 + $0x149] sm:$0xff]  ;;  %v1440_v3 = vld [vmem:[#allocation2 + $0x1a1] sm:$0xff] }
 0x2f9   : > { %v1548_v38 = vadd.f32 %v1532_v25, %v1512_v51  ;;  %v1569_v16 = vmul.f32 %v4145_v55, %v8960_v49  ;;  %v1604_v58 = vmul.f32 %v8963_v31, %v8962_v34  ;;  %v2530_v4 = vadd.f32 %v2514_v53, %v2494_v14  ;;  %v8965_v18 = vld [vmem:[#allocation31_spill] sm:$0xff]  ;;  %v8967_v52 = vld [vmem:[#allocation53_spill] sm:$0xff]  ;;  %v8968_v25 = vld [vmem:[#allocation90_spill] sm:$0xff] }
 0x2fa   : > { %v2531_v41 = vadd.f32 %v2515_v17, %v2495_v36  ;;  %v2614_v6 = vmul.f32 %v8965_v18, %v8964_v0  ;;  %v8966_v9 = vld [vmem:[#allocation75_spill] sm:$0xff]  ;;  %v1549_v60 = vadd.f32 %v1533_v63, %v1513_v47  ;;  %v1605_v23 = vmul.f32 %v8963_v31, %v8967_v52  ;;  %v8970_v34 = vld [vmem:[#allocation88_spill] sm:$0xff]  ;;  %v8974_v63 = vld [vmem:[#allocation30_spill] sm:$0xff] }
 0x2fb   : > { %v2615_v5 = vmul.f32 %v8966_v9, %v8964_v0  ;;  %v1584_v40 = vadd.f32 %v1568_v37, %v1548_v38  ;;  %v8969_v61 = vld [vmem:[#allocation27_spill] sm:$0xff]  ;;  %v2594_v51 = vadd.f32 %v2578_v22, %v2530_v4  ;;  %v8971_v53 = vld [vmem:[#allocation52_spill] sm:$0xff]  ;;  %v1676_v37 = vmul.f32 %v8974_v63, %v1440_v3  ;;  %v6994_v52 = vld [vmem:[#allocation2 + $0x125] sm:$0xff] }
 0x2fc   : > { %v1640_v55 = vmul.f32 %v8969_v61, %v8968_v25  ;;  %v2595_v49 = vadd.f32 %v2579_v30, %v2531_v41  ;;  %v2650_v17 = vmul.f32 %v8971_v53, %v8970_v34  ;;  %v8972_v14 = vld [vmem:[#allocation67_spill] sm:$0xff]  ;;  %v1585_v28 = vadd.f32 %v1569_v16, %v1549_v60  ;;  %8975 = vst [vmem:[#allocation40_spill] sm:$0xff] %v6994_v52  ;;  %v8976_v22 = vld [vmem:[#allocation101_spill] sm:$0xff] }
 0x2fd   : > { %v2651_v36 = vmul.f32 %v8972_v14, %v8970_v34  ;;  %v1441_v18 = vld [vmem:[#allocation2 + $0x1a9] sm:$0xff]  ;;  %v1620_v9 = vadd.f32 %v1604_v58, %v1584_v40  ;;  %v2630_v47 = vadd.f32 %v2614_v6, %v2594_v51  ;;  %v2686_v30 = vmul.f32 %v6994_v52, %v8976_v22 }
 0x2fe   : > { %v8973_v0 = vld [vmem:[#allocation91_spill] sm:$0xff]  ;;  %v2631_v31 = vadd.f32 %v2615_v5, %v2595_v49  ;;  %v1621_v25 = vadd.f32 %v1605_v23, %v1585_v28  ;;  %v1677_v40 = vmul.f32 %v8974_v63, %v1441_v18  ;;  %v4148_v58 = vld [vmem:[#allocation2 + $0xe2] sm:$0xff]  ;;  %v8981_v18 = vld [vmem:[#allocation36_spill] sm:$0xff] }
 0x2ff   : > { %v1641_v38 = vmul.f32 %v8969_v61, %v8973_v0  ;;  %v6998_v4 = vld [vmem:[#allocation2 + $0x12d] sm:$0xff]  ;;  %v1656_v16 = vadd.f32 %v1640_v55, %v1620_v9  ;;  %v8978_v0 = vld [vmem:[#allocation33_spill] sm:$0xff]  ;;  %v2666_v3 = vadd.f32 %v2650_v17, %v2630_v47  ;;  %v1776_v9 = vmul.f32 %v8899_v32, %v8981_v18  ;;  %v8988_v32 = vld [vmem:[#allocation104_spill] sm:$0xff] }
 0x300   : > { %8977 = vst [vmem:[#allocation98_spill] sm:$0xff] %v6998_v4  ;;  %v2687_v41 = vmul.f32 %v6998_v4, %v8976_v22  ;;  %v1740_v60 = vmul.f32 %v4148_v58, %v8978_v0  ;;  %v2667_v6 = vadd.f32 %v2651_v36, %v2631_v31  ;;  %v8979_v5 = vld [vmem:[#allocation97_spill] sm:$0xff]  ;;  %v8980_v61 = vld [vmem:[#allocation102_spill] sm:$0xff]  ;;  %v8983_v47 = vld [vmem:[#allocation103_spill] sm:$0xff] }
 0x301   : > { %v2722_v51 = vmul.f32 %v8980_v61, %v8979_v5  ;;  %v2723_v49 = vmul.f32 %v8980_v61, %v8896_v12  ;;  %v7008_v52 = vld [vmem:[#allocation2 + $0x185] sm:$0xff]  ;;  %v7010_v34 = vld [vmem:[#allocation2 + $0x18d] sm:$0xff]  ;;  %v1657_v22 = vadd.f32 %v1641_v38, %v1621_v25  ;;  %v1692_v28 = vadd.f32 %v1676_v37, %v1656_v16  ;;  %v8984_v58 = vld [vmem:[#allocation68_spill] sm:$0xff] }
 0x302   : > { %v4149_v23 = vld [vmem:[#allocation2 + $0xea] sm:$0xff]  ;;  %v2702_v17 = vadd.f32 %v2686_v30, %v2666_v3  ;;  %v2703_v36 = vadd.f32 %v2687_v41, %v2667_v6  ;;  %v8982_v63 = vld [vmem:[#allocation109_spill] sm:$0xff]  ;;  %v2759_v12 = vmul.f32 %v8983_v47, %v8984_v58  ;;  %v8985_v4 = vld [vmem:[#allocation48_spill] sm:$0xff]  ;;  %v2794_v30 = vmul.f32 %v8988_v32, %v7008_v52 }
 0x303   : > { %v1741_v55 = vmul.f32 %v4149_v23, %v8978_v0  ;;  %v2758_v31 = vmul.f32 %v8983_v47, %v8982_v63  ;;  %v1693_v5 = vadd.f32 %v1677_v40, %v1657_v22  ;;  %v1756_v61 = vadd.f32 %v1740_v60, %v1692_v28  ;;  %v8986_v37 = vld [vmem:[#allocation39_spill] sm:$0xff]  ;;  %v8987_v25 = vld [vmem:[#allocation112_spill] sm:$0xff]  ;;  %v4150_v40 = vld [vmem:[#allocation2 + $0x142] sm:$0xff] }
 0x304   : > { %v1777_v38 = vmul.f32 %v8985_v4, %v8981_v18  ;;  %v1812_v16 = vmul.f32 %v8987_v25, %v8986_v37  ;;  %v2738_v0 = vadd.f32 %v2722_v51, %v2702_v17  ;;  %v2739_v23 = vadd.f32 %v2723_v49, %v2703_v36  ;;  %v4151_v18 = vld [vmem:[#allocation2 + $0xc6] sm:$0xff]  ;;  %v4152_v49 = vld [vmem:[#allocation2 + $0xce] sm:$0xff] }
 0x305   : > { %v2795_v41 = vmul.f32 %v8988_v32, %v7010_v34  ;;  %v1757_v3 = vadd.f32 %v1741_v55, %v1693_v5  ;;  %v1792_v6 = vadd.f32 %v1776_v9, %v1756_v61  ;;  %v1813_v22 = vmul.f32 %v6816_v39, %v8986_v37  ;;  %v4153_v47 = vld [vmem:[#allocation2 + $0x14a] sm:$0xff]  ;;  %v8989_v5 = vld [vmem:[#allocation116_spill] sm:$0xff] }
 0x306   : > { %v1848_v60 = vmul.f32 %v4150_v40, %v8904_v10  ;;  %v2774_v4 = vadd.f32 %v2758_v31, %v2738_v0  ;;  %v2775_v28 = vadd.f32 %v2759_v12, %v2739_v23  ;;  %v2858_v51 = vmul.f32 %v4151_v18, %v8901_v35  ;;  %v8990_v37 = vld [vmem:[#allocation50_spill] sm:$0xff] }
 0x307   : > { %v2859_v17 = vmul.f32 %v4152_v49, %v8901_v35  ;;  %v1793_v36 = vadd.f32 %v1777_v38, %v1757_v3  ;;  %v1828_v25 = vadd.f32 %v1812_v16, %v1792_v6  ;;  %v1849_v55 = vmul.f32 %v4153_v47, %v8904_v10  ;;  %v1720_v0 = vld [vmem:[#allocation2 + $0x1a2] sm:$0xff]  ;;  %v8993_v3 = vld [vmem:[#allocation55_spill] sm:$0xff] }
 0x308   : > { %v1884_v61 = vmul.f32 %v8908_v13, %v6597_v27  ;;  %v2810_v39 = vadd.f32 %v2794_v30, %v2774_v4  ;;  %v2811_v9 = vadd.f32 %v2795_v41, %v2775_v28  ;;  %v2894_v31 = vmul.f32 %v8990_v37, %v8989_v5  ;;  %v8991_v18 = vld [vmem:[#allocation34_spill] sm:$0xff]  ;;  %v8992_v16 = vld [vmem:[#allocation113_spill] sm:$0xff] }
 0x309   : > { %v2895_v12 = vmul.f32 %v8914_v48, %v8989_v5  ;;  %v1829_v23 = vadd.f32 %v1813_v22, %v1793_v36  ;;  %v1864_v40 = vadd.f32 %v1848_v60, %v1828_v25  ;;  %v1885_v38 = vmul.f32 %v8908_v13, %v8991_v18  ;;  %v8994_v27 = vld [vmem:[#allocation118_spill] sm:$0xff]  ;;  %v8995_v30 = vld [vmem:[#allocation73_spill] sm:$0xff] }
 0x30a   : > { %v1920_v10 = vmul.f32 %v8993_v3, %v8992_v16  ;;  %v2874_v47 = vadd.f32 %v2858_v51, %v2810_v39  ;;  %v2875_v6 = vadd.f32 %v2859_v17, %v2811_v9  ;;  %v2930_v41 = vmul.f32 %v8995_v30, %v8994_v27  ;;  %v1721_v28 = vld [vmem:[#allocation2 + $0x1aa] sm:$0xff] }
 0x30b   : > { %v2931_v4 = vmul.f32 %v6850_v43, %v8994_v27  ;;  %v1865_v49 = vadd.f32 %v1849_v55, %v1829_v23  ;;  %v1900_v48 = vadd.f32 %v1884_v61, %v1864_v40  ;;  %v1921_v22 = vmul.f32 %v8993_v3, %v6830_v1  ;;  %v7050_v25 = vld [vmem:[#allocation2 + $0x126] sm:$0xff]  ;;  %v7054_v17 = vld [vmem:[#allocation2 + $0x12e] sm:$0xff] }
 0x30c   : > { %v1956_v60 = vmul.f32 %v8819_v62, %v1720_v0  ;;  %v2910_v13 = vadd.f32 %v2894_v31, %v2874_v47  ;;  %v2911_v36 = vadd.f32 %v2895_v12, %v2875_v6  ;;  %v2966_v51 = vmul.f32 %v7050_v25, %v8916_v42  ;;  %v4156_v37 = vld [vmem:[#allocation2 + $0xe3] sm:$0xff]  ;;  %v7066_v16 = vld [vmem:[#allocation2 + $0x18e] sm:$0xff] }
 0x30d   : > { %v2967_v39 = vmul.f32 %v7054_v17, %v8916_v42  ;;  %v1901_v9 = vadd.f32 %v1885_v38, %v1865_v49  ;;  %v1936_v55 = vadd.f32 %v1920_v10, %v1900_v48  ;;  %v1957_v61 = vmul.f32 %v8819_v62, %v1721_v28  ;;  %v8996_v1 = vld [vmem:[#allocation61_spill] sm:$0xff]  ;;  %v4157_v10 = vld [vmem:[#allocation2 + $0xeb] sm:$0xff] }
 0x30e   : > { %v2020_v23 = vmul.f32 %v4156_v37, %v8996_v1  ;;  %v2946_v0 = vadd.f32 %v2930_v41, %v2910_v13  ;;  %v2947_v31 = vadd.f32 %v2931_v4, %v2911_v36  ;;  %v3002_v12 = vmul.f32 %v8918_v8, %v6601_v29  ;;  %v7064_v18 = vld [vmem:[#allocation2 + $0x186] sm:$0xff] }
 0x30f   : > { %v3003_v40 = vmul.f32 %v8918_v8, %v6603_v50  ;;  %v1937_v3 = vadd.f32 %v1921_v22, %v1901_v9  ;;  %v1972_v38 = vadd.f32 %v1956_v60, %v1936_v55  ;;  %v2021_v62 = vmul.f32 %v4157_v10, %v8996_v1  ;;  %v4158_v55 = vld [vmem:[#allocation2 + $0x143] sm:$0xff] }
 0x310   : > { %v2056_v47 = vmul.f32 %v8920_v7, %v8715_v19  ;;  %v2982_v6 = vadd.f32 %v2966_v51, %v2946_v0  ;;  %v2983_v41 = vadd.f32 %v2967_v39, %v2947_v31  ;;  %v3038_v29 = vmul.f32 %v8919_v45, %v6858_v26  ;;  %v8997_v39 = vld [vmem:[#allocation138_spill] sm:$0xff] }
 0x311   : > { %v3039_v50 = vmul.f32 %v8919_v45, %v6868_v46  ;;  %v1973_v4 = vadd.f32 %v1957_v61, %v1937_v3  ;;  %v2036_v28 = vadd.f32 %v2020_v23, %v1972_v38  ;;  %v2057_v49 = vmul.f32 %v6641_v2, %v8715_v19  ;;  %v8998_v61 = vld [vmem:[#allocation78_spill] sm:$0xff]  ;;  %v3897_v19 = vpop.f32.mrf.mxu1 }
 0x312   : > { %v2092_v48 = vmul.f32 %v6882_v33, %v8718_v57  ;;  %v3018_v22 = vadd.f32 %v3002_v12, %v2982_v6  ;;  %v3019_v60 = vadd.f32 %v3003_v40, %v2983_v41  ;;  %v3074_v7 = vmul.f32 %v8820_v44, %v7064_v18  ;;  %v4159_v0 = vld [vmem:[#allocation2 + $0x14b] sm:$0xff]  ;;  %v2000_v10 = vld [vmem:[#allocation2 + $0x1a3] sm:$0xff] }
 0x313   : > { %v3075_v13 = vmul.f32 %v8820_v44, %v7066_v16  ;;  %v2037_v36 = vadd.f32 %v2021_v62, %v1973_v4  ;;  %v2072_v51 = vadd.f32 %v2056_v47, %v2036_v28  ;;  %v2093_v9 = vmul.f32 %v8997_v39, %v8718_v57  ;;  %v8999_v12 = vld [vmem:[#allocation79_spill] sm:$0xff]  ;;  %v7092_v57 = vld [vmem:[%s7568_s6] ss:$0 sm:$0xff]  ;;  %v9000_v41 = vld [vmem:[#allocation110_spill] sm:$0xff] }
 0x314   : > { %v2128_v37 = vmul.f32 %v4158_v55, %v8998_v61  ;;  %v3054_v2 = vadd.f32 %v3038_v29, %v3018_v22  ;;  %v3055_v1 = vadd.f32 %v3039_v50, %v3019_v60  ;;  %v2129_v31 = vmul.f32 %v4159_v0, %v8998_v61  ;;  %v2001_v62 = vld [vmem:[#allocation2 + $0x1ab] sm:$0xff]  ;;  %v9003_v60 = vld [vmem:[#allocation140_spill] sm:$0xff]  ;;  %v9004_v39 = vld [vmem:[#allocation85_spill] sm:$0xff] }
 0x315   : > { %v2073_v33 = vadd.f32 %v2057_v49, %v2037_v36  ;;  %v2108_v23 = vadd.f32 %v2092_v48, %v2072_v51  ;;  %v2164_v40 = vmul.f32 %v8999_v12, %v6633_v21  ;;  %v2165_v29 = vmul.f32 %v8999_v12, %v9000_v41  ;;  %v9001_v50 = vld [vmem:[#allocation74_spill] sm:$0xff]  ;;  %v3214_v49 = vpop.f32.mrf.mxu1  ;;  %v7101_v21 = vld [vmem:[%s7566_s4] ss:$0 sm:$0xff] }
 0x316   : > { %v3090_v3 = vadd.f32 %v3074_v7, %v3054_v2  ;;  %v3091_v38 = vadd.f32 %v3075_v13, %v3055_v1  ;;  %v9002_v4 = vld [vmem:[#allocation82_spill] sm:$0xff]  ;;  %v3279_v13 = vld [vmem:[%s4430_s20 + $0x10] sm:$0xff]  ;;  %v3223_v55 = vadd.f32 %v3897_v19, %v7092_v57  ;;  %v3277_v61 = vld [vmem:[%s4430_s20] sm:$0xff]  ;;  %v2237_v1 = vmul.f32 %v9004_v39, %v2001_v62 }
 0x317   : > { %v2109_v47 = vadd.f32 %v2093_v9, %v2073_v33  ;;  %v2144_v6 = vadd.f32 %v2128_v37, %v2108_v23  ;;  %v2200_v28 = vmul.f32 %v9002_v4, %v9001_v50  ;;  %v2201_v7 = vmul.f32 %v9002_v4, %v9003_v60  ;;  %v4161_v12 = vld [vmem:[#allocation2 + $0xe4] sm:$0xff] }
 0x318   : > { %v3113_v48 = vadd.f32 %v7101_v21, %v3090_v3  ;;  %v3114_v22 = vadd.f32 %v7101_v21, %v3091_v38  ;;  %v2236_v9 = vmul.f32 %v9004_v39, %v2000_v10  ;;  %v3215_v33 = vadd.f32 %v7092_v57, %v3214_v49  ;;  %v9005_v3 = vld [vmem:[#allocation92_spill] sm:$0xff]  ;;  %v4164_v39 = vld [vmem:[#allocation2 + $0x14c] sm:$0xff] }
 0x319   : > { %v2145_v36 = vadd.f32 %v2129_v31, %v2109_v47  ;;  %v2180_v51 = vadd.f32 %v2164_v40, %v2144_v6  ;;  %v2300_v38 = vmul.f32 %v4161_v12, %v9005_v3  ;;  %v3295_v41 = vadd.f32 %v3279_v13, %v3223_v55  ;;  %v4162_v31 = vld [vmem:[#allocation2 + $0xec] sm:$0xff]  ;;  %v9006_v6 = vld [vmem:[#allocation93_spill] sm:$0xff] }
 0x31a   : > { %v3129_v37 = vmax.f32 %v3113_v48, 0.0  ;;  %v3130_v2 = vmax.f32 %v3114_v22, 0.0  ;;  %v2301_v40 = vmul.f32 %v4162_v31, %v9005_v3  ;;  %v7115_v10 = vadd.f32 %v3277_v61, %v3215_v33  ;;  %v9010_v33 = vld [vmem:[#allocation111_spill] sm:$0xff] }
 0x31b   : > { %v2181_v23 = vadd.f32 %v2165_v29, %v2145_v36  ;;  %v2216_v0 = vadd.f32 %v2200_v28, %v2180_v51  ;;  %v2336_v4 = vmul.f32 %v8941_v15, %v9006_v6  ;;  %v7119_v62 = vrot.slane %v3295_v41, 7 }
 0x31c   : > { %v3139_v50 = vpack.c.bf16 %v3130_v2, %v3129_v37  ;;  %3442 = vrot.lane.b32.xlu0 %v7115_v10, %s4274_s24  ;;  %v2337_v49 = vmul.f32 %v8942_v11, %v9006_v6  ;;  %v2372_v48 = vmul.f32 %v6938_v20, %v8940_v59  ;;  %v2373_v15 = vmul.f32 %v6942_v54, %v8940_v59  ;;  %v2280_v54 = vld [vmem:[#allocation2 + $0x1a4] sm:$0xff]  ;;  %v9008_v37 = vld [vmem:[#allocation96_spill] sm:$0xff] }
 0x31d   : > { %v2217_v19 = vadd.f32 %v2201_v7, %v2181_v23  ;;  %v2252_v47 = vadd.f32 %v2236_v9, %v2216_v0  ;;  %v4163_v7 = vld [vmem:[#allocation2 + $0x144] sm:$0xff]  ;;  %v3420_v36 = vsel %vm3336_vm4, %v7119_v62, %v7115_v10  ;;  %v2409_v20 = vmul.f32 %v4164_v39, %v8945_v56  ;;  %v9007_v9 = vld [vmem:[#allocation107_spill] sm:$0xff] }
 0x31e   : > { %3907 = vmatprep.mubr.msk.bf16.mxu1 %vm968_vm2, %v3139_v50  ;;  %v2408_v13 = vmul.f32 %v4163_v7, %v8945_v56  ;;  %v2444_v59 = vmul.f32 %v9007_v9, %v8952_v24  ;;  %v2445_v2 = vmul.f32 %v9007_v9, %v9008_v37  ;;  %v2281_v0 = vld [vmem:[#allocation2 + $0x1ac] sm:$0xff] }
 0x31f   : > { %v2253_v29 = vadd.f32 %v2237_v1, %v2217_v19  ;;  %v2316_v28 = vadd.f32 %v2300_v38, %v2252_v47  ;;  %v9009_v1 = vld [vmem:[#allocation51_spill] sm:$0xff]  ;;  %v9011_v38 = vld [vmem:[#allocation54_spill] sm:$0xff] }
 0x320   : > { %3426 = vrot.lane.b32.xlu0 %v3420_v36, %s4275_s13  ;;  %v2480_v23 = vmul.f32 %v9010_v33, %v9009_v1  ;;  %v2481_v41 = vmul.f32 %v9010_v33, %v9011_v38  ;;  %v9012_v50 = vld [vmem:[#allocation114_spill] sm:$0xff]  ;;  %v9016_v36 = vld [vmem:[#allocation40_spill] sm:$0xff] }
 0x321   : > { %v2317_v22 = vadd.f32 %v2301_v40, %v2253_v29  ;;  %v2352_v60 = vadd.f32 %v2336_v4, %v2316_v28  ;;  %v2516_v56 = vmul.f32 %v9012_v50, %v2280_v54  ;;  %v2517_v24 = vmul.f32 %v9012_v50, %v2281_v0  ;;  %v4165_v19 = vld [vmem:[#allocation2 + $0xe5] sm:$0xff]  ;;  %v4166_v28 = vld [vmem:[#allocation2 + $0xed] sm:$0xff] }
 0x322   : > { %v9013_v47 = vld [vmem:[#allocation86_spill] sm:$0xff]  ;;  %v9018_v54 = vld [vmem:[#allocation101_spill] sm:$0xff] }
 0x323   : > { %v2353_v51 = vadd.f32 %v2337_v49, %v2317_v22  ;;  %v2388_v11 = vadd.f32 %v2372_v48, %v2352_v60  ;;  %v2580_v6 = vmul.f32 %v4165_v19, %v9013_v47  ;;  %v2581_v49 = vmul.f32 %v4166_v28, %v9013_v47  ;;  %v9014_v48 = vld [vmem:[#allocation87_spill] sm:$0xff]  ;;  %v9019_v1 = vld [vmem:[#allocation102_spill] sm:$0xff] }
 0x324   : > { %v2617_v7 = vmul.f32 %v8972_v14, %v9014_v48  ;;  %v2724_v33 = vmul.f32 %v9019_v1, %v8982_v63  ;;  %v2560_v14 = vld [vmem:[#allocation2 + $0x1a5] sm:$0xff]  ;;  %v2896_v28 = vmul.f32 %v8995_v30, %v8989_v5 }
 0x325   : > { %v2389_v55 = vadd.f32 %v2373_v15, %v2353_v51  ;;  %v2424_v61 = vadd.f32 %v2408_v13, %v2388_v11  ;;  %v2616_v15 = vmul.f32 %v8971_v53, %v9014_v48  ;;  %v9015_v13 = vld [vmem:[#allocation88_spill] sm:$0xff]  ;;  %v4169_v47 = vld [vmem:[#allocation2 + $0xe6] sm:$0xff] }
 0x326   : > { %v2652_v51 = vmul.f32 %v9016_v36, %v9015_v13 }
 0x327   : > { %v2425_v12 = vadd.f32 %v2409_v20, %v2389_v55  ;;  %v2460_v3 = vadd.f32 %v2444_v59, %v2424_v61  ;;  %v9017_v20 = vld [vmem:[#allocation98_spill] sm:$0xff] }
 0x328   : > { %v2653_v9 = vmul.f32 %v9017_v20, %v9015_v13  ;;  %v4167_v59 = vld [vmem:[#allocation2 + $0x145] sm:$0xff]  ;;  %v3005_v20 = vmul.f32 %v8918_v8, %v6868_v46 }
 0x329   : > { %v2461_v31 = vadd.f32 %v2445_v2, %v2425_v12  ;;  %v2496_v40 = vadd.f32 %v2480_v23, %v2460_v3  ;;  %v2688_v55 = vmul.f32 %v4167_v59, %v9018_v54  ;;  %v4168_v2 = vld [vmem:[#allocation2 + $0x14d] sm:$0xff]  ;;  %v2725_v12 = vmul.f32 %v9019_v1, %v8984_v58 }
 0x32a   : > { %v2689_v53 = vmul.f32 %v4168_v2, %v9018_v54  ;;  %v9020_v3 = vld [vmem:[#allocation103_spill] sm:$0xff] }
 0x32b   : > { %v2497_v4 = vadd.f32 %v2481_v41, %v2461_v31  ;;  %v2532_v29 = vadd.f32 %v2516_v56, %v2496_v40  ;;  %v2760_v38 = vmul.f32 %v9020_v3, %v7008_v52  ;;  %v2561_v41 = vld [vmem:[#allocation2 + $0x1ad] sm:$0xff]  ;;  %v2761_v31 = vmul.f32 %v9020_v3, %v7010_v34 }
 0x32c   : > { %v2796_v40 = vmul.f32 %v8988_v32, %v2560_v14  ;;  %v2797_v63 = vmul.f32 %v8988_v32, %v2561_v41  ;;  %v2897_v34 = vmul.f32 %v6850_v43, %v8989_v5  ;;  %v3898_v43 = vpop.f32.mrf.mxu1  ;;  %v2840_v5 = vld [vmem:[#allocation2 + $0x1a6] sm:$0xff] }
 0x32d   : > { %v2533_v22 = vadd.f32 %v2517_v24, %v2497_v4  ;;  %v2596_v60 = vadd.f32 %v2580_v6, %v2532_v29  ;;  %v2860_v6 = vmul.f32 %v4169_v47, %v8901_v35  ;;  %v4170_v29 = vld [vmem:[#allocation2 + $0xee] sm:$0xff]  ;;  %v3226_v46 = vadd.f32 %v3898_v43, %v7092_v57 }
 0x32e   : > { %v2861_v52 = vmul.f32 %v4170_v29, %v8901_v35  ;;  %v3217_v54 = vpop.f32.mrf.mxu1 }
 0x32f   : > { %v2597_v11 = vadd.f32 %v2581_v49, %v2533_v22  ;;  %v2632_v39 = vadd.f32 %v2616_v15, %v2596_v60  ;;  %v2932_v15 = vmul.f32 %v7050_v25, %v8994_v27  ;;  %v2933_v60 = vmul.f32 %v7054_v17, %v8994_v27  ;;  %v2841_v17 = vld [vmem:[#allocation2 + $0x1ae] sm:$0xff] }
 0x330   : > { %v3040_v27 = vmul.f32 %v8919_v45, %v7064_v18  ;;  %v3218_v3 = vadd.f32 %v7092_v57, %v3217_v54 }
 0x331   : > { %v2633_v61 = vadd.f32 %v2617_v7, %v2597_v11  ;;  %v2668_v37 = vadd.f32 %v2652_v51, %v2632_v39  ;;  %v4171_v7 = vld [vmem:[#allocation2 + $0x146] sm:$0xff]  ;;  %v4172_v51 = vld [vmem:[#allocation2 + $0x14e] sm:$0xff]  ;;  %v3004_v11 = vmul.f32 %v8918_v8, %v6858_v26  ;;  %v3076_v26 = vmul.f32 %v8820_v44, %v2840_v5 }
 0x332   : > { %v2968_v13 = vmul.f32 %v4171_v7, %v8916_v42  ;;  %v2969_v30 = vmul.f32 %v4172_v51, %v8916_v42  ;;  %v3041_v42 = vmul.f32 %v8919_v45, %v7066_v16  ;;  %v3281_v16 = vld [vmem:[%s4430_s20 + $0x20] sm:$0xff]  ;;  %v3284_v7 = vld [vmem:[%s4430_s20 + $0x38] sm:$0xff] }
 0x333   : > { %v2669_v23 = vadd.f32 %v2653_v9, %v2633_v61  ;;  %v2704_v0 = vadd.f32 %v2688_v55, %v2668_v37  ;;  %v3077_v37 = vmul.f32 %v8820_v44, %v2841_v17 }
 0x335   : > { %v2705_v50 = vadd.f32 %v2689_v53, %v2669_v23  ;;  %v2740_v56 = vadd.f32 %v2724_v33, %v2704_v0  ;;  %v3280_v53 = vld [vmem:[%s4430_s20 + $0x18] sm:$0xff] }
 0x337   : > { %v2741_v24 = vadd.f32 %v2725_v12, %v2705_v50  ;;  %v2776_v19 = vadd.f32 %v2760_v38, %v2740_v56  ;;  %v3296_v12 = vadd.f32 %v3280_v53, %v3226_v46  ;;  %v3283_v38 = vld [vmem:[%s4430_s20 + $0x30] sm:$0xff]  ;;  %v3278_v50 = vld [vmem:[%s4430_s20 + $0x8] sm:$0xff] }
 0x339   : > { %v2777_v4 = vadd.f32 %v2761_v31, %v2741_v24  ;;  %v2812_v58 = vadd.f32 %v2796_v40, %v2776_v19  ;;  %v3282_v24 = vld [vmem:[%s4430_s20 + $0x28] sm:$0xff] }
 0x33b   : > { %v2813_v49 = vadd.f32 %v2797_v63, %v2777_v4  ;;  %v2876_v48 = vadd.f32 %v2860_v6, %v2812_v58  ;;  %v7206_v4 = vadd.f32 %v3278_v50, %v3218_v3  ;;  %v3404_v58 = vsel %vm3333_vm5, %v7119_v62, %v7115_v10 }
 0x33d   : > { %v2877_v32 = vadd.f32 %v2861_v52, %v2813_v49  ;;  %v2912_v22 = vadd.f32 %v2896_v28, %v2876_v48  ;;  %v3388_v28 = vsel %vm3330_vm6, %v7119_v62, %v7115_v10 }
 0x33f   : > { %v2913_v35 = vadd.f32 %v2897_v34, %v2877_v32  ;;  %v2948_v36 = vadd.f32 %v2932_v15, %v2912_v22 }
 0x341   : > { %v2949_v39 = vadd.f32 %v2933_v60, %v2913_v35  ;;  %v2984_v25 = vadd.f32 %v2968_v13, %v2948_v36 }
 0x342   : > { %v3901_v18 = vpop.f32.mrf.mxu1 }
 0x343   : > { %v2985_v9 = vadd.f32 %v2969_v30, %v2949_v39  ;;  %v3020_v59 = vadd.f32 %v3004_v11, %v2984_v25  ;;  %v3239_v14 = vadd.f32 %v3901_v18, %v7092_v57  ;;  %v3285_v18 = vld [vmem:[%s4430_s20 + $0x40] sm:$0xff] }
 0x344   : > { %v3230_v45 = vpop.f32.mrf.mxu1 }
 0x345   : > { %v3021_v55 = vadd.f32 %v3005_v20, %v2985_v9  ;;  %v3056_v61 = vadd.f32 %v3040_v27, %v3020_v59  ;;  %v3231_v23 = vadd.f32 %v7092_v57, %v3230_v45  ;;  %v3299_v19 = vadd.f32 %v3283_v38, %v3239_v14  ;;  %v3286_v38 = vld [vmem:[%s4430_s20 + $0x48] sm:$0xff] }
 0x346   : > { %v3902_v41 = vpop.f32.mrf.mxu1  ;;  %v3356_v14 = vsel %vm3324_vm8, %v7119_v62, %v7115_v10 }
 0x347   : > { %v3057_v2 = vadd.f32 %v3041_v42, %v3021_v55  ;;  %v3092_v8 = vadd.f32 %v3076_v26, %v3056_v61  ;;  %v3297_v56 = vadd.f32 %v3281_v16, %v3231_v23  ;;  %v7220_v48 = vrot.slane %v3299_v19, 5 }
 0x348   : > { %v3233_v40 = vpop.f32.mrf.mxu1  ;;  %v3242_v60 = vadd.f32 %v3902_v41, %v7092_v57 }
 0x349   : > { %v3093_v1 = vadd.f32 %v3077_v37, %v3057_v2  ;;  %v3115_v33 = vadd.f32 %v7101_v21, %v3092_v8  ;;  %v7201_v63 = vrot.slane %v3297_v56, 6  ;;  %v3234_v47 = vadd.f32 %v7092_v57, %v3233_v40  ;;  %v3287_v2 = vld [vmem:[%s4430_s20 + $0x50] sm:$0xff] }
 0x34a   : > { %v3300_v13 = vadd.f32 %v3284_v7, %v3242_v60  ;;  %v3319_v40 = vsel %vm3318_vm10, %v7119_v62, %v7115_v10 }
 0x34b   : > { %v3116_v44 = vadd.f32 %v7101_v21, %v3093_v1  ;;  %v3131_v0 = vmax.f32 %v3115_v33, 0.0  ;;  %v7204_v21 = vrot.slane %v3296_v12, 7  ;;  %v3298_v29 = vadd.f32 %v3282_v24, %v3234_v47 }
 0x34c   : > { %v3405_v52 = vsel %vm3336_vm4, %v7201_v63, %v3404_v58  ;;  %v3389_v49 = vsel %vm3333_vm5, %v7201_v63, %v3388_v28  ;;  %v7232_v35 = vrot.slane %v3300_v13, 5  ;;  %v3372_v33 = vsel %vm3327_vm7, %v7119_v62, %v7115_v10  ;;  %v3288_v58 = vld [vmem:[%s4430_s20 + $0x58] sm:$0xff] }
 0x34d   : > { %v3132_v31 = vmax.f32 %v3116_v44, 0.0  ;;  %3410 = vrot.lane.b32.xlu0 %v3405_v52, %s4276_s21  ;;  %v3462_v34 = vrot.slane %v3298_v29, 6  ;;  %v3543_v15 = vsel %vm3333_vm5, %v7204_v21, %v7206_v4  ;;  %v3390_v22 = vsel %vm3336_vm4, %v7220_v48, %v3389_v49 }
 0x34e   : > { %v3511_v36 = vsel %vm3327_vm7, %v7204_v21, %v7206_v4  ;;  %v3495_v51 = vsel %vm3324_vm8, %v7204_v21, %v7206_v4  ;;  %v3527_v30 = vsel %vm3330_vm6, %v7204_v21, %v7206_v4  ;;  %v3461_v5 = vsel %vm3318_vm10, %v7204_v21, %v7206_v4 }
 0x34f   : > { %v3140_v6 = vpack.c.bf16 %v3132_v31, %v3131_v0  ;;  %v3544_v32 = vsel %vm3336_vm4, %v3462_v34, %v3543_v15  ;;  %v3512_v11 = vsel %vm3330_vm6, %v3462_v34, %v3511_v36  ;;  %v3496_v43 = vsel %vm3327_vm7, %v3462_v34, %v3495_v51 }
 0x350   : > { %3549 = vrot.lane.b32.xlu1 %v3544_v32, %s4277_s22  ;;  %v3528_v39 = vsel %vm3333_vm5, %v3462_v34, %v3527_v30  ;;  %v3513_v25 = vsel %vm3333_vm5, %v7232_v35, %v3512_v11  ;;  %v7253_v20 = vsel %vm3330_vm6, %v7232_v35, %v3496_v43  ;;  %v3463_v27 = vsel %vm3321_vm9, %v3462_v34, %v3461_v5 }
 0x351   : > { %3908 = vmatmul.mubr.msk.bf16.gmra.mxu1 %vm968_vm2, %v3140_v6  ;;  %3394 = vrot.lane.b32.xlu0 %v3390_v22, %s4278_s14  ;;  %v3465_v17 = vsel %vm3324_vm8, %v7232_v35, %v3463_v27  ;;  %v3529_v9 = vsel %vm3336_vm4, %v7232_v35, %v3528_v39  ;;  %v3479_v59 = vsel %vm3321_vm9, %v7204_v21, %v7206_v4  ;;  %v3291_v27 = vld [vmem:[%s4430_s20 + $0x70] sm:$0xff]  ;;  %vm3416_vm2 = vcmask 195749  }
 0x352   : > { %v3560_v42 = vsel %vm3318_vm10, %v7232_v35, %v3462_v34  ;;  %v3480_v26 = vsel %vm3324_vm8, %v3462_v34, %v3479_v59  ;;  %v3575_v54 = vsel %vm3318_vm10, %v3462_v34, %v7204_v21  ;;  %v3373_v16 = vsel %vm3330_vm6, %v7201_v63, %v3372_v33  ;;  %v3289_v59 = vld [vmem:[%s4430_s20 + $0x60] sm:$0xff] }
 0x353   : > { %v3481_v55 = vsel %vm3327_vm7, %v7232_v35, %v3480_v26  ;;  %v3576_v61 = vsel %vm3321_vm9, %v7232_v35, %v3575_v54  ;;  %v3357_v44 = vsel %vm3327_vm7, %v7201_v63, %v3356_v14  ;;  %v3340_v0 = vsel %vm3321_vm9, %v7119_v62, %v7115_v10 }
 0x354   : > { %3533 = vrot.lane.b32.xlu1 %v3529_v9, %s4279_s25  ;;  %v3341_v41 = vsel %vm3324_vm8, %v7201_v63, %v3340_v0  ;;  %v3374_v31 = vsel %vm3333_vm5, %v7220_v48, %v3373_v16  ;;  %v3358_v19 = vsel %vm3330_vm6, %v7220_v48, %v3357_v44  ;;  %v3436_v47 = vsel %vm3318_vm10, %v7201_v63, %v7119_v62 }
 0x355   : > { %v3322_v6 = vsel %vm3321_vm9, %v7201_v63, %v3319_v40  ;;  %v3342_v28 = vsel %vm3327_vm7, %v7220_v48, %v3341_v41  ;;  %v3421_v34 = vsel %vm3318_vm10, %v7220_v48, %v7201_v63  ;;  %v3437_v22 = vsel %vm3321_vm9, %v7220_v48, %v3436_v47 }
 0x356   : > { %v3325_v60 = vsel %vm3324_vm8, %v7220_v48, %v3322_v6 }
 0x3ad   : > { %v3905_v37 = vpop.f32.mrf.mxu1 }
 0x3ae   : > { %v3255_v8 = vadd.f32 %v3905_v37, %v7092_v57 }
 0x3af   : > { %v3246_v46 = vpop.f32.mrf.mxu1 }
 0x3b0   : > { %v3303_v53 = vadd.f32 %v3287_v2, %v3255_v8  ;;  %v3247_v1 = vadd.f32 %v7092_v57, %v3246_v46 }
 0x3b1   : > { %v3906_v45 = vpop.f32.mrf.mxu1 }
 0x3b2   : > { %v3301_v23 = vadd.f32 %v3285_v18, %v3247_v1  ;;  %v7290_v12 = vrot.slane %v3303_v53, 3  ;;  %v3258_v24 = vadd.f32 %v3906_v45, %v7092_v57  ;;  %v3290_v1 = vld [vmem:[%s4430_s20 + $0x68] sm:$0xff] }
 0x3b3   : > { %v3249_v3 = vpop.f32.mrf.mxu1 }
 0x3b4   : > { %v7295_v50 = vrot.slane %v3301_v23, 4  ;;  %v3250_v56 = vadd.f32 %v7092_v57, %v3249_v3  ;;  %v3304_v7 = vadd.f32 %v3288_v58, %v3258_v24 }
 0x3b6   : > { %v3302_v29 = vadd.f32 %v3286_v38, %v3250_v56  ;;  %v3375_v52 = vsel %vm3336_vm4, %v7295_v50, %v3374_v31  ;;  %v3359_v10 = vsel %vm3333_vm5, %v7295_v50, %v3358_v19  ;;  %v3343_v49 = vsel %vm3330_vm6, %v7295_v50, %v3342_v28 }
 0x3b7   : > { %3378 = vrot.lane.b32.xlu0 %v3375_v52, %s4280_s26  ;;  %v3360_v62 = vsel %vm3336_vm4, %v7290_v12, %v3359_v10  ;;  %v7331_v32 = vsel %vm3321_vm9, %v7295_v50, %v3421_v34  ;;  %v7339_v13 = vsel %vm3324_vm8, %v7295_v50, %v3437_v22  ;;  %v3328_v63 = vsel %vm3327_vm7, %v7295_v50, %v3325_v60 }
 0x3b8   : > { %v7326_v15 = vrot.slane %v3302_v29, 4  ;;  %3362 = vrot.lane.b32.xlu1 %v3360_v62, %s4281_s17  ;;  %v7368_v39 = vrot.slane %v3304_v7, 3  ;;  %v3344_v33 = vsel %vm3333_vm5, %v7290_v12, %v3343_v49  ;;  %v3391_v3 = vsel %vm3318_vm10, %v7290_v12, %v7295_v50 }
 0x3b9   : > { %v3406_v31 = vsel %vm3318_vm10, %v7295_v50, %v7220_v48  ;;  %v3423_v29 = vsel %vm3324_vm8, %v7290_v12, %v7331_v32  ;;  %v3439_v49 = vsel %vm3327_vm7, %v7290_v12, %v7339_v13 }
 0x3ba   : > { %v3467_v36 = vsel %vm3327_vm7, %v7326_v15, %v3465_v17  ;;  %v3514_v51 = vsel %vm3336_vm4, %v7326_v15, %v3513_v25  ;;  %v7350_v30 = vsel %vm3318_vm10, %v7326_v15, %v7232_v35  ;;  %v3498_v11 = vsel %vm3333_vm5, %v7326_v15, %v7253_v20 }
 0x3bb   : > { %v7358_v43 = vsel %vm3321_vm9, %v7326_v15, %v3560_v42  ;;  %v7362_v5 = vsel %vm3330_vm6, %v7326_v15, %v3481_v55  ;;  %v7366_v35 = vsel %vm3324_vm8, %v7326_v15, %v3576_v61  ;;  %v3499_v25 = vsel %vm3336_vm4, %v7368_v39, %v3498_v11  ;;  %v3292_v55 = vld [vmem:[%s4430_s20 + $0x78] sm:$0xff]  ;;  %s4285_s20 = smov 36  }
 0x3bc   : > { %3517 = vrot.lane.b32.xlu1 %v3514_v51, %s4282_s1  ;;  %v3407_v19 = vsel %vm3321_vm9, %v7290_v12, %v3406_v31  ;;  %v3469_v6 = vsel %vm3330_vm6, %v7368_v39, %v3467_v36  ;;  %v3530_v32 = vsel %vm3318_vm10, %v7368_v39, %v7326_v15  ;;  %v3483_v13 = vsel %vm3333_vm5, %v7368_v39, %v7362_v5 }
 0x3bd   : > { %v3562_v11 = vsel %vm3324_vm8, %v7368_v39, %v7358_v43 }
 0x3c0   : > { %3501 = vrot.lane.b32.xlu1 %v3499_v25, %s4283_s11  ;;  %v3559_v25 = vsel %vm3336_vm4, %v7204_v21, %v7206_v4 }
 0x3c2   : > { %v7464_v21 = vpop.permute.xlu1 %3549 }
 0x411   : > { %v3909_v20 = vpop.f32.mrf.mxu1 }
 0x412   : > { %v3271_v17 = vadd.f32 %v3909_v20, %v7092_v57  ;;  %v3578_v20 = vsel %vm3327_vm7, %v7368_v39, %v7366_v35 }
 0x413   : > { %v3262_v9 = vpop.f32.mrf.mxu1 }
 0x414   : > { %v3307_v42 = vadd.f32 %v3291_v27, %v3271_v17  ;;  %v3263_v26 = vadd.f32 %v7092_v57, %v3262_v9  ;;  %v3443_v17 = vpop.permute.xlu0 %3442 }
 0x415   : > { %v3910_v54 = vpop.f32.mrf.mxu1 }
 0x416   : > { %v3335_v61 = vrot.slane %v3307_v42, 1  ;;  %v3305_v37 = vadd.f32 %v3289_v59, %v3263_v26  ;;  %v3274_v2 = vadd.f32 %v3910_v54, %v7092_v57  ;;  %v7466_v59 = vpop.permute.xlu1 %3533 }
 0x417   : > { %v3265_v8 = vpop.f32.mrf.mxu1 }
 0x418   : > { %v3332_v46 = vrot.slane %v3305_v37, 2  ;;  %v3308_v18 = vadd.f32 %v3292_v55, %v3274_v2  ;;  %v3266_v53 = vadd.f32 %v7092_v57, %v3265_v8  ;;  %3348 = vrot.lane.b32.xlu0 %v3335_v61, %s4284_s15  ;;  %v3331_v57 = vsel %vm3330_vm6, %v7290_v12, %v3328_v63  ;;  %v3427_v9 = vpop.permute.xlu0 %3426 }
 0x41a   : > { %v3345_v45 = vsel %vm3336_vm4, %v3332_v46, %v3344_v33  ;;  %v3361_v16 = vsel %vm3318_vm10, %v3335_v61, %v3332_v46  ;;  %v3306_v14 = vadd.f32 %v3290_v1, %v3266_v53  ;;  %v3376_v23 = vsel %vm3318_vm10, %v3332_v46, %v7290_v12 }
 0x41b   : > { %3364 = vrot.lane.b32.xlu1 %v3361_v16, %s4281_s17  ;;  %v3472_v44 = vrot.slane %v3308_v18, 1  ;;  %v3377_v0 = vsel %vm3321_vm9, %v3335_v61, %v3376_v23  ;;  %v3334_v38 = vsel %vm3333_vm5, %v3332_v46, %v3331_v57  ;;  %v3392_v56 = vsel %vm3321_vm9, %v3332_v46, %v3391_v3 }
 0x41c   : > { %3346 = vrot.lane.b32.xlu0 %v3345_v45, %s4284_s15  ;;  %v3470_v41 = vrot.slane %v3306_v14, 2  ;;  %v3337_v40 = vsel %vm3336_vm4, %v3335_v61, %v3334_v38  ;;  %v3393_v24 = vsel %vm3324_vm8, %v3335_v61, %v3392_v56  ;;  %v3408_v48 = vsel %vm3324_vm8, %v3332_v46, %v3407_v19  ;;  %v3411_v35 = vpop.permute.xlu0 %3410 }
 0x41d   : > { %3339 = vst.msk [vmem:[%s4634_s10] sm:$0xff] %vm566_vm1, %v3337_v40  ;;  %v3409_v58 = vsel %vm3327_vm7, %v3335_v61, %v3408_v48  ;;  %v3424_v10 = vsel %vm3327_vm7, %v3332_v46, %v3423_v29  ;;  %v3440_v22 = vsel %vm3330_vm6, %v3332_v46, %v3439_v49  ;;  %v3546_v12 = vsel %vm3321_vm9, %v7368_v39, %v7350_v30 }
 0x41e   : > { %v3500_v47 = vsel %vm3318_vm10, %v3472_v44, %v3470_v41  ;;  %v3471_v50 = vsel %vm3333_vm5, %v3470_v41, %v3469_v6  ;;  %v3515_v28 = vsel %vm3318_vm10, %v3470_v41, %v7368_v39  ;;  %v3425_v62 = vsel %vm3330_vm6, %v3335_v61, %v3424_v10 }
 0x41f   : > { %3380 = vrot.lane.b32.xlu1 %v3377_v0, %s4280_s26  ;;  %v3473_v52 = vsel %vm3336_vm4, %v3472_v44, %v3471_v50  ;;  %v3516_v34 = vsel %vm3321_vm9, %v3472_v44, %v3515_v28  ;;  %v3531_v60 = vsel %vm3321_vm9, %v3470_v41, %v3530_v32  ;;  %v3441_v7 = vsel %vm3333_vm5, %v3335_v61, %v3440_v22  ;;  %s9021_s26 = sand.u32 1, %s4241_s28  }
 0x420   : > { %3487 = vrot.lane.b32.xlu0 %v3472_v44, %s4285_s20  ;;  %v3532_v63 = vsel %vm3324_vm8, %v3472_v44, %v3531_v60  ;;  %v3547_v15 = vsel %vm3324_vm8, %v3470_v41, %v3546_v12  ;;  %v3484_v36 = vsel %vm3336_vm4, %v3470_v41, %v3483_v13  ;;  %v3563_v30 = vsel %vm3327_vm7, %v3470_v41, %v3562_v11  ;;  %v3395_v42 = vpop.permute.xlu0 %3394  ;;  %s3592_s17 = scalar_lea.sflag [#allocation4], %s9021_s26 }
 0x421   : > { %v3548_v51 = vsel %vm3327_vm7, %v3472_v44, %v3547_v15  ;;  %v3564_v5 = vsel %vm3330_vm6, %v3472_v44, %v3563_v30  ;;  %v3579_v43 = vsel %vm3330_vm6, %v3470_v41, %v3578_v20  ;;  %vm3400_vm1 = vcmask 162948  }
 0x422   : > { %v3580_v27 = vsel %vm3333_vm5, %v3472_v44, %v3579_v43  ;;  %vm3448_vm4 = vcmask 261351   ;;  %vm3402_vm5 = vcmask 158848   ;;  %vm3418_vm6 = vcmask 192672  }
 0x423   : > { %3396 = vrot.lane.b32.xlu1 %v3393_v24, %s4278_s14  ;;  %vm3434_vm7 = vcmask 226496   ;;  %vm3450_vm8 = vcmask 260320   ;;  %vm3477_vm9 = vcmask 294144   ;;  %vm3493_vm10 = vcmask 319776  }
 0x424   : > { %3503 = vrot.lane.b32.xlu0 %v3500_v47, %s4283_s11  ;;  %s4289_s11 = smov [#allocation3]  }
 0x425   : > { %s4177_s15 = sshll.u32 %s4289_s11, 4  ;;  %s4178_s15 = int_to_ptr.vmem [resolvable:$false] %s4177_s15 }
 0x427   : > { %3412 = vrot.lane.b32.xlu1 %v3409_v58, %s4276_s21 }
 0x428   : > { %3474 = vrot.lane.b32.xlu0 %v3473_v52, %s4286_s16 }
 0x429   : > { %v3379_v54 = vpop.permute.xlu0 %3378 }
 0x42a   : > { %v3363_v39 = vpop.permute.xlu1 %3362 }
 0x42b   : > { %3428 = vrot.lane.b32.xlu1 %v3425_v62, %s4275_s13  ;;  %s3791_s13 = sshll.u32 %s4253_s9, 1 }
 0x42c   : > { %3519 = vrot.lane.b32.xlu0 %v3516_v34, %s4282_s1  ;;  %s3603_s21 = sadd.s32 %s4249_s30, %s3791_s13 }
 0x42d   : > { %s3792_s9 = sshll.u32 %s3603_s21, 7 }
 0x42e   : > { %v7468_v26 = vpop.permute.xlu1 %3517 }
 0x42f   : > { %3444 = vrot.lane.b32.xlu1 %v3441_v7, %s4274_s24  ;;  %s4288_s24 = smov 60  }
 0x430   : > { %3535 = vrot.lane.b32.xlu0 %v3532_v63, %s4279_s25  ;;  %s7506_s25 = scalar_lea.hbm %s7570_s8, %s3792_s9 }
 0x432   : > { %v3502_v55 = vpop.permute.xlu1 %3501 }
 0x433   : > { %3485 = vrot.lane.b32.xlu1 %v3484_v36, %s4285_s20  ;;  %s4179_s20 = scalar_lea.vmem %s4178_s15, 256 }
 0x434   : > { %3551 = vrot.lane.b32.xlu0 %v3548_v51, %s4277_s22  ;;  %s3607_s22 = sshll.u32 %s4634_s10, 4  ;;  %s7508_s22 = int_to_ptr.vmem [resolvable:$true] %s3607_s22 }
 0x435   : > { %s4173_s1 = scalar_lea.vmem %s7508_s22, 128  ;;  %p4180_p11 = scmp.lt.s32.totalorder %s7508_s22, %s4178_s15 }
 0x436   : > { %p4174_p7 = scmp.ne.s32.totalorder %s7508_s22, %s4173_s1  ;;  %p4181_p12 = scmp.lt.s32.totalorder %s4179_s20, %s4173_s1 }
 0x437   : > { %3565 = vrot.lane.b32.xlu1 %v3559_v25, %s4287_s23 }
 0x438   : > { %3567 = vrot.lane.b32.xlu0 %v3564_v5, %s4287_s23  ;;  %p4175_p9 = pnand %p4174_p7, %p4386_p3  ;;  %p4182_p13 = por %p4181_p12, %p4180_p11 }
 0x43a   : > { %p4176_p10 = pneg %p4175_p9 }
 0x43b   : > { %3581 = vrot.lane.b32.xlu1 %v7206_v4, %s4288_s24 }
 0x43c   : > { %3583 = vrot.lane.b32.xlu0 %v3580_v27, %s4288_s24  ;;  %p4183_p0 = pnand %p4182_p13, %p4176_p10 }
 0x48a   : > { %v3349_v4 = vpop.permute.xlu0 %3348 }
 0x48b   : > { %3355 = vst.msk [vmem:[%s4634_s10 + $0x7] sm:$0x1] %vm3354_vm11, %v3349_v4  ;;  %vm3491_vm11 = vcmask 326945  }
 0x48d   : > { %v3365_v61 = vpop.permute.xlu1 %3364 }
 0x48e   : > { %v3347_v37 = vpop.permute.xlu0 %3346 }
 0x48f   : > { %3353 = vst.msk [vmem:[%s4634_s10 - $0x1] sm:$0xfe] %vm3352_vm12, %v3347_v37  ;;  %vm3507_vm12 = vcmask 359746  }
 0x490   : > { %3369 = vst.msk [vmem:[%s4634_s10 - $0x2] sm:$0xfc] %vm3368_vm13, %v3363_v39  ;;  %vm3509_vm13 = vcmask 353600  }
 0x491   : > { %3371 = vst.msk [vmem:[%s4634_s10 + $0x6] sm:$0x3] %vm3370_vm14, %v3365_v61  ;;  %v3381_v2 = vpop.permute.xlu1 %3380  ;;  %vm3523_vm14 = vcmask 392547  }
 0x492   : > { %3385 = vst.msk [vmem:[%s4634_s10 - $0x3] sm:$0xf8] %vm3384_vm15, %v3379_v54  ;;  %v3488_v8 = vpop.permute.xlu0 %3487  ;;  %vm3525_vm15 = vcmask 387424  }
 0x493   : > { %3387 = vst.msk [vmem:[%s4634_s10 + $0x5] sm:$0x7] %vm3386_vm0, %v3381_v2  ;;  %vm3541_vm0 = vcmask 421248  }
 0x494   : > { %3401 = vst.msk [vmem:[%s4634_s10 - $0x4] sm:$0xf0] %vm3400_vm1, %v3395_v42  ;;  %vm3539_vm1 = vcmask 425348  }
 0x495   : > { %3417 = vst.msk [vmem:[%s4634_s10 - $0x5] sm:$0xe0] %vm3416_vm2, %v3411_v35  ;;  %v3397_v46 = vpop.permute.xlu1 %3396  ;;  %vm3555_vm2 = vcmask 458149  }
 0x496   : > { %3433 = vst.msk [vmem:[%s4634_s10 - $0x6] sm:$0xc0] %vm3432_vm3, %v3427_v9  ;;  %v3504_v18 = vpop.permute.xlu0 %3503  ;;  %vm3557_vm3 = vcmask 455072  }
 0x497   : > { %3449 = vst.msk [vmem:[%s4634_s10 - $0x7] sm:$0x80] %vm3448_vm4, %v3443_v17  ;;  %vm3571_vm4 = vcmask 490950  }
 0x498   : > { %3403 = vst.msk [vmem:[%s4634_s10 + $0x4] sm:$0xf] %vm3402_vm5, %v3397_v46  ;;  %vm3573_vm5 = vcmask 488896  }
 0x499   : > { %v3413_v53 = vpop.permute.xlu1 %3412 }
 0x49a   : > { %v3475_v1 = vpop.permute.xlu0 %3474  ;;  %3419 = vst.msk [vmem:[%s4634_s10 + $0x3] sm:$0x1f] %vm3418_vm6, %v3413_v53  ;;  %vm3587_vm6 = vcmask 523751  }
 0x49d   : > { %v3429_v33 = vpop.permute.xlu1 %3428 }
 0x49e   : > { %v3520_v45 = vpop.permute.xlu0 %3519  ;;  %3435 = vst.msk [vmem:[%s4634_s10 + $0x2] sm:$0x3f] %vm3434_vm7, %v3429_v33  ;;  %vm3589_vm7 = vcmask 522720  }
 0x4a1   : > { %v3445_v16 = vpop.permute.xlu1 %3444 }
 0x4a2   : > { %v3536_v14 = vpop.permute.xlu0 %3535  ;;  %3451 = vst.msk [vmem:[%s4634_s10 + $0x1] sm:$0x7f] %vm3450_vm8, %v3445_v16 }
 0x4a3   : > { %3478 = vst.msk [vmem:[%s4634_s10] sm:$0xff] %vm3477_vm9, %v3475_v1 }
 0x4a4   : > { %3494 = vst.msk [vmem:[%s4634_s10 + $0x7] sm:$0x1] %vm3493_vm10, %v3488_v8 }
 0x4a5   : > { %v3486_v23 = vpop.permute.xlu1 %3485 }
 0x4a6   : > { %v3552_v44 = vpop.permute.xlu0 %3551  ;;  %3492 = vst.msk [vmem:[%s4634_s10 - $0x1] sm:$0xfe] %vm3491_vm11, %v3486_v23 }
 0x4a7   : > { %3508 = vst.msk [vmem:[%s4634_s10 - $0x2] sm:$0xfc] %vm3507_vm12, %v3502_v55 }
 0x4a8   : > { %3510 = vst.msk [vmem:[%s4634_s10 + $0x6] sm:$0x3] %vm3509_vm13, %v3504_v18 }
 0x4a9   : > { %3524 = vst.msk [vmem:[%s4634_s10 - $0x3] sm:$0xf8] %vm3523_vm14, %v7468_v26  ;;  %v3566_v57 = vpop.permute.xlu1 %3565 }
 0x4aa   : > { %3526 = vst.msk [vmem:[%s4634_s10 + $0x5] sm:$0x7] %vm3525_vm15, %v3520_v45  ;;  %v3568_v0 = vpop.permute.xlu0 %3567 }
 0x4ab   : > { %3542 = vst.msk [vmem:[%s4634_s10 + $0x4] sm:$0xf] %vm3541_vm0, %v3536_v14 }
 0x4ac   : > { %3540 = vst.msk [vmem:[%s4634_s10 - $0x4] sm:$0xf0] %vm3539_vm1, %v7466_v59 }
 0x4ad   : > { %3556 = vst.msk [vmem:[%s4634_s10 - $0x5] sm:$0xe0] %vm3555_vm2, %v7464_v21  ;;  %v3582_v3 = vpop.permute.xlu1 %3581 }
 0x4ae   : > { %3558 = vst.msk [vmem:[%s4634_s10 + $0x3] sm:$0x1f] %vm3557_vm3, %v3552_v44  ;;  %v3584_v38 = vpop.permute.xlu0 %3583 }
 0x4af   : > { %3572 = vst.msk [vmem:[%s4634_s10 - $0x6] sm:$0xc0] %vm3571_vm4, %v3566_v57 }
 0x4b0   : > { %3574 = vst.msk [vmem:[%s4634_s10 + $0x2] sm:$0x3f] %vm3573_vm5, %v3568_v0 }
 0x4b1   : > { %3588 = vst.msk [vmem:[%s4634_s10 - $0x7] sm:$0x80] %vm3587_vm6, %v3582_v3 }
 0x4b2   : > { %3590 = vst.msk [vmem:[%s4634_s10 + $0x1] sm:$0x7f] %vm3589_vm7, %v3584_v38 }
 0x4b3   : > { %4186 = shalt.err (!%p4183_p0)
}
 0x4b4   : > { %s4187_s10 = scalar_lea.hbm %s7506_s25, 128  ;;  %s4191_s24 = scalar_lea.hbm %s7570_s8, 512 }
 0x4b5   : > { %p4188_p1 = scmp.ne.s32.totalorder %s7506_s25, %s4187_s10  ;;  %p4192_p5 = scmp.lt.s32.totalorder %s7506_s25, %s7570_s8 }
 0x4b6   : > { %p4193_p6 = scmp.lt.s32.totalorder %s4191_s24, %s4187_s10 }
 0x4b7   : > { %p4189_p2 = pnand %p4188_p1, %p4386_p3 }
 0x4b8   : > { %p4194_p7 = por %p4193_p6, %p4192_p5 }
 0x4b9   : > { %p4190_p4 = pneg %p4189_p2 }
 0x4bb   : > { %p4195_p9 = pnand %p4194_p7, %p4190_p4 }
 0x4bd   : > { %4198 = shalt.err (!%p4195_p9)
}
 0x4be   : > { %3916 = dma.vmem_to_hbm [thread:$0]  (%p4386_p3), %s7508_s22, 128, %s7506_s25, %s3592_s17  }
 0x4bf PF: > { %p3922_p10 = scmp.ge.s32.totalorder %s4265_s12, 2  ;;  %s3619_s9 = sand.u32 1, %s4237_s27  }
 0x4c0   : > { %s3620_s30 = scalar_lea.sflag [#allocation4], %s3619_s9 }
 0x4c1   : > { %p3919_p11 = pnand %p3922_p10, %p4395_p8 }
 0x4c3   : > { %p3920_p12 = pneg %p3919_p11 }
 0x4c5   : > { %4232 = dma.done.wait (%p3920_p12), %s3620_s30, 128  }
 0x4c6   : > { %4234 = vsyncadd (%p3920_p12), %s3620_s30, 4294967168  ;;  %s21_s12 = sadd.s32 1, %s4265_s12   ;;  %s9022_s18 = sld [smem:[#allocation10_spill]] }
 0x4c7   : > { %p18_p13 = scmp.ge.s32.totalorder %s21_s12, 6   ;;  %s9023_s30 = sld [smem:[#allocation6_spill]] }
 0x4c8   : > { %s9024_s9 = sld [smem:[#allocation7_spill]]  ;;  %s9027_s27 = smov %s4241_s28 }
 0x4c9   : > { %s9025_s10 = sld [smem:[#allocation8_spill]]  ;;  %s9028_s28 = smov %s4245_s29 }
 0x4ca   : > { %s9026_s11 = sld [smem:[#allocation9_spill]]  ;;  %20 = sbr.rel (!%p18_p13) target bundleno = 7 (0x7), region = 120 }
 0x4cc   : > { %s9029_s29 = smov %s9022_s18 }
 0x4cf   :  { %3625 = vsyncpa [#allocation4], 1 }
 0x4d0   :  { %3627 = vsyncpa [#allocation4 + $0x1], 1 }

</bundles_post_ra>
